<compile_context>
chip_gen: v5e
topology: v5e:2x2
jax: 0.10.0
libtpu: 0.0.40
codegen_flags: <defaults>
</compile_context>

<pallas_src>
import numpy as np
import jax
import jax.numpy as jnp
from jax.experimental import pallas as pl
from jax.experimental.pallas import tpu as pltpu

# ---------------- model configuration (ECForGraphTCN defaults) ----------------
NODE_INDIM = 6
EDGE_INDIM = 4
H_DIM = 5
E_DIM = 4
HIDDEN_DIM = 40
L_EC = 3
ALPHA_EC = 0.5
assert H_DIM <= 8 and E_DIM <= 8  # stripe packing assumes each piece fits in one 8-row stripe

# ---------------- batching / blocking configuration ----------------
N_NODES = 32                                  # nodes per graph
E_PER_GRAPH = 64                              # edges per graph
N_GRAPHS = 16                                 # graphs per call
GRAPHS_PER_BLOCK = 8                          # sweep knob: 4 on v5e, 8 on v6e/v7x
NUM_BLOCKS = N_GRAPHS // GRAPHS_PER_BLOCK     # keep EVEN for v7x dual TensorCores
N_BLOCK = GRAPHS_PER_BLOCK * N_NODES          # 256 nodes per block (on lanes)
E_BLOCK = GRAPHS_PER_BLOCK * E_PER_GRAPH      # 512 edges per block (on lanes)
N_TOTAL = N_GRAPHS * N_NODES
E_TOTAL = N_GRAPHS * E_PER_GRAPH

SLAB_LANES = 128                              # lane-dense parameter slab width

# ---------------- packed-parameter layout (static, module-level) ----------------
CAT_IJE_COLS = 24                             # stripes: x_i [0:5], x_j [8:13], e [16:20]
CAT_HA_COLS = 16                              # stripes: h   [0:5], agg [8:12]
CAT_EDGE_COLS = 8 * (L_EC + 1)                # stripes: stage s at [8s : 8s + 4]


def _weight_defs():
    """Every weight in 'transposed' [out, in] form, fused first layers pre-concatenated."""
    defs = [("ne_w0", HIDDEN_DIM, NODE_INDIM), ("ne_w1", H_DIM, HIDDEN_DIM),   # node encoder
            ("ee_w0", HIDDEN_DIM, EDGE_INDIM), ("ee_w1", E_DIM, HIDDEN_DIM)]   # edge encoder
    for l in range(L_EC):
        defs += [(f"r0_{l}", HIDDEN_DIM, CAT_IJE_COLS),   # relational L0 on cat([x_i,x_j,e])
                 (f"r1_{l}", HIDDEN_DIM, HIDDEN_DIM),
                 (f"r2_{l}", E_DIM, HIDDEN_DIM),
                 (f"o0_{l}", HIDDEN_DIM, CAT_HA_COLS),    # object L0 on cat([h, agg])
                 (f"o1_{l}", HIDDEN_DIM, HIDDEN_DIM),
                 (f"o2_{l}", H_DIM, HIDDEN_DIM)]
    defs += [("w0", HIDDEN_DIM, CAT_EDGE_COLS),           # W MLP L0 on cat(edge stages)
             ("w1", HIDDEN_DIM, HIDDEN_DIM),
             ("w2", 1, HIDDEN_DIM)]
    return defs


WEIGHT_DEFS = _weight_defs()
WEIGHT_OFFSETS = {}
_row = 0
for _name, _r, _c in WEIGHT_DEFS:
    WEIGHT_OFFSETS[_name] = (_row, _r, _c)
    _row += ((_r + 15) // 16) * 16            # 16-row (bf16 tile) aligned entries
W_SLAB_ROWS = _row                            # 912 rows for the default configuration

BIAS_DEFS = []
for _l in range(L_EC):
    BIAS_DEFS += [(f"r0b_{_l}", HIDDEN_DIM), (f"r1b_{_l}", HIDDEN_DIM), (f"r2b_{_l}", E_DIM),
                  (f"o0b_{_l}", HIDDEN_DIM), (f"o1b_{_l}", HIDDEN_DIM), (f"o2b_{_l}", H_DIM)]
BIAS_DEFS += [("wb0", HIDDEN_DIM), ("wb1", HIDDEN_DIM), ("wb2", 1)]
BIAS_ROWS = dict(BIAS_DEFS)
BIAS_LANE = {name: i for i, (name, _) in enumerate(BIAS_DEFS)}
B_SLAB_ROWS = HIDDEN_DIM                      # 40 rows, one bias per lane column
assert len(BIAS_DEFS) <= SLAB_LANES

# Real (non-padding) column ranges inside the packed fused weights.
PACKED_COL_RANGES = {}
for _l in range(L_EC):
    PACKED_COL_RANGES[f"r0_{_l}"] = [(0, H_DIM), (8, H_DIM), (16, E_DIM)]
    PACKED_COL_RANGES[f"o0_{_l}"] = [(0, H_DIM), (8, E_DIM)]
PACKED_COL_RANGES["w0"] = [(8 * s, E_DIM) for s in range(L_EC + 1)]


def init_params(key):
    """Pack all weights into one bf16 slab and all biases into one small f32 slab."""
    w_slab = np.zeros((W_SLAB_ROWS, SLAB_LANES), np.float32)
    b_slab = np.zeros((B_SLAB_ROWS, SLAB_LANES), np.float32)
    n_w, n_b = len(WEIGHT_DEFS), len(BIAS_DEFS)
    keys = jax.random.split(key, n_w + n_b)
    for k, (name, r, c) in zip(keys[:n_w], WEIGHT_DEFS):
        off = WEIGHT_OFFSETS[name][0]
        ranges = PACKED_COL_RANGES.get(name, [(0, c)])
        fan_in = sum(w for _, w in ranges)                # fan-in of the *concatenated* input
        bound = 1.0 / float(np.sqrt(fan_in))
        for sk, (c0, w) in zip(jax.random.split(k, len(ranges)), ranges):
            w_slab[off:off + r, c0:c0 + w] = np.asarray(
                jax.random.uniform(sk, (r, w), jnp.float32, -bound, bound))
    for k, (name, r) in zip(keys[n_w:], BIAS_DEFS):
        # NOTE: test-harness init; torch.nn.Linear uses 1/sqrt(fan_in) for biases too.
        b_slab[:r, BIAS_LANE[name]] = np.asarray(
            jax.random.uniform(k, (r,), jnp.float32, -0.1, 0.1))
    return jnp.asarray(w_slab, jnp.bfloat16), jnp.asarray(b_slab, jnp.float32)


def _wget(wslab):
    """Just-in-time weight loader (works on a Ref inside the kernel or a plain array)."""
    def get(name):
        off, r, c = WEIGHT_OFFSETS[name]
        return wslab[off:off + r, :c]                     # bf16 [out, in]
    return get


def _bget(bslab):
    """Just-in-time bias loader: one f32 lane column per bias."""
    def get(name):
        lane, r = BIAS_LANE[name], BIAS_ROWS[name]
        return bslab[:r, lane:lane + 1]                   # f32 [out, 1]
    return get


# ---------------- shared forward math (transposed layout, used inside the kernel) ----------------
def _relu(v):
    return jnp.maximum(v, 0.0)


def _stripe8(v):
    """Zero-pad a [r<=8, cols] f32 piece to an 8-row (tile-aligned) stripe."""
    r, cols = v.shape
    if r == 8:
        return v
    return jnp.concatenate([v, jnp.zeros((8 - r, cols), v.dtype)], axis=0)


def _build_one_hots(src_row, tgt_row, tgt_col, n_block, e_block):
    """Loop-invariant one-hot incidence matrices, built directly in both orientations."""
    n_iota = jax.lax.broadcasted_iota(jnp.int32, (n_block, e_block), 0)
    e_iota = jax.lax.broadcasted_iota(jnp.int32, (e_block, n_block), 1)
    oh_src_t = jnp.where(src_row == n_iota, 1.0, 0.0).astype(jnp.bfloat16)   # [N, E]
    oh_tgt_t = jnp.where(tgt_row == n_iota, 1.0, 0.0).astype(jnp.bfloat16)   # [N, E]
    oh_tgt = jnp.where(tgt_col == e_iota, 1.0, 0.0).astype(jnp.bfloat16)     # [E, N]
    return oh_src_t, oh_tgt_t, oh_tgt


def _forward_math_t(x_t, ea_t, oh_src_t, oh_tgt_t, oh_tgt, W, B):
    """ECForGraphTCN forward in transposed [feature, row] layout -> sigmoid logits [1, E]."""
    def dot(w_bf, a):   # weight already bf16 (slab); cast activation once at the dot
        return jnp.dot(w_bf, a.astype(jnp.bfloat16), preferred_element_type=jnp.float32)

    # encoders: Linear -> ReLU -> Linear, then the module's outer self.relu
    h_t = _relu(dot(W("ne_w1"), _relu(dot(W("ne_w0"), x_t))))     # [H_DIM, N]
    e_t = _relu(dot(W("ee_w1"), _relu(dot(W("ee_w0"), ea_t))))    # [E_DIM, E]

    edge_stripes = [_stripe8(e_t)]                                # ResIN also returns input edge attr
    for l in range(L_EC):
        h_bf = h_t.astype(jnp.bfloat16)                           # cast once, reused by both gathers
        x_i_t = jnp.dot(h_bf, oh_tgt_t, preferred_element_type=jnp.float32)   # gather h[tgt] [H_DIM,E]
        x_j_t = jnp.dot(h_bf, oh_src_t, preferred_element_type=jnp.float32)   # gather h[src] [H_DIM,E]
        # relational model on cat([x_i, x_j, e]): ONE fused dot over 8-row stripes
        cat_ije = jnp.concatenate(
            [_stripe8(x_i_t), _stripe8(x_j_t), _stripe8(e_t)], axis=0)        # [24, E]
        t = _relu(dot(W(f"r0_{l}"), cat_ije) + B(f"r0b_{l}"))
        t = _relu(dot(W(f"r1_{l}"), t) + B(f"r1b_{l}"))
        e_tilde_t = dot(W(f"r2_{l}"), t) + B(f"r2b_{l}")          # [E_DIM, E]
        # scatter-add of messages onto target nodes (one-hot already in [E, N] orientation)
        agg_t = jnp.dot(e_tilde_t.astype(jnp.bfloat16), oh_tgt,
                        preferred_element_type=jnp.float32)       # [E_DIM, N]
        # object model on cat([h, agg]): ONE fused dot over 8-row stripes
        cat_ha = jnp.concatenate([_stripe8(h_t), _stripe8(agg_t)], axis=0)    # [16, N]
        t = _relu(dot(W(f"o0_{l}"), cat_ha) + B(f"o0b_{l}"))
        t = _relu(dot(W(f"o1_{l}"), t) + B(f"o1b_{l}"))
        dx_t = dot(W(f"o2_{l}"), t) + B(f"o2b_{l}")               # [H_DIM, N]
        # residual (convex combination) on nodes and edges
        h_t = ALPHA_EC * h_t + (1.0 - ALPHA_EC) * dx_t
        e_t = ALPHA_EC * e_t + (1.0 - ALPHA_EC) * e_tilde_t
        edge_stripes.append(_stripe8(e_t))

    # W MLP on torch.cat(edge_attrs, dim=1): ONE fused dot over the L_EC+1 stage stripes
    ecat = jnp.concatenate(edge_stripes, axis=0)                  # [8*(L_EC+1), E]
    t = _relu(dot(W("w0"), ecat) + B("wb0"))
    t = _relu(dot(W("w1"), t) + B("wb1"))
    logits_t = dot(W("w2"), t) + B("wb2")                         # [1, E]  (lane-dense)
    return jax.nn.sigmoid(logits_t)


# ---------------- Pallas kernel ----------------
def ec_kernel(x_t_ref, ea_t_ref, src_row_ref, tgt_row_ref, tgt_col_ref,
              wslab_ref, bslab_ref, out_ref):
    oh_src_t, oh_tgt_t, oh_tgt = _build_one_hots(
        src_row_ref[...], tgt_row_ref[...], tgt_col_ref[...], N_BLOCK, E_BLOCK)
    out_ref[...] = _forward_math_t(
        x_t_ref[...], ea_t_ref[...], oh_src_t, oh_tgt_t, oh_tgt,
        _wget(wslab_ref), _bget(bslab_ref))


# ---------------- wrapper glue ----------------
def _prepare_inputs(x, edge_index, edge_attr):
    """[B, ...] per-graph inputs -> lane-major stacked blocks with block-local node ids."""
    b, n, _ = x.shape
    e = edge_attr.shape[1]
    offs = (jnp.arange(b, dtype=jnp.int32) % GRAPHS_PER_BLOCK) * n
    ei = edge_index.astype(jnp.int32) + offs[:, None, None]
    src_row = ei[:, 0, :].reshape(1, b * e)
    tgt_row = ei[:, 1, :].reshape(1, b * e)
    tgt_col = ei[:, 1, :].reshape(b * e, 1)
    x_t = jnp.transpose(x, (2, 0, 1)).reshape(x.shape[2], b * n).astype(jnp.float32)
    ea_t = jnp.transpose(edge_attr, (2, 0, 1)).reshape(edge_attr.shape[2], b * e).astype(jnp.float32)
    return x_t, ea_t, src_row, tgt_row, tgt_col


def _cost_estimate():
    macs = 0
    macs += N_TOTAL * HIDDEN_DIM * (NODE_INDIM + H_DIM)
    macs += E_TOTAL * HIDDEN_DIM * (EDGE_INDIM + E_DIM)
    per_layer = NUM_BLOCKS * N_BLOCK * E_BLOCK * (2 * H_DIM + E_DIM)        # gathers + scatter
    per_layer += E_TOTAL * HIDDEN_DIM * (CAT_IJE_COLS + HIDDEN_DIM + E_DIM)
    per_layer += N_TOTAL * HIDDEN_DIM * (CAT_HA_COLS + HIDDEN_DIM + H_DIM)
    macs += L_EC * per_layer
    macs += E_TOTAL * HIDDEN_DIM * (CAT_EDGE_COLS + HIDDEN_DIM + 1)
    bytes_accessed = (4 * (NODE_INDIM * N_TOTAL + EDGE_INDIM * E_TOTAL + 3 * E_TOTAL + E_TOTAL)
                      + 2 * W_SLAB_ROWS * SLAB_LANES + 4 * B_SLAB_ROWS * SLAB_LANES)
    return pl.CostEstimate(flops=2 * macs, transcendentals=E_TOTAL,
                           bytes_accessed=bytes_accessed)


@jax.jit
def ec_for_graph_tcn(x, edge_index, edge_attr, wslab, bslab):
    """Pallas-backed ECForGraphTCN forward over a batch of graphs.
    Returns per-edge weights of shape [B * E_per_graph, 1] (graph-major edge order)."""
    x_t, ea_t, src_row, tgt_row, tgt_col = _prepare_inputs(x, edge_index, edge_attr)

    out = pl.pallas_call(
        ec_kernel,
        grid=(NUM_BLOCKS,),
        in_specs=[
            pl.BlockSpec((NODE_INDIM, N_BLOCK), lambda b: (0, b)),
            pl.BlockSpec((EDGE_INDIM, E_BLOCK), lambda b: (0, b)),
            pl.BlockSpec((1, E_BLOCK), lambda b: (0, b)),
            pl.BlockSpec((1, E_BLOCK), lambda b: (0, b)),
            pl.BlockSpec((E_BLOCK, 1), lambda b: (b, 0)),
            pl.BlockSpec((W_SLAB_ROWS, SLAB_LANES), lambda b: (0, 0)),   # bf16 weight slab
            pl.BlockSpec((B_SLAB_ROWS, SLAB_LANES), lambda b: (0, 0)),   # f32 bias slab
        ],
        out_specs=pl.BlockSpec((1, E_BLOCK), lambda b: (0, b)),          # lane-dense output row
        out_shape=jax.ShapeDtypeStruct((1, E_TOTAL), jnp.float32),
        compiler_params=pltpu.CompilerParams(
            dimension_semantics=("parallel",),
            vmem_limit_bytes=32 * 1024 * 1024,
        ),
        cost_estimate=_cost_estimate(),
    )(x_t, ea_t, src_row, tgt_row, tgt_col, wslab, bslab)

    return out.reshape(E_TOTAL, 1)


# ---------------- pure-JAX references (test harness only) ----------------
def _reference_transposed(x, edge_index, edge_attr, wslab, bslab):
    """Exactly the kernel math, re-run in plain JAX per block."""
    x_t, ea_t, src_row, tgt_row, tgt_col = _prepare_inputs(x, edge_index, edge_attr)
    outs = []
    for b in range(NUM_BLOCKS):
        ns, ne = b * N_BLOCK, (b + 1) * N_BLOCK
        es, ee = b * E_BLOCK, (b + 1) * E_BLOCK
        oh = _build_one_hots(src_row[:, es:ee], tgt_row[:, es:ee],
                             tgt_col[es:ee, :], N_BLOCK, E_BLOCK)
        outs.append(_forward_math_t(x_t[:, ns:ne], ea_t[:, es:ee], *oh,
                                    _wget(wslab), _bget(bslab)))
    return jnp.concatenate(outs, axis=1).reshape(E_TOTAL, 1)


def _unpack_plain_params(wslab, bslab):
    """Recover per-parameter arrays (still bf16-rounded values, as f32) from the slabs."""
    Wd = {name: np.asarray(wslab[WEIGHT_OFFSETS[name][0]:WEIGHT_OFFSETS[name][0] + r, :c],
                           np.float32)
          for name, r, c in WEIGHT_DEFS}
    Bd = {name: np.asarray(bslab[:r, BIAS_LANE[name]], np.float32) for name, r in BIAS_DEFS}
    return Wd, Bd


def _reference_plain_graph(x, ea, src, tgt, Wd, Bd):
    """Module-semantics reference per graph: index gather + segment scatter-add."""
    b16 = lambda a: a.astype(jnp.bfloat16)
    dot = lambda a, w_t: jnp.dot(b16(a), b16(w_t).T, preferred_element_type=jnp.float32)
    sub = lambda w, c0, width: w[:, c0:c0 + width]

    h = _relu(dot(_relu(dot(x, Wd["ne_w0"])), Wd["ne_w1"]))
    e = _relu(dot(_relu(dot(ea, Wd["ee_w0"])), Wd["ee_w1"]))
    edge_outs = [e]
    for l in range(L_EC):
        r0, o0 = Wd[f"r0_{l}"], Wd[f"o0_{l}"]
        r0i, r0j, r0e = sub(r0, 0, H_DIM), sub(r0, 8, H_DIM), sub(r0, 16, E_DIM)
        o0h, o0a = sub(o0, 0, H_DIM), sub(o0, 8, E_DIM)
        x_i = b16(h)[tgt].astype(jnp.float32)            # matches the bf16 one-hot gather
        x_j = b16(h)[src].astype(jnp.float32)
        t = _relu(dot(x_i, r0i) + dot(x_j, r0j) + dot(e, r0e) + Bd[f"r0b_{l}"])
        t = _relu(dot(t, Wd[f"r1_{l}"]) + Bd[f"r1b_{l}"])
        e_tilde = dot(t, Wd[f"r2_{l}"]) + Bd[f"r2b_{l}"]
        agg = jax.ops.segment_sum(b16(e_tilde).astype(jnp.float32), tgt,
                                  num_segments=x.shape[0])
        t = _relu(dot(h, o0h) + dot(agg, o0a) + Bd[f"o0b_{l}"])
        t = _relu(dot(t, Wd[f"o1_{l}"]) + Bd[f"o1b_{l}"])
        dx = dot(t, Wd[f"o2_{l}"]) + Bd[f"o2b_{l}"]
        h = ALPHA_EC * h + (1.0 - ALPHA_EC) * dx
        e = ALPHA_EC * e + (1.0 - ALPHA_EC) * e_tilde
        edge_outs.append(e)
    w0 = Wd["w0"]
    t = jnp.asarray(Bd["wb0"])
    for s, eo in enumerate(edge_outs):
        t = t + dot(eo, sub(w0, 8 * s, E_DIM))
    t = _relu(t)
    t = _relu(dot(t, Wd["w1"]) + Bd["wb1"])
    return jax.nn.sigmoid(dot(t, Wd["w2"]) + Bd["wb2"])  # [E, 1]


if __name__ == "__main__":
    assert N_GRAPHS % GRAPHS_PER_BLOCK == 0
    key = jax.random.PRNGKey(0)
    k_x, k_e, k_i, k_p = jax.random.split(key, 4)

    x = jax.random.normal(k_x, (N_GRAPHS, N_NODES, NODE_INDIM), jnp.float32)
    edge_attr = jax.random.normal(k_e, (N_GRAPHS, E_PER_GRAPH, EDGE_INDIM), jnp.float32)
    edge_index = jax.random.randint(k_i, (N_GRAPHS, 2, E_PER_GRAPH), 0, N_NODES, jnp.int32)
    wslab, bslab = init_params(k_p)

    out = ec_for_graph_tcn(x, edge_index, edge_attr, wslab, bslab)
    out = jax.block_until_ready(out)
    assert out.shape == (E_TOTAL, 1)
    assert bool(jnp.all((out >= 0.0) & (out <= 1.0)))

    # check 1: the kernel's exact math, re-run in pure JAX (tight tolerance)
    ref_t = jax.jit(_reference_transposed)(x, edge_index, edge_attr, wslab, bslab)
    np.testing.assert_allclose(np.asarray(out), np.asarray(ref_t), rtol=5e-3, atol=5e-3)

    # check 2: module-semantics reference (index gather + segment scatter-add per graph)
    Wd, Bd = _unpack_plain_params(wslab, bslab)
    ref_plain_fn = jax.jit(_reference_plain_graph)
    ref_p = jnp.concatenate(
        [ref_plain_fn(x[g], edge_attr[g], edge_index[g, 0], edge_index[g, 1], Wd, Bd)
         for g in range(N_GRAPHS)], axis=0)
    np.testing.assert_allclose(np.asarray(out), np.asarray(ref_p), rtol=2e-2, atol=2e-2)

    print("KERNEL_OK")
</pallas_src>

<mosaic_0001>
module attributes {stable_mosaic.version = 11 : i64} {
  func.func @ec_kernel(%arg0: i32, %arg1: memref<6x256xf32, #tpu.memory_space<vmem>>, %arg2: memref<4x512xf32, #tpu.memory_space<vmem>>, %arg3: memref<1x512xi32, #tpu.memory_space<vmem>>, %arg4: memref<1x512xi32, #tpu.memory_space<vmem>>, %arg5: memref<512x1xi32, #tpu.memory_space<vmem>>, %arg6: memref<912x128xbf16, #tpu.memory_space<vmem>>, %arg7: memref<40x128xf32, #tpu.memory_space<vmem>>, %arg8: memref<1x512xf32, #tpu.memory_space<vmem>>) attributes {dimension_semantics = [#tpu.dimension_semantics<parallel>], iteration_bounds = array<i64: 2>, scalar_prefetch = 0 : i64, scratch_operands = 0 : i64, tpu.core_type = #tpu.core_type<tc>, window_params = [{transform_indices = @transform_0, window_bounds = array<i64: 6, 256>}, {transform_indices = @transform_1, window_bounds = array<i64: 4, 512>}, {transform_indices = @transform_2, window_bounds = array<i64: 1, 512>}, {transform_indices = @transform_3, window_bounds = array<i64: 1, 512>}, {transform_indices = @transform_4, window_bounds = array<i64: 512, 1>}, {pipeline_mode = #tpu.pipeline_mode<synchronous>, transform_indices = @transform_5, window_bounds = array<i64: 912, 128>}, {pipeline_mode = #tpu.pipeline_mode<synchronous>, transform_indices = @transform_6, window_bounds = array<i64: 40, 128>}, {transform_indices = @transform_7, window_bounds = array<i64: 1, 512>}]} {
    %c0 = arith.constant 0 : index
    %c0_0 = arith.constant 0 : index
    %0 = vector.load %arg3[%c0, %c0_0] : memref<1x512xi32, #tpu.memory_space<vmem>>, vector<1x512xi32>
    %c0_1 = arith.constant 0 : index
    %c0_2 = arith.constant 0 : index
    %1 = vector.load %arg4[%c0_1, %c0_2] : memref<1x512xi32, #tpu.memory_space<vmem>>, vector<1x512xi32>
    %c0_3 = arith.constant 0 : index
    %c0_4 = arith.constant 0 : index
    %2 = vector.load %arg5[%c0_3, %c0_4] : memref<512x1xi32, #tpu.memory_space<vmem>>, vector<512x1xi32>
    %3 = tpu.iota {dimensions = array<i32: 0>} : vector<256x512xi32>
    %4 = tpu.iota {dimensions = array<i32: 1>} : vector<512x256xi32>
    %5 = vector.broadcast %0 : vector<1x512xi32> to vector<256x512xi32>
    %6 = arith.cmpi eq, %5, %3 : vector<256x512xi32>
    %cst = arith.constant 1.000000e+00 : f32
    %cst_5 = arith.constant 0.000000e+00 : f32
    %7 = vector.broadcast %cst : f32 to vector<256x512xf32>
    %8 = vector.broadcast %cst_5 : f32 to vector<256x512xf32>
    %9 = arith.select %6, %7, %8 : vector<256x512xi1>, vector<256x512xf32>
    %10 = arith.truncf %9 : vector<256x512xf32> to vector<256x512xbf16>
    %11 = vector.broadcast %1 : vector<1x512xi32> to vector<256x512xi32>
    %12 = arith.cmpi eq, %11, %3 : vector<256x512xi32>
    %cst_6 = arith.constant 1.000000e+00 : f32
    %cst_7 = arith.constant 0.000000e+00 : f32
    %13 = vector.broadcast %cst_6 : f32 to vector<256x512xf32>
    %14 = vector.broadcast %cst_7 : f32 to vector<256x512xf32>
    %15 = arith.select %12, %13, %14 : vector<256x512xi1>, vector<256x512xf32>
    %16 = arith.truncf %15 : vector<256x512xf32> to vector<256x512xbf16>
    %17 = vector.broadcast %2 : vector<512x1xi32> to vector<512x256xi32>
    %18 = arith.cmpi eq, %17, %4 : vector<512x256xi32>
    %cst_8 = arith.constant 1.000000e+00 : f32
    %cst_9 = arith.constant 0.000000e+00 : f32
    %19 = vector.broadcast %cst_8 : f32 to vector<512x256xf32>
    %20 = vector.broadcast %cst_9 : f32 to vector<512x256xf32>
    %21 = arith.select %18, %19, %20 : vector<512x256xi1>, vector<512x256xf32>
    %22 = arith.truncf %21 : vector<512x256xf32> to vector<512x256xbf16>
    %c0_10 = arith.constant 0 : index
    %c0_11 = arith.constant 0 : index
    %23 = vector.load %arg1[%c0_10, %c0_11] : memref<6x256xf32, #tpu.memory_space<vmem>>, vector<6x256xf32>
    %c0_12 = arith.constant 0 : index
    %c0_13 = arith.constant 0 : index
    %24 = vector.load %arg2[%c0_12, %c0_13] : memref<4x512xf32, #tpu.memory_space<vmem>>, vector<4x512xf32>
    %c48 = arith.constant 48 : index
    %c0_14 = arith.constant 0 : index
    %25 = vector.load %arg6[%c48, %c0_14] : memref<912x128xbf16, #tpu.memory_space<vmem>>, vector<5x40xbf16>
    %c0_15 = arith.constant 0 : index
    %c0_16 = arith.constant 0 : index
    %26 = vector.load %arg6[%c0_15, %c0_16] : memref<912x128xbf16, #tpu.memory_space<vmem>>, vector<40x6xbf16>
    %27 = arith.truncf %23 : vector<6x256xf32> to vector<6x256xbf16>
    %cst_17 = arith.constant dense<0.000000e+00> : vector<40x256xf32>
    %28 = tpu.matmul %26, %27, %cst_17 {dimension_numbers = #tpu.dot_dimension_numbers<[1], [0], [0], [1], [0, 0, 1, 1], [], []>} : vector<40x6xbf16>, vector<6x256xbf16>, vector<40x256xf32> -> vector<40x256xf32>
    %cst_18 = arith.constant 0.000000e+00 : f32
    %29 = vector.broadcast %cst_18 : f32 to vector<40x256xf32>
    %30 = arith.maximumf %28, %29 : vector<40x256xf32>
    %31 = arith.truncf %30 : vector<40x256xf32> to vector<40x256xbf16>
    %cst_19 = arith.constant dense<0.000000e+00> : vector<5x256xf32>
    %32 = tpu.matmul %25, %31, %cst_19 {dimension_numbers = #tpu.dot_dimension_numbers<[1], [0], [0], [1], [0, 0, 1, 1], [], []>} : vector<5x40xbf16>, vector<40x256xbf16>, vector<5x256xf32> -> vector<5x256xf32>
    %cst_20 = arith.constant 0.000000e+00 : f32
    %33 = vector.broadcast %cst_20 : f32 to vector<5x256xf32>
    %34 = arith.maximumf %32, %33 : vector<5x256xf32>
    %c112 = arith.constant 112 : index
    %c0_21 = arith.constant 0 : index
    %35 = vector.load %arg6[%c112, %c0_21] : memref<912x128xbf16, #tpu.memory_space<vmem>>, vector<4x40xbf16>
    %c64 = arith.constant 64 : index
    %c0_22 = arith.constant 0 : index
    %36 = vector.load %arg6[%c64, %c0_22] : memref<912x128xbf16, #tpu.memory_space<vmem>>, vector<40x4xbf16>
    %37 = arith.truncf %24 : vector<4x512xf32> to vector<4x512xbf16>
    %cst_23 = arith.constant dense<0.000000e+00> : vector<40x512xf32>
    %38 = tpu.matmul %36, %37, %cst_23 {dimension_numbers = #tpu.dot_dimension_numbers<[1], [0], [0], [1], [0, 0, 1, 1], [], []>} : vector<40x4xbf16>, vector<4x512xbf16>, vector<40x512xf32> -> vector<40x512xf32>
    %cst_24 = arith.constant 0.000000e+00 : f32
    %39 = vector.broadcast %cst_24 : f32 to vector<40x512xf32>
    %40 = arith.maximumf %38, %39 : vector<40x512xf32>
    %41 = arith.truncf %40 : vector<40x512xf32> to vector<40x512xbf16>
    %cst_25 = arith.constant dense<0.000000e+00> : vector<4x512xf32>
    %42 = tpu.matmul %35, %41, %cst_25 {dimension_numbers = #tpu.dot_dimension_numbers<[1], [0], [0], [1], [0, 0, 1, 1], [], []>} : vector<4x40xbf16>, vector<40x512xbf16>, vector<4x512xf32> -> vector<4x512xf32>
    %cst_26 = arith.constant 0.000000e+00 : f32
    %43 = vector.broadcast %cst_26 : f32 to vector<4x512xf32>
    %44 = arith.maximumf %42, %43 : vector<4x512xf32>
    %cst_27 = arith.constant 0.000000e+00 : f32
    %45 = vector.broadcast %cst_27 : f32 to vector<4x512xf32>
    %46 = tpu.concatenate %44, %45 in 0 : vector<4x512xf32>, vector<4x512xf32> -> vector<8x512xf32>
    %47 = arith.truncf %34 : vector<5x256xf32> to vector<5x256xbf16>
    %cst_28 = arith.constant dense<0.000000e+00> : vector<5x512xf32>
    %48 = tpu.matmul %47, %16, %cst_28 {dimension_numbers = #tpu.dot_dimension_numbers<[1], [0], [0], [1], [0, 0, 1, 1], [], []>} : vector<5x256xbf16>, vector<256x512xbf16>, vector<5x512xf32> -> vector<5x512xf32>
    %cst_29 = arith.constant dense<0.000000e+00> : vector<5x512xf32>
    %49 = tpu.matmul %47, %10, %cst_29 {dimension_numbers = #tpu.dot_dimension_numbers<[1], [0], [0], [1], [0, 0, 1, 1], [], []>} : vector<5x256xbf16>, vector<256x512xbf16>, vector<5x512xf32> -> vector<5x512xf32>
    %cst_30 = arith.constant 0.000000e+00 : f32
    %50 = vector.broadcast %cst_30 : f32 to vector<3x512xf32>
    %51 = tpu.concatenate %48, %50 in 0 : vector<5x512xf32>, vector<3x512xf32> -> vector<8x512xf32>
    %cst_31 = arith.constant 0.000000e+00 : f32
    %52 = vector.broadcast %cst_31 : f32 to vector<3x512xf32>
    %53 = tpu.concatenate %49, %52 in 0 : vector<5x512xf32>, vector<3x512xf32> -> vector<8x512xf32>
    %cst_32 = arith.constant 0.000000e+00 : f32
    %54 = vector.broadcast %cst_32 : f32 to vector<4x512xf32>
    %55 = tpu.concatenate %44, %54 in 0 : vector<4x512xf32>, vector<4x512xf32> -> vector<8x512xf32>
    %56 = tpu.concatenate %51, %53, %55 in 0 : vector<8x512xf32>, vector<8x512xf32>, vector<8x512xf32> -> vector<24x512xf32>
    %c128 = arith.constant 128 : index
    %c0_33 = arith.constant 0 : index
    %57 = vector.load %arg6[%c128, %c0_33] : memref<912x128xbf16, #tpu.memory_space<vmem>>, vector<40x24xbf16>
    %58 = arith.truncf %56 : vector<24x512xf32> to vector<24x512xbf16>
    %cst_34 = arith.constant dense<0.000000e+00> : vector<40x512xf32>
    %59 = tpu.matmul %57, %58, %cst_34 {dimension_numbers = #tpu.dot_dimension_numbers<[1], [0], [0], [1], [0, 0, 1, 1], [], []>} : vector<40x24xbf16>, vector<24x512xbf16>, vector<40x512xf32> -> vector<40x512xf32>
    %c0_35 = arith.constant 0 : index
    %c0_36 = arith.constant 0 : index
    %60 = vector.load %arg7[%c0_35, %c0_36] : memref<40x128xf32, #tpu.memory_space<vmem>>, vector<40x1xf32>
    %61 = vector.broadcast %60 : vector<40x1xf32> to vector<40x512xf32>
    %62 = arith.addf %59, %61 : vector<40x512xf32>
    %cst_37 = arith.constant 0.000000e+00 : f32
    %63 = vector.broadcast %cst_37 : f32 to vector<40x512xf32>
    %64 = arith.maximumf %62, %63 : vector<40x512xf32>
    %c176 = arith.constant 176 : index
    %c0_38 = arith.constant 0 : index
    %65 = vector.load %arg6[%c176, %c0_38] : memref<912x128xbf16, #tpu.memory_space<vmem>>, vector<40x40xbf16>
    %66 = arith.truncf %64 : vector<40x512xf32> to vector<40x512xbf16>
    %cst_39 = arith.constant dense<0.000000e+00> : vector<40x512xf32>
    %67 = tpu.matmul %65, %66, %cst_39 {dimension_numbers = #tpu.dot_dimension_numbers<[1], [0], [0], [1], [0, 0, 1, 1], [], []>} : vector<40x40xbf16>, vector<40x512xbf16>, vector<40x512xf32> -> vector<40x512xf32>
    %c0_40 = arith.constant 0 : index
    %c1 = arith.constant 1 : index
    %68 = vector.load %arg7[%c0_40, %c1] : memref<40x128xf32, #tpu.memory_space<vmem>>, vector<40x1xf32>
    %69 = vector.broadcast %68 : vector<40x1xf32> to vector<40x512xf32>
    %70 = arith.addf %67, %69 : vector<40x512xf32>
    %cst_41 = arith.constant 0.000000e+00 : f32
    %71 = vector.broadcast %cst_41 : f32 to vector<40x512xf32>
    %72 = arith.maximumf %70, %71 : vector<40x512xf32>
    %c224 = arith.constant 224 : index
    %c0_42 = arith.constant 0 : index
    %73 = vector.load %arg6[%c224, %c0_42] : memref<912x128xbf16, #tpu.memory_space<vmem>>, vector<4x40xbf16>
    %74 = arith.truncf %72 : vector<40x512xf32> to vector<40x512xbf16>
    %cst_43 = arith.constant dense<0.000000e+00> : vector<4x512xf32>
    %75 = tpu.matmul %73, %74, %cst_43 {dimension_numbers = #tpu.dot_dimension_numbers<[1], [0], [0], [1], [0, 0, 1, 1], [], []>} : vector<4x40xbf16>, vector<40x512xbf16>, vector<4x512xf32> -> vector<4x512xf32>
    %c0_44 = arith.constant 0 : index
    %c2 = arith.constant 2 : index
    %76 = vector.load %arg7[%c0_44, %c2] : memref<40x128xf32, #tpu.memory_space<vmem>>, vector<4x1xf32>
    %77 = vector.broadcast %76 : vector<4x1xf32> to vector<4x512xf32>
    %78 = arith.addf %75, %77 : vector<4x512xf32>
    %79 = arith.truncf %78 : vector<4x512xf32> to vector<4x512xbf16>
    %cst_45 = arith.constant dense<0.000000e+00> : vector<4x256xf32>
    %80 = tpu.matmul %79, %22, %cst_45 {dimension_numbers = #tpu.dot_dimension_numbers<[1], [0], [0], [1], [0, 0, 1, 1], [], []>} : vector<4x512xbf16>, vector<512x256xbf16>, vector<4x256xf32> -> vector<4x256xf32>
    %cst_46 = arith.constant 0.000000e+00 : f32
    %81 = vector.broadcast %cst_46 : f32 to vector<3x256xf32>
    %82 = tpu.concatenate %34, %81 in 0 : vector<5x256xf32>, vector<3x256xf32> -> vector<8x256xf32>
    %cst_47 = arith.constant 0.000000e+00 : f32
    %83 = vector.broadcast %cst_47 : f32 to vector<4x256xf32>
    %84 = tpu.concatenate %80, %83 in 0 : vector<4x256xf32>, vector<4x256xf32> -> vector<8x256xf32>
    %85 = tpu.concatenate %82, %84 in 0 : vector<8x256xf32>, vector<8x256xf32> -> vector<16x256xf32>
    %c240 = arith.constant 240 : index
    %c0_48 = arith.constant 0 : index
    %86 = vector.load %arg6[%c240, %c0_48] : memref<912x128xbf16, #tpu.memory_space<vmem>>, vector<40x16xbf16>
    %87 = arith.truncf %85 : vector<16x256xf32> to vector<16x256xbf16>
    %cst_49 = arith.constant dense<0.000000e+00> : vector<40x256xf32>
    %88 = tpu.matmul %86, %87, %cst_49 {dimension_numbers = #tpu.dot_dimension_numbers<[1], [0], [0], [1], [0, 0, 1, 1], [], []>} : vector<40x16xbf16>, vector<16x256xbf16>, vector<40x256xf32> -> vector<40x256xf32>
    %c0_50 = arith.constant 0 : index
    %c3 = arith.constant 3 : index
    %89 = vector.load %arg7[%c0_50, %c3] : memref<40x128xf32, #tpu.memory_space<vmem>>, vector<40x1xf32>
    %90 = vector.broadcast %89 : vector<40x1xf32> to vector<40x256xf32>
    %91 = arith.addf %88, %90 : vector<40x256xf32>
    %cst_51 = arith.constant 0.000000e+00 : f32
    %92 = vector.broadcast %cst_51 : f32 to vector<40x256xf32>
    %93 = arith.maximumf %91, %92 : vector<40x256xf32>
    %c288 = arith.constant 288 : index
    %c0_52 = arith.constant 0 : index
    %94 = vector.load %arg6[%c288, %c0_52] : memref<912x128xbf16, #tpu.memory_space<vmem>>, vector<40x40xbf16>
    %95 = arith.truncf %93 : vector<40x256xf32> to vector<40x256xbf16>
    %cst_53 = arith.constant dense<0.000000e+00> : vector<40x256xf32>
    %96 = tpu.matmul %94, %95, %cst_53 {dimension_numbers = #tpu.dot_dimension_numbers<[1], [0], [0], [1], [0, 0, 1, 1], [], []>} : vector<40x40xbf16>, vector<40x256xbf16>, vector<40x256xf32> -> vector<40x256xf32>
    %c0_54 = arith.constant 0 : index
    %c4 = arith.constant 4 : index
    %97 = vector.load %arg7[%c0_54, %c4] : memref<40x128xf32, #tpu.memory_space<vmem>>, vector<40x1xf32>
    %98 = vector.broadcast %97 : vector<40x1xf32> to vector<40x256xf32>
    %99 = arith.addf %96, %98 : vector<40x256xf32>
    %cst_55 = arith.constant 0.000000e+00 : f32
    %100 = vector.broadcast %cst_55 : f32 to vector<40x256xf32>
    %101 = arith.maximumf %99, %100 : vector<40x256xf32>
    %c336 = arith.constant 336 : index
    %c0_56 = arith.constant 0 : index
    %102 = vector.load %arg6[%c336, %c0_56] : memref<912x128xbf16, #tpu.memory_space<vmem>>, vector<5x40xbf16>
    %103 = arith.truncf %101 : vector<40x256xf32> to vector<40x256xbf16>
    %cst_57 = arith.constant dense<0.000000e+00> : vector<5x256xf32>
    %104 = tpu.matmul %102, %103, %cst_57 {dimension_numbers = #tpu.dot_dimension_numbers<[1], [0], [0], [1], [0, 0, 1, 1], [], []>} : vector<5x40xbf16>, vector<40x256xbf16>, vector<5x256xf32> -> vector<5x256xf32>
    %c0_58 = arith.constant 0 : index
    %c5 = arith.constant 5 : index
    %105 = vector.load %arg7[%c0_58, %c5] : memref<40x128xf32, #tpu.memory_space<vmem>>, vector<5x1xf32>
    %106 = vector.broadcast %105 : vector<5x1xf32> to vector<5x256xf32>
    %107 = arith.addf %104, %106 : vector<5x256xf32>
    %cst_59 = arith.constant 5.000000e-01 : f32
    %108 = vector.broadcast %cst_59 : f32 to vector<5x256xf32>
    %109 = arith.mulf %108, %34 : vector<5x256xf32>
    %cst_60 = arith.constant 5.000000e-01 : f32
    %110 = vector.broadcast %cst_60 : f32 to vector<5x256xf32>
    %111 = arith.mulf %110, %107 : vector<5x256xf32>
    %112 = arith.addf %109, %111 : vector<5x256xf32>
    %cst_61 = arith.constant 5.000000e-01 : f32
    %113 = vector.broadcast %cst_61 : f32 to vector<4x512xf32>
    %114 = arith.mulf %113, %44 : vector<4x512xf32>
    %cst_62 = arith.constant 5.000000e-01 : f32
    %115 = vector.broadcast %cst_62 : f32 to vector<4x512xf32>
    %116 = arith.mulf %115, %78 : vector<4x512xf32>
    %117 = arith.addf %114, %116 : vector<4x512xf32>
    %cst_63 = arith.constant 0.000000e+00 : f32
    %118 = vector.broadcast %cst_63 : f32 to vector<4x512xf32>
    %119 = tpu.concatenate %117, %118 in 0 : vector<4x512xf32>, vector<4x512xf32> -> vector<8x512xf32>
    %120 = arith.truncf %112 : vector<5x256xf32> to vector<5x256xbf16>
    %cst_64 = arith.constant dense<0.000000e+00> : vector<5x512xf32>
    %121 = tpu.matmul %120, %16, %cst_64 {dimension_numbers = #tpu.dot_dimension_numbers<[1], [0], [0], [1], [0, 0, 1, 1], [], []>} : vector<5x256xbf16>, vector<256x512xbf16>, vector<5x512xf32> -> vector<5x512xf32>
    %cst_65 = arith.constant dense<0.000000e+00> : vector<5x512xf32>
    %122 = tpu.matmul %120, %10, %cst_65 {dimension_numbers = #tpu.dot_dimension_numbers<[1], [0], [0], [1], [0, 0, 1, 1], [], []>} : vector<5x256xbf16>, vector<256x512xbf16>, vector<5x512xf32> -> vector<5x512xf32>
    %cst_66 = arith.constant 0.000000e+00 : f32
    %123 = vector.broadcast %cst_66 : f32 to vector<3x512xf32>
    %124 = tpu.concatenate %121, %123 in 0 : vector<5x512xf32>, vector<3x512xf32> -> vector<8x512xf32>
    %cst_67 = arith.constant 0.000000e+00 : f32
    %125 = vector.broadcast %cst_67 : f32 to vector<3x512xf32>
    %126 = tpu.concatenate %122, %125 in 0 : vector<5x512xf32>, vector<3x512xf32> -> vector<8x512xf32>
    %cst_68 = arith.constant 0.000000e+00 : f32
    %127 = vector.broadcast %cst_68 : f32 to vector<4x512xf32>
    %128 = tpu.concatenate %117, %127 in 0 : vector<4x512xf32>, vector<4x512xf32> -> vector<8x512xf32>
    %129 = tpu.concatenate %124, %126, %128 in 0 : vector<8x512xf32>, vector<8x512xf32>, vector<8x512xf32> -> vector<24x512xf32>
    %c352 = arith.constant 352 : index
    %c0_69 = arith.constant 0 : index
    %130 = vector.load %arg6[%c352, %c0_69] : memref<912x128xbf16, #tpu.memory_space<vmem>>, vector<40x24xbf16>
    %131 = arith.truncf %129 : vector<24x512xf32> to vector<24x512xbf16>
    %cst_70 = arith.constant dense<0.000000e+00> : vector<40x512xf32>
    %132 = tpu.matmul %130, %131, %cst_70 {dimension_numbers = #tpu.dot_dimension_numbers<[1], [0], [0], [1], [0, 0, 1, 1], [], []>} : vector<40x24xbf16>, vector<24x512xbf16>, vector<40x512xf32> -> vector<40x512xf32>
    %c0_71 = arith.constant 0 : index
    %c6 = arith.constant 6 : index
    %133 = vector.load %arg7[%c0_71, %c6] : memref<40x128xf32, #tpu.memory_space<vmem>>, vector<40x1xf32>
    %134 = vector.broadcast %133 : vector<40x1xf32> to vector<40x512xf32>
    %135 = arith.addf %132, %134 : vector<40x512xf32>
    %cst_72 = arith.constant 0.000000e+00 : f32
    %136 = vector.broadcast %cst_72 : f32 to vector<40x512xf32>
    %137 = arith.maximumf %135, %136 : vector<40x512xf32>
    %c400 = arith.constant 400 : index
    %c0_73 = arith.constant 0 : index
    %138 = vector.load %arg6[%c400, %c0_73] : memref<912x128xbf16, #tpu.memory_space<vmem>>, vector<40x40xbf16>
    %139 = arith.truncf %137 : vector<40x512xf32> to vector<40x512xbf16>
    %cst_74 = arith.constant dense<0.000000e+00> : vector<40x512xf32>
    %140 = tpu.matmul %138, %139, %cst_74 {dimension_numbers = #tpu.dot_dimension_numbers<[1], [0], [0], [1], [0, 0, 1, 1], [], []>} : vector<40x40xbf16>, vector<40x512xbf16>, vector<40x512xf32> -> vector<40x512xf32>
    %c0_75 = arith.constant 0 : index
    %c7 = arith.constant 7 : index
    %141 = vector.load %arg7[%c0_75, %c7] : memref<40x128xf32, #tpu.memory_space<vmem>>, vector<40x1xf32>
    %142 = vector.broadcast %141 : vector<40x1xf32> to vector<40x512xf32>
    %143 = arith.addf %140, %142 : vector<40x512xf32>
    %cst_76 = arith.constant 0.000000e+00 : f32
    %144 = vector.broadcast %cst_76 : f32 to vector<40x512xf32>
    %145 = arith.maximumf %143, %144 : vector<40x512xf32>
    %c448 = arith.constant 448 : index
    %c0_77 = arith.constant 0 : index
    %146 = vector.load %arg6[%c448, %c0_77] : memref<912x128xbf16, #tpu.memory_space<vmem>>, vector<4x40xbf16>
    %147 = arith.truncf %145 : vector<40x512xf32> to vector<40x512xbf16>
    %cst_78 = arith.constant dense<0.000000e+00> : vector<4x512xf32>
    %148 = tpu.matmul %146, %147, %cst_78 {dimension_numbers = #tpu.dot_dimension_numbers<[1], [0], [0], [1], [0, 0, 1, 1], [], []>} : vector<4x40xbf16>, vector<40x512xbf16>, vector<4x512xf32> -> vector<4x512xf32>
    %c0_79 = arith.constant 0 : index
    %c8 = arith.constant 8 : index
    %149 = vector.load %arg7[%c0_79, %c8] : memref<40x128xf32, #tpu.memory_space<vmem>>, vector<4x1xf32>
    %150 = vector.broadcast %149 : vector<4x1xf32> to vector<4x512xf32>
    %151 = arith.addf %148, %150 : vector<4x512xf32>
    %152 = arith.truncf %151 : vector<4x512xf32> to vector<4x512xbf16>
    %cst_80 = arith.constant dense<0.000000e+00> : vector<4x256xf32>
    %153 = tpu.matmul %152, %22, %cst_80 {dimension_numbers = #tpu.dot_dimension_numbers<[1], [0], [0], [1], [0, 0, 1, 1], [], []>} : vector<4x512xbf16>, vector<512x256xbf16>, vector<4x256xf32> -> vector<4x256xf32>
    %cst_81 = arith.constant 0.000000e+00 : f32
    %154 = vector.broadcast %cst_81 : f32 to vector<3x256xf32>
    %155 = tpu.concatenate %112, %154 in 0 : vector<5x256xf32>, vector<3x256xf32> -> vector<8x256xf32>
    %cst_82 = arith.constant 0.000000e+00 : f32
    %156 = vector.broadcast %cst_82 : f32 to vector<4x256xf32>
    %157 = tpu.concatenate %153, %156 in 0 : vector<4x256xf32>, vector<4x256xf32> -> vector<8x256xf32>
    %158 = tpu.concatenate %155, %157 in 0 : vector<8x256xf32>, vector<8x256xf32> -> vector<16x256xf32>
    %c464 = arith.constant 464 : index
    %c0_83 = arith.constant 0 : index
    %159 = vector.load %arg6[%c464, %c0_83] : memref<912x128xbf16, #tpu.memory_space<vmem>>, vector<40x16xbf16>
    %160 = arith.truncf %158 : vector<16x256xf32> to vector<16x256xbf16>
    %cst_84 = arith.constant dense<0.000000e+00> : vector<40x256xf32>
    %161 = tpu.matmul %159, %160, %cst_84 {dimension_numbers = #tpu.dot_dimension_numbers<[1], [0], [0], [1], [0, 0, 1, 1], [], []>} : vector<40x16xbf16>, vector<16x256xbf16>, vector<40x256xf32> -> vector<40x256xf32>
    %c0_85 = arith.constant 0 : index
    %c9 = arith.constant 9 : index
    %162 = vector.load %arg7[%c0_85, %c9] : memref<40x128xf32, #tpu.memory_space<vmem>>, vector<40x1xf32>
    %163 = vector.broadcast %162 : vector<40x1xf32> to vector<40x256xf32>
    %164 = arith.addf %161, %163 : vector<40x256xf32>
    %cst_86 = arith.constant 0.000000e+00 : f32
    %165 = vector.broadcast %cst_86 : f32 to vector<40x256xf32>
    %166 = arith.maximumf %164, %165 : vector<40x256xf32>
    %c512 = arith.constant 512 : index
    %c0_87 = arith.constant 0 : index
    %167 = vector.load %arg6[%c512, %c0_87] : memref<912x128xbf16, #tpu.memory_space<vmem>>, vector<40x40xbf16>
    %168 = arith.truncf %166 : vector<40x256xf32> to vector<40x256xbf16>
    %cst_88 = arith.constant dense<0.000000e+00> : vector<40x256xf32>
    %169 = tpu.matmul %167, %168, %cst_88 {dimension_numbers = #tpu.dot_dimension_numbers<[1], [0], [0], [1], [0, 0, 1, 1], [], []>} : vector<40x40xbf16>, vector<40x256xbf16>, vector<40x256xf32> -> vector<40x256xf32>
    %c0_89 = arith.constant 0 : index
    %c10 = arith.constant 10 : index
    %170 = vector.load %arg7[%c0_89, %c10] : memref<40x128xf32, #tpu.memory_space<vmem>>, vector<40x1xf32>
    %171 = vector.broadcast %170 : vector<40x1xf32> to vector<40x256xf32>
    %172 = arith.addf %169, %171 : vector<40x256xf32>
    %cst_90 = arith.constant 0.000000e+00 : f32
    %173 = vector.broadcast %cst_90 : f32 to vector<40x256xf32>
    %174 = arith.maximumf %172, %173 : vector<40x256xf32>
    %c560 = arith.constant 560 : index
    %c0_91 = arith.constant 0 : index
    %175 = vector.load %arg6[%c560, %c0_91] : memref<912x128xbf16, #tpu.memory_space<vmem>>, vector<5x40xbf16>
    %176 = arith.truncf %174 : vector<40x256xf32> to vector<40x256xbf16>
    %cst_92 = arith.constant dense<0.000000e+00> : vector<5x256xf32>
    %177 = tpu.matmul %175, %176, %cst_92 {dimension_numbers = #tpu.dot_dimension_numbers<[1], [0], [0], [1], [0, 0, 1, 1], [], []>} : vector<5x40xbf16>, vector<40x256xbf16>, vector<5x256xf32> -> vector<5x256xf32>
    %c0_93 = arith.constant 0 : index
    %c11 = arith.constant 11 : index
    %178 = vector.load %arg7[%c0_93, %c11] : memref<40x128xf32, #tpu.memory_space<vmem>>, vector<5x1xf32>
    %179 = vector.broadcast %178 : vector<5x1xf32> to vector<5x256xf32>
    %180 = arith.addf %177, %179 : vector<5x256xf32>
    %cst_94 = arith.constant 5.000000e-01 : f32
    %181 = vector.broadcast %cst_94 : f32 to vector<5x256xf32>
    %182 = arith.mulf %181, %112 : vector<5x256xf32>
    %cst_95 = arith.constant 5.000000e-01 : f32
    %183 = vector.broadcast %cst_95 : f32 to vector<5x256xf32>
    %184 = arith.mulf %183, %180 : vector<5x256xf32>
    %185 = arith.addf %182, %184 : vector<5x256xf32>
    %cst_96 = arith.constant 5.000000e-01 : f32
    %186 = vector.broadcast %cst_96 : f32 to vector<4x512xf32>
    %187 = arith.mulf %186, %117 : vector<4x512xf32>
    %cst_97 = arith.constant 5.000000e-01 : f32
    %188 = vector.broadcast %cst_97 : f32 to vector<4x512xf32>
    %189 = arith.mulf %188, %151 : vector<4x512xf32>
    %190 = arith.addf %187, %189 : vector<4x512xf32>
    %cst_98 = arith.constant 0.000000e+00 : f32
    %191 = vector.broadcast %cst_98 : f32 to vector<4x512xf32>
    %192 = tpu.concatenate %190, %191 in 0 : vector<4x512xf32>, vector<4x512xf32> -> vector<8x512xf32>
    %193 = arith.truncf %185 : vector<5x256xf32> to vector<5x256xbf16>
    %cst_99 = arith.constant dense<0.000000e+00> : vector<5x512xf32>
    %194 = tpu.matmul %193, %16, %cst_99 {dimension_numbers = #tpu.dot_dimension_numbers<[1], [0], [0], [1], [0, 0, 1, 1], [], []>} : vector<5x256xbf16>, vector<256x512xbf16>, vector<5x512xf32> -> vector<5x512xf32>
    %cst_100 = arith.constant dense<0.000000e+00> : vector<5x512xf32>
    %195 = tpu.matmul %193, %10, %cst_100 {dimension_numbers = #tpu.dot_dimension_numbers<[1], [0], [0], [1], [0, 0, 1, 1], [], []>} : vector<5x256xbf16>, vector<256x512xbf16>, vector<5x512xf32> -> vector<5x512xf32>
    %cst_101 = arith.constant 0.000000e+00 : f32
    %196 = vector.broadcast %cst_101 : f32 to vector<3x512xf32>
    %197 = tpu.concatenate %194, %196 in 0 : vector<5x512xf32>, vector<3x512xf32> -> vector<8x512xf32>
    %cst_102 = arith.constant 0.000000e+00 : f32
    %198 = vector.broadcast %cst_102 : f32 to vector<3x512xf32>
    %199 = tpu.concatenate %195, %198 in 0 : vector<5x512xf32>, vector<3x512xf32> -> vector<8x512xf32>
    %cst_103 = arith.constant 0.000000e+00 : f32
    %200 = vector.broadcast %cst_103 : f32 to vector<4x512xf32>
    %201 = tpu.concatenate %190, %200 in 0 : vector<4x512xf32>, vector<4x512xf32> -> vector<8x512xf32>
    %202 = tpu.concatenate %197, %199, %201 in 0 : vector<8x512xf32>, vector<8x512xf32>, vector<8x512xf32> -> vector<24x512xf32>
    %c576 = arith.constant 576 : index
    %c0_104 = arith.constant 0 : index
    %203 = vector.load %arg6[%c576, %c0_104] : memref<912x128xbf16, #tpu.memory_space<vmem>>, vector<40x24xbf16>
    %204 = arith.truncf %202 : vector<24x512xf32> to vector<24x512xbf16>
    %cst_105 = arith.constant dense<0.000000e+00> : vector<40x512xf32>
    %205 = tpu.matmul %203, %204, %cst_105 {dimension_numbers = #tpu.dot_dimension_numbers<[1], [0], [0], [1], [0, 0, 1, 1], [], []>} : vector<40x24xbf16>, vector<24x512xbf16>, vector<40x512xf32> -> vector<40x512xf32>
    %c0_106 = arith.constant 0 : index
    %c12 = arith.constant 12 : index
    %206 = vector.load %arg7[%c0_106, %c12] : memref<40x128xf32, #tpu.memory_space<vmem>>, vector<40x1xf32>
    %207 = vector.broadcast %206 : vector<40x1xf32> to vector<40x512xf32>
    %208 = arith.addf %205, %207 : vector<40x512xf32>
    %cst_107 = arith.constant 0.000000e+00 : f32
    %209 = vector.broadcast %cst_107 : f32 to vector<40x512xf32>
    %210 = arith.maximumf %208, %209 : vector<40x512xf32>
    %c624 = arith.constant 624 : index
    %c0_108 = arith.constant 0 : index
    %211 = vector.load %arg6[%c624, %c0_108] : memref<912x128xbf16, #tpu.memory_space<vmem>>, vector<40x40xbf16>
    %212 = arith.truncf %210 : vector<40x512xf32> to vector<40x512xbf16>
    %cst_109 = arith.constant dense<0.000000e+00> : vector<40x512xf32>
    %213 = tpu.matmul %211, %212, %cst_109 {dimension_numbers = #tpu.dot_dimension_numbers<[1], [0], [0], [1], [0, 0, 1, 1], [], []>} : vector<40x40xbf16>, vector<40x512xbf16>, vector<40x512xf32> -> vector<40x512xf32>
    %c0_110 = arith.constant 0 : index
    %c13 = arith.constant 13 : index
    %214 = vector.load %arg7[%c0_110, %c13] : memref<40x128xf32, #tpu.memory_space<vmem>>, vector<40x1xf32>
    %215 = vector.broadcast %214 : vector<40x1xf32> to vector<40x512xf32>
    %216 = arith.addf %213, %215 : vector<40x512xf32>
    %cst_111 = arith.constant 0.000000e+00 : f32
    %217 = vector.broadcast %cst_111 : f32 to vector<40x512xf32>
    %218 = arith.maximumf %216, %217 : vector<40x512xf32>
    %c672 = arith.constant 672 : index
    %c0_112 = arith.constant 0 : index
    %219 = vector.load %arg6[%c672, %c0_112] : memref<912x128xbf16, #tpu.memory_space<vmem>>, vector<4x40xbf16>
    %220 = arith.truncf %218 : vector<40x512xf32> to vector<40x512xbf16>
    %cst_113 = arith.constant dense<0.000000e+00> : vector<4x512xf32>
    %221 = tpu.matmul %219, %220, %cst_113 {dimension_numbers = #tpu.dot_dimension_numbers<[1], [0], [0], [1], [0, 0, 1, 1], [], []>} : vector<4x40xbf16>, vector<40x512xbf16>, vector<4x512xf32> -> vector<4x512xf32>
    %c0_114 = arith.constant 0 : index
    %c14 = arith.constant 14 : index
    %222 = vector.load %arg7[%c0_114, %c14] : memref<40x128xf32, #tpu.memory_space<vmem>>, vector<4x1xf32>
    %223 = vector.broadcast %222 : vector<4x1xf32> to vector<4x512xf32>
    %224 = arith.addf %221, %223 : vector<4x512xf32>
    %cst_115 = arith.constant 5.000000e-01 : f32
    %225 = vector.broadcast %cst_115 : f32 to vector<4x512xf32>
    %226 = arith.mulf %225, %190 : vector<4x512xf32>
    %cst_116 = arith.constant 5.000000e-01 : f32
    %227 = vector.broadcast %cst_116 : f32 to vector<4x512xf32>
    %228 = arith.mulf %227, %224 : vector<4x512xf32>
    %229 = arith.addf %226, %228 : vector<4x512xf32>
    %cst_117 = arith.constant 0.000000e+00 : f32
    %230 = vector.broadcast %cst_117 : f32 to vector<4x512xf32>
    %231 = tpu.concatenate %229, %230 in 0 : vector<4x512xf32>, vector<4x512xf32> -> vector<8x512xf32>
    %232 = tpu.concatenate %46, %119, %192, %231 in 0 : vector<8x512xf32>, vector<8x512xf32>, vector<8x512xf32>, vector<8x512xf32> -> vector<32x512xf32>
    %c800 = arith.constant 800 : index
    %c0_118 = arith.constant 0 : index
    %233 = vector.load %arg6[%c800, %c0_118] : memref<912x128xbf16, #tpu.memory_space<vmem>>, vector<40x32xbf16>
    %234 = arith.truncf %232 : vector<32x512xf32> to vector<32x512xbf16>
    %cst_119 = arith.constant dense<0.000000e+00> : vector<40x512xf32>
    %235 = tpu.matmul %233, %234, %cst_119 {dimension_numbers = #tpu.dot_dimension_numbers<[1], [0], [0], [1], [0, 0, 1, 1], [], []>} : vector<40x32xbf16>, vector<32x512xbf16>, vector<40x512xf32> -> vector<40x512xf32>
    %c0_120 = arith.constant 0 : index
    %c18 = arith.constant 18 : index
    %236 = vector.load %arg7[%c0_120, %c18] : memref<40x128xf32, #tpu.memory_space<vmem>>, vector<40x1xf32>
    %237 = vector.broadcast %236 : vector<40x1xf32> to vector<40x512xf32>
    %238 = arith.addf %235, %237 : vector<40x512xf32>
    %cst_121 = arith.constant 0.000000e+00 : f32
    %239 = vector.broadcast %cst_121 : f32 to vector<40x512xf32>
    %240 = arith.maximumf %238, %239 : vector<40x512xf32>
    %c848 = arith.constant 848 : index
    %c0_122 = arith.constant 0 : index
    %241 = vector.load %arg6[%c848, %c0_122] : memref<912x128xbf16, #tpu.memory_space<vmem>>, vector<40x40xbf16>
    %242 = arith.truncf %240 : vector<40x512xf32> to vector<40x512xbf16>
    %cst_123 = arith.constant dense<0.000000e+00> : vector<40x512xf32>
    %243 = tpu.matmul %241, %242, %cst_123 {dimension_numbers = #tpu.dot_dimension_numbers<[1], [0], [0], [1], [0, 0, 1, 1], [], []>} : vector<40x40xbf16>, vector<40x512xbf16>, vector<40x512xf32> -> vector<40x512xf32>
    %c0_124 = arith.constant 0 : index
    %c19 = arith.constant 19 : index
    %244 = vector.load %arg7[%c0_124, %c19] : memref<40x128xf32, #tpu.memory_space<vmem>>, vector<40x1xf32>
    %245 = vector.broadcast %244 : vector<40x1xf32> to vector<40x512xf32>
    %246 = arith.addf %243, %245 : vector<40x512xf32>
    %cst_125 = arith.constant 0.000000e+00 : f32
    %247 = vector.broadcast %cst_125 : f32 to vector<40x512xf32>
    %248 = arith.maximumf %246, %247 : vector<40x512xf32>
    %c896 = arith.constant 896 : index
    %c0_126 = arith.constant 0 : index
    %249 = vector.load %arg6[%c896, %c0_126] : memref<912x128xbf16, #tpu.memory_space<vmem>>, vector<1x40xbf16>
    %250 = arith.truncf %248 : vector<40x512xf32> to vector<40x512xbf16>
    %cst_127 = arith.constant dense<0.000000e+00> : vector<1x512xf32>
    %251 = tpu.matmul %249, %250, %cst_127 {dimension_numbers = #tpu.dot_dimension_numbers<[1], [0], [0], [1], [0, 0, 1, 1], [], []>} : vector<1x40xbf16>, vector<40x512xbf16>, vector<1x512xf32> -> vector<1x512xf32>
    %c0_128 = arith.constant 0 : index
    %c20 = arith.constant 20 : index
    %252 = vector.load %arg7[%c0_128, %c20] : memref<40x128xf32, #tpu.memory_space<vmem>>, vector<1x1xf32>
    %253 = vector.broadcast %252 : vector<1x1xf32> to vector<1x512xf32>
    %254 = arith.addf %251, %253 : vector<1x512xf32>
    %255 = arith.negf %254 : vector<1x512xf32>
    %256 = math.exp %255 : vector<1x512xf32>
    %cst_129 = arith.constant 1.000000e+00 : f32
    %257 = vector.broadcast %cst_129 : f32 to vector<1x512xf32>
    %258 = arith.addf %257, %256 : vector<1x512xf32>
    %259 = arith.divf %257, %258 : vector<1x512xf32>
    %c0_130 = arith.constant 0 : index
    %c0_131 = arith.constant 0 : index
    %260 = vector.load %arg8[%c0_130, %c0_131] : memref<1x512xf32, #tpu.memory_space<vmem>>, vector<1x512xf32>
    tpu.vector_store %arg8[%c0_130, %c0_131], %259 {strides = array<i32>} : memref<1x512xf32, #tpu.memory_space<vmem>>, vector<1x512xf32>,
    return
  }
  func.func @transform_0(%arg0: i32) -> (i32, i32) {
    %c0_i32 = arith.constant 0 : i32
    %c0_i32_0 = arith.constant 0 : i32
    return %c0_i32, %arg0 : i32, i32
  }
  func.func @transform_1(%arg0: i32) -> (i32, i32) {
    %c0_i32 = arith.constant 0 : i32
    %c0_i32_0 = arith.constant 0 : i32
    return %c0_i32, %arg0 : i32, i32
  }
  func.func @transform_2(%arg0: i32) -> (i32, i32) {
    %c0_i32 = arith.constant 0 : i32
    %c0_i32_0 = arith.constant 0 : i32
    return %c0_i32, %arg0 : i32, i32
  }
  func.func @transform_3(%arg0: i32) -> (i32, i32) {
    %c0_i32 = arith.constant 0 : i32
    %c0_i32_0 = arith.constant 0 : i32
    return %c0_i32, %arg0 : i32, i32
  }
  func.func @transform_4(%arg0: i32) -> (i32, i32) {
    %c0_i32 = arith.constant 0 : i32
    %c0_i32_0 = arith.constant 0 : i32
    return %arg0, %c0_i32 : i32, i32
  }
  func.func @transform_5(%arg0: i32) -> (i32, i32) {
    %c0_i32 = arith.constant 0 : i32
    %c0_i32_0 = arith.constant 0 : i32
    %c0_i32_1 = arith.constant 0 : i32
    return %c0_i32, %c0_i32_0 : i32, i32
  }
  func.func @transform_6(%arg0: i32) -> (i32, i32) {
    %c0_i32 = arith.constant 0 : i32
    %c0_i32_0 = arith.constant 0 : i32
    %c0_i32_1 = arith.constant 0 : i32
    return %c0_i32, %c0_i32_0 : i32, i32
  }
  func.func @transform_7(%arg0: i32) -> (i32, i32) {
    %c0_i32 = arith.constant 0 : i32
    %c0_i32_0 = arith.constant 0 : i32
    return %c0_i32, %arg0 : i32, i32
  }
}

</mosaic_0001>

<bundles_post_ra>
// kernel: squeeze.4
= control target key start
LH: loop header
LB: loop body
LE: loop exit
PB: predicated region body
PF: predicated region fallthrough
CT: control target
= control target key end

     0   :  { %vm3_vm0 = vcmask 523264   ;;  %vm10_vm1 = vcmask 1048064   ;;  %s111_s0 = inlined_call_operand.vmem [shape: s32[16,64], index: 0, kind: input, shape index: {}]   ;;  %s112_s1 = inlined_call_operand.vmem [shape: s32[1,1024], index: 1, kind: output, shape index: {}]  }
   0x1   :  { %v61_v0 = vld [vmem:[%s111_s0 + $0x1] ss:$2 sm:$0xff]   ;;  %v2_v1 = vld [vmem:[%s111_s0] ss:$2 sm:$0xff]   ;;  %s70_s0 = smov 64  }
   0x2   :  { %8 = vrot.lane.b32.xlu0 %v61_v0, %s70_s0  ;;  %4 = vst.msk [vmem:[#allocation0] ss:$8 sm:$0xf] %vm3_vm0, %v2_v1  }
   0x3   :  { %5 = vst.msk [vmem:[#allocation0] ss:$8 sm:$0xf0] %vm3_vm0, %v2_v1  }
  0x74   :  { %v9_v2 = vpop.permute.xlu0 %8  }
  0x75   :  { %11 = vst.msk [vmem:[#allocation0] ss:$8 sm:$0xf] %vm10_vm1, %v9_v2  }
  0x76   :  { %12 = vst.msk [vmem:[#allocation0] ss:$8 sm:$0xf0] %vm10_vm1, %v9_v2  }
  0x7c   :  { %v15_v3 = vld [vmem:[#allocation0] sm:$0x1]  ;;  %v20_v4 = vld [vmem:[#allocation0 + $0x8] sm:$0x1]  ;;  %v26_v5 = vld [vmem:[#allocation0 + $0x10] sm:$0x1] }
  0x7d   :  { %18 = vst [vmem:[%s112_s1] sm:$0x1] %v15_v3  ;;  %v32_v6 = vld [vmem:[#allocation0 + $0x18] sm:$0x1]  ;;  %v38_v7 = vld [vmem:[#allocation0 + $0x20] sm:$0x1] }
  0x7e   :  { %62 = vst [vmem:[%s112_s1 + $0x1] sm:$0x1] %v20_v4  ;;  %v44_v8 = vld [vmem:[#allocation0 + $0x28] sm:$0x1]  ;;  %v50_v9 = vld [vmem:[#allocation0 + $0x30] sm:$0x1] }
  0x7f   :  { %63 = vst [vmem:[%s112_s1 + $0x2] sm:$0x1] %v26_v5  ;;  %v56_v10 = vld [vmem:[#allocation0 + $0x38] sm:$0x1] }
  0x80   :  { %64 = vst [vmem:[%s112_s1 + $0x3] sm:$0x1] %v32_v6 }
  0x81   :  { %65 = vst [vmem:[%s112_s1 + $0x4] sm:$0x1] %v38_v7 }
  0x82   :  { %66 = vst [vmem:[%s112_s1 + $0x5] sm:$0x1] %v44_v8 }
  0x83   :  { %67 = vst [vmem:[%s112_s1 + $0x6] sm:$0x1] %v50_v9 }
  0x84   :  { %68 = vst [vmem:[%s112_s1 + $0x7] sm:$0x1] %v56_v10 }

// kernel: squeeze.0
= control target key start
LH: loop header
LB: loop body
LE: loop exit
PB: predicated region body
PF: predicated region fallthrough
CT: control target
= control target key end

     0   :  { %s3771_s8 = smov 126   ;;  %s3772_s9 = smov 127   ;;  %vm3_vm0 = vcmask 7168   ;;  %s8218_s0 = inlined_call_operand.vmem [shape: s32[16,64], index: 0, kind: input, shape index: {}]   ;;  %s8219_s1 = inlined_call_operand.vmem [shape: s32[1024,1], index: 1, kind: output, shape index: {}]  }
   0x1   :  { %v3847_v0 = vld [vmem:[%s8218_s0] sm:$0xff]   ;;  %s3773_s10 = smov 125   ;;  %v3855_v1 = vld [vmem:[%s8218_s0 + $0x8] sm:$0xff]   ;;  %s3774_s13 = smov 124  }
   0x2   :  { %80 = vrot.lane.b32.xlu1 %v3847_v0, %s3771_s8  ;;  %39 = vrot.lane.b32.xlu0 %v3847_v0, %s3772_s9  ;;  %s3775_s14 = smov 123   ;;  %s3776_s15 = smov 122   ;;  %v5011_v38 = vld [vmem:[%s8218_s0] sm:$0xff]   ;;  %v5120_v42 = vld [vmem:[%s8218_s0 + $0x8] sm:$0xff]  }
   0x3   :  { %121 = vrot.lane.b32.xlu2 %v3847_v0, %s3773_s10  ;;  %s3777_s16 = smov 121   ;;  %s3778_s17 = smov 120  }
   0x4   :  { %s3779_s18 = smov 119   ;;  %s3780_s19 = smov 118  }
   0x5   :  { %s3781_s20 = smov 117   ;;  %s3782_s21 = smov 116  }
   0x6   :  { %s3783_s22 = smov 115   ;;  %s3784_s23 = smov 114  }
   0x7   :  { %s3785_s24 = smov 113   ;;  %s3786_s25 = smov 112  }
   0x8   :  { %s3787_s26 = smov 111   ;;  %s3788_s27 = smov 110  }
   0x9   :  { %s3789_s7 = smov 109   ;;  %s3790_s12 = smov 108  }
   0xa   :  { %101 = vrot.lane.b32.xlu1 %v3855_v1, %s3771_s8  ;;  %60 = vrot.lane.b32.xlu0 %v3855_v1, %s3772_s9  ;;  %s3792_s5 = smov 106   ;;  %s3793_s6 = smov 105  }
   0xb   :  { %142 = vrot.lane.b32.xlu2 %v3855_v1, %s3773_s10  ;;  %s3796_s10 = smov 102   ;;  %s3800_s2 = smov 98  }
   0xc   :  { %s3803_s8 = smov 95   ;;  %s3807_s11 = smov 91  }
   0xd   :  { %s3809_s3 = smov 90   ;;  %s3813_s9 = smov 85  }
   0xe   :  { %s3825_s29 = smov 73  }
  0x12   :  { %183 = vrot.lane.b32.xlu1 %v3855_v1, %s3774_s13  ;;  %162 = vrot.lane.b32.xlu0 %v3847_v0, %s3774_s13  ;;  %s3798_s13 = smov 100  }
  0x13   :  { %203 = vrot.lane.b32.xlu2 %v3847_v0, %s3775_s14 }
  0x1a   :  { %244 = vrot.lane.b32.xlu1 %v3847_v0, %s3776_s15  ;;  %224 = vrot.lane.b32.xlu0 %v3855_v1, %s3775_s14  ;;  %s3816_s14 = smov 82  }
  0x1b   :  { %265 = vrot.lane.b32.xlu2 %v3855_v1, %s3776_s15 }
  0x22   :  { %306 = vrot.lane.b32.xlu1 %v3855_v1, %s3777_s16  ;;  %285 = vrot.lane.b32.xlu0 %v3847_v0, %s3777_s16  ;;  %s3799_s16 = smov 99  }
  0x23   :  { %326 = vrot.lane.b32.xlu2 %v3847_v0, %s3778_s17 }
  0x2a   :  { %367 = vrot.lane.b32.xlu1 %v3847_v0, %s3779_s18  ;;  %347 = vrot.lane.b32.xlu0 %v3855_v1, %s3778_s17 }
  0x2b   :  { %388 = vrot.lane.b32.xlu2 %v3855_v1, %s3779_s18  ;;  %s3818_s18 = smov 81  }
  0x32   :  { %429 = vrot.lane.b32.xlu1 %v3855_v1, %s3780_s19  ;;  %408 = vrot.lane.b32.xlu0 %v3847_v0, %s3780_s19  ;;  %s3794_s19 = smov 104  }
  0x33   :  { %449 = vrot.lane.b32.xlu2 %v3847_v0, %s3781_s20 }
  0x3a   :  { %490 = vrot.lane.b32.xlu1 %v3847_v0, %s3782_s21  ;;  %470 = vrot.lane.b32.xlu0 %v3855_v1, %s3781_s20  ;;  %s3806_s20 = smov 93  }
  0x3b   :  { %511 = vrot.lane.b32.xlu2 %v3855_v1, %s3782_s21 }
  0x42   :  { %552 = vrot.lane.b32.xlu1 %v3855_v1, %s3783_s22  ;;  %531 = vrot.lane.b32.xlu0 %v3847_v0, %s3783_s22  ;;  %s3802_s22 = smov 96  }
  0x43   :  { %572 = vrot.lane.b32.xlu2 %v3847_v0, %s3784_s23 }
  0x4a   :  { %613 = vrot.lane.b32.xlu1 %v3847_v0, %s3785_s24  ;;  %593 = vrot.lane.b32.xlu0 %v3855_v1, %s3784_s23  ;;  %s3820_s23 = smov 77  }
  0x4b   :  { %634 = vrot.lane.b32.xlu2 %v3855_v1, %s3785_s24  ;;  %s3821_s24 = smov 78  }
  0x52   :  { %675 = vrot.lane.b32.xlu1 %v3855_v1, %s3786_s25  ;;  %654 = vrot.lane.b32.xlu0 %v3847_v0, %s3786_s25  ;;  %s3791_s25 = smov 107  }
  0x53   :  { %695 = vrot.lane.b32.xlu2 %v3847_v0, %s3787_s26 }
  0x5a   :  { %736 = vrot.lane.b32.xlu1 %v3847_v0, %s3788_s27  ;;  %716 = vrot.lane.b32.xlu0 %v3855_v1, %s3787_s26  ;;  %s3814_s26 = smov 83  }
  0x5b   :  { %757 = vrot.lane.b32.xlu2 %v3855_v1, %s3788_s27 }
  0x5d   :  { %v122_v2 = vpop.permute.xlu2 %121  }
  0x5e   :  { %2671 = vst.msk [vmem:[%s8219_s1 + $0x3] sm:$0x1] %vm3_vm0, %v122_v2  }
  0x5f   :  { %2672 = vst.msk [vmem:[%s8219_s1 + $0x42] sm:$0x2] %vm3_vm0, %v122_v2  }
  0x60   :  { %2673 = vst.msk [vmem:[%s8219_s1 + $0x81] sm:$0x4] %vm3_vm0, %v122_v2  }
  0x61   :  { %2674 = vst.msk [vmem:[%s8219_s1 + $0xc0] sm:$0x8] %vm3_vm0, %v122_v2  }
  0x62   :  { %798 = vrot.lane.b32.xlu1 %v3855_v1, %s3789_s7  ;;  %777 = vrot.lane.b32.xlu0 %v3847_v0, %s3789_s7  ;;  %2675 = vst.msk [vmem:[%s8219_s1 + $0xff] sm:$0x10] %vm3_vm0, %v122_v2   ;;  %s3795_s7 = smov 103  }
  0x63   :  { %2676 = vst.msk [vmem:[%s8219_s1 + $0x13e] sm:$0x20] %vm3_vm0, %v122_v2   ;;  %818 = vrot.lane.b32.xlu2 %v3847_v0, %s3790_s12 }
  0x64   :  { %2677 = vst.msk [vmem:[%s8219_s1 + $0x17d] sm:$0x40] %vm3_vm0, %v122_v2  }
  0x65   :  { %2678 = vst.msk [vmem:[%s8219_s1 + $0x1bc] sm:$0x80] %vm3_vm0, %v122_v2   ;;  %v143_v3 = vpop.permute.xlu2 %142  }
  0x66   :  { %2680 = vst.msk [vmem:[%s8219_s1 + $0x203] sm:$0x1] %vm3_vm0, %v143_v3  }
  0x67   :  { %2681 = vst.msk [vmem:[%s8219_s1 + $0x242] sm:$0x2] %vm3_vm0, %v143_v3  }
  0x68   :  { %2682 = vst.msk [vmem:[%s8219_s1 + $0x281] sm:$0x4] %vm3_vm0, %v143_v3  }
  0x69   :  { %2683 = vst.msk [vmem:[%s8219_s1 + $0x2c0] sm:$0x8] %vm3_vm0, %v143_v3  }
  0x6a   :  { %859 = vrot.lane.b32.xlu1 %v3847_v0, %s3791_s25  ;;  %839 = vrot.lane.b32.xlu0 %v3855_v1, %s3790_s12  ;;  %2684 = vst.msk [vmem:[%s8219_s1 + $0x2ff] sm:$0x10] %vm3_vm0, %v143_v3   ;;  %s3815_s12 = smov 84  }
  0x6b   :  { %2685 = vst.msk [vmem:[%s8219_s1 + $0x33e] sm:$0x20] %vm3_vm0, %v143_v3   ;;  %880 = vrot.lane.b32.xlu2 %v3855_v1, %s3791_s25  ;;  %s3797_s25 = smov 101  }
  0x6c   :  { %2686 = vst.msk [vmem:[%s8219_s1 + $0x37d] sm:$0x40] %vm3_vm0, %v143_v3  }
  0x6d   :  { %2687 = vst.msk [vmem:[%s8219_s1 + $0x3bc] sm:$0x80] %vm3_vm0, %v143_v3   ;;  %v3967_v6 = vpop.permute.xlu2 %203  }
  0x6e   :  { %2705 = vst.msk [vmem:[%s8219_s1 + $0x5] sm:$0x1] %vm3_vm0, %v3967_v6  }
  0x6f   :  { %2706 = vst.msk [vmem:[%s8219_s1 + $0x44] sm:$0x2] %vm3_vm0, %v3967_v6  }
  0x70   :  { %2707 = vst.msk [vmem:[%s8219_s1 + $0x83] sm:$0x4] %vm3_vm0, %v3967_v6  }
  0x71   :  { %2708 = vst.msk [vmem:[%s8219_s1 + $0xc2] sm:$0x8] %vm3_vm0, %v3967_v6  }
  0x72   :  { %921 = vrot.lane.b32.xlu1 %v3855_v1, %s3792_s5  ;;  %900 = vrot.lane.b32.xlu0 %v3847_v0, %s3792_s5  ;;  %2709 = vst.msk [vmem:[%s8219_s1 + $0x101] sm:$0x10] %vm3_vm0, %v3967_v6   ;;  %s3830_s5 = smov 69  }
  0x73   :  { %941 = vrot.lane.b32.xlu2 %v3847_v0, %s3793_s6  ;;  %2710 = vst.msk [vmem:[%s8219_s1 + $0x140] sm:$0x20] %vm3_vm0, %v3967_v6  }
  0x74   :  { %v81_v4 = vpop.permute.xlu1 %80   ;;  %v40_v5 = vpop.permute.xlu0 %39   ;;  %2711 = vst.msk [vmem:[%s8219_s1 + $0x17f] sm:$0x40] %vm3_vm0, %v3967_v6  }
  0x75   :  { %2654 = vst.msk [vmem:[%s8219_s1 + $0x2] sm:$0x1] %vm3_vm0, %v81_v4   ;;  %v4072_v11 = vpop.permute.xlu2 %265  }
  0x76   :  { %2655 = vst.msk [vmem:[%s8219_s1 + $0x41] sm:$0x2] %vm3_vm0, %v81_v4  }
  0x77   :  { %2656 = vst.msk [vmem:[%s8219_s1 + $0x80] sm:$0x4] %vm3_vm0, %v81_v4  }
  0x78   :  { %2657 = vst.msk [vmem:[%s8219_s1 + $0xbf] sm:$0x8] %vm3_vm0, %v81_v4  }
  0x79   :  { %2658 = vst.msk [vmem:[%s8219_s1 + $0xfe] sm:$0x10] %vm3_vm0, %v81_v4  }
  0x7a   :  { %2659 = vst.msk [vmem:[%s8219_s1 + $0x13d] sm:$0x20] %vm3_vm0, %v81_v4   ;;  %982 = vrot.lane.b32.xlu1 %v3847_v0, %s3794_s19  ;;  %962 = vrot.lane.b32.xlu0 %v3855_v1, %s3793_s6  ;;  %s3817_s6 = smov 80  }
  0x7b   :  { %2660 = vst.msk [vmem:[%s8219_s1 + $0x17c] sm:$0x40] %vm3_vm0, %v81_v4   ;;  %1003 = vrot.lane.b32.xlu2 %v3855_v1, %s3794_s19  ;;  %s3801_s19 = smov 97  }
  0x7c   :  { %2661 = vst.msk [vmem:[%s8219_s1 + $0x1bb] sm:$0x80] %vm3_vm0, %v81_v4   ;;  %v102_v7 = vpop.permute.xlu1 %101   ;;  %v61_v8 = vpop.permute.xlu0 %60  }
  0x7d   :  { %2637 = vst.msk [vmem:[%s8219_s1 + $0x1] sm:$0x1] %vm3_vm0, %v40_v5   ;;  %v327_v14 = vpop.permute.xlu2 %326  }
  0x7e   :  { %2638 = vst.msk [vmem:[%s8219_s1 + $0x40] sm:$0x2] %vm3_vm0, %v40_v5  }
  0x7f   :  { %2639 = vst.msk [vmem:[%s8219_s1 + $0x7f] sm:$0x4] %vm3_vm0, %v40_v5  }
  0x80   :  { %2640 = vst.msk [vmem:[%s8219_s1 + $0xbe] sm:$0x8] %vm3_vm0, %v40_v5  }
  0x81   :  { %2641 = vst.msk [vmem:[%s8219_s1 + $0xfd] sm:$0x10] %vm3_vm0, %v40_v5  }
  0x82   :  { %2642 = vst.msk [vmem:[%s8219_s1 + $0x13c] sm:$0x20] %vm3_vm0, %v40_v5   ;;  %1044 = vrot.lane.b32.xlu1 %v3855_v1, %s3795_s7  ;;  %1023 = vrot.lane.b32.xlu0 %v3847_v0, %s3795_s7  ;;  %s3812_s7 = smov 87  }
  0x83   :  { %2643 = vst.msk [vmem:[%s8219_s1 + $0x17b] sm:$0x40] %vm3_vm0, %v40_v5   ;;  %1064 = vrot.lane.b32.xlu2 %v3847_v0, %s3796_s10 }
  0x84   :  { %2644 = vst.msk [vmem:[%s8219_s1 + $0x1ba] sm:$0x80] %vm3_vm0, %v40_v5   ;;  %v184_v9 = vpop.permute.xlu1 %183   ;;  %v4035_v10 = vpop.permute.xlu0 %162  }
  0x85   :  { %2663 = vst.msk [vmem:[%s8219_s1 + $0x202] sm:$0x1] %vm3_vm0, %v102_v7   ;;  %v389_v17 = vpop.permute.xlu2 %388  }
  0x86   :  { %2664 = vst.msk [vmem:[%s8219_s1 + $0x241] sm:$0x2] %vm3_vm0, %v102_v7  }
  0x87   :  { %2665 = vst.msk [vmem:[%s8219_s1 + $0x280] sm:$0x4] %vm3_vm0, %v102_v7  }
  0x88   :  { %2666 = vst.msk [vmem:[%s8219_s1 + $0x2bf] sm:$0x8] %vm3_vm0, %v102_v7  }
  0x89   :  { %2667 = vst.msk [vmem:[%s8219_s1 + $0x2fe] sm:$0x10] %vm3_vm0, %v102_v7  }
  0x8a   :  { %2668 = vst.msk [vmem:[%s8219_s1 + $0x33d] sm:$0x20] %vm3_vm0, %v102_v7   ;;  %1105 = vrot.lane.b32.xlu1 %v3847_v0, %s3797_s25  ;;  %1085 = vrot.lane.b32.xlu0 %v3855_v1, %s3796_s10  ;;  %s3824_s10 = smov 75  }
  0x8b   :  { %2669 = vst.msk [vmem:[%s8219_s1 + $0x37c] sm:$0x40] %vm3_vm0, %v102_v7   ;;  %1126 = vrot.lane.b32.xlu2 %v3855_v1, %s3797_s25  ;;  %s3804_s25 = smov 94  }
  0x8c   :  { %2670 = vst.msk [vmem:[%s8219_s1 + $0x3bb] sm:$0x80] %vm3_vm0, %v102_v7   ;;  %v4104_v12 = vpop.permute.xlu1 %244   ;;  %v4148_v13 = vpop.permute.xlu0 %224  }
  0x8d   :  { %2646 = vst.msk [vmem:[%s8219_s1 + $0x201] sm:$0x1] %vm3_vm0, %v61_v8   ;;  %v450_v20 = vpop.permute.xlu2 %449  }
  0x8e   :  { %2647 = vst.msk [vmem:[%s8219_s1 + $0x240] sm:$0x2] %vm3_vm0, %v61_v8  }
  0x8f   :  { %2648 = vst.msk [vmem:[%s8219_s1 + $0x27f] sm:$0x4] %vm3_vm0, %v61_v8  }
  0x90   :  { %2649 = vst.msk [vmem:[%s8219_s1 + $0x2be] sm:$0x8] %vm3_vm0, %v61_v8  }
  0x91   :  { %2650 = vst.msk [vmem:[%s8219_s1 + $0x2fd] sm:$0x10] %vm3_vm0, %v61_v8  }
  0x92   :  { %2651 = vst.msk [vmem:[%s8219_s1 + $0x33c] sm:$0x20] %vm3_vm0, %v61_v8   ;;  %1167 = vrot.lane.b32.xlu1 %v3855_v1, %s3798_s13  ;;  %1146 = vrot.lane.b32.xlu0 %v3847_v0, %s3798_s13 }
  0x93   :  { %2652 = vst.msk [vmem:[%s8219_s1 + $0x37b] sm:$0x40] %vm3_vm0, %v61_v8   ;;  %1187 = vrot.lane.b32.xlu2 %v3847_v0, %s3799_s16 }
  0x94   :  { %2653 = vst.msk [vmem:[%s8219_s1 + $0x3ba] sm:$0x80] %vm3_vm0, %v61_v8   ;;  %v307_v15 = vpop.permute.xlu1 %306   ;;  %v286_v16 = vpop.permute.xlu0 %285  }
  0x95   :  { %2712 = vst.msk [vmem:[%s8219_s1 + $0x1be] sm:$0x80] %vm3_vm0, %v3967_v6   ;;  %v512_v23 = vpop.permute.xlu2 %511  }
  0x96   :  { %2697 = vst.msk [vmem:[%s8219_s1 + $0x204] sm:$0x1] %vm3_vm0, %v184_v9  }
  0x97   :  { %2698 = vst.msk [vmem:[%s8219_s1 + $0x243] sm:$0x2] %vm3_vm0, %v184_v9  }
  0x98   :  { %2699 = vst.msk [vmem:[%s8219_s1 + $0x282] sm:$0x4] %vm3_vm0, %v184_v9  }
  0x99   :  { %2700 = vst.msk [vmem:[%s8219_s1 + $0x2c1] sm:$0x8] %vm3_vm0, %v184_v9  }
  0x9a   :  { %1228 = vrot.lane.b32.xlu1 %v3847_v0, %s3800_s2  ;;  %1208 = vrot.lane.b32.xlu0 %v3855_v1, %s3799_s16  ;;  %2701 = vst.msk [vmem:[%s8219_s1 + $0x300] sm:$0x10] %vm3_vm0, %v184_v9   ;;  %s3822_s16 = smov 76  }
  0x9b   :  { %1249 = vrot.lane.b32.xlu2 %v3855_v1, %s3800_s2  ;;  %2702 = vst.msk [vmem:[%s8219_s1 + $0x33f] sm:$0x20] %vm3_vm0, %v184_v9   ;;  %s3808_s2 = smov 89  }
  0x9c   :  { %2703 = vst.msk [vmem:[%s8219_s1 + $0x37e] sm:$0x40] %vm3_vm0, %v184_v9   ;;  %v368_v18 = vpop.permute.xlu1 %367   ;;  %v348_v19 = vpop.permute.xlu0 %347  }
  0x9d   :  { %2704 = vst.msk [vmem:[%s8219_s1 + $0x3bd] sm:$0x80] %vm3_vm0, %v184_v9   ;;  %v573_v26 = vpop.permute.xlu2 %572  }
  0x9e   :  { %2688 = vst.msk [vmem:[%s8219_s1 + $0x4] sm:$0x1] %vm3_vm0, %v4035_v10  }
  0x9f   :  { %2689 = vst.msk [vmem:[%s8219_s1 + $0x43] sm:$0x2] %vm3_vm0, %v4035_v10  }
  0xa0   :  { %2690 = vst.msk [vmem:[%s8219_s1 + $0x82] sm:$0x4] %vm3_vm0, %v4035_v10  }
  0xa1   :  { %2691 = vst.msk [vmem:[%s8219_s1 + $0xc1] sm:$0x8] %vm3_vm0, %v4035_v10  }
  0xa2   :  { %1290 = vrot.lane.b32.xlu1 %v3855_v1, %s3801_s19  ;;  %1269 = vrot.lane.b32.xlu0 %v3847_v0, %s3801_s19  ;;  %2692 = vst.msk [vmem:[%s8219_s1 + $0x100] sm:$0x10] %vm3_vm0, %v4035_v10   ;;  %s3805_s19 = smov 92  }
  0xa3   :  { %1310 = vrot.lane.b32.xlu2 %v3847_v0, %s3802_s22  ;;  %2693 = vst.msk [vmem:[%s8219_s1 + $0x13f] sm:$0x20] %vm3_vm0, %v4035_v10  }
  0xa4   :  { %2694 = vst.msk [vmem:[%s8219_s1 + $0x17e] sm:$0x40] %vm3_vm0, %v4035_v10   ;;  %v430_v21 = vpop.permute.xlu1 %429   ;;  %v409_v22 = vpop.permute.xlu0 %408  }
  0xa5   :  { %2695 = vst.msk [vmem:[%s8219_s1 + $0x1bd] sm:$0x80] %vm3_vm0, %v4035_v10   ;;  %v635_v29 = vpop.permute.xlu2 %634  }
  0xa6   :  { %2731 = vst.msk [vmem:[%s8219_s1 + $0x206] sm:$0x1] %vm3_vm0, %v4072_v11  }
  0xa7   :  { %2732 = vst.msk [vmem:[%s8219_s1 + $0x245] sm:$0x2] %vm3_vm0, %v4072_v11  }
  0xa8   :  { %2733 = vst.msk [vmem:[%s8219_s1 + $0x284] sm:$0x4] %vm3_vm0, %v4072_v11  }
  0xa9   :  { %2734 = vst.msk [vmem:[%s8219_s1 + $0x2c3] sm:$0x8] %vm3_vm0, %v4072_v11  }
  0xaa   :  { %1351 = vrot.lane.b32.xlu1 %v3847_v0, %s3803_s8  ;;  %1331 = vrot.lane.b32.xlu0 %v3855_v1, %s3802_s22  ;;  %2735 = vst.msk [vmem:[%s8219_s1 + $0x302] sm:$0x10] %vm3_vm0, %v4072_v11   ;;  %s3831_s22 = smov 67  }
  0xab   :  { %1372 = vrot.lane.b32.xlu2 %v3855_v1, %s3803_s8  ;;  %2736 = vst.msk [vmem:[%s8219_s1 + $0x341] sm:$0x20] %vm3_vm0, %v4072_v11  }
  0xac   :  { %2737 = vst.msk [vmem:[%s8219_s1 + $0x380] sm:$0x40] %vm3_vm0, %v4072_v11   ;;  %v491_v24 = vpop.permute.xlu1 %490   ;;  %v471_v25 = vpop.permute.xlu0 %470  }
  0xad   :  { %2738 = vst.msk [vmem:[%s8219_s1 + $0x3bf] sm:$0x80] %vm3_vm0, %v4072_v11   ;;  %v696_v32 = vpop.permute.xlu2 %695  }
  0xae   :  { %2722 = vst.msk [vmem:[%s8219_s1 + $0x6] sm:$0x1] %vm3_vm0, %v4104_v12  }
  0xaf   :  { %2723 = vst.msk [vmem:[%s8219_s1 + $0x45] sm:$0x2] %vm3_vm0, %v4104_v12  }
  0xb0   :  { %2724 = vst.msk [vmem:[%s8219_s1 + $0x84] sm:$0x4] %vm3_vm0, %v4104_v12  }
  0xb1   :  { %2725 = vst.msk [vmem:[%s8219_s1 + $0xc3] sm:$0x8] %vm3_vm0, %v4104_v12  }
  0xb2   :  { %1413 = vrot.lane.b32.xlu1 %v3855_v1, %s3804_s25  ;;  %1392 = vrot.lane.b32.xlu0 %v3847_v0, %s3804_s25  ;;  %2726 = vst.msk [vmem:[%s8219_s1 + $0x102] sm:$0x10] %vm3_vm0, %v4104_v12   ;;  %s3810_s25 = smov 88  }
  0xb3   :  { %2727 = vst.msk [vmem:[%s8219_s1 + $0x141] sm:$0x20] %vm3_vm0, %v4104_v12   ;;  %1433 = vrot.lane.b32.xlu2 %v3847_v0, %s3806_s20 }
  0xb4   :  { %2728 = vst.msk [vmem:[%s8219_s1 + $0x180] sm:$0x40] %vm3_vm0, %v4104_v12   ;;  %v553_v27 = vpop.permute.xlu1 %552   ;;  %v532_v28 = vpop.permute.xlu0 %531  }
  0xb5   :  { %2729 = vst.msk [vmem:[%s8219_s1 + $0x1bf] sm:$0x80] %vm3_vm0, %v4104_v12   ;;  %v758_v35 = vpop.permute.xlu2 %757  }
  0xb6   :  { %2714 = vst.msk [vmem:[%s8219_s1 + $0x205] sm:$0x1] %vm3_vm0, %v4148_v13  }
  0xb7   :  { %2715 = vst.msk [vmem:[%s8219_s1 + $0x244] sm:$0x2] %vm3_vm0, %v4148_v13  }
  0xb8   :  { %2716 = vst.msk [vmem:[%s8219_s1 + $0x283] sm:$0x4] %vm3_vm0, %v4148_v13  }
  0xb9   :  { %2717 = vst.msk [vmem:[%s8219_s1 + $0x2c2] sm:$0x8] %vm3_vm0, %v4148_v13  }
  0xba   :  { %1474 = vrot.lane.b32.xlu1 %v3847_v0, %s3805_s19  ;;  %1454 = vrot.lane.b32.xlu0 %v3855_v1, %s3806_s20  ;;  %2718 = vst.msk [vmem:[%s8219_s1 + $0x301] sm:$0x10] %vm3_vm0, %v4148_v13   ;;  %s3819_s20 = smov 79  }
  0xbb   :  { %2719 = vst.msk [vmem:[%s8219_s1 + $0x340] sm:$0x20] %vm3_vm0, %v4148_v13   ;;  %1495 = vrot.lane.b32.xlu2 %v3855_v1, %s3805_s19  ;;  %s3827_s19 = smov 72  }
  0xbc   :  { %2720 = vst.msk [vmem:[%s8219_s1 + $0x37f] sm:$0x40] %vm3_vm0, %v4148_v13   ;;  %v614_v30 = vpop.permute.xlu1 %613   ;;  %v594_v31 = vpop.permute.xlu0 %593  }
  0xbd   :  { %2721 = vst.msk [vmem:[%s8219_s1 + $0x3be] sm:$0x80] %vm3_vm0, %v4148_v13   ;;  %v819_v39 = vpop.permute.xlu2 %818  }
  0xbe   :  { %2756 = vst.msk [vmem:[%s8219_s1 + $0x8] sm:$0x1] %vm3_vm0, %v327_v14  }
  0xbf   :  { %2757 = vst.msk [vmem:[%s8219_s1 + $0x47] sm:$0x2] %vm3_vm0, %v327_v14  }
  0xc0   :  { %2758 = vst.msk [vmem:[%s8219_s1 + $0x86] sm:$0x4] %vm3_vm0, %v327_v14  }
  0xc1   :  { %2759 = vst.msk [vmem:[%s8219_s1 + $0xc5] sm:$0x8] %vm3_vm0, %v327_v14  }
  0xc2   :  { %2760 = vst.msk [vmem:[%s8219_s1 + $0x104] sm:$0x10] %vm3_vm0, %v327_v14   ;;  %1536 = vrot.lane.b32.xlu1 %v3855_v1, %s3807_s11  ;;  %1515 = vrot.lane.b32.xlu0 %v3847_v0, %s3807_s11  ;;  %s3811_s11 = smov 86  }
  0xc3   :  { %2761 = vst.msk [vmem:[%s8219_s1 + $0x143] sm:$0x20] %vm3_vm0, %v327_v14   ;;  %1556 = vrot.lane.b32.xlu2 %v5011_v38, %s3809_s3 }
  0xc4   :  { %2762 = vst.msk [vmem:[%s8219_s1 + $0x182] sm:$0x40] %vm3_vm0, %v327_v14   ;;  %v676_v33 = vpop.permute.xlu1 %675   ;;  %v655_v34 = vpop.permute.xlu0 %654  }
  0xc5   :  { %2763 = vst.msk [vmem:[%s8219_s1 + $0x1c1] sm:$0x80] %vm3_vm0, %v327_v14   ;;  %v5122_v43 = vpop.permute.xlu2 %880  }
  0xc6   :  { %2748 = vst.msk [vmem:[%s8219_s1 + $0x207] sm:$0x1] %vm3_vm0, %v307_v15  }
  0xc7   :  { %2749 = vst.msk [vmem:[%s8219_s1 + $0x246] sm:$0x2] %vm3_vm0, %v307_v15  }
  0xc8   :  { %2750 = vst.msk [vmem:[%s8219_s1 + $0x285] sm:$0x4] %vm3_vm0, %v307_v15  }
  0xc9   :  { %2751 = vst.msk [vmem:[%s8219_s1 + $0x2c4] sm:$0x8] %vm3_vm0, %v307_v15  }
  0xca   :  { %2752 = vst.msk [vmem:[%s8219_s1 + $0x303] sm:$0x10] %vm3_vm0, %v307_v15   ;;  %1597 = vrot.lane.b32.xlu1 %v3847_v0, %s3808_s2  ;;  %1577 = vrot.lane.b32.xlu0 %v3855_v1, %s3809_s3 }
  0xcb   :  { %2753 = vst.msk [vmem:[%s8219_s1 + $0x342] sm:$0x20] %vm3_vm0, %v307_v15   ;;  %1618 = vrot.lane.b32.xlu2 %v5120_v42, %s3808_s2 }
  0xcc   :  { %2754 = vst.msk [vmem:[%s8219_s1 + $0x381] sm:$0x40] %vm3_vm0, %v307_v15   ;;  %v737_v36 = vpop.permute.xlu1 %736   ;;  %v717_v37 = vpop.permute.xlu0 %716  }
  0xcd   :  { %2755 = vst.msk [vmem:[%s8219_s1 + $0x3c0] sm:$0x80] %vm3_vm0, %v307_v15   ;;  %v942_v46 = vpop.permute.xlu2 %941  }
  0xce   :  { %2739 = vst.msk [vmem:[%s8219_s1 + $0x7] sm:$0x1] %vm3_vm0, %v286_v16  }
  0xcf   :  { %2740 = vst.msk [vmem:[%s8219_s1 + $0x46] sm:$0x2] %vm3_vm0, %v286_v16  }
  0xd0   :  { %2741 = vst.msk [vmem:[%s8219_s1 + $0x85] sm:$0x4] %vm3_vm0, %v286_v16  }
  0xd1   :  { %2742 = vst.msk [vmem:[%s8219_s1 + $0xc4] sm:$0x8] %vm3_vm0, %v286_v16  }
  0xd2   :  { %2743 = vst.msk [vmem:[%s8219_s1 + $0x103] sm:$0x10] %vm3_vm0, %v286_v16   ;;  %1659 = vrot.lane.b32.xlu1 %v3855_v1, %s3810_s25  ;;  %1638 = vrot.lane.b32.xlu0 %v5011_v38, %s3810_s25 }
  0xd3   :  { %2744 = vst.msk [vmem:[%s8219_s1 + $0x142] sm:$0x20] %vm3_vm0, %v286_v16   ;;  %1679 = vrot.lane.b32.xlu2 %v5011_v38, %s3812_s7 }
  0xd4   :  { %2745 = vst.msk [vmem:[%s8219_s1 + $0x181] sm:$0x40] %vm3_vm0, %v286_v16   ;;  %v799_v40 = vpop.permute.xlu1 %798   ;;  %v5079_v41 = vpop.permute.xlu0 %777  }
  0xd5   :  { %2746 = vst.msk [vmem:[%s8219_s1 + $0x1c0] sm:$0x80] %vm3_vm0, %v286_v16   ;;  %v1004_v49 = vpop.permute.xlu2 %1003  }
  0xd6   :  { %2782 = vst.msk [vmem:[%s8219_s1 + $0x209] sm:$0x1] %vm3_vm0, %v389_v17  }
  0xd7   :  { %2783 = vst.msk [vmem:[%s8219_s1 + $0x248] sm:$0x2] %vm3_vm0, %v389_v17  }
  0xd8   :  { %2784 = vst.msk [vmem:[%s8219_s1 + $0x287] sm:$0x4] %vm3_vm0, %v389_v17  }
  0xd9   :  { %2785 = vst.msk [vmem:[%s8219_s1 + $0x2c6] sm:$0x8] %vm3_vm0, %v389_v17  }
  0xda   :  { %2786 = vst.msk [vmem:[%s8219_s1 + $0x305] sm:$0x10] %vm3_vm0, %v389_v17   ;;  %1720 = vrot.lane.b32.xlu1 %v5011_v38, %s3811_s11  ;;  %1700 = vrot.lane.b32.xlu0 %v5120_v42, %s3812_s7 }
  0xdb   :  { %2787 = vst.msk [vmem:[%s8219_s1 + $0x344] sm:$0x20] %vm3_vm0, %v389_v17   ;;  %1741 = vrot.lane.b32.xlu2 %v5120_v42, %s3811_s11  ;;  %s3833_s11 = smov 65  }
  0xdc   :  { %2788 = vst.msk [vmem:[%s8219_s1 + $0x383] sm:$0x40] %vm3_vm0, %v389_v17   ;;  %v5156_v44 = vpop.permute.xlu1 %859   ;;  %v5194_v45 = vpop.permute.xlu0 %839  }
  0xdd   :  { %2789 = vst.msk [vmem:[%s8219_s1 + $0x3c2] sm:$0x80] %vm3_vm0, %v389_v17   ;;  %v1065_v52 = vpop.permute.xlu2 %1064  }
  0xde   :  { %2773 = vst.msk [vmem:[%s8219_s1 + $0x9] sm:$0x1] %vm3_vm0, %v368_v18  }
  0xdf   :  { %2774 = vst.msk [vmem:[%s8219_s1 + $0x48] sm:$0x2] %vm3_vm0, %v368_v18  }
  0xe0   :  { %2775 = vst.msk [vmem:[%s8219_s1 + $0x87] sm:$0x4] %vm3_vm0, %v368_v18  }
  0xe1   :  { %2776 = vst.msk [vmem:[%s8219_s1 + $0xc6] sm:$0x8] %vm3_vm0, %v368_v18  }
  0xe2   :  { %2777 = vst.msk [vmem:[%s8219_s1 + $0x105] sm:$0x10] %vm3_vm0, %v368_v18   ;;  %1782 = vrot.lane.b32.xlu1 %v5120_v42, %s3813_s9  ;;  %1761 = vrot.lane.b32.xlu0 %v5011_v38, %s3813_s9  ;;  %s3823_s9 = smov 74  }
  0xe3   :  { %2778 = vst.msk [vmem:[%s8219_s1 + $0x144] sm:$0x20] %vm3_vm0, %v368_v18   ;;  %1802 = vrot.lane.b32.xlu2 %v5011_v38, %s3815_s12 }
  0xe4   :  { %2779 = vst.msk [vmem:[%s8219_s1 + $0x183] sm:$0x40] %vm3_vm0, %v368_v18   ;;  %v922_v47 = vpop.permute.xlu1 %921   ;;  %v901_v48 = vpop.permute.xlu0 %900  }
  0xe5   :  { %2780 = vst.msk [vmem:[%s8219_s1 + $0x1c2] sm:$0x80] %vm3_vm0, %v368_v18   ;;  %v1127_v55 = vpop.permute.xlu2 %1126  }
  0xe6   :  { %2765 = vst.msk [vmem:[%s8219_s1 + $0x208] sm:$0x1] %vm3_vm0, %v348_v19  }
  0xe7   :  { %2766 = vst.msk [vmem:[%s8219_s1 + $0x247] sm:$0x2] %vm3_vm0, %v348_v19  }
  0xe8   :  { %2767 = vst.msk [vmem:[%s8219_s1 + $0x286] sm:$0x4] %vm3_vm0, %v348_v19  }
  0xe9   :  { %2768 = vst.msk [vmem:[%s8219_s1 + $0x2c5] sm:$0x8] %vm3_vm0, %v348_v19  }
  0xea   :  { %2769 = vst.msk [vmem:[%s8219_s1 + $0x304] sm:$0x10] %vm3_vm0, %v348_v19   ;;  %1843 = vrot.lane.b32.xlu1 %v5011_v38, %s3814_s26  ;;  %1823 = vrot.lane.b32.xlu0 %v5120_v42, %s3815_s12  ;;  %s3828_s12 = smov 70  }
  0xeb   :  { %2770 = vst.msk [vmem:[%s8219_s1 + $0x343] sm:$0x20] %vm3_vm0, %v348_v19   ;;  %1864 = vrot.lane.b32.xlu2 %v5120_v42, %s3814_s26  ;;  %s3826_s26 = smov 71  }
  0xec   :  { %2771 = vst.msk [vmem:[%s8219_s1 + $0x382] sm:$0x40] %vm3_vm0, %v348_v19   ;;  %v983_v50 = vpop.permute.xlu1 %982   ;;  %v963_v51 = vpop.permute.xlu0 %962  }
  0xed   :  { %2772 = vst.msk [vmem:[%s8219_s1 + $0x3c1] sm:$0x80] %vm3_vm0, %v348_v19   ;;  %v1188_v58 = vpop.permute.xlu2 %1187  }
  0xee   :  { %2807 = vst.msk [vmem:[%s8219_s1 + $0xb] sm:$0x1] %vm3_vm0, %v450_v20  }
  0xef   :  { %2808 = vst.msk [vmem:[%s8219_s1 + $0x4a] sm:$0x2] %vm3_vm0, %v450_v20  }
  0xf0   :  { %2809 = vst.msk [vmem:[%s8219_s1 + $0x89] sm:$0x4] %vm3_vm0, %v450_v20  }
  0xf1   :  { %2810 = vst.msk [vmem:[%s8219_s1 + $0xc8] sm:$0x8] %vm3_vm0, %v450_v20  }
  0xf2   :  { %2811 = vst.msk [vmem:[%s8219_s1 + $0x107] sm:$0x10] %vm3_vm0, %v450_v20   ;;  %1905 = vrot.lane.b32.xlu1 %v5120_v42, %s3816_s14  ;;  %1884 = vrot.lane.b32.xlu0 %v5011_v38, %s3816_s14  ;;  %s3832_s14 = smov 66  }
  0xf3   :  { %2812 = vst.msk [vmem:[%s8219_s1 + $0x146] sm:$0x20] %vm3_vm0, %v450_v20   ;;  %1925 = vrot.lane.b32.xlu2 %v5011_v38, %s3818_s18 }
  0xf4   :  { %2813 = vst.msk [vmem:[%s8219_s1 + $0x185] sm:$0x40] %vm3_vm0, %v450_v20   ;;  %v1045_v53 = vpop.permute.xlu1 %1044   ;;  %v1024_v54 = vpop.permute.xlu0 %1023  }
  0xf5   :  { %2814 = vst.msk [vmem:[%s8219_s1 + $0x1c4] sm:$0x80] %vm3_vm0, %v450_v20   ;;  %v1250_v61 = vpop.permute.xlu2 %1249  }
  0xf6   :  { %2799 = vst.msk [vmem:[%s8219_s1 + $0x20a] sm:$0x1] %vm3_vm0, %v430_v21  }
  0xf7   :  { %2800 = vst.msk [vmem:[%s8219_s1 + $0x249] sm:$0x2] %vm3_vm0, %v430_v21  }
  0xf8   :  { %2801 = vst.msk [vmem:[%s8219_s1 + $0x288] sm:$0x4] %vm3_vm0, %v430_v21  }
  0xf9   :  { %2802 = vst.msk [vmem:[%s8219_s1 + $0x2c7] sm:$0x8] %vm3_vm0, %v430_v21  }
  0xfa   :  { %2803 = vst.msk [vmem:[%s8219_s1 + $0x306] sm:$0x10] %vm3_vm0, %v430_v21   ;;  %1966 = vrot.lane.b32.xlu1 %v5011_v38, %s3817_s6  ;;  %1946 = vrot.lane.b32.xlu0 %v5120_v42, %s3818_s18 }
  0xfb   :  { %2804 = vst.msk [vmem:[%s8219_s1 + $0x345] sm:$0x20] %vm3_vm0, %v430_v21   ;;  %1987 = vrot.lane.b32.xlu2 %v5120_v42, %s3817_s6 }
  0xfc   :  { %2805 = vst.msk [vmem:[%s8219_s1 + $0x384] sm:$0x40] %vm3_vm0, %v430_v21   ;;  %v1106_v56 = vpop.permute.xlu1 %1105   ;;  %v1086_v57 = vpop.permute.xlu0 %1085  }
  0xfd   :  { %2806 = vst.msk [vmem:[%s8219_s1 + $0x3c3] sm:$0x80] %vm3_vm0, %v430_v21   ;;  %v1311_v0 = vpop.permute.xlu2 %1310   ;;  %v6557_v21 = vld [vmem:[%s8218_s0] sm:$0xff]  }
  0xfe   :  { %2790 = vst.msk [vmem:[%s8219_s1 + $0xa] sm:$0x1] %vm3_vm0, %v409_v22  }
  0xff   :  { %2791 = vst.msk [vmem:[%s8219_s1 + $0x49] sm:$0x2] %vm3_vm0, %v409_v22  }
 0x100   :  { %2792 = vst.msk [vmem:[%s8219_s1 + $0x88] sm:$0x4] %vm3_vm0, %v409_v22  }
 0x101   :  { %2793 = vst.msk [vmem:[%s8219_s1 + $0xc7] sm:$0x8] %vm3_vm0, %v409_v22  }
 0x102   :  { %2794 = vst.msk [vmem:[%s8219_s1 + $0x106] sm:$0x10] %vm3_vm0, %v409_v22   ;;  %2028 = vrot.lane.b32.xlu1 %v5120_v42, %s3819_s20  ;;  %2007 = vrot.lane.b32.xlu0 %v5011_v38, %s3819_s20 }
 0x103   :  { %2795 = vst.msk [vmem:[%s8219_s1 + $0x145] sm:$0x20] %vm3_vm0, %v409_v22   ;;  %2048 = vrot.lane.b32.xlu2 %v5011_v38, %s3821_s24 }
 0x104   :  { %2796 = vst.msk [vmem:[%s8219_s1 + $0x184] sm:$0x40] %vm3_vm0, %v409_v22   ;;  %v1168_v59 = vpop.permute.xlu1 %1167   ;;  %v1147_v60 = vpop.permute.xlu0 %1146  }
 0x105   :  { %2797 = vst.msk [vmem:[%s8219_s1 + $0x1c3] sm:$0x80] %vm3_vm0, %v409_v22   ;;  %v1373_v3 = vpop.permute.xlu2 %1372  }
 0x106   :  { %2833 = vst.msk [vmem:[%s8219_s1 + $0x20c] sm:$0x1] %vm3_vm0, %v512_v23  }
 0x107   :  { %2834 = vst.msk [vmem:[%s8219_s1 + $0x24b] sm:$0x2] %vm3_vm0, %v512_v23  }
 0x108   :  { %2835 = vst.msk [vmem:[%s8219_s1 + $0x28a] sm:$0x4] %vm3_vm0, %v512_v23  }
 0x109   :  { %2836 = vst.msk [vmem:[%s8219_s1 + $0x2c9] sm:$0x8] %vm3_vm0, %v512_v23  }
 0x10a   :  { %2837 = vst.msk [vmem:[%s8219_s1 + $0x308] sm:$0x10] %vm3_vm0, %v512_v23   ;;  %2089 = vrot.lane.b32.xlu1 %v5011_v38, %s3820_s23  ;;  %2069 = vrot.lane.b32.xlu0 %v5120_v42, %s3821_s24 }
 0x10b   :  { %2838 = vst.msk [vmem:[%s8219_s1 + $0x347] sm:$0x20] %vm3_vm0, %v512_v23   ;;  %2110 = vrot.lane.b32.xlu2 %v5120_v42, %s3820_s23  ;;  %s3829_s23 = smov 68  }
 0x10c   :  { %2839 = vst.msk [vmem:[%s8219_s1 + $0x386] sm:$0x40] %vm3_vm0, %v512_v23   ;;  %v1229_v62 = vpop.permute.xlu1 %1228   ;;  %v1209_v63 = vpop.permute.xlu0 %1208  }
 0x10d   :  { %2840 = vst.msk [vmem:[%s8219_s1 + $0x3c5] sm:$0x80] %vm3_vm0, %v512_v23   ;;  %v1434_v6 = vpop.permute.xlu2 %1433  }
 0x10e   :  { %2824 = vst.msk [vmem:[%s8219_s1 + $0xc] sm:$0x1] %vm3_vm0, %v491_v24  }
 0x10f   :  { %2825 = vst.msk [vmem:[%s8219_s1 + $0x4b] sm:$0x2] %vm3_vm0, %v491_v24  }
 0x110   :  { %2826 = vst.msk [vmem:[%s8219_s1 + $0x8a] sm:$0x4] %vm3_vm0, %v491_v24  }
 0x111   :  { %2827 = vst.msk [vmem:[%s8219_s1 + $0xc9] sm:$0x8] %vm3_vm0, %v491_v24  }
 0x112   :  { %2828 = vst.msk [vmem:[%s8219_s1 + $0x108] sm:$0x10] %vm3_vm0, %v491_v24   ;;  %2151 = vrot.lane.b32.xlu1 %v5120_v42, %s3822_s16  ;;  %2130 = vrot.lane.b32.xlu0 %v5011_v38, %s3822_s16 }
 0x113   :  { %2829 = vst.msk [vmem:[%s8219_s1 + $0x147] sm:$0x20] %vm3_vm0, %v491_v24   ;;  %2171 = vrot.lane.b32.xlu2 %v5011_v38, %s3824_s10 }
 0x114   :  { %2830 = vst.msk [vmem:[%s8219_s1 + $0x186] sm:$0x40] %vm3_vm0, %v491_v24   ;;  %v1291_v1 = vpop.permute.xlu1 %1290   ;;  %v1270_v2 = vpop.permute.xlu0 %1269  }
 0x115   :  { %2831 = vst.msk [vmem:[%s8219_s1 + $0x1c5] sm:$0x80] %vm3_vm0, %v491_v24   ;;  %v1496_v9 = vpop.permute.xlu2 %1495  }
 0x116   :  { %2816 = vst.msk [vmem:[%s8219_s1 + $0x20b] sm:$0x1] %vm3_vm0, %v471_v25  }
 0x117   :  { %2817 = vst.msk [vmem:[%s8219_s1 + $0x24a] sm:$0x2] %vm3_vm0, %v471_v25  }
 0x118   :  { %2818 = vst.msk [vmem:[%s8219_s1 + $0x289] sm:$0x4] %vm3_vm0, %v471_v25  }
 0x119   :  { %2819 = vst.msk [vmem:[%s8219_s1 + $0x2c8] sm:$0x8] %vm3_vm0, %v471_v25  }
 0x11a   :  { %2820 = vst.msk [vmem:[%s8219_s1 + $0x307] sm:$0x10] %vm3_vm0, %v471_v25   ;;  %2212 = vrot.lane.b32.xlu1 %v5011_v38, %s3823_s9  ;;  %2192 = vrot.lane.b32.xlu0 %v5120_v42, %s3824_s10 }
 0x11b   :  { %2821 = vst.msk [vmem:[%s8219_s1 + $0x346] sm:$0x20] %vm3_vm0, %v471_v25   ;;  %2233 = vrot.lane.b32.xlu2 %v5120_v42, %s3823_s9 }
 0x11c   :  { %2822 = vst.msk [vmem:[%s8219_s1 + $0x385] sm:$0x40] %vm3_vm0, %v471_v25   ;;  %v1352_v4 = vpop.permute.xlu1 %1351   ;;  %v1332_v5 = vpop.permute.xlu0 %1331  }
 0x11d   :  { %2823 = vst.msk [vmem:[%s8219_s1 + $0x3c4] sm:$0x80] %vm3_vm0, %v471_v25   ;;  %v1557_v12 = vpop.permute.xlu2 %1556  }
 0x11e   :  { %2858 = vst.msk [vmem:[%s8219_s1 + $0xe] sm:$0x1] %vm3_vm0, %v573_v26  }
 0x11f   :  { %2859 = vst.msk [vmem:[%s8219_s1 + $0x4d] sm:$0x2] %vm3_vm0, %v573_v26  }
 0x120   :  { %2860 = vst.msk [vmem:[%s8219_s1 + $0x8c] sm:$0x4] %vm3_vm0, %v573_v26  }
 0x121   :  { %2861 = vst.msk [vmem:[%s8219_s1 + $0xcb] sm:$0x8] %vm3_vm0, %v573_v26  }
 0x122   :  { %2862 = vst.msk [vmem:[%s8219_s1 + $0x10a] sm:$0x10] %vm3_vm0, %v573_v26   ;;  %2274 = vrot.lane.b32.xlu1 %v5120_v42, %s3825_s29  ;;  %2253 = vrot.lane.b32.xlu0 %v5011_v38, %s3825_s29 }
 0x123   :  { %2863 = vst.msk [vmem:[%s8219_s1 + $0x149] sm:$0x20] %vm3_vm0, %v573_v26   ;;  %2294 = vrot.lane.b32.xlu2 %v5011_v38, %s3827_s19 }
 0x124   :  { %2864 = vst.msk [vmem:[%s8219_s1 + $0x188] sm:$0x40] %vm3_vm0, %v573_v26   ;;  %v1414_v7 = vpop.permute.xlu1 %1413   ;;  %v1393_v8 = vpop.permute.xlu0 %1392  }
 0x125   :  { %2865 = vst.msk [vmem:[%s8219_s1 + $0x1c7] sm:$0x80] %vm3_vm0, %v573_v26   ;;  %v1619_v15 = vpop.permute.xlu2 %1618  }
 0x126   :  { %2850 = vst.msk [vmem:[%s8219_s1 + $0x20d] sm:$0x1] %vm3_vm0, %v553_v27  }
 0x127   :  { %2851 = vst.msk [vmem:[%s8219_s1 + $0x24c] sm:$0x2] %vm3_vm0, %v553_v27  }
 0x128   :  { %2852 = vst.msk [vmem:[%s8219_s1 + $0x28b] sm:$0x4] %vm3_vm0, %v553_v27  }
 0x129   :  { %2853 = vst.msk [vmem:[%s8219_s1 + $0x2ca] sm:$0x8] %vm3_vm0, %v553_v27  }
 0x12a   :  { %2854 = vst.msk [vmem:[%s8219_s1 + $0x309] sm:$0x10] %vm3_vm0, %v553_v27   ;;  %2335 = vrot.lane.b32.xlu1 %v5011_v38, %s3826_s26  ;;  %2315 = vrot.lane.b32.xlu0 %v5120_v42, %s3827_s19 }
 0x12b   :  { %2855 = vst.msk [vmem:[%s8219_s1 + $0x348] sm:$0x20] %vm3_vm0, %v553_v27   ;;  %2356 = vrot.lane.b32.xlu2 %v5120_v42, %s3826_s26 }
 0x12c   :  { %2856 = vst.msk [vmem:[%s8219_s1 + $0x387] sm:$0x40] %vm3_vm0, %v553_v27   ;;  %v1475_v10 = vpop.permute.xlu1 %1474   ;;  %v1455_v11 = vpop.permute.xlu0 %1454  }
 0x12d   :  { %2857 = vst.msk [vmem:[%s8219_s1 + $0x3c6] sm:$0x80] %vm3_vm0, %v553_v27   ;;  %v1680_v18 = vpop.permute.xlu2 %1679  }
 0x12e   :  { %2841 = vst.msk [vmem:[%s8219_s1 + $0xd] sm:$0x1] %vm3_vm0, %v532_v28  }
 0x12f   :  { %2842 = vst.msk [vmem:[%s8219_s1 + $0x4c] sm:$0x2] %vm3_vm0, %v532_v28  }
 0x130   :  { %2843 = vst.msk [vmem:[%s8219_s1 + $0x8b] sm:$0x4] %vm3_vm0, %v532_v28  }
 0x131   :  { %2844 = vst.msk [vmem:[%s8219_s1 + $0xca] sm:$0x8] %vm3_vm0, %v532_v28  }
 0x132   :  { %2845 = vst.msk [vmem:[%s8219_s1 + $0x109] sm:$0x10] %vm3_vm0, %v532_v28   ;;  %2397 = vrot.lane.b32.xlu1 %v5120_v42, %s3828_s12  ;;  %2376 = vrot.lane.b32.xlu0 %v5011_v38, %s3828_s12 }
 0x133   :  { %2846 = vst.msk [vmem:[%s8219_s1 + $0x148] sm:$0x20] %vm3_vm0, %v532_v28   ;;  %2417 = vrot.lane.b32.xlu2 %v5011_v38, %s3830_s5 }
 0x134   :  { %2847 = vst.msk [vmem:[%s8219_s1 + $0x187] sm:$0x40] %vm3_vm0, %v532_v28   ;;  %v1537_v13 = vpop.permute.xlu1 %1536   ;;  %v1516_v14 = vpop.permute.xlu0 %1515  }
 0x135   :  { %2848 = vst.msk [vmem:[%s8219_s1 + $0x1c6] sm:$0x80] %vm3_vm0, %v532_v28   ;;  %v1742_v22 = vpop.permute.xlu2 %1741  }
 0x136   :  { %2884 = vst.msk [vmem:[%s8219_s1 + $0x20f] sm:$0x1] %vm3_vm0, %v635_v29  }
 0x137   :  { %2885 = vst.msk [vmem:[%s8219_s1 + $0x24e] sm:$0x2] %vm3_vm0, %v635_v29  }
 0x138   :  { %2886 = vst.msk [vmem:[%s8219_s1 + $0x28d] sm:$0x4] %vm3_vm0, %v635_v29  }
 0x139   :  { %2887 = vst.msk [vmem:[%s8219_s1 + $0x2cc] sm:$0x8] %vm3_vm0, %v635_v29  }
 0x13a   :  { %2888 = vst.msk [vmem:[%s8219_s1 + $0x30b] sm:$0x10] %vm3_vm0, %v635_v29   ;;  %2458 = vrot.lane.b32.xlu1 %v5011_v38, %s3829_s23  ;;  %2438 = vrot.lane.b32.xlu0 %v5120_v42, %s3830_s5 }
 0x13b   :  { %2889 = vst.msk [vmem:[%s8219_s1 + $0x34a] sm:$0x20] %vm3_vm0, %v635_v29   ;;  %2479 = vrot.lane.b32.xlu2 %v5120_v42, %s3829_s23 }
 0x13c   :  { %2890 = vst.msk [vmem:[%s8219_s1 + $0x389] sm:$0x40] %vm3_vm0, %v635_v29   ;;  %v1598_v16 = vpop.permute.xlu1 %1597   ;;  %v1578_v17 = vpop.permute.xlu0 %1577  }
 0x13d   :  { %2891 = vst.msk [vmem:[%s8219_s1 + $0x3c8] sm:$0x80] %vm3_vm0, %v635_v29   ;;  %v1803_v25 = vpop.permute.xlu2 %1802  }
 0x13e   :  { %2875 = vst.msk [vmem:[%s8219_s1 + $0xf] sm:$0x1] %vm3_vm0, %v614_v30  }
 0x13f   :  { %2876 = vst.msk [vmem:[%s8219_s1 + $0x4e] sm:$0x2] %vm3_vm0, %v614_v30  }
 0x140   :  { %2877 = vst.msk [vmem:[%s8219_s1 + $0x8d] sm:$0x4] %vm3_vm0, %v614_v30  }
 0x141   :  { %2878 = vst.msk [vmem:[%s8219_s1 + $0xcc] sm:$0x8] %vm3_vm0, %v614_v30  }
 0x142   :  { %2879 = vst.msk [vmem:[%s8219_s1 + $0x10b] sm:$0x10] %vm3_vm0, %v614_v30   ;;  %2520 = vrot.lane.b32.xlu1 %v5120_v42, %s3831_s22  ;;  %2499 = vrot.lane.b32.xlu0 %v5011_v38, %s3831_s22 }
 0x143   :  { %2880 = vst.msk [vmem:[%s8219_s1 + $0x14a] sm:$0x20] %vm3_vm0, %v614_v30   ;;  %2540 = vrot.lane.b32.xlu2 %v6557_v21, %s3832_s14 }
 0x144   :  { %2881 = vst.msk [vmem:[%s8219_s1 + $0x189] sm:$0x40] %vm3_vm0, %v614_v30   ;;  %v1660_v19 = vpop.permute.xlu1 %1659   ;;  %v1639_v20 = vpop.permute.xlu0 %1638  }
 0x145   :  { %2882 = vst.msk [vmem:[%s8219_s1 + $0x1c8] sm:$0x80] %vm3_vm0, %v614_v30   ;;  %v1865_v28 = vpop.permute.xlu2 %1864  }
 0x146   :  { %2867 = vst.msk [vmem:[%s8219_s1 + $0x20e] sm:$0x1] %vm3_vm0, %v594_v31  }
 0x147   :  { %2868 = vst.msk [vmem:[%s8219_s1 + $0x24d] sm:$0x2] %vm3_vm0, %v594_v31  }
 0x148   :  { %2869 = vst.msk [vmem:[%s8219_s1 + $0x28c] sm:$0x4] %vm3_vm0, %v594_v31  }
 0x149   :  { %2870 = vst.msk [vmem:[%s8219_s1 + $0x2cb] sm:$0x8] %vm3_vm0, %v594_v31  }
 0x14a   :  { %2871 = vst.msk [vmem:[%s8219_s1 + $0x30a] sm:$0x10] %vm3_vm0, %v594_v31   ;;  %2561 = vrot.lane.b32.xlu0 %v5120_v42, %s3832_s14  ;;  %2581 = vrot.lane.b32.xlu1 %v6557_v21, %s3833_s11 }
 0x14b   :  { %2872 = vst.msk [vmem:[%s8219_s1 + $0x349] sm:$0x20] %vm3_vm0, %v594_v31  }
 0x14c   :  { %2873 = vst.msk [vmem:[%s8219_s1 + $0x388] sm:$0x40] %vm3_vm0, %v594_v31   ;;  %v1721_v23 = vpop.permute.xlu1 %1720   ;;  %v1701_v24 = vpop.permute.xlu0 %1700  }
 0x14d   :  { %2874 = vst.msk [vmem:[%s8219_s1 + $0x3c7] sm:$0x80] %vm3_vm0, %v594_v31   ;;  %v6854_v31 = vld [vmem:[%s8218_s0 + $0x8] sm:$0xff]  }
 0x14e   :  { %2909 = vst.msk [vmem:[%s8219_s1 + $0x11] sm:$0x1] %vm3_vm0, %v696_v32   ;;  %2602 = vrot.lane.b32.xlu2 %v6854_v31, %s3833_s11 }
 0x14f   :  { %2910 = vst.msk [vmem:[%s8219_s1 + $0x50] sm:$0x2] %vm3_vm0, %v696_v32  }
 0x150   :  { %2911 = vst.msk [vmem:[%s8219_s1 + $0x8f] sm:$0x4] %vm3_vm0, %v696_v32  }
 0x151   :  { %2912 = vst.msk [vmem:[%s8219_s1 + $0xce] sm:$0x8] %vm3_vm0, %v696_v32  }
 0x152   :  { %2913 = vst.msk [vmem:[%s8219_s1 + $0x10d] sm:$0x10] %vm3_vm0, %v696_v32  }
 0x153   :  { %2914 = vst.msk [vmem:[%s8219_s1 + $0x14c] sm:$0x20] %vm3_vm0, %v696_v32  }
 0x154   :  { %2915 = vst.msk [vmem:[%s8219_s1 + $0x18b] sm:$0x40] %vm3_vm0, %v696_v32   ;;  %v1783_v26 = vpop.permute.xlu1 %1782   ;;  %v1762_v27 = vpop.permute.xlu0 %1761  }
 0x155   :  { %2916 = vst.msk [vmem:[%s8219_s1 + $0x1ca] sm:$0x80] %vm3_vm0, %v696_v32   ;;  %v1926_v32 = vpop.permute.xlu2 %1925  }
 0x156   :  { %2901 = vst.msk [vmem:[%s8219_s1 + $0x210] sm:$0x1] %vm3_vm0, %v676_v33  }
 0x157   :  { %2902 = vst.msk [vmem:[%s8219_s1 + $0x24f] sm:$0x2] %vm3_vm0, %v676_v33  }
 0x158   :  { %2903 = vst.msk [vmem:[%s8219_s1 + $0x28e] sm:$0x4] %vm3_vm0, %v676_v33  }
 0x159   :  { %2904 = vst.msk [vmem:[%s8219_s1 + $0x2cd] sm:$0x8] %vm3_vm0, %v676_v33  }
 0x15a   :  { %2905 = vst.msk [vmem:[%s8219_s1 + $0x30c] sm:$0x10] %vm3_vm0, %v676_v33  }
 0x15b   :  { %2906 = vst.msk [vmem:[%s8219_s1 + $0x34b] sm:$0x20] %vm3_vm0, %v676_v33  }
 0x15c   :  { %2907 = vst.msk [vmem:[%s8219_s1 + $0x38a] sm:$0x40] %vm3_vm0, %v676_v33   ;;  %v1844_v29 = vpop.permute.xlu1 %1843   ;;  %v1824_v30 = vpop.permute.xlu0 %1823  }
 0x15d   :  { %2908 = vst.msk [vmem:[%s8219_s1 + $0x3c9] sm:$0x80] %vm3_vm0, %v676_v33  }
 0x15e   :  { %2892 = vst.msk [vmem:[%s8219_s1 + $0x10] sm:$0x1] %vm3_vm0, %v655_v34  }
 0x15f   :  { %2893 = vst.msk [vmem:[%s8219_s1 + $0x4f] sm:$0x2] %vm3_vm0, %v655_v34  }
 0x160   :  { %2894 = vst.msk [vmem:[%s8219_s1 + $0x8e] sm:$0x4] %vm3_vm0, %v655_v34  }
 0x161   :  { %2895 = vst.msk [vmem:[%s8219_s1 + $0xcd] sm:$0x8] %vm3_vm0, %v655_v34  }
 0x162   :  { %2896 = vst.msk [vmem:[%s8219_s1 + $0x10c] sm:$0x10] %vm3_vm0, %v655_v34  }
 0x163   :  { %2897 = vst.msk [vmem:[%s8219_s1 + $0x14b] sm:$0x20] %vm3_vm0, %v655_v34  }
 0x164   :  { %2898 = vst.msk [vmem:[%s8219_s1 + $0x18a] sm:$0x40] %vm3_vm0, %v655_v34   ;;  %v1906_v33 = vpop.permute.xlu1 %1905  }
 0x165   :  { %2899 = vst.msk [vmem:[%s8219_s1 + $0x1c9] sm:$0x80] %vm3_vm0, %v655_v34   ;;  %v1885_v34 = vpop.permute.xlu0 %1884  }
 0x166   :  { %2935 = vst.msk [vmem:[%s8219_s1 + $0x212] sm:$0x1] %vm3_vm0, %v758_v35  }
 0x167   :  { %2936 = vst.msk [vmem:[%s8219_s1 + $0x251] sm:$0x2] %vm3_vm0, %v758_v35  }
 0x168   :  { %2937 = vst.msk [vmem:[%s8219_s1 + $0x290] sm:$0x4] %vm3_vm0, %v758_v35  }
 0x169   :  { %2938 = vst.msk [vmem:[%s8219_s1 + $0x2cf] sm:$0x8] %vm3_vm0, %v758_v35  }
 0x16a   :  { %2939 = vst.msk [vmem:[%s8219_s1 + $0x30e] sm:$0x10] %vm3_vm0, %v758_v35  }
 0x16b   :  { %2940 = vst.msk [vmem:[%s8219_s1 + $0x34d] sm:$0x20] %vm3_vm0, %v758_v35  }
 0x16c   :  { %2941 = vst.msk [vmem:[%s8219_s1 + $0x38c] sm:$0x40] %vm3_vm0, %v758_v35  }
 0x16d   :  { %2942 = vst.msk [vmem:[%s8219_s1 + $0x3cb] sm:$0x80] %vm3_vm0, %v758_v35   ;;  %v1988_v35 = vpop.permute.xlu2 %1987  }
 0x16e   :  { %2926 = vst.msk [vmem:[%s8219_s1 + $0x12] sm:$0x1] %vm3_vm0, %v737_v36  }
 0x16f   :  { %2927 = vst.msk [vmem:[%s8219_s1 + $0x51] sm:$0x2] %vm3_vm0, %v737_v36  }
 0x170   :  { %2928 = vst.msk [vmem:[%s8219_s1 + $0x90] sm:$0x4] %vm3_vm0, %v737_v36  }
 0x171   :  { %2929 = vst.msk [vmem:[%s8219_s1 + $0xcf] sm:$0x8] %vm3_vm0, %v737_v36  }
 0x172   :  { %2930 = vst.msk [vmem:[%s8219_s1 + $0x10e] sm:$0x10] %vm3_vm0, %v737_v36  }
 0x173   :  { %2931 = vst.msk [vmem:[%s8219_s1 + $0x14d] sm:$0x20] %vm3_vm0, %v737_v36  }
 0x174   :  { %2932 = vst.msk [vmem:[%s8219_s1 + $0x18c] sm:$0x40] %vm3_vm0, %v737_v36  }
 0x175   :  { %2933 = vst.msk [vmem:[%s8219_s1 + $0x1cb] sm:$0x80] %vm3_vm0, %v737_v36   ;;  %v1967_v36 = vpop.permute.xlu1 %1966   ;;  %v2049_v38 = vpop.permute.xlu2 %2048  }
 0x176   :  { %2918 = vst.msk [vmem:[%s8219_s1 + $0x211] sm:$0x1] %vm3_vm0, %v717_v37  }
 0x177   :  { %2919 = vst.msk [vmem:[%s8219_s1 + $0x250] sm:$0x2] %vm3_vm0, %v717_v37  }
 0x178   :  { %2920 = vst.msk [vmem:[%s8219_s1 + $0x28f] sm:$0x4] %vm3_vm0, %v717_v37  }
 0x179   :  { %2921 = vst.msk [vmem:[%s8219_s1 + $0x2ce] sm:$0x8] %vm3_vm0, %v717_v37  }
 0x17a   :  { %2922 = vst.msk [vmem:[%s8219_s1 + $0x30d] sm:$0x10] %vm3_vm0, %v717_v37  }
 0x17b   :  { %2923 = vst.msk [vmem:[%s8219_s1 + $0x34c] sm:$0x20] %vm3_vm0, %v717_v37  }
 0x17c   :  { %2924 = vst.msk [vmem:[%s8219_s1 + $0x38b] sm:$0x40] %vm3_vm0, %v717_v37  }
 0x17d   :  { %2925 = vst.msk [vmem:[%s8219_s1 + $0x3ca] sm:$0x80] %vm3_vm0, %v717_v37   ;;  %v1947_v37 = vpop.permute.xlu0 %1946  }
 0x17e   :  { %2960 = vst.msk [vmem:[%s8219_s1 + $0x14] sm:$0x1] %vm3_vm0, %v819_v39  }
 0x17f   :  { %2961 = vst.msk [vmem:[%s8219_s1 + $0x53] sm:$0x2] %vm3_vm0, %v819_v39  }
 0x180   :  { %2962 = vst.msk [vmem:[%s8219_s1 + $0x92] sm:$0x4] %vm3_vm0, %v819_v39  }
 0x181   :  { %2963 = vst.msk [vmem:[%s8219_s1 + $0xd1] sm:$0x8] %vm3_vm0, %v819_v39  }
 0x182   :  { %2964 = vst.msk [vmem:[%s8219_s1 + $0x110] sm:$0x10] %vm3_vm0, %v819_v39  }
 0x183   :  { %2965 = vst.msk [vmem:[%s8219_s1 + $0x14f] sm:$0x20] %vm3_vm0, %v819_v39  }
 0x184   :  { %2966 = vst.msk [vmem:[%s8219_s1 + $0x18e] sm:$0x40] %vm3_vm0, %v819_v39  }
 0x185   :  { %2967 = vst.msk [vmem:[%s8219_s1 + $0x1cd] sm:$0x80] %vm3_vm0, %v819_v39   ;;  %v2029_v39 = vpop.permute.xlu1 %2028  }
 0x186   :  { %2952 = vst.msk [vmem:[%s8219_s1 + $0x213] sm:$0x1] %vm3_vm0, %v799_v40  }
 0x187   :  { %2953 = vst.msk [vmem:[%s8219_s1 + $0x252] sm:$0x2] %vm3_vm0, %v799_v40  }
 0x188   :  { %2954 = vst.msk [vmem:[%s8219_s1 + $0x291] sm:$0x4] %vm3_vm0, %v799_v40  }
 0x189   :  { %2955 = vst.msk [vmem:[%s8219_s1 + $0x2d0] sm:$0x8] %vm3_vm0, %v799_v40  }
 0x18a   :  { %2956 = vst.msk [vmem:[%s8219_s1 + $0x30f] sm:$0x10] %vm3_vm0, %v799_v40  }
 0x18b   :  { %2957 = vst.msk [vmem:[%s8219_s1 + $0x34e] sm:$0x20] %vm3_vm0, %v799_v40  }
 0x18c   :  { %2958 = vst.msk [vmem:[%s8219_s1 + $0x38d] sm:$0x40] %vm3_vm0, %v799_v40  }
 0x18d   :  { %2959 = vst.msk [vmem:[%s8219_s1 + $0x3cc] sm:$0x80] %vm3_vm0, %v799_v40   ;;  %v2008_v40 = vpop.permute.xlu0 %2007   ;;  %v2090_v42 = vpop.permute.xlu1 %2089  }
 0x18e   :  { %2943 = vst.msk [vmem:[%s8219_s1 + $0x13] sm:$0x1] %vm3_vm0, %v5079_v41  }
 0x18f   :  { %2944 = vst.msk [vmem:[%s8219_s1 + $0x52] sm:$0x2] %vm3_vm0, %v5079_v41  }
 0x190   :  { %2945 = vst.msk [vmem:[%s8219_s1 + $0x91] sm:$0x4] %vm3_vm0, %v5079_v41  }
 0x191   :  { %2946 = vst.msk [vmem:[%s8219_s1 + $0xd0] sm:$0x8] %vm3_vm0, %v5079_v41  }
 0x192   :  { %2947 = vst.msk [vmem:[%s8219_s1 + $0x10f] sm:$0x10] %vm3_vm0, %v5079_v41  }
 0x193   :  { %2948 = vst.msk [vmem:[%s8219_s1 + $0x14e] sm:$0x20] %vm3_vm0, %v5079_v41  }
 0x194   :  { %2949 = vst.msk [vmem:[%s8219_s1 + $0x18d] sm:$0x40] %vm3_vm0, %v5079_v41  }
 0x195   :  { %2950 = vst.msk [vmem:[%s8219_s1 + $0x1cc] sm:$0x80] %vm3_vm0, %v5079_v41   ;;  %v2111_v41 = vpop.permute.xlu2 %2110  }
 0x196   :  { %2986 = vst.msk [vmem:[%s8219_s1 + $0x215] sm:$0x1] %vm3_vm0, %v5122_v43  }
 0x197   :  { %2987 = vst.msk [vmem:[%s8219_s1 + $0x254] sm:$0x2] %vm3_vm0, %v5122_v43  }
 0x198   :  { %2988 = vst.msk [vmem:[%s8219_s1 + $0x293] sm:$0x4] %vm3_vm0, %v5122_v43  }
 0x199   :  { %2989 = vst.msk [vmem:[%s8219_s1 + $0x2d2] sm:$0x8] %vm3_vm0, %v5122_v43  }
 0x19a   :  { %2990 = vst.msk [vmem:[%s8219_s1 + $0x311] sm:$0x10] %vm3_vm0, %v5122_v43  }
 0x19b   :  { %2991 = vst.msk [vmem:[%s8219_s1 + $0x350] sm:$0x20] %vm3_vm0, %v5122_v43  }
 0x19c   :  { %2992 = vst.msk [vmem:[%s8219_s1 + $0x38f] sm:$0x40] %vm3_vm0, %v5122_v43  }
 0x19d   :  { %2993 = vst.msk [vmem:[%s8219_s1 + $0x3ce] sm:$0x80] %vm3_vm0, %v5122_v43   ;;  %v2070_v43 = vpop.permute.xlu0 %2069  }
 0x19e   :  { %2977 = vst.msk [vmem:[%s8219_s1 + $0x15] sm:$0x1] %vm3_vm0, %v5156_v44  }
 0x19f   :  { %2978 = vst.msk [vmem:[%s8219_s1 + $0x54] sm:$0x2] %vm3_vm0, %v5156_v44  }
 0x1a0   :  { %2979 = vst.msk [vmem:[%s8219_s1 + $0x93] sm:$0x4] %vm3_vm0, %v5156_v44  }
 0x1a1   :  { %2980 = vst.msk [vmem:[%s8219_s1 + $0xd2] sm:$0x8] %vm3_vm0, %v5156_v44  }
 0x1a2   :  { %2981 = vst.msk [vmem:[%s8219_s1 + $0x111] sm:$0x10] %vm3_vm0, %v5156_v44  }
 0x1a3   :  { %2982 = vst.msk [vmem:[%s8219_s1 + $0x150] sm:$0x20] %vm3_vm0, %v5156_v44  }
 0x1a4   :  { %2983 = vst.msk [vmem:[%s8219_s1 + $0x18f] sm:$0x40] %vm3_vm0, %v5156_v44  }
 0x1a5   :  { %2984 = vst.msk [vmem:[%s8219_s1 + $0x1ce] sm:$0x80] %vm3_vm0, %v5156_v44   ;;  %v2172_v44 = vpop.permute.xlu2 %2171  }
 0x1a6   :  { %2969 = vst.msk [vmem:[%s8219_s1 + $0x214] sm:$0x1] %vm3_vm0, %v5194_v45  }
 0x1a7   :  { %2970 = vst.msk [vmem:[%s8219_s1 + $0x253] sm:$0x2] %vm3_vm0, %v5194_v45  }
 0x1a8   :  { %2971 = vst.msk [vmem:[%s8219_s1 + $0x292] sm:$0x4] %vm3_vm0, %v5194_v45  }
 0x1a9   :  { %2972 = vst.msk [vmem:[%s8219_s1 + $0x2d1] sm:$0x8] %vm3_vm0, %v5194_v45  }
 0x1aa   :  { %2973 = vst.msk [vmem:[%s8219_s1 + $0x310] sm:$0x10] %vm3_vm0, %v5194_v45  }
 0x1ab   :  { %2974 = vst.msk [vmem:[%s8219_s1 + $0x34f] sm:$0x20] %vm3_vm0, %v5194_v45  }
 0x1ac   :  { %2975 = vst.msk [vmem:[%s8219_s1 + $0x38e] sm:$0x40] %vm3_vm0, %v5194_v45  }
 0x1ad   :  { %2976 = vst.msk [vmem:[%s8219_s1 + $0x3cd] sm:$0x80] %vm3_vm0, %v5194_v45   ;;  %v2152_v45 = vpop.permute.xlu1 %2151  }
 0x1ae   :  { %3011 = vst.msk [vmem:[%s8219_s1 + $0x17] sm:$0x1] %vm3_vm0, %v942_v46  }
 0x1af   :  { %3012 = vst.msk [vmem:[%s8219_s1 + $0x56] sm:$0x2] %vm3_vm0, %v942_v46  }
 0x1b0   :  { %3013 = vst.msk [vmem:[%s8219_s1 + $0x95] sm:$0x4] %vm3_vm0, %v942_v46  }
 0x1b1   :  { %3014 = vst.msk [vmem:[%s8219_s1 + $0xd4] sm:$0x8] %vm3_vm0, %v942_v46  }
 0x1b2   :  { %3015 = vst.msk [vmem:[%s8219_s1 + $0x113] sm:$0x10] %vm3_vm0, %v942_v46  }
 0x1b3   :  { %3016 = vst.msk [vmem:[%s8219_s1 + $0x152] sm:$0x20] %vm3_vm0, %v942_v46  }
 0x1b4   :  { %3017 = vst.msk [vmem:[%s8219_s1 + $0x191] sm:$0x40] %vm3_vm0, %v942_v46  }
 0x1b5   :  { %3018 = vst.msk [vmem:[%s8219_s1 + $0x1d0] sm:$0x80] %vm3_vm0, %v942_v46   ;;  %v2131_v46 = vpop.permute.xlu0 %2130  }
 0x1b6   :  { %3003 = vst.msk [vmem:[%s8219_s1 + $0x216] sm:$0x1] %vm3_vm0, %v922_v47  }
 0x1b7   :  { %3004 = vst.msk [vmem:[%s8219_s1 + $0x255] sm:$0x2] %vm3_vm0, %v922_v47  }
 0x1b8   :  { %3005 = vst.msk [vmem:[%s8219_s1 + $0x294] sm:$0x4] %vm3_vm0, %v922_v47  }
 0x1b9   :  { %3006 = vst.msk [vmem:[%s8219_s1 + $0x2d3] sm:$0x8] %vm3_vm0, %v922_v47  }
 0x1ba   :  { %3007 = vst.msk [vmem:[%s8219_s1 + $0x312] sm:$0x10] %vm3_vm0, %v922_v47  }
 0x1bb   :  { %3008 = vst.msk [vmem:[%s8219_s1 + $0x351] sm:$0x20] %vm3_vm0, %v922_v47  }
 0x1bc   :  { %3009 = vst.msk [vmem:[%s8219_s1 + $0x390] sm:$0x40] %vm3_vm0, %v922_v47  }
 0x1bd   :  { %3010 = vst.msk [vmem:[%s8219_s1 + $0x3cf] sm:$0x80] %vm3_vm0, %v922_v47   ;;  %v2234_v47 = vpop.permute.xlu2 %2233  }
 0x1be   :  { %2994 = vst.msk [vmem:[%s8219_s1 + $0x16] sm:$0x1] %vm3_vm0, %v901_v48  }
 0x1bf   :  { %2995 = vst.msk [vmem:[%s8219_s1 + $0x55] sm:$0x2] %vm3_vm0, %v901_v48  }
 0x1c0   :  { %2996 = vst.msk [vmem:[%s8219_s1 + $0x94] sm:$0x4] %vm3_vm0, %v901_v48  }
 0x1c1   :  { %2997 = vst.msk [vmem:[%s8219_s1 + $0xd3] sm:$0x8] %vm3_vm0, %v901_v48  }
 0x1c2   :  { %2998 = vst.msk [vmem:[%s8219_s1 + $0x112] sm:$0x10] %vm3_vm0, %v901_v48  }
 0x1c3   :  { %2999 = vst.msk [vmem:[%s8219_s1 + $0x151] sm:$0x20] %vm3_vm0, %v901_v48  }
 0x1c4   :  { %3000 = vst.msk [vmem:[%s8219_s1 + $0x190] sm:$0x40] %vm3_vm0, %v901_v48  }
 0x1c5   :  { %3001 = vst.msk [vmem:[%s8219_s1 + $0x1cf] sm:$0x80] %vm3_vm0, %v901_v48   ;;  %v2213_v48 = vpop.permute.xlu1 %2212  }
 0x1c6   :  { %3037 = vst.msk [vmem:[%s8219_s1 + $0x218] sm:$0x1] %vm3_vm0, %v1004_v49  }
 0x1c7   :  { %3038 = vst.msk [vmem:[%s8219_s1 + $0x257] sm:$0x2] %vm3_vm0, %v1004_v49  }
 0x1c8   :  { %3039 = vst.msk [vmem:[%s8219_s1 + $0x296] sm:$0x4] %vm3_vm0, %v1004_v49  }
 0x1c9   :  { %3040 = vst.msk [vmem:[%s8219_s1 + $0x2d5] sm:$0x8] %vm3_vm0, %v1004_v49  }
 0x1ca   :  { %3041 = vst.msk [vmem:[%s8219_s1 + $0x314] sm:$0x10] %vm3_vm0, %v1004_v49  }
 0x1cb   :  { %3042 = vst.msk [vmem:[%s8219_s1 + $0x353] sm:$0x20] %vm3_vm0, %v1004_v49  }
 0x1cc   :  { %3043 = vst.msk [vmem:[%s8219_s1 + $0x392] sm:$0x40] %vm3_vm0, %v1004_v49  }
 0x1cd   :  { %3044 = vst.msk [vmem:[%s8219_s1 + $0x3d1] sm:$0x80] %vm3_vm0, %v1004_v49   ;;  %v2193_v49 = vpop.permute.xlu0 %2192  }
 0x1ce   :  { %3028 = vst.msk [vmem:[%s8219_s1 + $0x18] sm:$0x1] %vm3_vm0, %v983_v50  }
 0x1cf   :  { %3029 = vst.msk [vmem:[%s8219_s1 + $0x57] sm:$0x2] %vm3_vm0, %v983_v50  }
 0x1d0   :  { %3030 = vst.msk [vmem:[%s8219_s1 + $0x96] sm:$0x4] %vm3_vm0, %v983_v50  }
 0x1d1   :  { %3031 = vst.msk [vmem:[%s8219_s1 + $0xd5] sm:$0x8] %vm3_vm0, %v983_v50  }
 0x1d2   :  { %3032 = vst.msk [vmem:[%s8219_s1 + $0x114] sm:$0x10] %vm3_vm0, %v983_v50  }
 0x1d3   :  { %3033 = vst.msk [vmem:[%s8219_s1 + $0x153] sm:$0x20] %vm3_vm0, %v983_v50  }
 0x1d4   :  { %3034 = vst.msk [vmem:[%s8219_s1 + $0x192] sm:$0x40] %vm3_vm0, %v983_v50  }
 0x1d5   :  { %3035 = vst.msk [vmem:[%s8219_s1 + $0x1d1] sm:$0x80] %vm3_vm0, %v983_v50   ;;  %v2295_v50 = vpop.permute.xlu2 %2294  }
 0x1d6   :  { %3020 = vst.msk [vmem:[%s8219_s1 + $0x217] sm:$0x1] %vm3_vm0, %v963_v51  }
 0x1d7   :  { %3021 = vst.msk [vmem:[%s8219_s1 + $0x256] sm:$0x2] %vm3_vm0, %v963_v51  }
 0x1d8   :  { %3022 = vst.msk [vmem:[%s8219_s1 + $0x295] sm:$0x4] %vm3_vm0, %v963_v51  }
 0x1d9   :  { %3023 = vst.msk [vmem:[%s8219_s1 + $0x2d4] sm:$0x8] %vm3_vm0, %v963_v51  }
 0x1da   :  { %3024 = vst.msk [vmem:[%s8219_s1 + $0x313] sm:$0x10] %vm3_vm0, %v963_v51  }
 0x1db   :  { %3025 = vst.msk [vmem:[%s8219_s1 + $0x352] sm:$0x20] %vm3_vm0, %v963_v51  }
 0x1dc   :  { %3026 = vst.msk [vmem:[%s8219_s1 + $0x391] sm:$0x40] %vm3_vm0, %v963_v51  }
 0x1dd   :  { %3027 = vst.msk [vmem:[%s8219_s1 + $0x3d0] sm:$0x80] %vm3_vm0, %v963_v51   ;;  %v2275_v51 = vpop.permute.xlu1 %2274  }
 0x1de   :  { %3062 = vst.msk [vmem:[%s8219_s1 + $0x1a] sm:$0x1] %vm3_vm0, %v1065_v52  }
 0x1df   :  { %3063 = vst.msk [vmem:[%s8219_s1 + $0x59] sm:$0x2] %vm3_vm0, %v1065_v52  }
 0x1e0   :  { %3064 = vst.msk [vmem:[%s8219_s1 + $0x98] sm:$0x4] %vm3_vm0, %v1065_v52  }
 0x1e1   :  { %3065 = vst.msk [vmem:[%s8219_s1 + $0xd7] sm:$0x8] %vm3_vm0, %v1065_v52  }
 0x1e2   :  { %3066 = vst.msk [vmem:[%s8219_s1 + $0x116] sm:$0x10] %vm3_vm0, %v1065_v52  }
 0x1e3   :  { %3067 = vst.msk [vmem:[%s8219_s1 + $0x155] sm:$0x20] %vm3_vm0, %v1065_v52  }
 0x1e4   :  { %3068 = vst.msk [vmem:[%s8219_s1 + $0x194] sm:$0x40] %vm3_vm0, %v1065_v52  }
 0x1e5   :  { %3069 = vst.msk [vmem:[%s8219_s1 + $0x1d3] sm:$0x80] %vm3_vm0, %v1065_v52   ;;  %v2254_v52 = vpop.permute.xlu0 %2253  }
 0x1e6   :  { %3054 = vst.msk [vmem:[%s8219_s1 + $0x219] sm:$0x1] %vm3_vm0, %v1045_v53  }
 0x1e7   :  { %3055 = vst.msk [vmem:[%s8219_s1 + $0x258] sm:$0x2] %vm3_vm0, %v1045_v53  }
 0x1e8   :  { %3056 = vst.msk [vmem:[%s8219_s1 + $0x297] sm:$0x4] %vm3_vm0, %v1045_v53  }
 0x1e9   :  { %3057 = vst.msk [vmem:[%s8219_s1 + $0x2d6] sm:$0x8] %vm3_vm0, %v1045_v53  }
 0x1ea   :  { %3058 = vst.msk [vmem:[%s8219_s1 + $0x315] sm:$0x10] %vm3_vm0, %v1045_v53  }
 0x1eb   :  { %3059 = vst.msk [vmem:[%s8219_s1 + $0x354] sm:$0x20] %vm3_vm0, %v1045_v53  }
 0x1ec   :  { %3060 = vst.msk [vmem:[%s8219_s1 + $0x393] sm:$0x40] %vm3_vm0, %v1045_v53  }
 0x1ed   :  { %3061 = vst.msk [vmem:[%s8219_s1 + $0x3d2] sm:$0x80] %vm3_vm0, %v1045_v53   ;;  %v2357_v53 = vpop.permute.xlu2 %2356  }
 0x1ee   :  { %3045 = vst.msk [vmem:[%s8219_s1 + $0x19] sm:$0x1] %vm3_vm0, %v1024_v54  }
 0x1ef   :  { %3046 = vst.msk [vmem:[%s8219_s1 + $0x58] sm:$0x2] %vm3_vm0, %v1024_v54  }
 0x1f0   :  { %3047 = vst.msk [vmem:[%s8219_s1 + $0x97] sm:$0x4] %vm3_vm0, %v1024_v54  }
 0x1f1   :  { %3048 = vst.msk [vmem:[%s8219_s1 + $0xd6] sm:$0x8] %vm3_vm0, %v1024_v54  }
 0x1f2   :  { %3049 = vst.msk [vmem:[%s8219_s1 + $0x115] sm:$0x10] %vm3_vm0, %v1024_v54  }
 0x1f3   :  { %3050 = vst.msk [vmem:[%s8219_s1 + $0x154] sm:$0x20] %vm3_vm0, %v1024_v54  }
 0x1f4   :  { %3051 = vst.msk [vmem:[%s8219_s1 + $0x193] sm:$0x40] %vm3_vm0, %v1024_v54  }
 0x1f5   :  { %3052 = vst.msk [vmem:[%s8219_s1 + $0x1d2] sm:$0x80] %vm3_vm0, %v1024_v54   ;;  %v2336_v54 = vpop.permute.xlu1 %2335  }
 0x1f6   :  { %3088 = vst.msk [vmem:[%s8219_s1 + $0x21b] sm:$0x1] %vm3_vm0, %v1127_v55  }
 0x1f7   :  { %3089 = vst.msk [vmem:[%s8219_s1 + $0x25a] sm:$0x2] %vm3_vm0, %v1127_v55  }
 0x1f8   :  { %3090 = vst.msk [vmem:[%s8219_s1 + $0x299] sm:$0x4] %vm3_vm0, %v1127_v55  }
 0x1f9   :  { %3091 = vst.msk [vmem:[%s8219_s1 + $0x2d8] sm:$0x8] %vm3_vm0, %v1127_v55  }
 0x1fa   :  { %3092 = vst.msk [vmem:[%s8219_s1 + $0x317] sm:$0x10] %vm3_vm0, %v1127_v55  }
 0x1fb   :  { %3093 = vst.msk [vmem:[%s8219_s1 + $0x356] sm:$0x20] %vm3_vm0, %v1127_v55  }
 0x1fc   :  { %3094 = vst.msk [vmem:[%s8219_s1 + $0x395] sm:$0x40] %vm3_vm0, %v1127_v55  }
 0x1fd   :  { %3095 = vst.msk [vmem:[%s8219_s1 + $0x3d4] sm:$0x80] %vm3_vm0, %v1127_v55   ;;  %v2316_v55 = vpop.permute.xlu0 %2315  }
 0x1fe   :  { %3079 = vst.msk [vmem:[%s8219_s1 + $0x1b] sm:$0x1] %vm3_vm0, %v1106_v56  }
 0x1ff   :  { %3080 = vst.msk [vmem:[%s8219_s1 + $0x5a] sm:$0x2] %vm3_vm0, %v1106_v56  }
 0x200   :  { %3081 = vst.msk [vmem:[%s8219_s1 + $0x99] sm:$0x4] %vm3_vm0, %v1106_v56  }
 0x201   :  { %3082 = vst.msk [vmem:[%s8219_s1 + $0xd8] sm:$0x8] %vm3_vm0, %v1106_v56  }
 0x202   :  { %3083 = vst.msk [vmem:[%s8219_s1 + $0x117] sm:$0x10] %vm3_vm0, %v1106_v56  }
 0x203   :  { %3084 = vst.msk [vmem:[%s8219_s1 + $0x156] sm:$0x20] %vm3_vm0, %v1106_v56  }
 0x204   :  { %3085 = vst.msk [vmem:[%s8219_s1 + $0x195] sm:$0x40] %vm3_vm0, %v1106_v56  }
 0x205   :  { %3086 = vst.msk [vmem:[%s8219_s1 + $0x1d4] sm:$0x80] %vm3_vm0, %v1106_v56   ;;  %v2418_v56 = vpop.permute.xlu2 %2417  }
 0x206   :  { %3071 = vst.msk [vmem:[%s8219_s1 + $0x21a] sm:$0x1] %vm3_vm0, %v1086_v57  }
 0x207   :  { %3072 = vst.msk [vmem:[%s8219_s1 + $0x259] sm:$0x2] %vm3_vm0, %v1086_v57  }
 0x208   :  { %3073 = vst.msk [vmem:[%s8219_s1 + $0x298] sm:$0x4] %vm3_vm0, %v1086_v57  }
 0x209   :  { %3074 = vst.msk [vmem:[%s8219_s1 + $0x2d7] sm:$0x8] %vm3_vm0, %v1086_v57  }
 0x20a   :  { %3075 = vst.msk [vmem:[%s8219_s1 + $0x316] sm:$0x10] %vm3_vm0, %v1086_v57  }
 0x20b   :  { %3076 = vst.msk [vmem:[%s8219_s1 + $0x355] sm:$0x20] %vm3_vm0, %v1086_v57  }
 0x20c   :  { %3077 = vst.msk [vmem:[%s8219_s1 + $0x394] sm:$0x40] %vm3_vm0, %v1086_v57  }
 0x20d   :  { %3078 = vst.msk [vmem:[%s8219_s1 + $0x3d3] sm:$0x80] %vm3_vm0, %v1086_v57   ;;  %v2398_v57 = vpop.permute.xlu1 %2397  }
 0x20e   :  { %3113 = vst.msk [vmem:[%s8219_s1 + $0x1d] sm:$0x1] %vm3_vm0, %v1188_v58  }
 0x20f   :  { %3114 = vst.msk [vmem:[%s8219_s1 + $0x5c] sm:$0x2] %vm3_vm0, %v1188_v58  }
 0x210   :  { %3115 = vst.msk [vmem:[%s8219_s1 + $0x9b] sm:$0x4] %vm3_vm0, %v1188_v58  }
 0x211   :  { %3116 = vst.msk [vmem:[%s8219_s1 + $0xda] sm:$0x8] %vm3_vm0, %v1188_v58  }
 0x212   :  { %3117 = vst.msk [vmem:[%s8219_s1 + $0x119] sm:$0x10] %vm3_vm0, %v1188_v58  }
 0x213   :  { %3118 = vst.msk [vmem:[%s8219_s1 + $0x158] sm:$0x20] %vm3_vm0, %v1188_v58  }
 0x214   :  { %3119 = vst.msk [vmem:[%s8219_s1 + $0x197] sm:$0x40] %vm3_vm0, %v1188_v58  }
 0x215   :  { %3120 = vst.msk [vmem:[%s8219_s1 + $0x1d6] sm:$0x80] %vm3_vm0, %v1188_v58   ;;  %v2377_v58 = vpop.permute.xlu0 %2376  }
 0x216   :  { %3105 = vst.msk [vmem:[%s8219_s1 + $0x21c] sm:$0x1] %vm3_vm0, %v1168_v59  }
 0x217   :  { %3106 = vst.msk [vmem:[%s8219_s1 + $0x25b] sm:$0x2] %vm3_vm0, %v1168_v59  }
 0x218   :  { %3107 = vst.msk [vmem:[%s8219_s1 + $0x29a] sm:$0x4] %vm3_vm0, %v1168_v59  }
 0x219   :  { %3108 = vst.msk [vmem:[%s8219_s1 + $0x2d9] sm:$0x8] %vm3_vm0, %v1168_v59  }
 0x21a   :  { %3109 = vst.msk [vmem:[%s8219_s1 + $0x318] sm:$0x10] %vm3_vm0, %v1168_v59  }
 0x21b   :  { %3110 = vst.msk [vmem:[%s8219_s1 + $0x357] sm:$0x20] %vm3_vm0, %v1168_v59  }
 0x21c   :  { %3111 = vst.msk [vmem:[%s8219_s1 + $0x396] sm:$0x40] %vm3_vm0, %v1168_v59  }
 0x21d   :  { %3112 = vst.msk [vmem:[%s8219_s1 + $0x3d5] sm:$0x80] %vm3_vm0, %v1168_v59   ;;  %v2480_v59 = vpop.permute.xlu2 %2479  }
 0x21e   :  { %3096 = vst.msk [vmem:[%s8219_s1 + $0x1c] sm:$0x1] %vm3_vm0, %v1147_v60  }
 0x21f   :  { %3097 = vst.msk [vmem:[%s8219_s1 + $0x5b] sm:$0x2] %vm3_vm0, %v1147_v60  }
 0x220   :  { %3098 = vst.msk [vmem:[%s8219_s1 + $0x9a] sm:$0x4] %vm3_vm0, %v1147_v60  }
 0x221   :  { %3099 = vst.msk [vmem:[%s8219_s1 + $0xd9] sm:$0x8] %vm3_vm0, %v1147_v60  }
 0x222   :  { %3100 = vst.msk [vmem:[%s8219_s1 + $0x118] sm:$0x10] %vm3_vm0, %v1147_v60  }
 0x223   :  { %3101 = vst.msk [vmem:[%s8219_s1 + $0x157] sm:$0x20] %vm3_vm0, %v1147_v60  }
 0x224   :  { %3102 = vst.msk [vmem:[%s8219_s1 + $0x196] sm:$0x40] %vm3_vm0, %v1147_v60  }
 0x225   :  { %3103 = vst.msk [vmem:[%s8219_s1 + $0x1d5] sm:$0x80] %vm3_vm0, %v1147_v60   ;;  %v2459_v60 = vpop.permute.xlu1 %2458  }
 0x226   :  { %3139 = vst.msk [vmem:[%s8219_s1 + $0x21e] sm:$0x1] %vm3_vm0, %v1250_v61  }
 0x227   :  { %3140 = vst.msk [vmem:[%s8219_s1 + $0x25d] sm:$0x2] %vm3_vm0, %v1250_v61  }
 0x228   :  { %3141 = vst.msk [vmem:[%s8219_s1 + $0x29c] sm:$0x4] %vm3_vm0, %v1250_v61  }
 0x229   :  { %3142 = vst.msk [vmem:[%s8219_s1 + $0x2db] sm:$0x8] %vm3_vm0, %v1250_v61  }
 0x22a   :  { %3143 = vst.msk [vmem:[%s8219_s1 + $0x31a] sm:$0x10] %vm3_vm0, %v1250_v61  }
 0x22b   :  { %3144 = vst.msk [vmem:[%s8219_s1 + $0x359] sm:$0x20] %vm3_vm0, %v1250_v61  }
 0x22c   :  { %3145 = vst.msk [vmem:[%s8219_s1 + $0x398] sm:$0x40] %vm3_vm0, %v1250_v61  }
 0x22d   :  { %3146 = vst.msk [vmem:[%s8219_s1 + $0x3d7] sm:$0x80] %vm3_vm0, %v1250_v61   ;;  %v2439_v61 = vpop.permute.xlu0 %2438  }
 0x22e   :  { %3130 = vst.msk [vmem:[%s8219_s1 + $0x1e] sm:$0x1] %vm3_vm0, %v1229_v62  }
 0x22f   :  { %3131 = vst.msk [vmem:[%s8219_s1 + $0x5d] sm:$0x2] %vm3_vm0, %v1229_v62  }
 0x230   :  { %3132 = vst.msk [vmem:[%s8219_s1 + $0x9c] sm:$0x4] %vm3_vm0, %v1229_v62  }
 0x231   :  { %3133 = vst.msk [vmem:[%s8219_s1 + $0xdb] sm:$0x8] %vm3_vm0, %v1229_v62  }
 0x232   :  { %3134 = vst.msk [vmem:[%s8219_s1 + $0x11a] sm:$0x10] %vm3_vm0, %v1229_v62  }
 0x233   :  { %3135 = vst.msk [vmem:[%s8219_s1 + $0x159] sm:$0x20] %vm3_vm0, %v1229_v62  }
 0x234   :  { %3136 = vst.msk [vmem:[%s8219_s1 + $0x198] sm:$0x40] %vm3_vm0, %v1229_v62  }
 0x235   :  { %3137 = vst.msk [vmem:[%s8219_s1 + $0x1d7] sm:$0x80] %vm3_vm0, %v1229_v62   ;;  %v2541_v62 = vpop.permute.xlu2 %2540  }
 0x236   :  { %3122 = vst.msk [vmem:[%s8219_s1 + $0x21d] sm:$0x1] %vm3_vm0, %v1209_v63  }
 0x237   :  { %3123 = vst.msk [vmem:[%s8219_s1 + $0x25c] sm:$0x2] %vm3_vm0, %v1209_v63  }
 0x238   :  { %3124 = vst.msk [vmem:[%s8219_s1 + $0x29b] sm:$0x4] %vm3_vm0, %v1209_v63  }
 0x239   :  { %3125 = vst.msk [vmem:[%s8219_s1 + $0x2da] sm:$0x8] %vm3_vm0, %v1209_v63  }
 0x23a   :  { %3126 = vst.msk [vmem:[%s8219_s1 + $0x319] sm:$0x10] %vm3_vm0, %v1209_v63  }
 0x23b   :  { %3127 = vst.msk [vmem:[%s8219_s1 + $0x358] sm:$0x20] %vm3_vm0, %v1209_v63  }
 0x23c   :  { %3128 = vst.msk [vmem:[%s8219_s1 + $0x397] sm:$0x40] %vm3_vm0, %v1209_v63  }
 0x23d   :  { %3129 = vst.msk [vmem:[%s8219_s1 + $0x3d6] sm:$0x80] %vm3_vm0, %v1209_v63   ;;  %v2521_v63 = vpop.permute.xlu1 %2520  }
 0x23e   :  { %3164 = vst.msk [vmem:[%s8219_s1 + $0x20] sm:$0x1] %vm3_vm0, %v1311_v0  }
 0x23f   :  { %3165 = vst.msk [vmem:[%s8219_s1 + $0x5f] sm:$0x2] %vm3_vm0, %v1311_v0  }
 0x240   :  { %3166 = vst.msk [vmem:[%s8219_s1 + $0x9e] sm:$0x4] %vm3_vm0, %v1311_v0  }
 0x241   :  { %3167 = vst.msk [vmem:[%s8219_s1 + $0xdd] sm:$0x8] %vm3_vm0, %v1311_v0  }
 0x242   :  { %3168 = vst.msk [vmem:[%s8219_s1 + $0x11c] sm:$0x10] %vm3_vm0, %v1311_v0  }
 0x243   :  { %3169 = vst.msk [vmem:[%s8219_s1 + $0x15b] sm:$0x20] %vm3_vm0, %v1311_v0  }
 0x244   :  { %3170 = vst.msk [vmem:[%s8219_s1 + $0x19a] sm:$0x40] %vm3_vm0, %v1311_v0  }
 0x245   :  { %3171 = vst.msk [vmem:[%s8219_s1 + $0x1d9] sm:$0x80] %vm3_vm0, %v1311_v0   ;;  %v2500_v0 = vpop.permute.xlu0 %2499  }
 0x246   :  { %3156 = vst.msk [vmem:[%s8219_s1 + $0x21f] sm:$0x1] %vm3_vm0, %v1291_v1  }
 0x247   :  { %3157 = vst.msk [vmem:[%s8219_s1 + $0x25e] sm:$0x2] %vm3_vm0, %v1291_v1  }
 0x248   :  { %3158 = vst.msk [vmem:[%s8219_s1 + $0x29d] sm:$0x4] %vm3_vm0, %v1291_v1  }
 0x249   :  { %3159 = vst.msk [vmem:[%s8219_s1 + $0x2dc] sm:$0x8] %vm3_vm0, %v1291_v1  }
 0x24a   :  { %3160 = vst.msk [vmem:[%s8219_s1 + $0x31b] sm:$0x10] %vm3_vm0, %v1291_v1  }
 0x24b   :  { %3161 = vst.msk [vmem:[%s8219_s1 + $0x35a] sm:$0x20] %vm3_vm0, %v1291_v1  }
 0x24c   :  { %3162 = vst.msk [vmem:[%s8219_s1 + $0x399] sm:$0x40] %vm3_vm0, %v1291_v1  }
 0x24d   :  { %3163 = vst.msk [vmem:[%s8219_s1 + $0x3d8] sm:$0x80] %vm3_vm0, %v1291_v1   ;;  %v2603_v1 = vpop.permute.xlu2 %2602  }
 0x24e   :  { %3147 = vst.msk [vmem:[%s8219_s1 + $0x1f] sm:$0x1] %vm3_vm0, %v1270_v2  }
 0x24f   :  { %3148 = vst.msk [vmem:[%s8219_s1 + $0x5e] sm:$0x2] %vm3_vm0, %v1270_v2  }
 0x250   :  { %3149 = vst.msk [vmem:[%s8219_s1 + $0x9d] sm:$0x4] %vm3_vm0, %v1270_v2  }
 0x251   :  { %3150 = vst.msk [vmem:[%s8219_s1 + $0xdc] sm:$0x8] %vm3_vm0, %v1270_v2  }
 0x252   :  { %3151 = vst.msk [vmem:[%s8219_s1 + $0x11b] sm:$0x10] %vm3_vm0, %v1270_v2  }
 0x253   :  { %3152 = vst.msk [vmem:[%s8219_s1 + $0x15a] sm:$0x20] %vm3_vm0, %v1270_v2  }
 0x254   :  { %3153 = vst.msk [vmem:[%s8219_s1 + $0x199] sm:$0x40] %vm3_vm0, %v1270_v2  }
 0x255   :  { %3154 = vst.msk [vmem:[%s8219_s1 + $0x1d8] sm:$0x80] %vm3_vm0, %v1270_v2   ;;  %v2582_v2 = vpop.permute.xlu1 %2581  }
 0x256   :  { %3190 = vst.msk [vmem:[%s8219_s1 + $0x221] sm:$0x1] %vm3_vm0, %v1373_v3  }
 0x257   :  { %3191 = vst.msk [vmem:[%s8219_s1 + $0x260] sm:$0x2] %vm3_vm0, %v1373_v3  }
 0x258   :  { %3192 = vst.msk [vmem:[%s8219_s1 + $0x29f] sm:$0x4] %vm3_vm0, %v1373_v3  }
 0x259   :  { %3193 = vst.msk [vmem:[%s8219_s1 + $0x2de] sm:$0x8] %vm3_vm0, %v1373_v3  }
 0x25a   :  { %3194 = vst.msk [vmem:[%s8219_s1 + $0x31d] sm:$0x10] %vm3_vm0, %v1373_v3  }
 0x25b   :  { %3195 = vst.msk [vmem:[%s8219_s1 + $0x35c] sm:$0x20] %vm3_vm0, %v1373_v3  }
 0x25c   :  { %3196 = vst.msk [vmem:[%s8219_s1 + $0x39b] sm:$0x40] %vm3_vm0, %v1373_v3  }
 0x25d   :  { %3197 = vst.msk [vmem:[%s8219_s1 + $0x3da] sm:$0x80] %vm3_vm0, %v1373_v3   ;;  %v2562_v3 = vpop.permute.xlu0 %2561  }
 0x25e   :  { %3181 = vst.msk [vmem:[%s8219_s1 + $0x21] sm:$0x1] %vm3_vm0, %v1352_v4  }
 0x25f   :  { %3182 = vst.msk [vmem:[%s8219_s1 + $0x60] sm:$0x2] %vm3_vm0, %v1352_v4  }
 0x260   :  { %3183 = vst.msk [vmem:[%s8219_s1 + $0x9f] sm:$0x4] %vm3_vm0, %v1352_v4  }
 0x261   :  { %3184 = vst.msk [vmem:[%s8219_s1 + $0xde] sm:$0x8] %vm3_vm0, %v1352_v4  }
 0x262   :  { %3185 = vst.msk [vmem:[%s8219_s1 + $0x11d] sm:$0x10] %vm3_vm0, %v1352_v4  }
 0x263   :  { %3186 = vst.msk [vmem:[%s8219_s1 + $0x15c] sm:$0x20] %vm3_vm0, %v1352_v4  }
 0x264   :  { %3187 = vst.msk [vmem:[%s8219_s1 + $0x19b] sm:$0x40] %vm3_vm0, %v1352_v4  }
 0x265   :  { %3188 = vst.msk [vmem:[%s8219_s1 + $0x1da] sm:$0x80] %vm3_vm0, %v1352_v4  }
 0x266   :  { %3173 = vst.msk [vmem:[%s8219_s1 + $0x220] sm:$0x1] %vm3_vm0, %v1332_v5  }
 0x267   :  { %3174 = vst.msk [vmem:[%s8219_s1 + $0x25f] sm:$0x2] %vm3_vm0, %v1332_v5  }
 0x268   :  { %3175 = vst.msk [vmem:[%s8219_s1 + $0x29e] sm:$0x4] %vm3_vm0, %v1332_v5  }
 0x269   :  { %3176 = vst.msk [vmem:[%s8219_s1 + $0x2dd] sm:$0x8] %vm3_vm0, %v1332_v5  }
 0x26a   :  { %3177 = vst.msk [vmem:[%s8219_s1 + $0x31c] sm:$0x10] %vm3_vm0, %v1332_v5  }
 0x26b   :  { %3178 = vst.msk [vmem:[%s8219_s1 + $0x35b] sm:$0x20] %vm3_vm0, %v1332_v5  }
 0x26c   :  { %3179 = vst.msk [vmem:[%s8219_s1 + $0x39a] sm:$0x40] %vm3_vm0, %v1332_v5  }
 0x26d   :  { %3180 = vst.msk [vmem:[%s8219_s1 + $0x3d9] sm:$0x80] %vm3_vm0, %v1332_v5  }
 0x26e   :  { %3215 = vst.msk [vmem:[%s8219_s1 + $0x23] sm:$0x1] %vm3_vm0, %v1434_v6  }
 0x26f   :  { %3216 = vst.msk [vmem:[%s8219_s1 + $0x62] sm:$0x2] %vm3_vm0, %v1434_v6  }
 0x270   :  { %3217 = vst.msk [vmem:[%s8219_s1 + $0xa1] sm:$0x4] %vm3_vm0, %v1434_v6  }
 0x271   :  { %3218 = vst.msk [vmem:[%s8219_s1 + $0xe0] sm:$0x8] %vm3_vm0, %v1434_v6  }
 0x272   :  { %3219 = vst.msk [vmem:[%s8219_s1 + $0x11f] sm:$0x10] %vm3_vm0, %v1434_v6  }
 0x273   :  { %3220 = vst.msk [vmem:[%s8219_s1 + $0x15e] sm:$0x20] %vm3_vm0, %v1434_v6  }
 0x274   :  { %3221 = vst.msk [vmem:[%s8219_s1 + $0x19d] sm:$0x40] %vm3_vm0, %v1434_v6  }
 0x275   :  { %3222 = vst.msk [vmem:[%s8219_s1 + $0x1dc] sm:$0x80] %vm3_vm0, %v1434_v6  }
 0x276   :  { %3207 = vst.msk [vmem:[%s8219_s1 + $0x222] sm:$0x1] %vm3_vm0, %v1414_v7  }
 0x277   :  { %3208 = vst.msk [vmem:[%s8219_s1 + $0x261] sm:$0x2] %vm3_vm0, %v1414_v7  }
 0x278   :  { %3209 = vst.msk [vmem:[%s8219_s1 + $0x2a0] sm:$0x4] %vm3_vm0, %v1414_v7  }
 0x279   :  { %3210 = vst.msk [vmem:[%s8219_s1 + $0x2df] sm:$0x8] %vm3_vm0, %v1414_v7  }
 0x27a   :  { %3211 = vst.msk [vmem:[%s8219_s1 + $0x31e] sm:$0x10] %vm3_vm0, %v1414_v7  }
 0x27b   :  { %3212 = vst.msk [vmem:[%s8219_s1 + $0x35d] sm:$0x20] %vm3_vm0, %v1414_v7  }
 0x27c   :  { %3213 = vst.msk [vmem:[%s8219_s1 + $0x39c] sm:$0x40] %vm3_vm0, %v1414_v7  }
 0x27d   :  { %3214 = vst.msk [vmem:[%s8219_s1 + $0x3db] sm:$0x80] %vm3_vm0, %v1414_v7  }
 0x27e   :  { %3198 = vst.msk [vmem:[%s8219_s1 + $0x22] sm:$0x1] %vm3_vm0, %v1393_v8  }
 0x27f   :  { %3199 = vst.msk [vmem:[%s8219_s1 + $0x61] sm:$0x2] %vm3_vm0, %v1393_v8  }
 0x280   :  { %3200 = vst.msk [vmem:[%s8219_s1 + $0xa0] sm:$0x4] %vm3_vm0, %v1393_v8  }
 0x281   :  { %3201 = vst.msk [vmem:[%s8219_s1 + $0xdf] sm:$0x8] %vm3_vm0, %v1393_v8  }
 0x282   :  { %3202 = vst.msk [vmem:[%s8219_s1 + $0x11e] sm:$0x10] %vm3_vm0, %v1393_v8  }
 0x283   :  { %3203 = vst.msk [vmem:[%s8219_s1 + $0x15d] sm:$0x20] %vm3_vm0, %v1393_v8  }
 0x284   :  { %3204 = vst.msk [vmem:[%s8219_s1 + $0x19c] sm:$0x40] %vm3_vm0, %v1393_v8  }
 0x285   :  { %3205 = vst.msk [vmem:[%s8219_s1 + $0x1db] sm:$0x80] %vm3_vm0, %v1393_v8  }
 0x286   :  { %3241 = vst.msk [vmem:[%s8219_s1 + $0x224] sm:$0x1] %vm3_vm0, %v1496_v9  }
 0x287   :  { %3242 = vst.msk [vmem:[%s8219_s1 + $0x263] sm:$0x2] %vm3_vm0, %v1496_v9  }
 0x288   :  { %3243 = vst.msk [vmem:[%s8219_s1 + $0x2a2] sm:$0x4] %vm3_vm0, %v1496_v9  }
 0x289   :  { %3244 = vst.msk [vmem:[%s8219_s1 + $0x2e1] sm:$0x8] %vm3_vm0, %v1496_v9  }
 0x28a   :  { %3245 = vst.msk [vmem:[%s8219_s1 + $0x320] sm:$0x10] %vm3_vm0, %v1496_v9  }
 0x28b   :  { %3246 = vst.msk [vmem:[%s8219_s1 + $0x35f] sm:$0x20] %vm3_vm0, %v1496_v9  }
 0x28c   :  { %3247 = vst.msk [vmem:[%s8219_s1 + $0x39e] sm:$0x40] %vm3_vm0, %v1496_v9  }
 0x28d   :  { %3248 = vst.msk [vmem:[%s8219_s1 + $0x3dd] sm:$0x80] %vm3_vm0, %v1496_v9  }
 0x28e   :  { %3232 = vst.msk [vmem:[%s8219_s1 + $0x24] sm:$0x1] %vm3_vm0, %v1475_v10  }
 0x28f   :  { %3233 = vst.msk [vmem:[%s8219_s1 + $0x63] sm:$0x2] %vm3_vm0, %v1475_v10  }
 0x290   :  { %3234 = vst.msk [vmem:[%s8219_s1 + $0xa2] sm:$0x4] %vm3_vm0, %v1475_v10  }
 0x291   :  { %3235 = vst.msk [vmem:[%s8219_s1 + $0xe1] sm:$0x8] %vm3_vm0, %v1475_v10  }
 0x292   :  { %3236 = vst.msk [vmem:[%s8219_s1 + $0x120] sm:$0x10] %vm3_vm0, %v1475_v10  }
 0x293   :  { %3237 = vst.msk [vmem:[%s8219_s1 + $0x15f] sm:$0x20] %vm3_vm0, %v1475_v10  }
 0x294   :  { %3238 = vst.msk [vmem:[%s8219_s1 + $0x19e] sm:$0x40] %vm3_vm0, %v1475_v10  }
 0x295   :  { %3239 = vst.msk [vmem:[%s8219_s1 + $0x1dd] sm:$0x80] %vm3_vm0, %v1475_v10  }
 0x296   :  { %3224 = vst.msk [vmem:[%s8219_s1 + $0x223] sm:$0x1] %vm3_vm0, %v1455_v11  }
 0x297   :  { %3225 = vst.msk [vmem:[%s8219_s1 + $0x262] sm:$0x2] %vm3_vm0, %v1455_v11  }
 0x298   :  { %3226 = vst.msk [vmem:[%s8219_s1 + $0x2a1] sm:$0x4] %vm3_vm0, %v1455_v11  }
 0x299   :  { %3227 = vst.msk [vmem:[%s8219_s1 + $0x2e0] sm:$0x8] %vm3_vm0, %v1455_v11  }
 0x29a   :  { %3228 = vst.msk [vmem:[%s8219_s1 + $0x31f] sm:$0x10] %vm3_vm0, %v1455_v11  }
 0x29b   :  { %3229 = vst.msk [vmem:[%s8219_s1 + $0x35e] sm:$0x20] %vm3_vm0, %v1455_v11  }
 0x29c   :  { %3230 = vst.msk [vmem:[%s8219_s1 + $0x39d] sm:$0x40] %vm3_vm0, %v1455_v11  }
 0x29d   :  { %3231 = vst.msk [vmem:[%s8219_s1 + $0x3dc] sm:$0x80] %vm3_vm0, %v1455_v11  }
 0x29e   :  { %3266 = vst.msk [vmem:[%s8219_s1 + $0x26] sm:$0x1] %vm3_vm0, %v1557_v12  }
 0x29f   :  { %3267 = vst.msk [vmem:[%s8219_s1 + $0x65] sm:$0x2] %vm3_vm0, %v1557_v12  }
 0x2a0   :  { %3268 = vst.msk [vmem:[%s8219_s1 + $0xa4] sm:$0x4] %vm3_vm0, %v1557_v12  }
 0x2a1   :  { %3269 = vst.msk [vmem:[%s8219_s1 + $0xe3] sm:$0x8] %vm3_vm0, %v1557_v12  }
 0x2a2   :  { %3270 = vst.msk [vmem:[%s8219_s1 + $0x122] sm:$0x10] %vm3_vm0, %v1557_v12  }
 0x2a3   :  { %3271 = vst.msk [vmem:[%s8219_s1 + $0x161] sm:$0x20] %vm3_vm0, %v1557_v12  }
 0x2a4   :  { %3272 = vst.msk [vmem:[%s8219_s1 + $0x1a0] sm:$0x40] %vm3_vm0, %v1557_v12  }
 0x2a5   :  { %3273 = vst.msk [vmem:[%s8219_s1 + $0x1df] sm:$0x80] %vm3_vm0, %v1557_v12  }
 0x2a6   :  { %3258 = vst.msk [vmem:[%s8219_s1 + $0x225] sm:$0x1] %vm3_vm0, %v1537_v13  }
 0x2a7   :  { %3259 = vst.msk [vmem:[%s8219_s1 + $0x264] sm:$0x2] %vm3_vm0, %v1537_v13  }
 0x2a8   :  { %3260 = vst.msk [vmem:[%s8219_s1 + $0x2a3] sm:$0x4] %vm3_vm0, %v1537_v13  }
 0x2a9   :  { %3261 = vst.msk [vmem:[%s8219_s1 + $0x2e2] sm:$0x8] %vm3_vm0, %v1537_v13  }
 0x2aa   :  { %3262 = vst.msk [vmem:[%s8219_s1 + $0x321] sm:$0x10] %vm3_vm0, %v1537_v13  }
 0x2ab   :  { %3263 = vst.msk [vmem:[%s8219_s1 + $0x360] sm:$0x20] %vm3_vm0, %v1537_v13  }
 0x2ac   :  { %3264 = vst.msk [vmem:[%s8219_s1 + $0x39f] sm:$0x40] %vm3_vm0, %v1537_v13  }
 0x2ad   :  { %3265 = vst.msk [vmem:[%s8219_s1 + $0x3de] sm:$0x80] %vm3_vm0, %v1537_v13  }
 0x2ae   :  { %3249 = vst.msk [vmem:[%s8219_s1 + $0x25] sm:$0x1] %vm3_vm0, %v1516_v14  }
 0x2af   :  { %3250 = vst.msk [vmem:[%s8219_s1 + $0x64] sm:$0x2] %vm3_vm0, %v1516_v14  }
 0x2b0   :  { %3251 = vst.msk [vmem:[%s8219_s1 + $0xa3] sm:$0x4] %vm3_vm0, %v1516_v14  }
 0x2b1   :  { %3252 = vst.msk [vmem:[%s8219_s1 + $0xe2] sm:$0x8] %vm3_vm0, %v1516_v14  }
 0x2b2   :  { %3253 = vst.msk [vmem:[%s8219_s1 + $0x121] sm:$0x10] %vm3_vm0, %v1516_v14  }
 0x2b3   :  { %3254 = vst.msk [vmem:[%s8219_s1 + $0x160] sm:$0x20] %vm3_vm0, %v1516_v14  }
 0x2b4   :  { %3255 = vst.msk [vmem:[%s8219_s1 + $0x19f] sm:$0x40] %vm3_vm0, %v1516_v14  }
 0x2b5   :  { %3256 = vst.msk [vmem:[%s8219_s1 + $0x1de] sm:$0x80] %vm3_vm0, %v1516_v14  }
 0x2b6   :  { %3292 = vst.msk [vmem:[%s8219_s1 + $0x227] sm:$0x1] %vm3_vm0, %v1619_v15  }
 0x2b7   :  { %3293 = vst.msk [vmem:[%s8219_s1 + $0x266] sm:$0x2] %vm3_vm0, %v1619_v15  }
 0x2b8   :  { %3294 = vst.msk [vmem:[%s8219_s1 + $0x2a5] sm:$0x4] %vm3_vm0, %v1619_v15  }
 0x2b9   :  { %3295 = vst.msk [vmem:[%s8219_s1 + $0x2e4] sm:$0x8] %vm3_vm0, %v1619_v15  }
 0x2ba   :  { %3296 = vst.msk [vmem:[%s8219_s1 + $0x323] sm:$0x10] %vm3_vm0, %v1619_v15  }
 0x2bb   :  { %3297 = vst.msk [vmem:[%s8219_s1 + $0x362] sm:$0x20] %vm3_vm0, %v1619_v15  }
 0x2bc   :  { %3298 = vst.msk [vmem:[%s8219_s1 + $0x3a1] sm:$0x40] %vm3_vm0, %v1619_v15  }
 0x2bd   :  { %3299 = vst.msk [vmem:[%s8219_s1 + $0x3e0] sm:$0x80] %vm3_vm0, %v1619_v15  }
 0x2be   :  { %3283 = vst.msk [vmem:[%s8219_s1 + $0x27] sm:$0x1] %vm3_vm0, %v1598_v16  }
 0x2bf   :  { %3284 = vst.msk [vmem:[%s8219_s1 + $0x66] sm:$0x2] %vm3_vm0, %v1598_v16  }
 0x2c0   :  { %3285 = vst.msk [vmem:[%s8219_s1 + $0xa5] sm:$0x4] %vm3_vm0, %v1598_v16  }
 0x2c1   :  { %3286 = vst.msk [vmem:[%s8219_s1 + $0xe4] sm:$0x8] %vm3_vm0, %v1598_v16  }
 0x2c2   :  { %3287 = vst.msk [vmem:[%s8219_s1 + $0x123] sm:$0x10] %vm3_vm0, %v1598_v16  }
 0x2c3   :  { %3288 = vst.msk [vmem:[%s8219_s1 + $0x162] sm:$0x20] %vm3_vm0, %v1598_v16  }
 0x2c4   :  { %3289 = vst.msk [vmem:[%s8219_s1 + $0x1a1] sm:$0x40] %vm3_vm0, %v1598_v16  }
 0x2c5   :  { %3290 = vst.msk [vmem:[%s8219_s1 + $0x1e0] sm:$0x80] %vm3_vm0, %v1598_v16  }
 0x2c6   :  { %3275 = vst.msk [vmem:[%s8219_s1 + $0x226] sm:$0x1] %vm3_vm0, %v1578_v17  }
 0x2c7   :  { %3276 = vst.msk [vmem:[%s8219_s1 + $0x265] sm:$0x2] %vm3_vm0, %v1578_v17  }
 0x2c8   :  { %3277 = vst.msk [vmem:[%s8219_s1 + $0x2a4] sm:$0x4] %vm3_vm0, %v1578_v17  }
 0x2c9   :  { %3278 = vst.msk [vmem:[%s8219_s1 + $0x2e3] sm:$0x8] %vm3_vm0, %v1578_v17  }
 0x2ca   :  { %3279 = vst.msk [vmem:[%s8219_s1 + $0x322] sm:$0x10] %vm3_vm0, %v1578_v17  }
 0x2cb   :  { %3280 = vst.msk [vmem:[%s8219_s1 + $0x361] sm:$0x20] %vm3_vm0, %v1578_v17  }
 0x2cc   :  { %3281 = vst.msk [vmem:[%s8219_s1 + $0x3a0] sm:$0x40] %vm3_vm0, %v1578_v17  }
 0x2cd   :  { %3282 = vst.msk [vmem:[%s8219_s1 + $0x3df] sm:$0x80] %vm3_vm0, %v1578_v17  }
 0x2ce   :  { %3317 = vst.msk [vmem:[%s8219_s1 + $0x29] sm:$0x1] %vm3_vm0, %v1680_v18  }
 0x2cf   :  { %3318 = vst.msk [vmem:[%s8219_s1 + $0x68] sm:$0x2] %vm3_vm0, %v1680_v18  }
 0x2d0   :  { %3319 = vst.msk [vmem:[%s8219_s1 + $0xa7] sm:$0x4] %vm3_vm0, %v1680_v18  }
 0x2d1   :  { %3320 = vst.msk [vmem:[%s8219_s1 + $0xe6] sm:$0x8] %vm3_vm0, %v1680_v18  }
 0x2d2   :  { %3321 = vst.msk [vmem:[%s8219_s1 + $0x125] sm:$0x10] %vm3_vm0, %v1680_v18  }
 0x2d3   :  { %3322 = vst.msk [vmem:[%s8219_s1 + $0x164] sm:$0x20] %vm3_vm0, %v1680_v18  }
 0x2d4   :  { %3323 = vst.msk [vmem:[%s8219_s1 + $0x1a3] sm:$0x40] %vm3_vm0, %v1680_v18  }
 0x2d5   :  { %3324 = vst.msk [vmem:[%s8219_s1 + $0x1e2] sm:$0x80] %vm3_vm0, %v1680_v18  }
 0x2d6   :  { %3309 = vst.msk [vmem:[%s8219_s1 + $0x228] sm:$0x1] %vm3_vm0, %v1660_v19  }
 0x2d7   :  { %3310 = vst.msk [vmem:[%s8219_s1 + $0x267] sm:$0x2] %vm3_vm0, %v1660_v19  }
 0x2d8   :  { %3311 = vst.msk [vmem:[%s8219_s1 + $0x2a6] sm:$0x4] %vm3_vm0, %v1660_v19  }
 0x2d9   :  { %3312 = vst.msk [vmem:[%s8219_s1 + $0x2e5] sm:$0x8] %vm3_vm0, %v1660_v19  }
 0x2da   :  { %3313 = vst.msk [vmem:[%s8219_s1 + $0x324] sm:$0x10] %vm3_vm0, %v1660_v19  }
 0x2db   :  { %3314 = vst.msk [vmem:[%s8219_s1 + $0x363] sm:$0x20] %vm3_vm0, %v1660_v19  }
 0x2dc   :  { %3315 = vst.msk [vmem:[%s8219_s1 + $0x3a2] sm:$0x40] %vm3_vm0, %v1660_v19  }
 0x2dd   :  { %3316 = vst.msk [vmem:[%s8219_s1 + $0x3e1] sm:$0x80] %vm3_vm0, %v1660_v19  }
 0x2de   :  { %3300 = vst.msk [vmem:[%s8219_s1 + $0x28] sm:$0x1] %vm3_vm0, %v1639_v20  }
 0x2df   :  { %3301 = vst.msk [vmem:[%s8219_s1 + $0x67] sm:$0x2] %vm3_vm0, %v1639_v20  }
 0x2e0   :  { %3302 = vst.msk [vmem:[%s8219_s1 + $0xa6] sm:$0x4] %vm3_vm0, %v1639_v20  }
 0x2e1   :  { %3303 = vst.msk [vmem:[%s8219_s1 + $0xe5] sm:$0x8] %vm3_vm0, %v1639_v20  }
 0x2e2   :  { %3304 = vst.msk [vmem:[%s8219_s1 + $0x124] sm:$0x10] %vm3_vm0, %v1639_v20  }
 0x2e3   :  { %3305 = vst.msk [vmem:[%s8219_s1 + $0x163] sm:$0x20] %vm3_vm0, %v1639_v20  }
 0x2e4   :  { %3306 = vst.msk [vmem:[%s8219_s1 + $0x1a2] sm:$0x40] %vm3_vm0, %v1639_v20  }
 0x2e5   :  { %3307 = vst.msk [vmem:[%s8219_s1 + $0x1e1] sm:$0x80] %vm3_vm0, %v1639_v20  }
 0x2e6   :  { %3343 = vst.msk [vmem:[%s8219_s1 + $0x22a] sm:$0x1] %vm3_vm0, %v1742_v22  }
 0x2e7   :  { %3344 = vst.msk [vmem:[%s8219_s1 + $0x269] sm:$0x2] %vm3_vm0, %v1742_v22  }
 0x2e8   :  { %3345 = vst.msk [vmem:[%s8219_s1 + $0x2a8] sm:$0x4] %vm3_vm0, %v1742_v22  }
 0x2e9   :  { %3346 = vst.msk [vmem:[%s8219_s1 + $0x2e7] sm:$0x8] %vm3_vm0, %v1742_v22  }
 0x2ea   :  { %3347 = vst.msk [vmem:[%s8219_s1 + $0x326] sm:$0x10] %vm3_vm0, %v1742_v22  }
 0x2eb   :  { %3348 = vst.msk [vmem:[%s8219_s1 + $0x365] sm:$0x20] %vm3_vm0, %v1742_v22  }
 0x2ec   :  { %3349 = vst.msk [vmem:[%s8219_s1 + $0x3a4] sm:$0x40] %vm3_vm0, %v1742_v22  }
 0x2ed   :  { %3350 = vst.msk [vmem:[%s8219_s1 + $0x3e3] sm:$0x80] %vm3_vm0, %v1742_v22  }
 0x2ee   :  { %3334 = vst.msk [vmem:[%s8219_s1 + $0x2a] sm:$0x1] %vm3_vm0, %v1721_v23  }
 0x2ef   :  { %3335 = vst.msk [vmem:[%s8219_s1 + $0x69] sm:$0x2] %vm3_vm0, %v1721_v23  }
 0x2f0   :  { %3336 = vst.msk [vmem:[%s8219_s1 + $0xa8] sm:$0x4] %vm3_vm0, %v1721_v23  }
 0x2f1   :  { %3337 = vst.msk [vmem:[%s8219_s1 + $0xe7] sm:$0x8] %vm3_vm0, %v1721_v23  }
 0x2f2   :  { %3338 = vst.msk [vmem:[%s8219_s1 + $0x126] sm:$0x10] %vm3_vm0, %v1721_v23  }
 0x2f3   :  { %3339 = vst.msk [vmem:[%s8219_s1 + $0x165] sm:$0x20] %vm3_vm0, %v1721_v23  }
 0x2f4   :  { %3340 = vst.msk [vmem:[%s8219_s1 + $0x1a4] sm:$0x40] %vm3_vm0, %v1721_v23  }
 0x2f5   :  { %3341 = vst.msk [vmem:[%s8219_s1 + $0x1e3] sm:$0x80] %vm3_vm0, %v1721_v23  }
 0x2f6   :  { %3326 = vst.msk [vmem:[%s8219_s1 + $0x229] sm:$0x1] %vm3_vm0, %v1701_v24  }
 0x2f7   :  { %3327 = vst.msk [vmem:[%s8219_s1 + $0x268] sm:$0x2] %vm3_vm0, %v1701_v24  }
 0x2f8   :  { %3328 = vst.msk [vmem:[%s8219_s1 + $0x2a7] sm:$0x4] %vm3_vm0, %v1701_v24  }
 0x2f9   :  { %3329 = vst.msk [vmem:[%s8219_s1 + $0x2e6] sm:$0x8] %vm3_vm0, %v1701_v24  }
 0x2fa   :  { %3330 = vst.msk [vmem:[%s8219_s1 + $0x325] sm:$0x10] %vm3_vm0, %v1701_v24  }
 0x2fb   :  { %3331 = vst.msk [vmem:[%s8219_s1 + $0x364] sm:$0x20] %vm3_vm0, %v1701_v24  }
 0x2fc   :  { %3332 = vst.msk [vmem:[%s8219_s1 + $0x3a3] sm:$0x40] %vm3_vm0, %v1701_v24  }
 0x2fd   :  { %3333 = vst.msk [vmem:[%s8219_s1 + $0x3e2] sm:$0x80] %vm3_vm0, %v1701_v24  }
 0x2fe   :  { %3368 = vst.msk [vmem:[%s8219_s1 + $0x2c] sm:$0x1] %vm3_vm0, %v1803_v25  }
 0x2ff   :  { %3369 = vst.msk [vmem:[%s8219_s1 + $0x6b] sm:$0x2] %vm3_vm0, %v1803_v25  }
 0x300   :  { %3370 = vst.msk [vmem:[%s8219_s1 + $0xaa] sm:$0x4] %vm3_vm0, %v1803_v25  }
 0x301   :  { %3371 = vst.msk [vmem:[%s8219_s1 + $0xe9] sm:$0x8] %vm3_vm0, %v1803_v25  }
 0x302   :  { %3372 = vst.msk [vmem:[%s8219_s1 + $0x128] sm:$0x10] %vm3_vm0, %v1803_v25  }
 0x303   :  { %3373 = vst.msk [vmem:[%s8219_s1 + $0x167] sm:$0x20] %vm3_vm0, %v1803_v25  }
 0x304   :  { %3374 = vst.msk [vmem:[%s8219_s1 + $0x1a6] sm:$0x40] %vm3_vm0, %v1803_v25  }
 0x305   :  { %3375 = vst.msk [vmem:[%s8219_s1 + $0x1e5] sm:$0x80] %vm3_vm0, %v1803_v25  }
 0x306   :  { %3360 = vst.msk [vmem:[%s8219_s1 + $0x22b] sm:$0x1] %vm3_vm0, %v1783_v26  }
 0x307   :  { %3361 = vst.msk [vmem:[%s8219_s1 + $0x26a] sm:$0x2] %vm3_vm0, %v1783_v26  }
 0x308   :  { %3362 = vst.msk [vmem:[%s8219_s1 + $0x2a9] sm:$0x4] %vm3_vm0, %v1783_v26  }
 0x309   :  { %3363 = vst.msk [vmem:[%s8219_s1 + $0x2e8] sm:$0x8] %vm3_vm0, %v1783_v26  }
 0x30a   :  { %3364 = vst.msk [vmem:[%s8219_s1 + $0x327] sm:$0x10] %vm3_vm0, %v1783_v26  }
 0x30b   :  { %3365 = vst.msk [vmem:[%s8219_s1 + $0x366] sm:$0x20] %vm3_vm0, %v1783_v26  }
 0x30c   :  { %3366 = vst.msk [vmem:[%s8219_s1 + $0x3a5] sm:$0x40] %vm3_vm0, %v1783_v26  }
 0x30d   :  { %3367 = vst.msk [vmem:[%s8219_s1 + $0x3e4] sm:$0x80] %vm3_vm0, %v1783_v26  }
 0x30e   :  { %3351 = vst.msk [vmem:[%s8219_s1 + $0x2b] sm:$0x1] %vm3_vm0, %v1762_v27  }
 0x30f   :  { %3352 = vst.msk [vmem:[%s8219_s1 + $0x6a] sm:$0x2] %vm3_vm0, %v1762_v27  }
 0x310   :  { %3353 = vst.msk [vmem:[%s8219_s1 + $0xa9] sm:$0x4] %vm3_vm0, %v1762_v27  }
 0x311   :  { %3354 = vst.msk [vmem:[%s8219_s1 + $0xe8] sm:$0x8] %vm3_vm0, %v1762_v27  }
 0x312   :  { %3355 = vst.msk [vmem:[%s8219_s1 + $0x127] sm:$0x10] %vm3_vm0, %v1762_v27  }
 0x313   :  { %3356 = vst.msk [vmem:[%s8219_s1 + $0x166] sm:$0x20] %vm3_vm0, %v1762_v27  }
 0x314   :  { %3357 = vst.msk [vmem:[%s8219_s1 + $0x1a5] sm:$0x40] %vm3_vm0, %v1762_v27  }
 0x315   :  { %3358 = vst.msk [vmem:[%s8219_s1 + $0x1e4] sm:$0x80] %vm3_vm0, %v1762_v27  }
 0x316   :  { %3394 = vst.msk [vmem:[%s8219_s1 + $0x22d] sm:$0x1] %vm3_vm0, %v1865_v28  }
 0x317   :  { %3395 = vst.msk [vmem:[%s8219_s1 + $0x26c] sm:$0x2] %vm3_vm0, %v1865_v28  }
 0x318   :  { %3396 = vst.msk [vmem:[%s8219_s1 + $0x2ab] sm:$0x4] %vm3_vm0, %v1865_v28  }
 0x319   :  { %3397 = vst.msk [vmem:[%s8219_s1 + $0x2ea] sm:$0x8] %vm3_vm0, %v1865_v28  }
 0x31a   :  { %3398 = vst.msk [vmem:[%s8219_s1 + $0x329] sm:$0x10] %vm3_vm0, %v1865_v28  }
 0x31b   :  { %3399 = vst.msk [vmem:[%s8219_s1 + $0x368] sm:$0x20] %vm3_vm0, %v1865_v28  }
 0x31c   :  { %3400 = vst.msk [vmem:[%s8219_s1 + $0x3a7] sm:$0x40] %vm3_vm0, %v1865_v28  }
 0x31d   :  { %3401 = vst.msk [vmem:[%s8219_s1 + $0x3e6] sm:$0x80] %vm3_vm0, %v1865_v28  }
 0x31e   :  { %3385 = vst.msk [vmem:[%s8219_s1 + $0x2d] sm:$0x1] %vm3_vm0, %v1844_v29  }
 0x31f   :  { %3386 = vst.msk [vmem:[%s8219_s1 + $0x6c] sm:$0x2] %vm3_vm0, %v1844_v29  }
 0x320   :  { %3387 = vst.msk [vmem:[%s8219_s1 + $0xab] sm:$0x4] %vm3_vm0, %v1844_v29  }
 0x321   :  { %3388 = vst.msk [vmem:[%s8219_s1 + $0xea] sm:$0x8] %vm3_vm0, %v1844_v29  }
 0x322   :  { %3389 = vst.msk [vmem:[%s8219_s1 + $0x129] sm:$0x10] %vm3_vm0, %v1844_v29  }
 0x323   :  { %3390 = vst.msk [vmem:[%s8219_s1 + $0x168] sm:$0x20] %vm3_vm0, %v1844_v29  }
 0x324   :  { %3391 = vst.msk [vmem:[%s8219_s1 + $0x1a7] sm:$0x40] %vm3_vm0, %v1844_v29  }
 0x325   :  { %3392 = vst.msk [vmem:[%s8219_s1 + $0x1e6] sm:$0x80] %vm3_vm0, %v1844_v29  }
 0x326   :  { %3377 = vst.msk [vmem:[%s8219_s1 + $0x22c] sm:$0x1] %vm3_vm0, %v1824_v30  }
 0x327   :  { %3378 = vst.msk [vmem:[%s8219_s1 + $0x26b] sm:$0x2] %vm3_vm0, %v1824_v30  }
 0x328   :  { %3379 = vst.msk [vmem:[%s8219_s1 + $0x2aa] sm:$0x4] %vm3_vm0, %v1824_v30  }
 0x329   :  { %3380 = vst.msk [vmem:[%s8219_s1 + $0x2e9] sm:$0x8] %vm3_vm0, %v1824_v30  }
 0x32a   :  { %3381 = vst.msk [vmem:[%s8219_s1 + $0x328] sm:$0x10] %vm3_vm0, %v1824_v30  }
 0x32b   :  { %3382 = vst.msk [vmem:[%s8219_s1 + $0x367] sm:$0x20] %vm3_vm0, %v1824_v30  }
 0x32c   :  { %3383 = vst.msk [vmem:[%s8219_s1 + $0x3a6] sm:$0x40] %vm3_vm0, %v1824_v30  }
 0x32d   :  { %3384 = vst.msk [vmem:[%s8219_s1 + $0x3e5] sm:$0x80] %vm3_vm0, %v1824_v30  }
 0x32e   :  { %3419 = vst.msk [vmem:[%s8219_s1 + $0x2f] sm:$0x1] %vm3_vm0, %v1926_v32  }
 0x32f   :  { %3420 = vst.msk [vmem:[%s8219_s1 + $0x6e] sm:$0x2] %vm3_vm0, %v1926_v32  }
 0x330   :  { %3421 = vst.msk [vmem:[%s8219_s1 + $0xad] sm:$0x4] %vm3_vm0, %v1926_v32  }
 0x331   :  { %3422 = vst.msk [vmem:[%s8219_s1 + $0xec] sm:$0x8] %vm3_vm0, %v1926_v32  }
 0x332   :  { %3423 = vst.msk [vmem:[%s8219_s1 + $0x12b] sm:$0x10] %vm3_vm0, %v1926_v32  }
 0x333   :  { %3424 = vst.msk [vmem:[%s8219_s1 + $0x16a] sm:$0x20] %vm3_vm0, %v1926_v32  }
 0x334   :  { %3425 = vst.msk [vmem:[%s8219_s1 + $0x1a9] sm:$0x40] %vm3_vm0, %v1926_v32  }
 0x335   :  { %3426 = vst.msk [vmem:[%s8219_s1 + $0x1e8] sm:$0x80] %vm3_vm0, %v1926_v32  }
 0x336   :  { %3411 = vst.msk [vmem:[%s8219_s1 + $0x22e] sm:$0x1] %vm3_vm0, %v1906_v33  }
 0x337   :  { %3412 = vst.msk [vmem:[%s8219_s1 + $0x26d] sm:$0x2] %vm3_vm0, %v1906_v33  }
 0x338   :  { %3413 = vst.msk [vmem:[%s8219_s1 + $0x2ac] sm:$0x4] %vm3_vm0, %v1906_v33  }
 0x339   :  { %3414 = vst.msk [vmem:[%s8219_s1 + $0x2eb] sm:$0x8] %vm3_vm0, %v1906_v33  }
 0x33a   :  { %3415 = vst.msk [vmem:[%s8219_s1 + $0x32a] sm:$0x10] %vm3_vm0, %v1906_v33  }
 0x33b   :  { %3416 = vst.msk [vmem:[%s8219_s1 + $0x369] sm:$0x20] %vm3_vm0, %v1906_v33  }
 0x33c   :  { %3417 = vst.msk [vmem:[%s8219_s1 + $0x3a8] sm:$0x40] %vm3_vm0, %v1906_v33  }
 0x33d   :  { %3418 = vst.msk [vmem:[%s8219_s1 + $0x3e7] sm:$0x80] %vm3_vm0, %v1906_v33  }
 0x33e   :  { %3402 = vst.msk [vmem:[%s8219_s1 + $0x2e] sm:$0x1] %vm3_vm0, %v1885_v34  }
 0x33f   :  { %3403 = vst.msk [vmem:[%s8219_s1 + $0x6d] sm:$0x2] %vm3_vm0, %v1885_v34  }
 0x340   :  { %3404 = vst.msk [vmem:[%s8219_s1 + $0xac] sm:$0x4] %vm3_vm0, %v1885_v34  }
 0x341   :  { %3405 = vst.msk [vmem:[%s8219_s1 + $0xeb] sm:$0x8] %vm3_vm0, %v1885_v34  }
 0x342   :  { %3406 = vst.msk [vmem:[%s8219_s1 + $0x12a] sm:$0x10] %vm3_vm0, %v1885_v34  }
 0x343   :  { %3407 = vst.msk [vmem:[%s8219_s1 + $0x169] sm:$0x20] %vm3_vm0, %v1885_v34  }
 0x344   :  { %3408 = vst.msk [vmem:[%s8219_s1 + $0x1a8] sm:$0x40] %vm3_vm0, %v1885_v34  }
 0x345   :  { %3409 = vst.msk [vmem:[%s8219_s1 + $0x1e7] sm:$0x80] %vm3_vm0, %v1885_v34  }
 0x346   :  { %3445 = vst.msk [vmem:[%s8219_s1 + $0x230] sm:$0x1] %vm3_vm0, %v1988_v35  }
 0x347   :  { %3446 = vst.msk [vmem:[%s8219_s1 + $0x26f] sm:$0x2] %vm3_vm0, %v1988_v35  }
 0x348   :  { %3447 = vst.msk [vmem:[%s8219_s1 + $0x2ae] sm:$0x4] %vm3_vm0, %v1988_v35  }
 0x349   :  { %3448 = vst.msk [vmem:[%s8219_s1 + $0x2ed] sm:$0x8] %vm3_vm0, %v1988_v35  }
 0x34a   :  { %3449 = vst.msk [vmem:[%s8219_s1 + $0x32c] sm:$0x10] %vm3_vm0, %v1988_v35  }
 0x34b   :  { %3450 = vst.msk [vmem:[%s8219_s1 + $0x36b] sm:$0x20] %vm3_vm0, %v1988_v35  }
 0x34c   :  { %3451 = vst.msk [vmem:[%s8219_s1 + $0x3aa] sm:$0x40] %vm3_vm0, %v1988_v35  }
 0x34d   :  { %3452 = vst.msk [vmem:[%s8219_s1 + $0x3e9] sm:$0x80] %vm3_vm0, %v1988_v35  }
 0x34e   :  { %3436 = vst.msk [vmem:[%s8219_s1 + $0x30] sm:$0x1] %vm3_vm0, %v1967_v36  }
 0x34f   :  { %3437 = vst.msk [vmem:[%s8219_s1 + $0x6f] sm:$0x2] %vm3_vm0, %v1967_v36  }
 0x350   :  { %3438 = vst.msk [vmem:[%s8219_s1 + $0xae] sm:$0x4] %vm3_vm0, %v1967_v36  }
 0x351   :  { %3439 = vst.msk [vmem:[%s8219_s1 + $0xed] sm:$0x8] %vm3_vm0, %v1967_v36  }
 0x352   :  { %3440 = vst.msk [vmem:[%s8219_s1 + $0x12c] sm:$0x10] %vm3_vm0, %v1967_v36  }
 0x353   :  { %3441 = vst.msk [vmem:[%s8219_s1 + $0x16b] sm:$0x20] %vm3_vm0, %v1967_v36  }
 0x354   :  { %3442 = vst.msk [vmem:[%s8219_s1 + $0x1aa] sm:$0x40] %vm3_vm0, %v1967_v36  }
 0x355   :  { %3443 = vst.msk [vmem:[%s8219_s1 + $0x1e9] sm:$0x80] %vm3_vm0, %v1967_v36  }
 0x356   :  { %3428 = vst.msk [vmem:[%s8219_s1 + $0x22f] sm:$0x1] %vm3_vm0, %v1947_v37  }
 0x357   :  { %3429 = vst.msk [vmem:[%s8219_s1 + $0x26e] sm:$0x2] %vm3_vm0, %v1947_v37  }
 0x358   :  { %3430 = vst.msk [vmem:[%s8219_s1 + $0x2ad] sm:$0x4] %vm3_vm0, %v1947_v37  }
 0x359   :  { %3431 = vst.msk [vmem:[%s8219_s1 + $0x2ec] sm:$0x8] %vm3_vm0, %v1947_v37  }
 0x35a   :  { %3432 = vst.msk [vmem:[%s8219_s1 + $0x32b] sm:$0x10] %vm3_vm0, %v1947_v37  }
 0x35b   :  { %3433 = vst.msk [vmem:[%s8219_s1 + $0x36a] sm:$0x20] %vm3_vm0, %v1947_v37  }
 0x35c   :  { %3434 = vst.msk [vmem:[%s8219_s1 + $0x3a9] sm:$0x40] %vm3_vm0, %v1947_v37  }
 0x35d   :  { %3435 = vst.msk [vmem:[%s8219_s1 + $0x3e8] sm:$0x80] %vm3_vm0, %v1947_v37  }
 0x35e   :  { %3470 = vst.msk [vmem:[%s8219_s1 + $0x32] sm:$0x1] %vm3_vm0, %v2049_v38  }
 0x35f   :  { %3471 = vst.msk [vmem:[%s8219_s1 + $0x71] sm:$0x2] %vm3_vm0, %v2049_v38  }
 0x360   :  { %3472 = vst.msk [vmem:[%s8219_s1 + $0xb0] sm:$0x4] %vm3_vm0, %v2049_v38  }
 0x361   :  { %3473 = vst.msk [vmem:[%s8219_s1 + $0xef] sm:$0x8] %vm3_vm0, %v2049_v38  }
 0x362   :  { %3474 = vst.msk [vmem:[%s8219_s1 + $0x12e] sm:$0x10] %vm3_vm0, %v2049_v38  }
 0x363   :  { %3475 = vst.msk [vmem:[%s8219_s1 + $0x16d] sm:$0x20] %vm3_vm0, %v2049_v38  }
 0x364   :  { %3476 = vst.msk [vmem:[%s8219_s1 + $0x1ac] sm:$0x40] %vm3_vm0, %v2049_v38  }
 0x365   :  { %3477 = vst.msk [vmem:[%s8219_s1 + $0x1eb] sm:$0x80] %vm3_vm0, %v2049_v38  }
 0x366   :  { %3462 = vst.msk [vmem:[%s8219_s1 + $0x231] sm:$0x1] %vm3_vm0, %v2029_v39  }
 0x367   :  { %3463 = vst.msk [vmem:[%s8219_s1 + $0x270] sm:$0x2] %vm3_vm0, %v2029_v39  }
 0x368   :  { %3464 = vst.msk [vmem:[%s8219_s1 + $0x2af] sm:$0x4] %vm3_vm0, %v2029_v39  }
 0x369   :  { %3465 = vst.msk [vmem:[%s8219_s1 + $0x2ee] sm:$0x8] %vm3_vm0, %v2029_v39  }
 0x36a   :  { %3466 = vst.msk [vmem:[%s8219_s1 + $0x32d] sm:$0x10] %vm3_vm0, %v2029_v39  }
 0x36b   :  { %3467 = vst.msk [vmem:[%s8219_s1 + $0x36c] sm:$0x20] %vm3_vm0, %v2029_v39  }
 0x36c   :  { %3468 = vst.msk [vmem:[%s8219_s1 + $0x3ab] sm:$0x40] %vm3_vm0, %v2029_v39  }
 0x36d   :  { %3469 = vst.msk [vmem:[%s8219_s1 + $0x3ea] sm:$0x80] %vm3_vm0, %v2029_v39  }
 0x36e   :  { %3453 = vst.msk [vmem:[%s8219_s1 + $0x31] sm:$0x1] %vm3_vm0, %v2008_v40  }
 0x36f   :  { %3454 = vst.msk [vmem:[%s8219_s1 + $0x70] sm:$0x2] %vm3_vm0, %v2008_v40  }
 0x370   :  { %3455 = vst.msk [vmem:[%s8219_s1 + $0xaf] sm:$0x4] %vm3_vm0, %v2008_v40  }
 0x371   :  { %3456 = vst.msk [vmem:[%s8219_s1 + $0xee] sm:$0x8] %vm3_vm0, %v2008_v40  }
 0x372   :  { %3457 = vst.msk [vmem:[%s8219_s1 + $0x12d] sm:$0x10] %vm3_vm0, %v2008_v40  }
 0x373   :  { %3458 = vst.msk [vmem:[%s8219_s1 + $0x16c] sm:$0x20] %vm3_vm0, %v2008_v40  }
 0x374   :  { %3459 = vst.msk [vmem:[%s8219_s1 + $0x1ab] sm:$0x40] %vm3_vm0, %v2008_v40  }
 0x375   :  { %3460 = vst.msk [vmem:[%s8219_s1 + $0x1ea] sm:$0x80] %vm3_vm0, %v2008_v40  }
 0x376   :  { %3496 = vst.msk [vmem:[%s8219_s1 + $0x233] sm:$0x1] %vm3_vm0, %v2111_v41  }
 0x377   :  { %3497 = vst.msk [vmem:[%s8219_s1 + $0x272] sm:$0x2] %vm3_vm0, %v2111_v41  }
 0x378   :  { %3498 = vst.msk [vmem:[%s8219_s1 + $0x2b1] sm:$0x4] %vm3_vm0, %v2111_v41  }
 0x379   :  { %3499 = vst.msk [vmem:[%s8219_s1 + $0x2f0] sm:$0x8] %vm3_vm0, %v2111_v41  }
 0x37a   :  { %3500 = vst.msk [vmem:[%s8219_s1 + $0x32f] sm:$0x10] %vm3_vm0, %v2111_v41  }
 0x37b   :  { %3501 = vst.msk [vmem:[%s8219_s1 + $0x36e] sm:$0x20] %vm3_vm0, %v2111_v41  }
 0x37c   :  { %3502 = vst.msk [vmem:[%s8219_s1 + $0x3ad] sm:$0x40] %vm3_vm0, %v2111_v41  }
 0x37d   :  { %3503 = vst.msk [vmem:[%s8219_s1 + $0x3ec] sm:$0x80] %vm3_vm0, %v2111_v41  }
 0x37e   :  { %3487 = vst.msk [vmem:[%s8219_s1 + $0x33] sm:$0x1] %vm3_vm0, %v2090_v42  }
 0x37f   :  { %3488 = vst.msk [vmem:[%s8219_s1 + $0x72] sm:$0x2] %vm3_vm0, %v2090_v42  }
 0x380   :  { %3489 = vst.msk [vmem:[%s8219_s1 + $0xb1] sm:$0x4] %vm3_vm0, %v2090_v42  }
 0x381   :  { %3490 = vst.msk [vmem:[%s8219_s1 + $0xf0] sm:$0x8] %vm3_vm0, %v2090_v42  }
 0x382   :  { %3491 = vst.msk [vmem:[%s8219_s1 + $0x12f] sm:$0x10] %vm3_vm0, %v2090_v42  }
 0x383   :  { %3492 = vst.msk [vmem:[%s8219_s1 + $0x16e] sm:$0x20] %vm3_vm0, %v2090_v42  }
 0x384   :  { %3493 = vst.msk [vmem:[%s8219_s1 + $0x1ad] sm:$0x40] %vm3_vm0, %v2090_v42  }
 0x385   :  { %3494 = vst.msk [vmem:[%s8219_s1 + $0x1ec] sm:$0x80] %vm3_vm0, %v2090_v42  }
 0x386   :  { %3479 = vst.msk [vmem:[%s8219_s1 + $0x232] sm:$0x1] %vm3_vm0, %v2070_v43  }
 0x387   :  { %3480 = vst.msk [vmem:[%s8219_s1 + $0x271] sm:$0x2] %vm3_vm0, %v2070_v43  }
 0x388   :  { %3481 = vst.msk [vmem:[%s8219_s1 + $0x2b0] sm:$0x4] %vm3_vm0, %v2070_v43  }
 0x389   :  { %3482 = vst.msk [vmem:[%s8219_s1 + $0x2ef] sm:$0x8] %vm3_vm0, %v2070_v43  }
 0x38a   :  { %3483 = vst.msk [vmem:[%s8219_s1 + $0x32e] sm:$0x10] %vm3_vm0, %v2070_v43  }
 0x38b   :  { %3484 = vst.msk [vmem:[%s8219_s1 + $0x36d] sm:$0x20] %vm3_vm0, %v2070_v43  }
 0x38c   :  { %3485 = vst.msk [vmem:[%s8219_s1 + $0x3ac] sm:$0x40] %vm3_vm0, %v2070_v43  }
 0x38d   :  { %3486 = vst.msk [vmem:[%s8219_s1 + $0x3eb] sm:$0x80] %vm3_vm0, %v2070_v43  }
 0x38e   :  { %3521 = vst.msk [vmem:[%s8219_s1 + $0x35] sm:$0x1] %vm3_vm0, %v2172_v44  }
 0x38f   :  { %3522 = vst.msk [vmem:[%s8219_s1 + $0x74] sm:$0x2] %vm3_vm0, %v2172_v44  }
 0x390   :  { %3523 = vst.msk [vmem:[%s8219_s1 + $0xb3] sm:$0x4] %vm3_vm0, %v2172_v44  }
 0x391   :  { %3524 = vst.msk [vmem:[%s8219_s1 + $0xf2] sm:$0x8] %vm3_vm0, %v2172_v44  }
 0x392   :  { %3525 = vst.msk [vmem:[%s8219_s1 + $0x131] sm:$0x10] %vm3_vm0, %v2172_v44  }
 0x393   :  { %3526 = vst.msk [vmem:[%s8219_s1 + $0x170] sm:$0x20] %vm3_vm0, %v2172_v44  }
 0x394   :  { %3527 = vst.msk [vmem:[%s8219_s1 + $0x1af] sm:$0x40] %vm3_vm0, %v2172_v44  }
 0x395   :  { %3528 = vst.msk [vmem:[%s8219_s1 + $0x1ee] sm:$0x80] %vm3_vm0, %v2172_v44  }
 0x396   :  { %3513 = vst.msk [vmem:[%s8219_s1 + $0x234] sm:$0x1] %vm3_vm0, %v2152_v45  }
 0x397   :  { %3514 = vst.msk [vmem:[%s8219_s1 + $0x273] sm:$0x2] %vm3_vm0, %v2152_v45  }
 0x398   :  { %3515 = vst.msk [vmem:[%s8219_s1 + $0x2b2] sm:$0x4] %vm3_vm0, %v2152_v45  }
 0x399   :  { %3516 = vst.msk [vmem:[%s8219_s1 + $0x2f1] sm:$0x8] %vm3_vm0, %v2152_v45  }
 0x39a   :  { %3517 = vst.msk [vmem:[%s8219_s1 + $0x330] sm:$0x10] %vm3_vm0, %v2152_v45  }
 0x39b   :  { %3518 = vst.msk [vmem:[%s8219_s1 + $0x36f] sm:$0x20] %vm3_vm0, %v2152_v45  }
 0x39c   :  { %3519 = vst.msk [vmem:[%s8219_s1 + $0x3ae] sm:$0x40] %vm3_vm0, %v2152_v45  }
 0x39d   :  { %3520 = vst.msk [vmem:[%s8219_s1 + $0x3ed] sm:$0x80] %vm3_vm0, %v2152_v45  }
 0x39e   :  { %3504 = vst.msk [vmem:[%s8219_s1 + $0x34] sm:$0x1] %vm3_vm0, %v2131_v46  }
 0x39f   :  { %3505 = vst.msk [vmem:[%s8219_s1 + $0x73] sm:$0x2] %vm3_vm0, %v2131_v46  }
 0x3a0   :  { %3506 = vst.msk [vmem:[%s8219_s1 + $0xb2] sm:$0x4] %vm3_vm0, %v2131_v46  }
 0x3a1   :  { %3507 = vst.msk [vmem:[%s8219_s1 + $0xf1] sm:$0x8] %vm3_vm0, %v2131_v46  }
 0x3a2   :  { %3508 = vst.msk [vmem:[%s8219_s1 + $0x130] sm:$0x10] %vm3_vm0, %v2131_v46  }
 0x3a3   :  { %3509 = vst.msk [vmem:[%s8219_s1 + $0x16f] sm:$0x20] %vm3_vm0, %v2131_v46  }
 0x3a4   :  { %3510 = vst.msk [vmem:[%s8219_s1 + $0x1ae] sm:$0x40] %vm3_vm0, %v2131_v46  }
 0x3a5   :  { %3511 = vst.msk [vmem:[%s8219_s1 + $0x1ed] sm:$0x80] %vm3_vm0, %v2131_v46  }
 0x3a6   :  { %3547 = vst.msk [vmem:[%s8219_s1 + $0x236] sm:$0x1] %vm3_vm0, %v2234_v47  }
 0x3a7   :  { %3548 = vst.msk [vmem:[%s8219_s1 + $0x275] sm:$0x2] %vm3_vm0, %v2234_v47  }
 0x3a8   :  { %3549 = vst.msk [vmem:[%s8219_s1 + $0x2b4] sm:$0x4] %vm3_vm0, %v2234_v47  }
 0x3a9   :  { %3550 = vst.msk [vmem:[%s8219_s1 + $0x2f3] sm:$0x8] %vm3_vm0, %v2234_v47  }
 0x3aa   :  { %3551 = vst.msk [vmem:[%s8219_s1 + $0x332] sm:$0x10] %vm3_vm0, %v2234_v47  }
 0x3ab   :  { %3552 = vst.msk [vmem:[%s8219_s1 + $0x371] sm:$0x20] %vm3_vm0, %v2234_v47  }
 0x3ac   :  { %3553 = vst.msk [vmem:[%s8219_s1 + $0x3b0] sm:$0x40] %vm3_vm0, %v2234_v47  }
 0x3ad   :  { %3554 = vst.msk [vmem:[%s8219_s1 + $0x3ef] sm:$0x80] %vm3_vm0, %v2234_v47  }
 0x3ae   :  { %3538 = vst.msk [vmem:[%s8219_s1 + $0x36] sm:$0x1] %vm3_vm0, %v2213_v48  }
 0x3af   :  { %3539 = vst.msk [vmem:[%s8219_s1 + $0x75] sm:$0x2] %vm3_vm0, %v2213_v48  }
 0x3b0   :  { %3540 = vst.msk [vmem:[%s8219_s1 + $0xb4] sm:$0x4] %vm3_vm0, %v2213_v48  }
 0x3b1   :  { %3541 = vst.msk [vmem:[%s8219_s1 + $0xf3] sm:$0x8] %vm3_vm0, %v2213_v48  }
 0x3b2   :  { %3542 = vst.msk [vmem:[%s8219_s1 + $0x132] sm:$0x10] %vm3_vm0, %v2213_v48  }
 0x3b3   :  { %3543 = vst.msk [vmem:[%s8219_s1 + $0x171] sm:$0x20] %vm3_vm0, %v2213_v48  }
 0x3b4   :  { %3544 = vst.msk [vmem:[%s8219_s1 + $0x1b0] sm:$0x40] %vm3_vm0, %v2213_v48  }
 0x3b5   :  { %3545 = vst.msk [vmem:[%s8219_s1 + $0x1ef] sm:$0x80] %vm3_vm0, %v2213_v48  }
 0x3b6   :  { %3530 = vst.msk [vmem:[%s8219_s1 + $0x235] sm:$0x1] %vm3_vm0, %v2193_v49  }
 0x3b7   :  { %3531 = vst.msk [vmem:[%s8219_s1 + $0x274] sm:$0x2] %vm3_vm0, %v2193_v49  }
 0x3b8   :  { %3532 = vst.msk [vmem:[%s8219_s1 + $0x2b3] sm:$0x4] %vm3_vm0, %v2193_v49  }
 0x3b9   :  { %3533 = vst.msk [vmem:[%s8219_s1 + $0x2f2] sm:$0x8] %vm3_vm0, %v2193_v49  }
 0x3ba   :  { %3534 = vst.msk [vmem:[%s8219_s1 + $0x331] sm:$0x10] %vm3_vm0, %v2193_v49  }
 0x3bb   :  { %3535 = vst.msk [vmem:[%s8219_s1 + $0x370] sm:$0x20] %vm3_vm0, %v2193_v49  }
 0x3bc   :  { %3536 = vst.msk [vmem:[%s8219_s1 + $0x3af] sm:$0x40] %vm3_vm0, %v2193_v49  }
 0x3bd   :  { %3537 = vst.msk [vmem:[%s8219_s1 + $0x3ee] sm:$0x80] %vm3_vm0, %v2193_v49  }
 0x3be   :  { %3572 = vst.msk [vmem:[%s8219_s1 + $0x38] sm:$0x1] %vm3_vm0, %v2295_v50  }
 0x3bf   :  { %3573 = vst.msk [vmem:[%s8219_s1 + $0x77] sm:$0x2] %vm3_vm0, %v2295_v50  }
 0x3c0   :  { %3574 = vst.msk [vmem:[%s8219_s1 + $0xb6] sm:$0x4] %vm3_vm0, %v2295_v50  }
 0x3c1   :  { %3575 = vst.msk [vmem:[%s8219_s1 + $0xf5] sm:$0x8] %vm3_vm0, %v2295_v50  }
 0x3c2   :  { %3576 = vst.msk [vmem:[%s8219_s1 + $0x134] sm:$0x10] %vm3_vm0, %v2295_v50  }
 0x3c3   :  { %3577 = vst.msk [vmem:[%s8219_s1 + $0x173] sm:$0x20] %vm3_vm0, %v2295_v50  }
 0x3c4   :  { %3578 = vst.msk [vmem:[%s8219_s1 + $0x1b2] sm:$0x40] %vm3_vm0, %v2295_v50  }
 0x3c5   :  { %3579 = vst.msk [vmem:[%s8219_s1 + $0x1f1] sm:$0x80] %vm3_vm0, %v2295_v50  }
 0x3c6   :  { %3564 = vst.msk [vmem:[%s8219_s1 + $0x237] sm:$0x1] %vm3_vm0, %v2275_v51  }
 0x3c7   :  { %3565 = vst.msk [vmem:[%s8219_s1 + $0x276] sm:$0x2] %vm3_vm0, %v2275_v51  }
 0x3c8   :  { %3566 = vst.msk [vmem:[%s8219_s1 + $0x2b5] sm:$0x4] %vm3_vm0, %v2275_v51  }
 0x3c9   :  { %3567 = vst.msk [vmem:[%s8219_s1 + $0x2f4] sm:$0x8] %vm3_vm0, %v2275_v51  }
 0x3ca   :  { %3568 = vst.msk [vmem:[%s8219_s1 + $0x333] sm:$0x10] %vm3_vm0, %v2275_v51  }
 0x3cb   :  { %3569 = vst.msk [vmem:[%s8219_s1 + $0x372] sm:$0x20] %vm3_vm0, %v2275_v51  }
 0x3cc   :  { %3570 = vst.msk [vmem:[%s8219_s1 + $0x3b1] sm:$0x40] %vm3_vm0, %v2275_v51  }
 0x3cd   :  { %3571 = vst.msk [vmem:[%s8219_s1 + $0x3f0] sm:$0x80] %vm3_vm0, %v2275_v51  }
 0x3ce   :  { %3555 = vst.msk [vmem:[%s8219_s1 + $0x37] sm:$0x1] %vm3_vm0, %v2254_v52  }
 0x3cf   :  { %3556 = vst.msk [vmem:[%s8219_s1 + $0x76] sm:$0x2] %vm3_vm0, %v2254_v52  }
 0x3d0   :  { %3557 = vst.msk [vmem:[%s8219_s1 + $0xb5] sm:$0x4] %vm3_vm0, %v2254_v52  }
 0x3d1   :  { %3558 = vst.msk [vmem:[%s8219_s1 + $0xf4] sm:$0x8] %vm3_vm0, %v2254_v52  }
 0x3d2   :  { %3559 = vst.msk [vmem:[%s8219_s1 + $0x133] sm:$0x10] %vm3_vm0, %v2254_v52  }
 0x3d3   :  { %3560 = vst.msk [vmem:[%s8219_s1 + $0x172] sm:$0x20] %vm3_vm0, %v2254_v52  }
 0x3d4   :  { %3561 = vst.msk [vmem:[%s8219_s1 + $0x1b1] sm:$0x40] %vm3_vm0, %v2254_v52  }
 0x3d5   :  { %3562 = vst.msk [vmem:[%s8219_s1 + $0x1f0] sm:$0x80] %vm3_vm0, %v2254_v52  }
 0x3d6   :  { %3598 = vst.msk [vmem:[%s8219_s1 + $0x239] sm:$0x1] %vm3_vm0, %v2357_v53  }
 0x3d7   :  { %3599 = vst.msk [vmem:[%s8219_s1 + $0x278] sm:$0x2] %vm3_vm0, %v2357_v53  }
 0x3d8   :  { %3600 = vst.msk [vmem:[%s8219_s1 + $0x2b7] sm:$0x4] %vm3_vm0, %v2357_v53  }
 0x3d9   :  { %3601 = vst.msk [vmem:[%s8219_s1 + $0x2f6] sm:$0x8] %vm3_vm0, %v2357_v53  }
 0x3da   :  { %3602 = vst.msk [vmem:[%s8219_s1 + $0x335] sm:$0x10] %vm3_vm0, %v2357_v53  }
 0x3db   :  { %3603 = vst.msk [vmem:[%s8219_s1 + $0x374] sm:$0x20] %vm3_vm0, %v2357_v53  }
 0x3dc   :  { %3604 = vst.msk [vmem:[%s8219_s1 + $0x3b3] sm:$0x40] %vm3_vm0, %v2357_v53  }
 0x3dd   :  { %3605 = vst.msk [vmem:[%s8219_s1 + $0x3f2] sm:$0x80] %vm3_vm0, %v2357_v53  }
 0x3de   :  { %3589 = vst.msk [vmem:[%s8219_s1 + $0x39] sm:$0x1] %vm3_vm0, %v2336_v54  }
 0x3df   :  { %3590 = vst.msk [vmem:[%s8219_s1 + $0x78] sm:$0x2] %vm3_vm0, %v2336_v54  }
 0x3e0   :  { %3591 = vst.msk [vmem:[%s8219_s1 + $0xb7] sm:$0x4] %vm3_vm0, %v2336_v54  }
 0x3e1   :  { %3592 = vst.msk [vmem:[%s8219_s1 + $0xf6] sm:$0x8] %vm3_vm0, %v2336_v54  }
 0x3e2   :  { %3593 = vst.msk [vmem:[%s8219_s1 + $0x135] sm:$0x10] %vm3_vm0, %v2336_v54  }
 0x3e3   :  { %3594 = vst.msk [vmem:[%s8219_s1 + $0x174] sm:$0x20] %vm3_vm0, %v2336_v54  }
 0x3e4   :  { %3595 = vst.msk [vmem:[%s8219_s1 + $0x1b3] sm:$0x40] %vm3_vm0, %v2336_v54  }
 0x3e5   :  { %3596 = vst.msk [vmem:[%s8219_s1 + $0x1f2] sm:$0x80] %vm3_vm0, %v2336_v54  }
 0x3e6   :  { %3581 = vst.msk [vmem:[%s8219_s1 + $0x238] sm:$0x1] %vm3_vm0, %v2316_v55  }
 0x3e7   :  { %3582 = vst.msk [vmem:[%s8219_s1 + $0x277] sm:$0x2] %vm3_vm0, %v2316_v55  }
 0x3e8   :  { %3583 = vst.msk [vmem:[%s8219_s1 + $0x2b6] sm:$0x4] %vm3_vm0, %v2316_v55  }
 0x3e9   :  { %3584 = vst.msk [vmem:[%s8219_s1 + $0x2f5] sm:$0x8] %vm3_vm0, %v2316_v55  }
 0x3ea   :  { %3585 = vst.msk [vmem:[%s8219_s1 + $0x334] sm:$0x10] %vm3_vm0, %v2316_v55  }
 0x3eb   :  { %3586 = vst.msk [vmem:[%s8219_s1 + $0x373] sm:$0x20] %vm3_vm0, %v2316_v55  }
 0x3ec   :  { %3587 = vst.msk [vmem:[%s8219_s1 + $0x3b2] sm:$0x40] %vm3_vm0, %v2316_v55  }
 0x3ed   :  { %3588 = vst.msk [vmem:[%s8219_s1 + $0x3f1] sm:$0x80] %vm3_vm0, %v2316_v55  }
 0x3ee   :  { %3623 = vst.msk [vmem:[%s8219_s1 + $0x3b] sm:$0x1] %vm3_vm0, %v2418_v56  }
 0x3ef   :  { %3624 = vst.msk [vmem:[%s8219_s1 + $0x7a] sm:$0x2] %vm3_vm0, %v2418_v56  }
 0x3f0   :  { %3625 = vst.msk [vmem:[%s8219_s1 + $0xb9] sm:$0x4] %vm3_vm0, %v2418_v56  }
 0x3f1   :  { %3626 = vst.msk [vmem:[%s8219_s1 + $0xf8] sm:$0x8] %vm3_vm0, %v2418_v56  }
 0x3f2   :  { %3627 = vst.msk [vmem:[%s8219_s1 + $0x137] sm:$0x10] %vm3_vm0, %v2418_v56  }
 0x3f3   :  { %3628 = vst.msk [vmem:[%s8219_s1 + $0x176] sm:$0x20] %vm3_vm0, %v2418_v56  }
 0x3f4   :  { %3629 = vst.msk [vmem:[%s8219_s1 + $0x1b5] sm:$0x40] %vm3_vm0, %v2418_v56  }
 0x3f5   :  { %3630 = vst.msk [vmem:[%s8219_s1 + $0x1f4] sm:$0x80] %vm3_vm0, %v2418_v56  }
 0x3f6   :  { %3615 = vst.msk [vmem:[%s8219_s1 + $0x23a] sm:$0x1] %vm3_vm0, %v2398_v57  }
 0x3f7   :  { %3616 = vst.msk [vmem:[%s8219_s1 + $0x279] sm:$0x2] %vm3_vm0, %v2398_v57  }
 0x3f8   :  { %3617 = vst.msk [vmem:[%s8219_s1 + $0x2b8] sm:$0x4] %vm3_vm0, %v2398_v57  }
 0x3f9   :  { %3618 = vst.msk [vmem:[%s8219_s1 + $0x2f7] sm:$0x8] %vm3_vm0, %v2398_v57  }
 0x3fa   :  { %3619 = vst.msk [vmem:[%s8219_s1 + $0x336] sm:$0x10] %vm3_vm0, %v2398_v57  }
 0x3fb   :  { %3620 = vst.msk [vmem:[%s8219_s1 + $0x375] sm:$0x20] %vm3_vm0, %v2398_v57  }
 0x3fc   :  { %3621 = vst.msk [vmem:[%s8219_s1 + $0x3b4] sm:$0x40] %vm3_vm0, %v2398_v57  }
 0x3fd   :  { %3622 = vst.msk [vmem:[%s8219_s1 + $0x3f3] sm:$0x80] %vm3_vm0, %v2398_v57  }
 0x3fe   :  { %3606 = vst.msk [vmem:[%s8219_s1 + $0x3a] sm:$0x1] %vm3_vm0, %v2377_v58  }
 0x3ff   :  { %3607 = vst.msk [vmem:[%s8219_s1 + $0x79] sm:$0x2] %vm3_vm0, %v2377_v58  }
 0x400   :  { %3608 = vst.msk [vmem:[%s8219_s1 + $0xb8] sm:$0x4] %vm3_vm0, %v2377_v58  }
 0x401   :  { %3609 = vst.msk [vmem:[%s8219_s1 + $0xf7] sm:$0x8] %vm3_vm0, %v2377_v58  }
 0x402   :  { %3610 = vst.msk [vmem:[%s8219_s1 + $0x136] sm:$0x10] %vm3_vm0, %v2377_v58  }
 0x403   :  { %3611 = vst.msk [vmem:[%s8219_s1 + $0x175] sm:$0x20] %vm3_vm0, %v2377_v58  }
 0x404   :  { %3612 = vst.msk [vmem:[%s8219_s1 + $0x1b4] sm:$0x40] %vm3_vm0, %v2377_v58  }
 0x405   :  { %3613 = vst.msk [vmem:[%s8219_s1 + $0x1f3] sm:$0x80] %vm3_vm0, %v2377_v58  }
 0x406   :  { %3649 = vst.msk [vmem:[%s8219_s1 + $0x23c] sm:$0x1] %vm3_vm0, %v2480_v59  }
 0x407   :  { %3650 = vst.msk [vmem:[%s8219_s1 + $0x27b] sm:$0x2] %vm3_vm0, %v2480_v59  }
 0x408   :  { %3651 = vst.msk [vmem:[%s8219_s1 + $0x2ba] sm:$0x4] %vm3_vm0, %v2480_v59  }
 0x409   :  { %3652 = vst.msk [vmem:[%s8219_s1 + $0x2f9] sm:$0x8] %vm3_vm0, %v2480_v59  }
 0x40a   :  { %3653 = vst.msk [vmem:[%s8219_s1 + $0x338] sm:$0x10] %vm3_vm0, %v2480_v59  }
 0x40b   :  { %3654 = vst.msk [vmem:[%s8219_s1 + $0x377] sm:$0x20] %vm3_vm0, %v2480_v59  }
 0x40c   :  { %3655 = vst.msk [vmem:[%s8219_s1 + $0x3b6] sm:$0x40] %vm3_vm0, %v2480_v59  }
 0x40d   :  { %3656 = vst.msk [vmem:[%s8219_s1 + $0x3f5] sm:$0x80] %vm3_vm0, %v2480_v59  }
 0x40e   :  { %3640 = vst.msk [vmem:[%s8219_s1 + $0x3c] sm:$0x1] %vm3_vm0, %v2459_v60  }
 0x40f   :  { %3641 = vst.msk [vmem:[%s8219_s1 + $0x7b] sm:$0x2] %vm3_vm0, %v2459_v60  }
 0x410   :  { %3642 = vst.msk [vmem:[%s8219_s1 + $0xba] sm:$0x4] %vm3_vm0, %v2459_v60  }
 0x411   :  { %3643 = vst.msk [vmem:[%s8219_s1 + $0xf9] sm:$0x8] %vm3_vm0, %v2459_v60  }
 0x412   :  { %3644 = vst.msk [vmem:[%s8219_s1 + $0x138] sm:$0x10] %vm3_vm0, %v2459_v60  }
 0x413   :  { %3645 = vst.msk [vmem:[%s8219_s1 + $0x177] sm:$0x20] %vm3_vm0, %v2459_v60  }
 0x414   :  { %3646 = vst.msk [vmem:[%s8219_s1 + $0x1b6] sm:$0x40] %vm3_vm0, %v2459_v60  }
 0x415   :  { %3647 = vst.msk [vmem:[%s8219_s1 + $0x1f5] sm:$0x80] %vm3_vm0, %v2459_v60  }
 0x416   :  { %3632 = vst.msk [vmem:[%s8219_s1 + $0x23b] sm:$0x1] %vm3_vm0, %v2439_v61  }
 0x417   :  { %3633 = vst.msk [vmem:[%s8219_s1 + $0x27a] sm:$0x2] %vm3_vm0, %v2439_v61  }
 0x418   :  { %3634 = vst.msk [vmem:[%s8219_s1 + $0x2b9] sm:$0x4] %vm3_vm0, %v2439_v61  }
 0x419   :  { %3635 = vst.msk [vmem:[%s8219_s1 + $0x2f8] sm:$0x8] %vm3_vm0, %v2439_v61  }
 0x41a   :  { %3636 = vst.msk [vmem:[%s8219_s1 + $0x337] sm:$0x10] %vm3_vm0, %v2439_v61  }
 0x41b   :  { %3637 = vst.msk [vmem:[%s8219_s1 + $0x376] sm:$0x20] %vm3_vm0, %v2439_v61  }
 0x41c   :  { %3638 = vst.msk [vmem:[%s8219_s1 + $0x3b5] sm:$0x40] %vm3_vm0, %v2439_v61  }
 0x41d   :  { %3639 = vst.msk [vmem:[%s8219_s1 + $0x3f4] sm:$0x80] %vm3_vm0, %v2439_v61  }
 0x41e   :  { %3674 = vst.msk [vmem:[%s8219_s1 + $0x3e] sm:$0x1] %vm3_vm0, %v2541_v62  }
 0x41f   :  { %3675 = vst.msk [vmem:[%s8219_s1 + $0x7d] sm:$0x2] %vm3_vm0, %v2541_v62  }
 0x420   :  { %3676 = vst.msk [vmem:[%s8219_s1 + $0xbc] sm:$0x4] %vm3_vm0, %v2541_v62  }
 0x421   :  { %3677 = vst.msk [vmem:[%s8219_s1 + $0xfb] sm:$0x8] %vm3_vm0, %v2541_v62  }
 0x422   :  { %3678 = vst.msk [vmem:[%s8219_s1 + $0x13a] sm:$0x10] %vm3_vm0, %v2541_v62  }
 0x423   :  { %3679 = vst.msk [vmem:[%s8219_s1 + $0x179] sm:$0x20] %vm3_vm0, %v2541_v62  }
 0x424   :  { %3680 = vst.msk [vmem:[%s8219_s1 + $0x1b8] sm:$0x40] %vm3_vm0, %v2541_v62  }
 0x425   :  { %3681 = vst.msk [vmem:[%s8219_s1 + $0x1f7] sm:$0x80] %vm3_vm0, %v2541_v62  }
 0x426   :  { %3666 = vst.msk [vmem:[%s8219_s1 + $0x23d] sm:$0x1] %vm3_vm0, %v2521_v63  }
 0x427   :  { %3667 = vst.msk [vmem:[%s8219_s1 + $0x27c] sm:$0x2] %vm3_vm0, %v2521_v63  }
 0x428   :  { %3668 = vst.msk [vmem:[%s8219_s1 + $0x2bb] sm:$0x4] %vm3_vm0, %v2521_v63  }
 0x429   :  { %3669 = vst.msk [vmem:[%s8219_s1 + $0x2fa] sm:$0x8] %vm3_vm0, %v2521_v63  }
 0x42a   :  { %3670 = vst.msk [vmem:[%s8219_s1 + $0x339] sm:$0x10] %vm3_vm0, %v2521_v63  }
 0x42b   :  { %3671 = vst.msk [vmem:[%s8219_s1 + $0x378] sm:$0x20] %vm3_vm0, %v2521_v63  }
 0x42c   :  { %3672 = vst.msk [vmem:[%s8219_s1 + $0x3b7] sm:$0x40] %vm3_vm0, %v2521_v63  }
 0x42d   :  { %3673 = vst.msk [vmem:[%s8219_s1 + $0x3f6] sm:$0x80] %vm3_vm0, %v2521_v63  }
 0x42e   :  { %3657 = vst.msk [vmem:[%s8219_s1 + $0x3d] sm:$0x1] %vm3_vm0, %v2500_v0  }
 0x42f   :  { %3658 = vst.msk [vmem:[%s8219_s1 + $0x7c] sm:$0x2] %vm3_vm0, %v2500_v0  }
 0x430   :  { %3659 = vst.msk [vmem:[%s8219_s1 + $0xbb] sm:$0x4] %vm3_vm0, %v2500_v0  }
 0x431   :  { %3660 = vst.msk [vmem:[%s8219_s1 + $0xfa] sm:$0x8] %vm3_vm0, %v2500_v0  }
 0x432   :  { %3661 = vst.msk [vmem:[%s8219_s1 + $0x139] sm:$0x10] %vm3_vm0, %v2500_v0  }
 0x433   :  { %3662 = vst.msk [vmem:[%s8219_s1 + $0x178] sm:$0x20] %vm3_vm0, %v2500_v0  }
 0x434   :  { %3663 = vst.msk [vmem:[%s8219_s1 + $0x1b7] sm:$0x40] %vm3_vm0, %v2500_v0  }
 0x435   :  { %3664 = vst.msk [vmem:[%s8219_s1 + $0x1f6] sm:$0x80] %vm3_vm0, %v2500_v0  }
 0x436   :  { %3700 = vst.msk [vmem:[%s8219_s1 + $0x23f] sm:$0x1] %vm3_vm0, %v2603_v1  }
 0x437   :  { %3701 = vst.msk [vmem:[%s8219_s1 + $0x27e] sm:$0x2] %vm3_vm0, %v2603_v1  }
 0x438   :  { %3702 = vst.msk [vmem:[%s8219_s1 + $0x2bd] sm:$0x4] %vm3_vm0, %v2603_v1  }
 0x439   :  { %3703 = vst.msk [vmem:[%s8219_s1 + $0x2fc] sm:$0x8] %vm3_vm0, %v2603_v1  }
 0x43a   :  { %3704 = vst.msk [vmem:[%s8219_s1 + $0x33b] sm:$0x10] %vm3_vm0, %v2603_v1  }
 0x43b   :  { %3705 = vst.msk [vmem:[%s8219_s1 + $0x37a] sm:$0x20] %vm3_vm0, %v2603_v1  }
 0x43c   :  { %3706 = vst.msk [vmem:[%s8219_s1 + $0x3b9] sm:$0x40] %vm3_vm0, %v2603_v1  }
 0x43d   :  { %3707 = vst.msk [vmem:[%s8219_s1 + $0x3f8] sm:$0x80] %vm3_vm0, %v2603_v1  }
 0x43e   :  { %3691 = vst.msk [vmem:[%s8219_s1 + $0x3f] sm:$0x1] %vm3_vm0, %v2582_v2  }
 0x43f   :  { %3692 = vst.msk [vmem:[%s8219_s1 + $0x7e] sm:$0x2] %vm3_vm0, %v2582_v2  }
 0x440   :  { %3693 = vst.msk [vmem:[%s8219_s1 + $0xbd] sm:$0x4] %vm3_vm0, %v2582_v2  }
 0x441   :  { %3694 = vst.msk [vmem:[%s8219_s1 + $0xfc] sm:$0x8] %vm3_vm0, %v2582_v2  }
 0x442   :  { %3695 = vst.msk [vmem:[%s8219_s1 + $0x13b] sm:$0x10] %vm3_vm0, %v2582_v2  }
 0x443   :  { %3696 = vst.msk [vmem:[%s8219_s1 + $0x17a] sm:$0x20] %vm3_vm0, %v2582_v2  }
 0x444   :  { %3697 = vst.msk [vmem:[%s8219_s1 + $0x1b9] sm:$0x40] %vm3_vm0, %v2582_v2  }
 0x445   :  { %3698 = vst.msk [vmem:[%s8219_s1 + $0x1f8] sm:$0x80] %vm3_vm0, %v2582_v2  }
 0x446   :  { %3683 = vst.msk [vmem:[%s8219_s1 + $0x23e] sm:$0x1] %vm3_vm0, %v2562_v3  }
 0x447   :  { %3684 = vst.msk [vmem:[%s8219_s1 + $0x27d] sm:$0x2] %vm3_vm0, %v2562_v3  }
 0x448   :  { %3685 = vst.msk [vmem:[%s8219_s1 + $0x2bc] sm:$0x4] %vm3_vm0, %v2562_v3  }
 0x449   :  { %3686 = vst.msk [vmem:[%s8219_s1 + $0x2fb] sm:$0x8] %vm3_vm0, %v2562_v3  }
 0x44a   :  { %3687 = vst.msk [vmem:[%s8219_s1 + $0x33a] sm:$0x10] %vm3_vm0, %v2562_v3  }
 0x44b   :  { %3688 = vst.msk [vmem:[%s8219_s1 + $0x379] sm:$0x20] %vm3_vm0, %v2562_v3  }
 0x44c   :  { %3689 = vst.msk [vmem:[%s8219_s1 + $0x3b8] sm:$0x40] %vm3_vm0, %v2562_v3  }
 0x44d   :  { %3690 = vst.msk [vmem:[%s8219_s1 + $0x3f7] sm:$0x80] %vm3_vm0, %v2562_v3  }
 0x44e   :  { %4 = vst.msk [vmem:[%s8219_s1] sm:$0x1] %vm3_vm0, %v6557_v21  }
 0x44f   :  { %2621 = vst.msk [vmem:[%s8219_s1 + $0x3f] sm:$0x2] %vm3_vm0, %v6557_v21  }
 0x450   :  { %2622 = vst.msk [vmem:[%s8219_s1 + $0x7e] sm:$0x4] %vm3_vm0, %v6557_v21  }
 0x451   :  { %2623 = vst.msk [vmem:[%s8219_s1 + $0xbd] sm:$0x8] %vm3_vm0, %v6557_v21  }
 0x452   :  { %2624 = vst.msk [vmem:[%s8219_s1 + $0xfc] sm:$0x10] %vm3_vm0, %v6557_v21  }
 0x453   :  { %2625 = vst.msk [vmem:[%s8219_s1 + $0x13b] sm:$0x20] %vm3_vm0, %v6557_v21  }
 0x454   :  { %2626 = vst.msk [vmem:[%s8219_s1 + $0x17a] sm:$0x40] %vm3_vm0, %v6557_v21  }
 0x455   :  { %2627 = vst.msk [vmem:[%s8219_s1 + $0x1b9] sm:$0x80] %vm3_vm0, %v6557_v21  }
 0x456   :  { %2629 = vst.msk [vmem:[%s8219_s1 + $0x200] sm:$0x1] %vm3_vm0, %v6854_v31  }
 0x457   :  { %2630 = vst.msk [vmem:[%s8219_s1 + $0x23f] sm:$0x2] %vm3_vm0, %v6854_v31  }
 0x458   :  { %2631 = vst.msk [vmem:[%s8219_s1 + $0x27e] sm:$0x4] %vm3_vm0, %v6854_v31  }
 0x459   :  { %2632 = vst.msk [vmem:[%s8219_s1 + $0x2bd] sm:$0x8] %vm3_vm0, %v6854_v31  }
 0x45a   :  { %2633 = vst.msk [vmem:[%s8219_s1 + $0x2fc] sm:$0x10] %vm3_vm0, %v6854_v31  }
 0x45b   :  { %2634 = vst.msk [vmem:[%s8219_s1 + $0x33b] sm:$0x20] %vm3_vm0, %v6854_v31  }
 0x45c   :  { %2635 = vst.msk [vmem:[%s8219_s1 + $0x37a] sm:$0x40] %vm3_vm0, %v6854_v31  }
 0x45d   :  { %2636 = vst.msk [vmem:[%s8219_s1 + $0x3b9] sm:$0x80] %vm3_vm0, %v6854_v31  }

// kernel: ec_for_graph_tcn.1
= control target key start
LH: loop header
LB: loop body
LE: loop exit
PB: predicated region body
PF: predicated region fallthrough
CT: control target
= control target key end

     0   :  { %12 = vsyncpa [#allocation3], 0  ;;  %s11780_s0 = inlined_call_operand.vmem [shape: f32[6,512], index: 0, kind: input, shape index: {}]   ;;  %s11781_s1 = inlined_call_operand.vmem [shape: f32[4,1024], index: 1, kind: input, shape index: {}]   ;;  %s11782_s2 = inlined_call_operand.vmem [shape: s32[1,1024], index: 2, kind: input, shape index: {}]   ;;  %s11783_s3 = inlined_call_operand.vmem [shape: s32[1,1024], index: 3, kind: input, shape index: {}]   ;;  %s11784_s4 = inlined_call_operand.vmem [shape: s32[1024,1], index: 4, kind: input, shape index: {}]   ;;  %s11785_s5 = inlined_call_operand.vmem [shape: bf16[912,128], index: 5, kind: input, shape index: {}]   ;;  %s11786_s6 = inlined_call_operand.vmem [shape: f32[40,128], index: 6, kind: input, shape index: {}]   ;;  %s11787_s7 = inlined_call_operand.hbm [shape: f32[1,1024], index: 7, kind: output, shape index: {}]  }
   0x1   :  { %14 = vsyncpa [#allocation3 + $0x1], 0  ;;  %s7181_s24 = smov 0   ;;  %s7183_s25 = smov 0  }
   0x2   :  { %s7185_s26 = smov 0   ;;  %s7187_s27 = smov 0  }
   0x3 LB: > { %s7202_s28 = sadd.s32 4294967295, %s7120_s27   ;;  %s5499_s29 = sadd.s32 4294967294, %s7120_s27   ;;  %s7120_s27 = sphi %s7187_s27, %s13870_s27   ;;  %s7116_s26 = sphi %s7185_s26, %s13869_s26   ;;  %s7112_s25 = sphi %s7183_s25, %s13868_s25   ;;  %s7108_s24 = sphi %s7181_s24, %s13867_s24  }
   0x4   : > { %s7206_s30 = sadd.s32 1, %s7120_s27   ;;  %s199_s8 = sadd.s32 1, %s7116_s26 }
   0x5   : > { %s196_s9 = ssub.s32 %s7120_s27, %s7206_s30  ;;  %p209_p0 = scmp.ne.s32.totalorder %s7116_s26, %s7112_s25 }
   0x6   : > { %p197_p1 = scmp.eq.s32.totalorder %s196_s9, 0  ;;  %p210_p2 = scmp.eq.s32.totalorder %s7202_s28, 1 }
   0x7   : > { %p215_p3 = scmp.ne.s32.totalorder %s7112_s25, %s7108_s24  ;;  %p216_p4 = scmp.eq.s32.totalorder %s5499_s29, 1 }
   0x8   : > { %s7217_s10 = scalar_select %p197_p1, %s7116_s26, %s199_s8  }
   0x9   : > { %p7219_p5 = por %p210_p2, %p209_p0  ;;  %p7223_p6 = por %p216_p4, %p215_p3 }
   0xa   : > { %p5502_p7 = scmp.ge.s32.totalorder %s7120_s27, 1  ;;  %p283_p8 = scmp.lt.s32.totalorder %s7120_s27, 3 }
   0xc   : > { %p284_p9 = pnand %p5502_p7, %p283_p8 }
   0xe   : > { %287 = sbr.rel (%p284_p9) target bundleno = 4413 (0x113d), region = 48 }
  0x13   : > { %s5504_s13 = sshll.u32 %s7202_s28, 1  ;;  %vm1660_vm0 = vcmask 1042432   ;;  %v6892_v6 = vld [vmem:[%s11785_s5] sm:$0xff]  ;;  %vm1650_vm1 = vcmask 48128   ;;  %v6893_v7 = vld [vmem:[%s11785_s5 + $0x8] sm:$0xff]  ;;  %s7243_s29 = sshll.u32 %s7202_s28, 2  ;;  %v11828_v61 = vlaneseq }
  0x14   : > { %p334_p10 = scmp.lt.s32.totalorder %s5504_s13, 3  ;;  %v1634_v8 = vld [vmem:[%s11785_s5 + $0x10] sm:$0xf]  ;;  %p340_p11 = scmp.lt.s32.totalorder %s7243_s29, 7  ;;  %vm11790_vm2 = vcmask 1043456   ;;  %vm11788_vm3 = vcmask 1041408  }
  0x15   : > { %v1646_v9 = vunpack.c.l.b16 %v1634_v8  ;;  %v6894_v49 = vld [vmem:[%s11785_s5 + $0x20] sm:$0xff]  ;;  %vm11791_vm4 = vcmask 31744   ;;  %v1629_v56 = vld [vmem:[%s11785_s5 + $0x18] sm:$0x7]  ;;  %vm11789_vm5 = vcmask 326656   ;;  %v7272_v57 = vld [vmem:[%s11785_s5 + $0x28] sm:$0xff] }
  0x16   : > { %s13872_s13 = smov (!%p334_p10, %s5504_s13), 3  ;;  %v1773_v58 = vld [vmem:[%s11785_s5 + $0x30] sm:$0xf]  ;;  %v7293_v63 = vshrl.u32 %v11828_v61, 7  ;;  %v12536_v61 = vmov 0  ;;  %s5510_s22 = sshll.u32 %s7202_s28, 6 }
  0x17   : > { %s5505_s14 = sshll.u32 %s13872_s13, 3  ;;  %v1649_v10 = vpack.c.b16 %v1646_v9, %v1646_v9  ;;  %v1800_v60 = vunpack.c.l.b16 %v1773_v58  ;;  %v12448_v9 = vmov 0  ;;  %v12524_v58 = vmov 0  ;;  %p356_p12 = scmp.lt.s32.totalorder %s5510_s22, 127 }
  0x18   : > { %s337_s17 = scalar_lea.vmem %s11780_s0, %s5505_s14  ;;  %v7319_v8 = vadd.s32 232, %v7293_v63  ;;  %s330_s21 = sand.u32 1, %s7112_s25  }
  0x19   : > { %v1625_v0 = vld [vmem:[%s337_s17] sm:$0x3f]  ;;  %v1626_v1 = vld [vmem:[%s337_s17 + $0x8] sm:$0x3f]  ;;  %s7247_s8 = scalar_select %p340_p11, %s7243_s29, 7 }
  0x1a   : > { %v1635_v2 = vpack.c.bf16 %v1625_v0, %v1625_v0  ;;  %v1636_v3 = vpack.c.bf16 %v1626_v1, %v1626_v1  ;;  %v7295_v0 = vpack.c.b16 %v1800_v60, %v1800_v60  ;;  %v7298_v1 = vadd.s32 112, %v7293_v63  ;;  %s13874_s22 = smov (!%p356_p12, %s5510_s22), 127  ;;  %s5393_s13 = scalar_lea.hbm %s11787_s7, %s7243_s29 }
  0x1b   : > { %s5507_s9 = sshll.u32 %s7247_s8, 2  ;;  %v12527_v60 = vmov 0  ;;  %s348_s17 = scalar_lea.vmem %s11782_s2, %s7247_s8 }
  0x1c   : > { %v1662_v4 = vsel %vm1660_vm0, %v1635_v2, 0  ;;  %v1665_v5 = vsel %vm1660_vm0, %v1636_v3, 0  ;;  %s343_s15 = scalar_lea.vmem %s11781_s1, %s5507_s9  ;;  %s353_s9 = scalar_lea.vmem %s11783_s3, %s7247_s8  ;;  %v7301_v2 = vadd.s32 120, %v7293_v63  ;;  %v7304_v3 = vadd.s32 240, %v7293_v63 }
  0x1d   : > { %1674 = vmatpush.bf16.msra.mxu0 %v1662_v4  ;;  %1697 = vmatpush.bf16.msra.mxu1 %v1665_v5  ;;  %v1627_v17 = vld [vmem:[%s343_s15] sm:$0xff]  ;;  %v1628_v20 = vld [vmem:[%s343_s15 + $0x8] sm:$0xff]  ;;  %v7307_v4 = vadd.s32 248, %v7293_v63  ;;  %v7310_v5 = vadd.s32 96, %v7293_v63  ;;  %s5511_s23 = sshll.u32 %s13874_s22, 3  ;;  %s11735_s22 = sshll.u32 %s330_s21, 2 }
  0x1e   : > { %1776 = vst [vmem:[#allocation1] ss:$2 sm:$0xff] %v1627_v17  ;;  %v7285_v59 = vld [vmem:[%s353_s9] sm:$0xf]  ;;  %v12457_v17 = vmov 0  ;;  %s9020_s14 = scalar_lea.vmem %s11784_s4, %s5511_s23  ;;  %s5397_s15 = sshll.u32 %s5393_s13, 4  ;;  %s5398_s15 = int_to_ptr.hbm [resolvable:$true] %s5397_s15 }
  0x1f   : > { %1778 = vst [vmem:[#allocation1 + $0x10] ss:$2 sm:$0xff] %v1628_v20  ;;  %v7290_v62 = vperm.slane %v7285_v59, 0  ;;  %v7390_v20 = vadd.s32 192, %v7293_v63  ;;  %s5383_s29 = scalar_lea.sflag [#allocation3], %s330_s21  ;;  %s7072_s16 = sshra.s32 %s5398_s15, 4  ;;  %s7073_s16 = int_to_ptr.hbm [resolvable:$true] %s7072_s16 }
  0x20   : > { %5520 = vmatmul.msk.bf16.vlgmr.msra.gmra.mxu0 %vm1650_vm1, %v6892_v6  ;;  %5523 = vmatmul.msk.bf16.vlgmr.msra.gmra.mxu1 %vm1650_vm1, %v6892_v6  ;;  %v7313_v6 = vadd.s32 104, %v7293_v63  ;;  %s7078_s19 = scalar_lea.hbm %s11787_s7, 8  ;;  %p7079_p2 = scmp.lt.s32.totalorder %s7073_s16, %s11787_s7 }
  0x21   : > { %vm849_vm6 = vcmp.eq.s32.totalorder %v7290_v62, %v7298_v1  ;;  %vm853_vm7 = vcmp.eq.s32.totalorder %v7290_v62, %v7301_v2  ;;  %vm913_vm8 = vcmp.eq.s32.totalorder %v7290_v62, %v7304_v3  ;;  %vm917_vm9 = vcmp.eq.s32.totalorder %v7290_v62, %v7307_v4 }
  0x22   : > { %vm7329_vm10 = vmpackc.low %vm853_vm7, %vm849_vm6  ;;  %vm841_vm11 = vcmp.eq.s32.totalorder %v7290_v62, %v7310_v5  ;;  %vm845_vm12 = vcmp.eq.s32.totalorder %v7290_v62, %v7313_v6  ;;  %vm909_vm14 = vcmp.eq.s32.totalorder %v7290_v62, %v7319_v8 }
  0x23   : > { %v12449_v9 = vsel %vm7329_vm10, 4294967295, %v12448_v9  ;;  %vm7344_vm15 = vmpackc.low %vm917_vm9, %vm913_vm8 }
  0x24   : > { %12450 = vst [vmem:[#allocation5_spill] sm:$0xff] %v12449_v9  ;;  %vm7363_vm0 = vmpackc.low %vm845_vm12, %vm841_vm11  ;;  %v12627_v9 = vmov 0 }
  0x25   : > { %v1779_v33 = vld.sshfl [vmem:[#allocation1] sm:$0xff pattern:$0x75316420]  ;;  %v1780_v34 = vld.sshfl [vmem:[#allocation1 + $0x8] sm:$0xff pattern:$0x75316420] }
  0x26   : > { %v1781_v27 = vld.sshfl [vmem:[#allocation1 + $0x10] sm:$0xff pattern:$0x75316420]  ;;  %v1782_v28 = vld.sshfl [vmem:[#allocation1 + $0x18] sm:$0xff pattern:$0x75316420]  ;;  %v1787_v47 = vpack.c.bf16 %v1779_v33, %v1779_v33  ;;  %v1788_v48 = vpack.c.bf16 %v1780_v34, %v1780_v34 }
  0x27   : > { %v1789_v31 = vpack.c.bf16 %v1781_v27, %v1781_v27  ;;  %v1790_v32 = vpack.c.bf16 %v1782_v28, %v1782_v28  ;;  %v7427_v27 = vadd.s32 184, %v7293_v63  ;;  %v12467_v28 = vmov 0 }
  0x28   : > { %v1816_v54 = vsel %vm11788_vm3, %v1787_v47, 0  ;;  %v1819_v55 = vsel %vm11788_vm3, %v1788_v48, 0  ;;  %v7465_v33 = vadd.s32 168, %v7293_v63  ;;  %v12474_v34 = vmov 0 }
  0x29   : > { %v1822_v37 = vsel %vm11788_vm3, %v1789_v31, 0  ;;  %v1825_v38 = vsel %vm11788_vm3, %v1790_v32, 0  ;;  %12466 = vst [vmem:[#allocation11_spill] sm:$0xff] %v7427_v27  ;;  %v7455_v31 = vadd.s32 40, %v7293_v63  ;;  %v7462_v32 = vadd.s32 160, %v7293_v63 }
  0x2a   : > { %1880 = vmatpush.bf16.msrb.mxu0 %v1822_v37  ;;  %1903 = vmatpush.bf16.msrb.mxu1 %v1825_v38  ;;  %12473 = vst [vmem:[#allocation14_spill] sm:$0xff] %v7465_v33  ;;  %v7489_v37 = vadd.s32 24, %v7293_v63  ;;  %v7496_v38 = vadd.s32 144, %v7293_v63  ;;  %v12489_v47 = vmov 0  ;;  %v12494_v48 = vmov 0 }
  0x30   : > { %5521 = vmatmul.msk.bf16.gmra.mxu0 %vm1650_vm1, %v6893_v7  ;;  %5524 = vmatmul.msk.bf16.gmra.mxu1 %vm1650_vm1, %v6893_v7  ;;  %v7316_v7 = vadd.s32 224, %v7293_v63 }
  0x32   : > { %vm905_vm13 = vcmp.eq.s32.totalorder %v7290_v62, %v7316_v7 }
  0x40   : > { %5522 = vmatmul.msk.bf16.gmra.mxu0 %vm1650_vm1, %v1649_v10  ;;  %5525 = vmatmul.msk.bf16.gmra.mxu1 %vm1650_vm1, %v1649_v10  ;;  %v11850_v10 = vmov 1.0|1.0   ;;  %vm7371_vm1 = vmpackc.low %vm909_vm14, %vm905_vm13 }
  0x41   : > { %5553 = vmatpush.bf16.msk.msra.mxu0 %vm7329_vm10, %v11850_v10  ;;  %5569 = vmatpush.bf16.msk.msra.mxu1 %vm7344_vm15, %v11850_v10  ;;  %v12458_v17 = vsel %vm7371_vm1, 4294967295, %v12457_v17 }
  0x42   : > { %12459 = vst [vmem:[#allocation8_spill] sm:$0xff] %v12458_v17 }
  0x45   : > { %5555 = vmatpush.bf16.msk.msra.mxu0 %vm7363_vm0, %v11850_v10  ;;  %5571 = vmatpush.bf16.msk.msra.mxu1 %vm7371_vm1, %v11850_v10 }
  0x50   : > { %5542 = vmatmul.msk.bf16.vlgmr.msrb.gmra.mxu0 %vm11791_vm4, %v6894_v49  ;;  %5545 = vmatmul.msk.bf16.vlgmr.msrb.gmra.mxu1 %vm11791_vm4, %v6894_v49 }
  0x60   : > { %5543 = vmatmul.msk.bf16.gmra.mxu0 %vm11791_vm4, %v7272_v57  ;;  %5546 = vmatmul.msk.bf16.gmra.mxu1 %vm11791_vm4, %v7272_v57 }
  0x70   : > { %5544 = vmatmul.msk.bf16.gmra.mxu0 %vm11791_vm4, %v7295_v0  ;;  %5547 = vmatmul.msk.bf16.gmra.mxu1 %vm11791_vm4, %v7295_v0 }
  0x9d   : > { %v1676_v11 = vpop.f32.mrf.mxu0  ;;  %v1699_v12 = vpop.f32.mrf.mxu1 }
  0x9e   : > { %v1713_v50 = vmax.f32 %v1676_v11, 0.0  ;;  %v1714_v51 = vmax.f32 %v1699_v12, 0.0  ;;  %v12451_v11 = vmov 0  ;;  %v7349_v12 = vadd.s32 80, %v7293_v63 }
  0x9f   : > { %v12452_v11 = vsel %vm7344_vm15, 4294967295, %v12451_v11  ;;  %vm12492_vm15 = vcmask 31744  }
  0xa0   : > { %12453 = vst [vmem:[#allocation6_spill] sm:$0xff] %v12452_v11  ;;  %vm833_vm6 = vcmp.eq.s32.totalorder %v7290_v62, %v7349_v12  ;;  %v12591_v11 = vmov 0 }
  0xa5   : > { %v1678_v13 = vpop.f32.mrf.mxu0  ;;  %v1701_v14 = vpop.f32.mrf.mxu1 }
  0xa6   : > { %v1715_v41 = vmax.f32 %v1678_v13, 0.0  ;;  %v1716_v42 = vmax.f32 %v1701_v14, 0.0  ;;  %v7352_v13 = vadd.s32 88, %v7293_v63  ;;  %v7355_v14 = vadd.s32 208, %v7293_v63 }
  0xa8   : > { %v1723_v52 = vpack.c.bf16 %v1715_v41, %v1713_v50  ;;  %v1724_v53 = vpack.c.bf16 %v1716_v42, %v1714_v51  ;;  %vm837_vm7 = vcmp.eq.s32.totalorder %v7290_v62, %v7352_v13  ;;  %vm897_vm8 = vcmp.eq.s32.totalorder %v7290_v62, %v7355_v14 }
  0xa9   : > { %vm7401_vm11 = vmpackc.low %vm837_vm7, %vm833_vm6  ;;  %vm889_vm6 = vcmp.eq.s32.totalorder %v7290_v62, %v7390_v20  ;;  %v7512_v41 = vadd.s32 8, %v7293_v63  ;;  %v12483_v42 = vmov 0  ;;  %v12500_v50 = vmov 0 }
  0xaa   : > { %5557 = vmatpush.bf16.msk.msra.mxu0 %vm7401_vm11, %v11850_v10  ;;  %v12503_v51 = vmov 0 }
  0xad   : > { %v1681_v15 = vpop.f32.mrf.mxu0  ;;  %v1704_v16 = vpop.f32.mrf.mxu1 }
  0xae   : > { %v1717_v39 = vmax.f32 %v1681_v15, 0.0  ;;  %v1718_v40 = vmax.f32 %v1704_v16, 0.0  ;;  %v7358_v15 = vadd.s32 216, %v7293_v63  ;;  %v12454_v16 = vmov 0 }
  0xaf   : > { %v12455_v16 = vsel %vm7363_vm0, 4294967295, %v12454_v16 }
  0xb0   : > { %12456 = vst [vmem:[#allocation7_spill] sm:$0xff] %v12455_v16  ;;  %vm901_vm9 = vcmp.eq.s32.totalorder %v7290_v62, %v7358_v15 }
  0xb1   : > { %vm7405_vm12 = vmpackc.low %vm901_vm9, %vm897_vm8 }
  0xb2   : > { %5573 = vmatpush.bf16.msk.msra.mxu1 %vm7405_vm12, %v11850_v10 }
  0xb5   : > { %v1683_v18 = vpop.f32.mrf.mxu0  ;;  %v1706_v19 = vpop.f32.mrf.mxu1 }
  0xb6   : > { %v1719_v23 = vmax.f32 %v1683_v18, 0.0  ;;  %v1720_v24 = vmax.f32 %v1706_v19, 0.0  ;;  %v7380_v18 = vadd.s32 64, %v7293_v63  ;;  %v7383_v19 = vadd.s32 72, %v7293_v63 }
  0xb8   : > { %v1725_v45 = vpack.c.bf16 %v1719_v23, %v1717_v39  ;;  %v1726_v46 = vpack.c.bf16 %v1720_v24, %v1718_v40  ;;  %v12463_v23 = vmov 0  ;;  %vm825_vm13 = vcmp.eq.s32.totalorder %v7290_v62, %v7380_v18 }
  0xb9   : > { %v12464_v23 = vsel %vm7405_vm12, 4294967295, %v12463_v23  ;;  %vm829_vm14 = vcmp.eq.s32.totalorder %v7290_v62, %v7383_v19  ;;  %v7414_v24 = vadd.s32 48, %v7293_v63  ;;  %v7499_v39 = vadd.s32 152, %v7293_v63 }
  0xba   : > { %12465 = vst [vmem:[#allocation10_spill] sm:$0xff] %v12464_v23  ;;  %vm7439_vm8 = vmpackc.low %vm829_vm14, %vm825_vm13  ;;  %vm885_vm14 = vcmp.eq.s32.totalorder %v7290_v62, %v7427_v27  ;;  %v12480_v40 = vmov 0  ;;  %vm805_vm12 = vcmp.eq.s32.totalorder %v7290_v62, %v7489_v37  ;;  %v12582_v23 = vmov 0 }
  0xbb   : > { %v12468_v28 = vsel %vm7439_vm8, 4294967295, %v12467_v28  ;;  %vm817_vm3 = vcmp.eq.s32.totalorder %v7290_v62, %v7414_v24  ;;  %5559 = vmatpush.bf16.msk.msra.mxu0 %vm7439_vm8, %v11850_v10 }
  0xbc   : > { %12469 = vst [vmem:[#allocation12_spill] sm:$0xff] %v12468_v28 }
  0xbd   : > { %v1686_v21 = vpop.f32.mrf.mxu0  ;;  %v1709_v22 = vpop.f32.mrf.mxu1 }
  0xbe   : > { %v1721_v25 = vmax.f32 %v1686_v21, 0.0  ;;  %v1722_v26 = vmax.f32 %v1709_v22, 0.0  ;;  %v7393_v21 = vadd.s32 200, %v7293_v63  ;;  %v12460_v22 = vmov 0 }
  0xbf   : > { %v12461_v22 = vsel %vm7401_vm11, 4294967295, %v12460_v22 }
  0xc0   : > { %v1727_v29 = vpack.c.bf16 %v1721_v25, %v1721_v25  ;;  %v1728_v30 = vpack.c.bf16 %v1722_v26, %v1722_v26  ;;  %12462 = vst [vmem:[#allocation9_spill] sm:$0xff] %v12461_v22  ;;  %v7417_v25 = vadd.s32 56, %v7293_v63  ;;  %vm893_vm7 = vcmp.eq.s32.totalorder %v7290_v62, %v7393_v21 }
  0xc1   : > { %v7424_v26 = vadd.s32 176, %v7293_v63  ;;  %vm7443_vm9 = vmpackc.low %vm893_vm7, %vm889_vm6  ;;  %v12603_v22 = vmov 0 }
  0xc2   : > { %v1735_v35 = vsel %vm11790_vm2, %v1727_v29, 0  ;;  %v1738_v36 = vsel %vm11790_vm2, %v1728_v30, 0  ;;  %v12470_v29 = vmov 0  ;;  %v7452_v30 = vadd.s32 32, %v7293_v63  ;;  %5575 = vmatpush.bf16.msk.msra.mxu1 %vm7443_vm9, %v11850_v10 }
  0xc3   : > { %1745 = vmatpush.bf16.msra.mxu2 %v1735_v35  ;;  %1758 = vmatpush.bf16.msra.mxu3 %v1738_v36  ;;  %v12471_v29 = vsel %vm7443_vm9, 4294967295, %v12470_v29  ;;  %vm881_vm13 = vcmp.eq.s32.totalorder %v7290_v62, %v7424_v26  ;;  %v12477_v35 = vmov 0  ;;  %v7486_v36 = vadd.s32 16, %v7293_v63 }
  0xc4   : > { %12472 = vst [vmem:[#allocation13_spill] sm:$0xff] %v12471_v29  ;;  %vm7477_vm7 = vmpackc.low %vm885_vm14, %vm881_vm13  ;;  %vm809_vm2 = vcmp.eq.s32.totalorder %v7290_v62, %v7452_v30 }
  0xc5   : > { %v1688_v43 = vpop.f32.mrf.mxu0  ;;  %v1711_v44 = vpop.f32.mrf.mxu1  ;;  %v12478_v35 = vsel %vm7477_vm7, 4294967295, %v12477_v35  ;;  %vm801_vm9 = vcmp.eq.s32.totalorder %v7290_v62, %v7486_v36 }
  0xc6   : > { %12479 = vst [vmem:[#allocation16_spill] sm:$0xff] %v12478_v35  ;;  %5577 = vmatpush.bf16.msk.msra.mxu1 %vm7477_vm7, %v11850_v10  ;;  %v7523_v43 = vadd.s32 128, %v7293_v63  ;;  %v7526_v44 = vadd.s32 136, %v7293_v63  ;;  %vm797_vm7 = vcmp.eq.s32.totalorder %v7290_v62, %v7512_v41 }
  0xc7   : > { %1746 = vmatpush.bf16.msra.mxu2 %v1725_v45  ;;  %1759 = vmatpush.bf16.msra.mxu3 %v1726_v46  ;;  %v7529_v45 = vperm.slane %v7285_v59, 2  ;;  %v12486_v46 = vmov 0 }
  0xc9   : > { %vm919_vm8 = vcmp.eq.s32.totalorder %v7529_v45, %v7307_v4 }
  0xcb   : > { %1747 = vmatpush.bf16.msra.mxu2 %v1723_v52  ;;  %1760 = vmatpush.bf16.msra.mxu3 %v1724_v53  ;;  %v12506_v52 = vmov 0  ;;  %v12509_v53 = vmov 0 }
  0xce   : > { %5526 = vmatmul.msk.bf16.vlgmr.msra.gmra.mxu2 %vm11789_vm5, %v1629_v56  ;;  %5527 = vmatmul.msk.bf16.vlgmr.msra.gmra.mxu3 %vm11789_vm5, %v1629_v56  ;;  %vm821_vm5 = vcmp.eq.s32.totalorder %v7290_v62, %v7417_v25  ;;  %v12518_v56 = vmov 0 }
  0xcf   : > { %1834 = vmatpush.bf16.msrb.mxu2 %v1816_v54  ;;  %1857 = vmatpush.bf16.msrb.mxu3 %v1819_v55  ;;  %vm7473_vm6 = vmpackc.low %vm821_vm5, %vm817_vm3  ;;  %vm873_vm3 = vcmp.eq.s32.totalorder %v7290_v62, %v7462_v32  ;;  %vm877_vm5 = vcmp.eq.s32.totalorder %v7290_v62, %v7465_v33  ;;  %v12512_v54 = vmov 0  ;;  %v12515_v55 = vmov 0 }
  0xd0   : > { %v12475_v34 = vsel %vm7473_vm6, 4294967295, %v12474_v34  ;;  %5561 = vmatpush.bf16.msk.msra.mxu0 %vm7473_vm6, %v11850_v10  ;;  %vm7514_vm14 = vmpackc.low %vm877_vm5, %vm873_vm3  ;;  %vm793_vm5 = vcmp.eq.s32.totalorder %v7290_v62, %v7293_v63  ;;  %vm915_vm6 = vcmp.eq.s32.totalorder %v7529_v45, %v7304_v3 }
  0xd1   : > { %12476 = vst [vmem:[#allocation15_spill] sm:$0xff] %v12475_v34  ;;  %v12484_v42 = vsel %vm7514_vm14, 4294967295, %v12483_v42  ;;  %5579 = vmatpush.bf16.msk.msra.mxu1 %vm7514_vm14, %v11850_v10  ;;  %vm7541_vm3 = vmpackc.low %vm805_vm12, %vm801_vm9  ;;  %vm861_vm14 = vcmp.eq.s32.totalorder %v7290_v62, %v7526_v44  ;;  %vm851_vm12 = vcmp.eq.s32.totalorder %v7529_v45, %v7298_v1  ;;  %vm855_vm9 = vcmp.eq.s32.totalorder %v7529_v45, %v7301_v2 }
  0xd2   : > { %12485 = vst [vmem:[#allocation18_spill] sm:$0xff] %v12484_v42  ;;  %v12487_v46 = vsel %vm7541_vm3, 4294967295, %v12486_v46  ;;  %v12558_v42 = vmov 0  ;;  %v12594_v34 = vmov 0 }
  0xd3   : > { %12488 = vst [vmem:[#allocation19_spill] sm:$0xff] %v12487_v46  ;;  %v12585_v46 = vmov 0 }
  0xde   : > { %5536 = vmatmul.msk.bf16.vlgmr.msrb.gmra.mxu2 %vm11791_vm4, %v6894_v49  ;;  %5539 = vmatmul.msk.bf16.vlgmr.msrb.gmra.mxu3 %vm11791_vm4, %v6894_v49  ;;  %v12497_v49 = vmov 0 }
  0xee   : > { %5537 = vmatmul.msk.bf16.gmra.mxu2 %vm11791_vm4, %v7272_v57  ;;  %5540 = vmatmul.msk.bf16.gmra.mxu3 %vm11791_vm4, %v7272_v57  ;;  %vm813_vm4 = vcmp.eq.s32.totalorder %v7290_v62, %v7455_v31  ;;  %v12521_v57 = vmov 0 }
  0xef   : > { %vm7507_vm13 = vmpackc.low %vm813_vm4, %vm809_vm2  ;;  %vm865_vm2 = vcmp.eq.s32.totalorder %v7290_v62, %v7496_v38  ;;  %vm869_vm4 = vcmp.eq.s32.totalorder %v7290_v62, %v7499_v39 }
  0xf0   : > { %v12481_v40 = vsel %vm7507_vm13, 4294967295, %v12480_v40  ;;  %5563 = vmatpush.bf16.msk.msra.mxu0 %vm7507_vm13, %v11850_v10  ;;  %vm7549_vm1 = vmpackc.low %vm869_vm4, %vm865_vm2  ;;  %vm857_vm13 = vcmp.eq.s32.totalorder %v7290_v62, %v7523_v43  ;;  %v12530_v62 = vmov 0 }
  0xf1   : > { %12482 = vst [vmem:[#allocation17_spill] sm:$0xff] %v12481_v40  ;;  %v12490_v47 = vsel %vm7549_vm1, 4294967295, %v12489_v47  ;;  %vm12493_vm2 = vmmov %vm12492_vm15  ;;  %5581 = vmatpush.bf16.msk.msra.mxu1 %vm7549_vm1, %v11850_v10  ;;  %vm891_vm1 = vcmp.eq.s32.totalorder %v7529_v45, %v7390_v20  ;;  %v12588_v40 = vmov 0 }
  0xf2   : > { %12491 = vst [vmem:[#allocation20_spill] sm:$0xff] %v12490_v47  ;;  %vm7565_vm4 = vmpackc.low %vm797_vm7, %vm793_vm5  ;;  %v12554_v47 = vmov 0 }
  0xf3   : > { %v12495_v48 = vsel %vm7565_vm4, 4294967295, %v12494_v48  ;;  %vm7583_vm7 = vmpackc.low %vm855_vm9, %vm851_vm12  ;;  %vm835_vm12 = vcmp.eq.s32.totalorder %v7529_v45, %v7349_v12  ;;  %vm839_vm9 = vcmp.eq.s32.totalorder %v7529_v45, %v7352_v13 }
  0xf4   : > { %12496 = vst [vmem:[#allocation21_spill] sm:$0xff] %v12495_v48  ;;  %5565 = vmatpush.bf16.msk.msra.mxu0 %vm7541_vm3, %v11850_v10  ;;  %v12501_v50 = vsel %vm7583_vm7, 4294967295, %v12500_v50  ;;  %vm7587_vm5 = vmpackc.low %vm919_vm8, %vm915_vm6  ;;  %vm847_vm3 = vcmp.eq.s32.totalorder %v7529_v45, %v7313_v6  ;;  %v12579_v48 = vmov 0 }
  0xf5   : > { %12502 = vst [vmem:[#allocation23_spill] sm:$0xff] %v12501_v50  ;;  %v12504_v51 = vsel %vm7587_vm5, 4294967295, %v12503_v51  ;;  %v12573_v50 = vmov 0 }
  0xf6   : > { %12505 = vst [vmem:[#allocation24_spill] sm:$0xff] %v12504_v51 }
  0xf8   : > { %5567 = vmatpush.bf16.msk.msra.mxu0 %vm7565_vm4, %v11850_v10 }
  0xfc   : > { %5617 = vmatpush.bf16.msk.msrb.mxu0 %vm7583_vm7, %v11850_v10 }
  0xfe   : > { %5538 = vmatmul.msk.bf16.gmra.mxu2 %vm12492_vm15, %v7295_v0  ;;  %5541 = vmatmul.msk.bf16.gmra.mxu3 %vm12493_vm2, %v7295_v0  ;;  %vm7579_vm15 = vmpackc.low %vm861_vm14, %vm857_vm13  ;;  %vm843_vm2 = vcmp.eq.s32.totalorder %v7529_v45, %v7310_v5  ;;  %vm907_vm13 = vcmp.eq.s32.totalorder %v7529_v45, %v7316_v7  ;;  %vm911_vm14 = vcmp.eq.s32.totalorder %v7529_v45, %v7319_v8  ;;  %v12533_v0 = vmov 0 }
  0xff   : > { %v12498_v49 = vsel %vm7579_vm15, 4294967295, %v12497_v49  ;;  %5583 = vmatpush.bf16.msk.msra.mxu1 %vm7579_vm15, %v11850_v10  ;;  %vm7611_vm8 = vmpackc.low %vm847_vm3, %vm843_vm2  ;;  %vm899_vm15 = vcmp.eq.s32.totalorder %v7529_v45, %v7355_v14 }
 0x100   : > { %12499 = vst [vmem:[#allocation22_spill] sm:$0xff] %v12498_v49  ;;  %v12507_v52 = vsel %vm7611_vm8, 4294967295, %v12506_v52  ;;  %vm7615_vm6 = vmpackc.low %vm911_vm14, %vm907_vm13  ;;  %5619 = vmatpush.bf16.msk.msrb.mxu0 %vm7611_vm8, %v11850_v10  ;;  %vm827_vm13 = vcmp.eq.s32.totalorder %v7529_v45, %v7380_v18  ;;  %vm831_vm14 = vcmp.eq.s32.totalorder %v7529_v45, %v7383_v19 }
 0x101   : > { %12508 = vst [vmem:[#allocation25_spill] sm:$0xff] %v12507_v52  ;;  %v12510_v53 = vsel %vm7615_vm6, 4294967295, %v12509_v53  ;;  %vm7633_vm3 = vmpackc.low %vm839_vm9, %vm835_vm12  ;;  %vm819_vm12 = vcmp.eq.s32.totalorder %v7529_v45, %v7414_v24  ;;  %vm823_vm9 = vcmp.eq.s32.totalorder %v7529_v45, %v7417_v25  ;;  %v12561_v52 = vmov 0 }
 0x102   : > { %12511 = vst [vmem:[#allocation26_spill] sm:$0xff] %v12510_v53  ;;  %v12513_v54 = vsel %vm7633_vm3, 4294967295, %v12512_v54 }
 0x103   : > { %5633 = vmatpush.bf16.msk.msrb.mxu1 %vm7587_vm5, %v11850_v10  ;;  %vm903_vm5 = vcmp.eq.s32.totalorder %v7529_v45, %v7358_v15  ;;  %12514 = vst [vmem:[#allocation27_spill] sm:$0xff] %v12513_v54  ;;  %v12557_v54 = vmov 1.0|1.0  }
 0x104   : > { %vm7637_vm2 = vmpackc.low %vm903_vm5, %vm899_vm15  ;;  %5621 = vmatpush.bf16.msk.msrb.mxu0 %vm7633_vm3, %v11850_v10  ;;  %vm883_vm3 = vcmp.eq.s32.totalorder %v7529_v45, %v7424_v26 }
 0x105   : > { %v12516_v55 = vsel %vm7637_vm2, 4294967295, %v12515_v55  ;;  %vm7655_vm15 = vmpackc.low %vm831_vm14, %vm827_vm13  ;;  %vm811_vm13 = vcmp.eq.s32.totalorder %v7529_v45, %v7452_v30  ;;  %vm815_vm14 = vcmp.eq.s32.totalorder %v7529_v45, %v7455_v31 }
 0x106   : > { %12517 = vst [vmem:[#allocation28_spill] sm:$0xff] %v12516_v55  ;;  %v12519_v56 = vsel %vm7655_vm15, 4294967295, %v12518_v56  ;;  %v7759_v55 = vpop.f32.mrf.mxu1 }
 0x107   : > { %5635 = vmatpush.bf16.msk.msrb.mxu1 %vm7615_vm6, %v11850_v10  ;;  %vm895_vm6 = vcmp.eq.s32.totalorder %v7529_v45, %v7393_v21  ;;  %12520 = vst [vmem:[#allocation29_spill] sm:$0xff] %v12519_v56 }
 0x108   : > { %vm7659_vm5 = vmpackc.low %vm895_vm6, %vm891_vm1  ;;  %5623 = vmatpush.bf16.msk.msrb.mxu0 %vm7655_vm15, %v11850_v10  ;;  %vm875_vm15 = vcmp.eq.s32.totalorder %v7529_v45, %v7462_v32 }
 0x109   : > { %v12522_v57 = vsel %vm7659_vm5, 4294967295, %v12521_v57  ;;  %vm7677_vm1 = vmpackc.low %vm823_vm9, %vm819_vm12  ;;  %vm803_vm12 = vcmp.eq.s32.totalorder %v7529_v45, %v7486_v36  ;;  %vm807_vm9 = vcmp.eq.s32.totalorder %v7529_v45, %v7489_v37 }
 0x10a   : > { %12523 = vst [vmem:[#allocation30_spill] sm:$0xff] %v12522_v57  ;;  %v12525_v58 = vsel %vm7677_vm1, 4294967295, %v12524_v58  ;;  %v7757_v57 = vpop.f32.mrf.mxu0 }
 0x10b   : > { %5637 = vmatpush.bf16.msk.msrb.mxu1 %vm7637_vm2, %v11850_v10  ;;  %vm887_vm2 = vcmp.eq.s32.totalorder %v7529_v45, %v7427_v27  ;;  %12526 = vst [vmem:[#allocation31_spill] sm:$0xff] %v12525_v58  ;;  %v12551_v58 = vmov 0 }
 0x10c   : > { %vm7681_vm6 = vmpackc.low %vm887_vm2, %vm883_vm3  ;;  %5625 = vmatpush.bf16.msk.msrb.mxu0 %vm7677_vm1, %v11850_v10 }
 0x10d   : > { %v12528_v60 = vsel %vm7681_vm6, 4294967295, %v12527_v60  ;;  %vm7699_vm3 = vmpackc.low %vm815_vm14, %vm811_vm13 }
 0x10e   : > { %12529 = vst [vmem:[#allocation32_spill] sm:$0xff] %v12528_v60  ;;  %v12531_v62 = vsel %vm7699_vm3, 4294967295, %v12530_v62  ;;  %vm7721_vm13 = vmpackc.low %vm807_vm9, %vm803_vm12  ;;  %vm799_vm12 = vcmp.eq.s32.totalorder %v7529_v45, %v7512_v41  ;;  %vm859_vm9 = vcmp.eq.s32.totalorder %v7529_v45, %v7523_v43  ;;  %v12542_v60 = vmov 0  ;;  %v7772_v53 = vpop.f32.mrf.mxu1 }
 0x10f   : > { %5639 = vmatpush.bf16.msk.msrb.mxu1 %vm7659_vm5, %v11850_v10  ;;  %vm879_vm5 = vcmp.eq.s32.totalorder %v7529_v45, %v7465_v33  ;;  %12532 = vst [vmem:[#allocation33_spill] sm:$0xff] %v12531_v62  ;;  %v12537_v61 = vsel %vm7721_vm13, 4294967295, %v12536_v61 }
 0x110   : > { %vm7703_vm2 = vmpackc.low %vm879_vm5, %vm875_vm15  ;;  %5627 = vmatpush.bf16.msk.msrb.mxu0 %vm7699_vm3, %v11850_v10  ;;  %vm867_vm15 = vcmp.eq.s32.totalorder %v7529_v45, %v7496_v38  ;;  %vm871_vm5 = vcmp.eq.s32.totalorder %v7529_v45, %v7499_v39  ;;  %12538 = vst [vmem:[#allocation35_spill] sm:$0xff] %v12537_v61 }
 0x111   : > { %v12534_v0 = vsel %vm7703_vm2, 4294967295, %v12533_v0  ;;  %vm7728_vm14 = vmpackc.low %vm871_vm5, %vm867_vm15 }
 0x112   : > { %12535 = vst [vmem:[#allocation34_spill] sm:$0xff] %v12534_v0  ;;  %v12539_v0 = vmov 0  ;;  %v7770_v61 = vpop.f32.mrf.mxu0 }
 0x113   : > { %5641 = vmatpush.bf16.msk.msrb.mxu1 %vm7681_vm6, %v11850_v10  ;;  %v12540_v0 = vsel %vm7728_vm14, 4294967295, %v12539_v0  ;;  %vm863_vm6 = vcmp.eq.s32.totalorder %v7529_v45, %v7526_v44 }
 0x114   : > { %5629 = vmatpush.bf16.msk.msrb.mxu0 %vm7721_vm13, %v11850_v10  ;;  %12541 = vst [vmem:[#allocation36_spill] sm:$0xff] %v12540_v0  ;;  %vm7750_vm5 = vmpackc.low %vm863_vm6, %vm859_vm9  ;;  %v12545_v0 = vmov 0 }
 0x115   : > { %v12546_v0 = vsel %vm7750_vm5, 4294967295, %v12545_v0 }
 0x116   : > { %12547 = vst [vmem:[#allocation38_spill] sm:$0xff] %v12546_v0 }
 0x117   : > { %5643 = vmatpush.bf16.msk.msrb.mxu1 %vm7703_vm2, %v11850_v10  ;;  %vm795_vm2 = vcmp.eq.s32.totalorder %v7529_v45, %v7293_v63  ;;  %v7765_v45 = vld [vmem:[%s348_s17] sm:$0xf]  ;;  %s7074_s17 = scalar_lea.hbm %s7073_s16, 4 }
 0x118   : > { %vm7743_vm15 = vmpackc.low %vm799_vm12, %vm795_vm2  ;;  %12548 = vst [vmem:[#allocation39_spill] sm:$0xff] %v7765_v45  ;;  %p7075_p13 = scmp.ne.s32.totalorder %s7073_s16, %s7074_s17  ;;  %p7080_p3 = scmp.lt.s32.totalorder %s7078_s19, %s7074_s17 }
 0x119   : > { %v12543_v60 = vsel %vm7743_vm15, 4294967295, %v12542_v60  ;;  %5631 = vmatpush.bf16.msk.msrb.mxu0 %vm7743_vm15, %v11850_v10 }
 0x11a   : > { %12544 = vst [vmem:[#allocation37_spill] sm:$0xff] %v12543_v60  ;;  %v7768_v60 = vperm.slane %v7765_v45, 0  ;;  %p7076_p0 = pnand %p7075_p13, %p7219_p5  ;;  %p7081_p4 = por %p7080_p3, %p7079_p2 }
 0x11b   : > { %5645 = vmatpush.bf16.msk.msrb.mxu1 %vm7728_vm14, %v11850_v10 }
 0x11c   : > { %vm525_vm6 = vcmp.eq.s32.totalorder %v7768_v60, %v7298_v1  ;;  %vm529_vm2 = vcmp.eq.s32.totalorder %v7768_v60, %v7301_v2  ;;  %vm589_vm12 = vcmp.eq.s32.totalorder %v7768_v60, %v7304_v3  ;;  %vm593_vm9 = vcmp.eq.s32.totalorder %v7768_v60, %v7307_v4  ;;  %p7077_p1 = pneg %p7076_p0 }
 0x11d   : > { %vm7798_vm14 = vmpackc.low %vm593_vm9, %vm589_vm12  ;;  %vm517_vm15 = vcmp.eq.s32.totalorder %v7768_v60, %v7310_v5  ;;  %vm585_vm13 = vcmp.eq.s32.totalorder %v7768_v60, %v7319_v8  ;;  %vm509_vm3 = vcmp.eq.s32.totalorder %v7768_v60, %v7349_v12  ;;  %vm513_vm1 = vcmp.eq.s32.totalorder %v7768_v60, %v7352_v13 }
 0x11e   : > { %v12555_v47 = vsel %vm7798_vm14, 4294967295, %v12554_v47  ;;  %p7082_p7 = pnand %p7081_p4, %p7077_p1 }
 0x11f   : > { %5647 = vmatpush.bf16.msk.msrb.mxu1 %vm7750_vm5, %v11850_v10  ;;  %vm7786_vm5 = vmpackc.low %vm529_vm2, %vm525_vm6  ;;  %12556 = vst [vmem:[#allocation43_spill] sm:$0xff] %v12555_v47  ;;  %vm521_vm6 = vcmp.eq.s32.totalorder %v7768_v60, %v7313_v6  ;;  %vm581_vm2 = vcmp.eq.s32.totalorder %v7768_v60, %v7316_v7  ;;  %v12564_v47 = vmov 0 }
 0x120   : > { %v12552_v58 = vsel %vm7786_vm5, 4294967295, %v12551_v58  ;;  %vm7822_vm12 = vmpackc.low %vm521_vm6, %vm517_vm15  ;;  %vm577_vm15 = vcmp.eq.s32.totalorder %v7768_v60, %v7358_v15 }
 0x121   : > { %12553 = vst [vmem:[#allocation42_spill] sm:$0xff] %v12552_v58  ;;  %v12559_v42 = vsel %vm7822_vm12, 4294967295, %v12558_v42  ;;  %vm7826_vm9 = vmpackc.low %vm585_vm13, %vm581_vm2  ;;  %vm501_vm2 = vcmp.eq.s32.totalorder %v7768_v60, %v7380_v18 }
 0x122   : > { %12560 = vst [vmem:[#allocation44_spill] sm:$0xff] %v12559_v42  ;;  %v12562_v52 = vsel %vm7826_vm9, 4294967295, %v12561_v52  ;;  %vm7844_vm13 = vmpackc.low %vm513_vm1, %vm509_vm3  ;;  %v12570_v42 = vmov 0 }
 0x123   : > { %12563 = vst [vmem:[#allocation45_spill] sm:$0xff] %v12562_v52  ;;  %v12565_v47 = vsel %vm7844_vm13, 4294967295, %v12564_v47 }
 0x124   : > { %12566 = vst [vmem:[#allocation46_spill] sm:$0xff] %v12565_v47 }
 0x151   : > { %v1749_v10 = vpop.f32.mrf.mxu2  ;;  %v1762_v0 = vpop.f32.mrf.mxu3 }
 0x152   : > { %v7782_v62 = vmax.f32 %v1749_v10, 0.0  ;;  %v7784_v51 = vmax.f32 %v1762_v0, 0.0  ;;  %v7810_v10 = vpop.f32.mrf.mxu0  ;;  %v7812_v0 = vpop.f32.mrf.mxu1 }
 0x154   : > { %12549 = vst [vmem:[#allocation40_spill] sm:$0xff] %v7782_v62  ;;  %v7792_v49 = vpack.c.bf16 %v7782_v62, %v7782_v62  ;;  %v7796_v56 = vpack.c.bf16 %v7784_v51, %v7784_v51 }
 0x155   : > { %12550 = vst [vmem:[#allocation41_spill] sm:$0xff] %v7784_v51 }
 0x156   : > { %2036 = vmatmul.bf16.vlgmr.msra.gmra.mxu0 %v7792_v49  ;;  %2049 = vmatmul.bf16.vlgmr.msra.gmra.mxu1 %v7796_v56 }
 0x157   : > { %5681 = vmatpush.bf16.msk.msra.mxu0 %vm7786_vm5, %v12557_v54  ;;  %5697 = vmatpush.bf16.msk.msra.mxu1 %vm7798_vm14, %v12557_v54  ;;  %vm573_vm5 = vcmp.eq.s32.totalorder %v7768_v60, %v7355_v14  ;;  %vm505_vm14 = vcmp.eq.s32.totalorder %v7768_v60, %v7383_v19 }
 0x158   : > { %vm7848_vm6 = vmpackc.low %vm577_vm15, %vm573_vm5  ;;  %vm493_vm5 = vcmp.eq.s32.totalorder %v7768_v60, %v7414_v24  ;;  %vm497_vm15 = vcmp.eq.s32.totalorder %v7768_v60, %v7417_v25 }
 0x159   : > { %v1751_v58 = vpop.f32.mrf.mxu2  ;;  %v1764_v35 = vpop.f32.mrf.mxu3  ;;  %vm7870_vm1 = vmpackc.low %vm505_vm14, %vm501_vm2  ;;  %vm557_vm14 = vcmp.eq.s32.totalorder %v7768_v60, %v7424_v26  ;;  %vm561_vm2 = vcmp.eq.s32.totalorder %v7768_v60, %v7427_v27 }
 0x15a   : > { %v12567_v35 = vmov 0  ;;  %v7860_v58 = vpop.f32.mrf.mxu0  ;;  %v7862_v52 = vpop.f32.mrf.mxu1  ;;  %v12571_v42 = vsel %vm7870_vm1, 4294967295, %v12570_v42 }
 0x15b   : > { %5683 = vmatpush.bf16.msk.msra.mxu0 %vm7822_vm12, %v12557_v54  ;;  %5699 = vmatpush.bf16.msk.msra.mxu1 %vm7826_vm9, %v12557_v54  ;;  %v12568_v35 = vsel %vm7848_vm6, 4294967295, %v12567_v35  ;;  %vm565_vm12 = vcmp.eq.s32.totalorder %v7768_v60, %v7390_v20  ;;  %vm569_vm9 = vcmp.eq.s32.totalorder %v7768_v60, %v7393_v21  ;;  %12572 = vst [vmem:[#allocation48_spill] sm:$0xff] %v12571_v42 }
 0x15c   : > { %12569 = vst [vmem:[#allocation47_spill] sm:$0xff] %v12568_v35  ;;  %vm7874_vm3 = vmpackc.low %vm569_vm9, %vm565_vm12  ;;  %v12576_v35 = vmov 0 }
 0x15d   : > { %v12574_v50 = vsel %vm7874_vm3, 4294967295, %v12573_v50  ;;  %vm7896_vm12 = vmpackc.low %vm497_vm15, %vm493_vm5 }
 0x15e   : > { %12575 = vst [vmem:[#allocation49_spill] sm:$0xff] %v12574_v50  ;;  %v12577_v35 = vsel %vm7896_vm12, 4294967295, %v12576_v35  ;;  %vm7900_vm9 = vmpackc.low %vm561_vm2, %vm557_vm14  ;;  %vm477_vm14 = vcmp.eq.s32.totalorder %v7768_v60, %v7486_v36  ;;  %vm481_vm2 = vcmp.eq.s32.totalorder %v7768_v60, %v7489_v37 }
 0x15f   : > { %5685 = vmatpush.bf16.msk.msra.mxu0 %vm7844_vm13, %v12557_v54  ;;  %5701 = vmatpush.bf16.msk.msra.mxu1 %vm7848_vm6, %v12557_v54  ;;  %12578 = vst [vmem:[#allocation50_spill] sm:$0xff] %v12577_v35  ;;  %v12580_v48 = vsel %vm7900_vm9, 4294967295, %v12579_v48  ;;  %vm485_vm6 = vcmp.eq.s32.totalorder %v7768_v60, %v7452_v30  ;;  %vm489_vm13 = vcmp.eq.s32.totalorder %v7768_v60, %v7455_v31  ;;  %v7937_v35 = vperm.slane %v7765_v45, 2 }
 0x160   : > { %12581 = vst [vmem:[#allocation51_spill] sm:$0xff] %v12580_v48  ;;  %vm7924_vm5 = vmpackc.low %vm489_vm13, %vm485_vm6  ;;  %vm541_vm13 = vcmp.eq.s32.totalorder %v7768_v60, %v7496_v38  ;;  %vm545_vm6 = vcmp.eq.s32.totalorder %v7768_v60, %v7499_v39 }
 0x161   : > { %v7882_v47 = vpop.f32.mrf.mxu2  ;;  %v7884_v29 = vpop.f32.mrf.mxu3  ;;  %v12583_v23 = vsel %vm7924_vm5, 4294967295, %v12582_v23 }
 0x162   : > { %v7912_v50 = vpop.f32.mrf.mxu0  ;;  %v7914_v42 = vpop.f32.mrf.mxu1  ;;  %12584 = vst [vmem:[#allocation52_spill] sm:$0xff] %v12583_v23 }
 0x163   : > { %5687 = vmatpush.bf16.msk.msra.mxu0 %vm7870_vm1, %v12557_v54  ;;  %5703 = vmatpush.bf16.msk.msra.mxu1 %vm7874_vm3, %v12557_v54  ;;  %vm549_vm1 = vcmp.eq.s32.totalorder %v7768_v60, %v7462_v32  ;;  %vm553_vm3 = vcmp.eq.s32.totalorder %v7768_v60, %v7465_v33  ;;  %v1937_v45 = vmax.f32 %v7912_v50, 0.0 }
 0x164   : > { %vm7928_vm15 = vmpackc.low %vm553_vm3, %vm549_vm1  ;;  %vm469_vm3 = vcmp.eq.s32.totalorder %v7768_v60, %v7293_v63 }
 0x165   : > { %v12586_v46 = vsel %vm7928_vm15, 4294967295, %v12585_v46  ;;  %vm7953_vm1 = vmpackc.low %vm481_vm2, %vm477_vm14  ;;  %vm527_vm14 = vcmp.eq.s32.totalorder %v7937_v35, %v7298_v1  ;;  %vm531_vm2 = vcmp.eq.s32.totalorder %v7937_v35, %v7301_v2 }
 0x166   : > { %2088 = vmatmul.bf16.vlgmr.msrb.gmra.mxu0 %v7792_v49  ;;  %2101 = vmatmul.bf16.vlgmr.msrb.gmra.mxu1 %v7796_v56  ;;  %12587 = vst [vmem:[#allocation53_spill] sm:$0xff] %v12586_v46  ;;  %v12589_v40 = vsel %vm7953_vm1, 4294967295, %v12588_v40 }
 0x167   : > { %5689 = vmatpush.bf16.msk.msra.mxu0 %vm7896_vm12, %v12557_v54  ;;  %5705 = vmatpush.bf16.msk.msra.mxu1 %vm7900_vm9, %v12557_v54  ;;  %12590 = vst [vmem:[#allocation54_spill] sm:$0xff] %v12589_v40  ;;  %vm473_vm9 = vcmp.eq.s32.totalorder %v7768_v60, %v7512_v41  ;;  %vm7961_vm12 = vmpackc.low %vm545_vm6, %vm541_vm13  ;;  %vm591_vm13 = vcmp.eq.s32.totalorder %v7937_v35, %v7304_v3  ;;  %v12609_v40 = vmov 0 }
 0x168   : > { %v12592_v11 = vsel %vm7961_vm12, 4294967295, %v12591_v11  ;;  %vm7973_vm8 = vmpackc.low %vm473_vm9, %vm469_vm3  ;;  %vm595_vm6 = vcmp.eq.s32.totalorder %v7937_v35, %v7307_v4 }
 0x169   : > { %v7939_v17 = vpop.f32.mrf.mxu2  ;;  %v7941_v48 = vpop.f32.mrf.mxu3  ;;  %12593 = vst [vmem:[#allocation55_spill] sm:$0xff] %v12592_v11  ;;  %v12595_v34 = vsel %vm7973_vm8, 4294967295, %v12594_v34  ;;  %vm7991_vm9 = vmpackc.low %vm531_vm2, %vm527_vm14  ;;  %vm587_vm14 = vcmp.eq.s32.totalorder %v7937_v35, %v7319_v8  ;;  %v12606_v11 = vmov 0 }
 0x16a   : > { %v1894_v46 = vpop.f32.mrf.mxu0  ;;  %v1917_v23 = vpop.f32.mrf.mxu1  ;;  %12596 = vst [vmem:[#allocation56_spill] sm:$0xff] %v12595_v34  ;;  %vm7999_vm3 = vmpackc.low %vm595_vm6, %vm591_vm13  ;;  %vm511_vm6 = vcmp.eq.s32.totalorder %v7937_v35, %v7349_v12  ;;  %v12615_v34 = vmov 0 }
 0x16b   : > { %5691 = vmatpush.bf16.msk.msra.mxu0 %vm7924_vm5, %v12557_v54  ;;  %5707 = vmatpush.bf16.msk.msra.mxu1 %vm7928_vm15, %v12557_v54  ;;  %vm533_vm5 = vcmp.eq.s32.totalorder %v7768_v60, %v7523_v43  ;;  %vm537_vm15 = vcmp.eq.s32.totalorder %v7768_v60, %v7526_v44  ;;  %v12597_v23 = vmov 0  ;;  %v12600_v46 = vmov 0 }
 0x16c   : > { %vm7987_vm7 = vmpackc.low %vm537_vm15, %vm533_vm5  ;;  %v12601_v46 = vsel %vm7991_vm9, 4294967295, %v12600_v46  ;;  %v12604_v22 = vsel %vm7999_vm3, 4294967295, %v12603_v22  ;;  %vm523_vm5 = vcmp.eq.s32.totalorder %v7937_v35, %v7313_v6  ;;  %vm583_vm15 = vcmp.eq.s32.totalorder %v7937_v35, %v7316_v7 }
 0x16d   : > { %v12598_v23 = vsel %vm7987_vm7, 4294967295, %v12597_v23  ;;  %12602 = vst [vmem:[#allocation58_spill] sm:$0xff] %v12601_v46  ;;  %vm8027_vm13 = vmpackc.low %vm587_vm14, %vm583_vm15 }
 0x16e   : > { %12599 = vst [vmem:[#allocation57_spill] sm:$0xff] %v12598_v23  ;;  %v12610_v40 = vsel %vm8027_vm13, 4294967295, %v12609_v40 }
 0x16f   : > { %5693 = vmatpush.bf16.msk.msra.mxu0 %vm7953_vm1, %v12557_v54  ;;  %5709 = vmatpush.bf16.msk.msra.mxu1 %vm7961_vm12, %v12557_v54  ;;  %12605 = vst [vmem:[#allocation59_spill] sm:$0xff] %v12604_v22  ;;  %vm519_vm1 = vcmp.eq.s32.totalorder %v7937_v35, %v7310_v5  ;;  %v12612_v22 = vmov 0  ;;  %vm507_vm12 = vcmp.eq.s32.totalorder %v7937_v35, %v7383_v19 }
 0x170   : > { %vm8023_vm2 = vmpackc.low %vm523_vm5, %vm519_vm1  ;;  %12611 = vst [vmem:[#allocation61_spill] sm:$0xff] %v12610_v40  ;;  %vm575_vm1 = vcmp.eq.s32.totalorder %v7937_v35, %v7355_v14  ;;  %vm579_vm5 = vcmp.eq.s32.totalorder %v7937_v35, %v7358_v15  ;;  %v12618_v40 = vmov 0 }
 0x171   : > { %v7995_v60 = vpop.f32.mrf.mxu2  ;;  %v7997_v28 = vpop.f32.mrf.mxu3  ;;  %v12607_v11 = vsel %vm8023_vm2, 4294967295, %v12606_v11  ;;  %vm8051_vm14 = vmpackc.low %vm579_vm5, %vm575_vm1  ;;  %vm495_vm5 = vcmp.eq.s32.totalorder %v7937_v35, %v7414_v24 }
 0x172   : > { %12608 = vst [vmem:[#allocation60_spill] sm:$0xff] %v12607_v11  ;;  %v12616_v34 = vsel %vm8051_vm14, 4294967295, %v12615_v34  ;;  %v12621_v11 = vmov 0 }
 0x173   : > { %5695 = vmatpush.bf16.msk.msra.mxu0 %vm7973_vm8, %v12557_v54  ;;  %5711 = vmatpush.bf16.msk.msra.mxu1 %vm7987_vm7, %v12557_v54  ;;  %vm515_vm7 = vcmp.eq.s32.totalorder %v7937_v35, %v7352_v13  ;;  %12617 = vst [vmem:[#allocation63_spill] sm:$0xff] %v12616_v34  ;;  %v12624_v34 = vmov 0 }
 0x174   : > { %vm8047_vm15 = vmpackc.low %vm515_vm7, %vm511_vm6  ;;  %vm571_vm7 = vcmp.eq.s32.totalorder %v7937_v35, %v7393_v21 }
 0x175   : > { %v12613_v22 = vsel %vm8047_vm15, 4294967295, %v12612_v22 }
 0x176   : > { %2140 = vmatmul.bf16.vlgmr.msra.gmra.mxu0 %v7792_v49  ;;  %2153 = vmatmul.bf16.vlgmr.msra.gmra.mxu1 %v7796_v56  ;;  %12614 = vst [vmem:[#allocation62_spill] sm:$0xff] %v12613_v22 }
 0x177   : > { %5745 = vmatpush.bf16.msk.msrb.mxu0 %vm7991_vm9, %v12557_v54  ;;  %5761 = vmatpush.bf16.msk.msrb.mxu1 %vm7999_vm3, %v12557_v54  ;;  %vm503_vm3 = vcmp.eq.s32.totalorder %v7937_v35, %v7380_v18 }
 0x178   : > { %vm8069_vm6 = vmpackc.low %vm507_vm12, %vm503_vm3 }
 0x179   : > { %v1843_v23 = vpop.f32.mrf.mxu2  ;;  %v1866_v46 = vpop.f32.mrf.mxu3  ;;  %v12619_v40 = vsel %vm8069_vm6, 4294967295, %v12618_v40 }
 0x17a   : > { %12620 = vst [vmem:[#allocation64_spill] sm:$0xff] %v12619_v40 }
 0x17b   : > { %5747 = vmatpush.bf16.msk.msrb.mxu0 %vm8023_vm2, %v12557_v54  ;;  %5763 = vmatpush.bf16.msk.msrb.mxu1 %vm8027_vm13, %v12557_v54  ;;  %vm567_vm2 = vcmp.eq.s32.totalorder %v7937_v35, %v7390_v20  ;;  %vm499_vm13 = vcmp.eq.s32.totalorder %v7937_v35, %v7417_v25 }
 0x17c   : > { %vm8073_vm1 = vmpackc.low %vm571_vm7, %vm567_vm2  ;;  %vm487_vm2 = vcmp.eq.s32.totalorder %v7937_v35, %v7452_v30  ;;  %vm491_vm7 = vcmp.eq.s32.totalorder %v7937_v35, %v7455_v31 }
 0x17d   : > { %v12622_v11 = vsel %vm8073_vm1, 4294967295, %v12621_v11  ;;  %vm8091_vm12 = vmpackc.low %vm499_vm13, %vm495_vm5  ;;  %vm551_vm13 = vcmp.eq.s32.totalorder %v7937_v35, %v7462_v32  ;;  %vm555_vm5 = vcmp.eq.s32.totalorder %v7937_v35, %v7465_v33  ;;  %v1932_v33 = vmax.f32 %v1866_v46, 0.0 }
 0x17e   : > { %12623 = vst [vmem:[#allocation65_spill] sm:$0xff] %v12622_v11  ;;  %v12625_v34 = vsel %vm8091_vm12, 4294967295, %v12624_v34  ;;  %v1923_v46 = vmax.f32 %v7939_v17, 0.0  ;;  %v12641_v17 = vmov 0 }
 0x17f   : > { %5749 = vmatpush.bf16.msk.msrb.mxu0 %vm8047_vm15, %v12557_v54  ;;  %5765 = vmatpush.bf16.msk.msrb.mxu1 %vm8051_vm14, %v12557_v54  ;;  %vm559_vm15 = vcmp.eq.s32.totalorder %v7937_v35, %v7424_v26  ;;  %vm563_vm14 = vcmp.eq.s32.totalorder %v7937_v35, %v7427_v27  ;;  %12626 = vst [vmem:[#allocation66_spill] sm:$0xff] %v12625_v34  ;;  %v1938_v27 = vmax.f32 %v7914_v42, 0.0  ;;  %v12739_v34 = vmov 0 }
 0x180   : > { %vm8095_vm3 = vmpackc.low %vm563_vm14, %vm559_vm15 }
 0x181   : > { %v1846_v22 = vpop.f32.mrf.mxu2  ;;  %v1869_v16 = vpop.f32.mrf.mxu3  ;;  %v12628_v9 = vsel %vm8095_vm3, 4294967295, %v12627_v9  ;;  %vm8115_vm15 = vmpackc.low %vm491_vm7, %vm487_vm2  ;;  %vm543_vm2 = vcmp.eq.s32.totalorder %v7937_v35, %v7496_v38  ;;  %vm547_vm7 = vcmp.eq.s32.totalorder %v7937_v35, %v7499_v39 }
 0x182   : > { %12629 = vst [vmem:[#allocation67_spill] sm:$0xff] %v12628_v9  ;;  %v1935_v40 = vmax.f32 %v1846_v22, 0.0  ;;  %v1936_v51 = vmax.f32 %v1869_v16, 0.0  ;;  %v12630_v16 = vmov 0  ;;  %v1931_v22 = vmax.f32 %v1843_v23, 0.0  ;;  %vm8119_vm14 = vmpackc.low %vm555_vm5, %vm551_vm13 }
 0x183   : > { %5751 = vmatpush.bf16.msk.msrb.mxu0 %vm8069_vm6, %v12557_v54  ;;  %5767 = vmatpush.bf16.msk.msrb.mxu1 %vm8073_vm1, %v12557_v54  ;;  %v12631_v16 = vsel %vm8115_vm15, 4294967295, %v12630_v16  ;;  %vm479_vm1 = vcmp.eq.s32.totalorder %v7937_v35, %v7486_v36  ;;  %vm12636_vm6 = vcmask 1043456   ;;  %v1928_v23 = vmax.f32 %v7997_v28, 0.0 }
 0x184   : > { %v1947_v11 = vpack.c.bf16 %v1935_v40, %v1935_v40  ;;  %v1948_v62 = vpack.c.bf16 %v1936_v51, %v1936_v51  ;;  %12632 = vst [vmem:[#allocation68_spill] sm:$0xff] %v12631_v16  ;;  %v12633_v40 = vmov 0  ;;  %vm12637_vm9 = vmmov %vm12636_vm6  ;;  %v1927_v51 = vmax.f32 %v7995_v60, 0.0 }
 0x185   : > { %v12634_v40 = vsel %vm8119_vm14, 4294967295, %v12633_v40  ;;  %v1924_v9 = vmax.f32 %v7941_v48, 0.0  ;;  %v1944_v28 = vpack.c.bf16 %v1932_v33, %v1928_v23  ;;  %vm471_vm13 = vcmp.eq.s32.totalorder %v7937_v35, %v7293_v63 }
 0x186   : > { %12635 = vst [vmem:[#allocation69_spill] sm:$0xff] %v12634_v40  ;;  %v1955_v42 = vsel %vm12636_vm6, %v1947_v11, 0  ;;  %v1958_v50 = vsel %vm12637_vm9, %v1948_v62, 0  ;;  %v12638_v11 = vmov 0  ;;  %v1943_v62 = vpack.c.bf16 %v1931_v22, %v1927_v51  ;;  %vm8150_vm6 = vmpackc.low %vm547_vm7, %vm543_vm2 }
 0x187   : > { %5753 = vmatpush.bf16.msk.msrb.mxu0 %vm8091_vm12, %v12557_v54  ;;  %5769 = vmatpush.bf16.msk.msrb.mxu1 %vm8095_vm3, %v12557_v54  ;;  %vm483_vm12 = vcmp.eq.s32.totalorder %v7937_v35, %v7489_v37  ;;  %v12642_v17 = vsel %vm8150_vm6, 4294967295, %v12641_v17  ;;  %v1949_v48 = vpack.c.bf16 %v1937_v45, %v1937_v45  ;;  %vm539_vm5 = vcmp.eq.s32.totalorder %v7937_v35, %v7526_v44 }
 0x188   : > { %1971 = vmatpush.bf16.msra.mxu2 %v1955_v42  ;;  %1984 = vmatpush.bf16.msra.mxu3 %v1958_v50  ;;  %vm8143_vm9 = vmpackc.low %vm483_vm12, %vm479_vm1  ;;  %12643 = vst [vmem:[#allocation71_spill] sm:$0xff] %v12642_v17  ;;  %vm475_vm1 = vcmp.eq.s32.totalorder %v7937_v35, %v7512_v41  ;;  %v1950_v50 = vpack.c.bf16 %v1938_v27, %v1938_v27  ;;  %v1919_v33 = vmax.f32 %v7882_v47, 0.0  ;;  %v1920_v22 = vmax.f32 %v7884_v29, 0.0 }
 0x189   : > { %v12639_v11 = vsel %vm8143_vm9, 4294967295, %v12638_v11  ;;  %v1848_v60 = vpop.f32.mrf.mxu2  ;;  %v1871_v42 = vpop.f32.mrf.mxu3  ;;  %vm535_vm12 = vcmp.eq.s32.totalorder %v7937_v35, %v7523_v43  ;;  %vm8170_vm2 = vmpackc.low %vm475_vm1, %vm471_vm13  ;;  %v12644_v27 = vmov 0  ;;  %v12647_v47 = vmov 0 }
 0x18a   : > { %12640 = vst [vmem:[#allocation70_spill] sm:$0xff] %v12639_v11  ;;  %v12645_v27 = vsel %vm8170_vm2, 4294967295, %v12644_v27  ;;  %v1939_v45 = vpack.c.bf16 %v1923_v46, %v1919_v33  ;;  %v1940_v35 = vpack.c.bf16 %v1924_v9, %v1920_v22  ;;  %vm8174_vm7 = vmpackc.low %vm539_vm5, %vm535_vm12  ;;  %v1929_v29 = vmax.f32 %v7810_v10, 0.0  ;;  %v1768_v9 = vld [vmem:[%s11785_s5 + $0x38] sm:$0x3] }
 0x18b   : > { %5755 = vmatpush.bf16.msk.msrb.mxu0 %vm8115_vm15, %v12557_v54  ;;  %5771 = vmatpush.bf16.msk.msrb.mxu1 %vm8119_vm14, %v12557_v54  ;;  %12646 = vst [vmem:[#allocation72_spill] sm:$0xff] %v12645_v27  ;;  %v12648_v47 = vsel %vm8174_vm7, 4294967295, %v12647_v47  ;;  %v1933_v51 = vmax.f32 %v7860_v58, 0.0  ;;  %vm12650_vm14 = vcmask 1043456   ;;  %v1930_v60 = vmax.f32 %v7812_v0, 0.0 }
 0x18c   : > { %1972 = vmatpush.bf16.msra.mxu2 %v1943_v62  ;;  %1985 = vmatpush.bf16.msra.mxu3 %v1944_v28  ;;  %12649 = vst [vmem:[#allocation73_spill] sm:$0xff] %v12648_v47  ;;  %v1961_v23 = vsel %vm12650_vm14, %v1949_v48, 0  ;;  %vm12651_vm3 = vmmov %vm12650_vm14  ;;  %v8183_v28 = vperm.slane %v7285_v59, 1  ;;  %v1934_v46 = vmax.f32 %v7862_v52, 0.0  ;;  %v1921_v10 = vmax.f32 %v7757_v57, 0.0 }
 0x18d   : > { %v1964_v62 = vsel %vm12651_vm3, %v1950_v50, 0  ;;  %v1922_v52 = vmax.f32 %v7759_v55, 0.0  ;;  %v1925_v0 = vmax.f32 %v7770_v61, 0.0  ;;  %v1945_v58 = vpack.c.bf16 %v1933_v51, %v1929_v29  ;;  %v12680_v51 = vld [vmem:[#allocation11_spill] sm:$0xff] }
 0x18e   : > { %vm12652_vm3 = vcmask 326656   ;;  %v1926_v42 = vmax.f32 %v7772_v53, 0.0  ;;  %v1946_v48 = vpack.c.bf16 %v1934_v46, %v1930_v60  ;;  %vm850_vm13 = vcmp.eq.s32.totalorder %v8183_v28, %v7298_v1  ;;  %v12687_v60 = vld [vmem:[#allocation14_spill] sm:$0xff] }
 0x18f   : > { %5757 = vmatpush.bf16.msk.msrb.mxu0 %vm8143_vm9, %v12557_v54  ;;  %5773 = vmatpush.bf16.msk.msrb.mxu1 %vm8150_vm6, %v12557_v54  ;;  %vm12653_vm14 = vmmov %vm12652_vm3  ;;  %vm854_vm1 = vcmp.eq.s32.totalorder %v8183_v28, %v7301_v2  ;;  %vm914_vm12 = vcmp.eq.s32.totalorder %v8183_v28, %v7304_v3  ;;  %vm918_vm5 = vcmp.eq.s32.totalorder %v8183_v28, %v7307_v4  ;;  %v12654_v61 = vmov 0 }
 0x190   : > { %1973 = vmatpush.bf16.msra.mxu2 %v1939_v45  ;;  %1986 = vmatpush.bf16.msra.mxu3 %v1940_v35  ;;  %v1941_v53 = vpack.c.bf16 %v1925_v0, %v1921_v10  ;;  %v1942_v55 = vpack.c.bf16 %v1926_v42, %v1922_v52  ;;  %v12657_v57 = vmov 0  ;;  %vm846_vm6 = vcmp.eq.s32.totalorder %v8183_v28, %v7313_v6 }
 0x191   : > { %v12660_v50 = vmov 0  ;;  %v12663_v33 = vmov 0  ;;  %vm838_vm9 = vcmp.eq.s32.totalorder %v8183_v28, %v7352_v13  ;;  %vm898_vm15 = vcmp.eq.s32.totalorder %v8183_v28, %v7355_v14 }
 0x192   : > { %vm902_vm8 = vcmp.eq.s32.totalorder %v8183_v28, %v7358_v15  ;;  %v12666_v22 = vmov 0  ;;  %v12669_v45 = vmov 0  ;;  %v12672_v35 = vmov 0 }
 0x193   : > { %5759 = vmatpush.bf16.msk.msrb.mxu0 %vm8170_vm2, %v12557_v54  ;;  %5775 = vmatpush.bf16.msk.msrb.mxu1 %vm8174_vm7, %v12557_v54  ;;  %vm842_vm7 = vcmp.eq.s32.totalorder %v8183_v28, %v7310_v5  ;;  %vm906_vm2 = vcmp.eq.s32.totalorder %v8183_v28, %v7316_v7  ;;  %v12676_v29 = vmov 0  ;;  %v12688_v46 = vmov 0 }
 0x194   : > { %1997 = vmatpush.bf16.msrb.mxu2 %v1961_v23  ;;  %2010 = vmatpush.bf16.msrb.mxu3 %v1964_v62  ;;  %v12681_v23 = vmov 0  ;;  %v12684_v62 = vmov 0  ;;  %v8337_v10 = vperm.slane %v7285_v59, 3  ;;  %v12694_v52 = vmov 0 }
 0x195   : > { %5548 = vmatmul.msk.bf16.vlgmr.msra.gmra.mxu2 %vm12652_vm3, %v1768_v9  ;;  %5549 = vmatmul.msk.bf16.vlgmr.msra.gmra.mxu3 %vm12653_vm14, %v1768_v9  ;;  %vm8212_vm3 = vmpackc.low %vm854_vm1, %vm850_vm13  ;;  %vm910_vm13 = vcmp.eq.s32.totalorder %v8183_v28, %v7319_v8  ;;  %v12697_v59 = vmov 0  ;;  %v12700_v0 = vmov 0  ;;  %v12709_v42 = vmov 0 }
 0x196   : > { %2192 = vmatmul.bf16.vlgmr.msrb.gmra.mxu0 %v7792_v49  ;;  %2205 = vmatmul.bf16.vlgmr.msrb.gmra.mxu1 %v7796_v56  ;;  %v12655_v61 = vsel %vm8212_vm3, 4294967295, %v12654_v61  ;;  %vm8216_vm14 = vmpackc.low %vm918_vm5, %vm914_vm12  ;;  %vm834_vm5 = vcmp.eq.s32.totalorder %v8183_v28, %v7349_v12  ;;  %vm844_vm4 = vcmp.eq.s32.totalorder %v8337_v10, %v7310_v5  ;;  %v12721_v47 = vmov 0 }
 0x197   : > { %12656 = vst [vmem:[#allocation74_spill] sm:$0xff] %v12655_v61  ;;  %v12658_v57 = vsel %vm8216_vm14, 4294967295, %v12657_v57  ;;  %vm8234_vm1 = vmpackc.low %vm846_vm6, %vm842_vm7  ;;  %vm826_vm7 = vcmp.eq.s32.totalorder %v8183_v28, %v7380_v18  ;;  %v12724_v17 = vmov 0  ;;  %v12727_v40 = vmov 0 }
 0x198   : > { %1998 = vmatpush.bf16.msrb.mxu2 %v1945_v58  ;;  %2011 = vmatpush.bf16.msrb.mxu3 %v1946_v48  ;;  %12659 = vst [vmem:[#allocation75_spill] sm:$0xff] %v12658_v57  ;;  %v12661_v50 = vsel %vm8234_vm1, 4294967295, %v12660_v50  ;;  %vm8238_vm12 = vmpackc.low %vm910_vm13, %vm906_vm2  ;;  %vm830_vm13 = vcmp.eq.s32.totalorder %v8183_v28, %v7383_v19  ;;  %v12706_v58 = vmov 0  ;;  %v12712_v48 = vmov 0 }
 0x199   : > { %12662 = vst [vmem:[#allocation76_spill] sm:$0xff] %v12661_v50  ;;  %v12664_v33 = vsel %vm8238_vm12, 4294967295, %v12663_v33  ;;  %vm8256_vm6 = vmpackc.low %vm838_vm9, %vm834_vm5  ;;  %v12730_v27 = vmov 0  ;;  %v12733_v11 = vmov 0  ;;  %v12736_v16 = vmov 0 }
 0x19a   : > { %12665 = vst [vmem:[#allocation77_spill] sm:$0xff] %v12664_v33  ;;  %v12667_v22 = vsel %vm8256_vm6, 4294967295, %v12666_v22  ;;  %vm8260_vm2 = vmpackc.low %vm902_vm8, %vm898_vm15  ;;  %vm12675_vm15 = vcmask 326656   ;;  %v12990_v57 = vmov 0 }
 0x19b   : > { %12668 = vst [vmem:[#allocation78_spill] sm:$0xff] %v12667_v22  ;;  %v12670_v45 = vsel %vm8260_vm2, 4294967295, %v12669_v45  ;;  %vm8278_vm8 = vmpackc.low %vm830_vm13, %vm826_vm7  ;;  %vm882_vm7 = vcmp.eq.s32.totalorder %v8183_v28, %v7424_v26  ;;  %vm886_vm13 = vcmp.eq.s32.totalorder %v8183_v28, %v12680_v51 }
 0x19c   : > { %1999 = vmatpush.bf16.msrb.mxu2 %v1941_v53  ;;  %2012 = vmatpush.bf16.msrb.mxu3 %v1942_v55  ;;  %12671 = vst [vmem:[#allocation79_spill] sm:$0xff] %v12670_v45  ;;  %v12673_v35 = vsel %vm8278_vm8, 4294967295, %v12672_v35  ;;  %vm12679_vm5 = vmmov %vm12675_vm15  ;;  %v12715_v53 = vmov 0  ;;  %v12718_v55 = vmov 0 }
 0x19d   : > { %12674 = vst [vmem:[#allocation80_spill] sm:$0xff] %v12673_v35 }
 0x1a0   : > { %5585 = vmatpush.bf16.msk.msra.mxu2 %vm8212_vm3, %v12557_v54  ;;  %5601 = vmatpush.bf16.msk.msra.mxu3 %vm8216_vm14, %v12557_v54  ;;  %vm890_vm14 = vcmp.eq.s32.totalorder %v8183_v28, %v7390_v20 }
 0x1a4   : > { %5587 = vmatpush.bf16.msk.msra.mxu2 %vm8234_vm1, %v12557_v54  ;;  %5603 = vmatpush.bf16.msk.msra.mxu3 %vm8238_vm12, %v12557_v54  ;;  %vm894_vm12 = vcmp.eq.s32.totalorder %v8183_v28, %v7393_v21  ;;  %vm818_vm1 = vcmp.eq.s32.totalorder %v8183_v28, %v7414_v24 }
 0x1a5   : > { %5550 = vmatmul.msk.bf16.vlgmr.msrb.gmra.mxu2 %vm12675_vm15, %v1768_v9  ;;  %vm8283_vm9 = vmpackc.low %vm894_vm12, %vm890_vm14  ;;  %5551 = vmatmul.msk.bf16.vlgmr.msrb.gmra.mxu3 %vm12679_vm5, %v1768_v9  ;;  %vm810_vm15 = vcmp.eq.s32.totalorder %v8183_v28, %v7452_v30  ;;  %vm814_vm5 = vcmp.eq.s32.totalorder %v8183_v28, %v7455_v31  ;;  %v12691_v9 = vmov 0 }
 0x1a6   : > { %v12677_v29 = vsel %vm8283_vm9, 4294967295, %v12676_v29  ;;  %vm8306_vm12 = vmpackc.low %vm886_vm13, %vm882_vm7  ;;  %vm802_vm7 = vcmp.eq.s32.totalorder %v8183_v28, %v7486_v36  ;;  %vm806_vm13 = vcmp.eq.s32.totalorder %v8183_v28, %v7489_v37 }
 0x1a7   : > { %12678 = vst [vmem:[#allocation81_spill] sm:$0xff] %v12677_v29  ;;  %v12685_v62 = vsel %vm8306_vm12, 4294967295, %v12684_v62  ;;  %v12934_v29 = vmov 0 }
 0x1a8   : > { %5589 = vmatpush.bf16.msk.msra.mxu2 %vm8256_vm6, %v12557_v54  ;;  %5605 = vmatpush.bf16.msk.msra.mxu3 %vm8260_vm2, %v12557_v54  ;;  %vm822_vm6 = vcmp.eq.s32.totalorder %v8183_v28, %v7417_v25  ;;  %12686 = vst [vmem:[#allocation82_spill] sm:$0xff] %v12685_v62  ;;  %vm874_vm2 = vcmp.eq.s32.totalorder %v8183_v28, %v7462_v32 }
 0x1a9   : > { %vm8302_vm14 = vmpackc.low %vm822_vm6, %vm818_vm1 }
 0x1aa   : > { %v12682_v23 = vsel %vm8302_vm14, 4294967295, %v12681_v23  ;;  %vm8324_vm1 = vmpackc.low %vm814_vm5, %vm810_vm15  ;;  %vm870_vm15 = vcmp.eq.s32.totalorder %v8183_v28, %v7499_v39  ;;  %vm798_vm5 = vcmp.eq.s32.totalorder %v8183_v28, %v7512_v41 }
 0x1ab   : > { %12683 = vst [vmem:[#allocation11_spill] sm:$0xff] %v12682_v23  ;;  %v12689_v46 = vsel %vm8324_vm1, 4294967295, %v12688_v46 }
 0x1ac   : > { %5591 = vmatpush.bf16.msk.msra.mxu2 %vm8278_vm8, %v12557_v54  ;;  %5607 = vmatpush.bf16.msk.msra.mxu3 %vm8283_vm9, %v12557_v54  ;;  %vm878_vm9 = vcmp.eq.s32.totalorder %v8183_v28, %v12687_v60  ;;  %12690 = vst [vmem:[#allocation14_spill] sm:$0xff] %v12689_v46  ;;  %v12987_v46 = vmov 0 }
 0x1ad   : > { %vm8328_vm6 = vmpackc.low %vm878_vm9, %vm874_vm2  ;;  %vm794_vm9 = vcmp.eq.s32.totalorder %v8183_v28, %v7293_v63 }
 0x1ae   : > { %v12692_v9 = vsel %vm8328_vm6, 4294967295, %v12691_v9  ;;  %vm8349_vm2 = vmpackc.low %vm806_vm13, %vm802_vm7  ;;  %vm852_vm7 = vcmp.eq.s32.totalorder %v8337_v10, %v7298_v1  ;;  %vm856_vm13 = vcmp.eq.s32.totalorder %v8337_v10, %v7301_v2 }
 0x1af   : > { %12693 = vst [vmem:[#allocation83_spill] sm:$0xff] %v12692_v9  ;;  %v12695_v52 = vsel %vm8349_vm2, 4294967295, %v12694_v52  ;;  %vm8369_vm8 = vmpackc.low %vm798_vm5, %vm794_vm9  ;;  %v12928_v9 = vmov 0 }
 0x1b0   : > { %5593 = vmatpush.bf16.msk.msra.mxu2 %vm8302_vm14, %v12557_v54  ;;  %5609 = vmatpush.bf16.msk.msra.mxu3 %vm8306_vm12, %v12557_v54  ;;  %vm866_vm12 = vcmp.eq.s32.totalorder %v8183_v28, %v7496_v38  ;;  %12696 = vst [vmem:[#allocation84_spill] sm:$0xff] %v12695_v52  ;;  %v12701_v0 = vsel %vm8369_vm8, 4294967295, %v12700_v0  ;;  %vm8387_vm9 = vmpackc.low %vm856_vm13, %vm852_vm7 }
 0x1b1   : > { %vm8357_vm14 = vmpackc.low %vm870_vm15, %vm866_vm12  ;;  %12702 = vst [vmem:[#allocation86_spill] sm:$0xff] %v12701_v0  ;;  %vm916_vm12 = vcmp.eq.s32.totalorder %v8337_v10, %v7304_v3  ;;  %vm920_vm15 = vcmp.eq.s32.totalorder %v8337_v10, %v7307_v4  ;;  %v12707_v58 = vsel %vm8387_vm9, 4294967295, %v12706_v58 }
 0x1b2   : > { %v12698_v59 = vsel %vm8357_vm14, 4294967295, %v12697_v59  ;;  %12708 = vst [vmem:[#allocation88_spill] sm:$0xff] %v12707_v58  ;;  %vm8391_vm5 = vmpackc.low %vm920_vm15, %vm916_vm12  ;;  %vm836_vm12 = vcmp.eq.s32.totalorder %v8337_v10, %v7349_v12  ;;  %vm840_vm15 = vcmp.eq.s32.totalorder %v8337_v10, %v7352_v13 }
 0x1b3   : > { %12699 = vst [vmem:[#allocation85_spill] sm:$0xff] %v12698_v59  ;;  %v12710_v42 = vsel %vm8391_vm5, 4294967295, %v12709_v42 }
 0x1b4   : > { %5595 = vmatpush.bf16.msk.msra.mxu2 %vm8324_vm1, %v12557_v54  ;;  %5611 = vmatpush.bf16.msk.msra.mxu3 %vm8328_vm6, %v12557_v54  ;;  %vm858_vm1 = vcmp.eq.s32.totalorder %v8183_v28, %v7523_v43  ;;  %vm862_vm6 = vcmp.eq.s32.totalorder %v8183_v28, %v7526_v44  ;;  %v12703_v28 = vmov 0  ;;  %12711 = vst [vmem:[#allocation89_spill] sm:$0xff] %v12710_v42  ;;  %v12758_v42 = vmov 0 }
 0x1b5   : > { %vm8383_vm3 = vmpackc.low %vm862_vm6, %vm858_vm1  ;;  %vm908_vm1 = vcmp.eq.s32.totalorder %v8337_v10, %v7316_v7  ;;  %vm912_vm6 = vcmp.eq.s32.totalorder %v8337_v10, %v7319_v8 }
 0x1b6   : > { %v12704_v28 = vsel %vm8383_vm3, 4294967295, %v12703_v28  ;;  %vm8419_vm13 = vmpackc.low %vm912_vm6, %vm908_vm1 }
 0x1b7   : > { %12705 = vst [vmem:[#allocation87_spill] sm:$0xff] %v12704_v28  ;;  %v12716_v53 = vsel %vm8419_vm13, 4294967295, %v12715_v53  ;;  %vm8439_vm1 = vmpackc.low %vm840_vm15, %vm836_vm12  ;;  %v12761_v28 = vmov 0 }
 0x1b8   : > { %5597 = vmatpush.bf16.msk.msra.mxu2 %vm8349_vm2, %v12557_v54  ;;  %5613 = vmatpush.bf16.msk.msra.mxu3 %vm8357_vm14, %v12557_v54  ;;  %vm848_vm2 = vcmp.eq.s32.totalorder %v8337_v10, %v7313_v6  ;;  %12717 = vst [vmem:[#allocation91_spill] sm:$0xff] %v12716_v53  ;;  %v12719_v55 = vsel %vm8439_vm1, 4294967295, %v12718_v55  ;;  %vm892_vm14 = vcmp.eq.s32.totalorder %v8337_v10, %v7390_v20  ;;  %v12746_v53 = vmov 0 }
 0x1b9   : > { %vm8415_vm7 = vmpackc.low %vm848_vm2, %vm844_vm4  ;;  %vm900_vm4 = vcmp.eq.s32.totalorder %v8337_v10, %v7355_v14  ;;  %vm904_vm2 = vcmp.eq.s32.totalorder %v8337_v10, %v7358_v15  ;;  %12720 = vst [vmem:[#allocation92_spill] sm:$0xff] %v12719_v55 }
 0x1ba   : > { %v12713_v48 = vsel %vm8415_vm7, 4294967295, %v12712_v48  ;;  %vm8443_vm6 = vmpackc.low %vm904_vm2, %vm900_vm4  ;;  %vm820_vm4 = vcmp.eq.s32.totalorder %v8337_v10, %v7414_v24  ;;  %vm824_vm2 = vcmp.eq.s32.totalorder %v8337_v10, %v7417_v25 }
 0x1bb   : > { %12714 = vst [vmem:[#allocation90_spill] sm:$0xff] %v12713_v48  ;;  %v12722_v47 = vsel %vm8443_vm6, 4294967295, %v12721_v47  ;;  %v397_v48 = vld [vmem:[%s9020_s14 + $0x100] sm:$0xff] }
 0x1bc   : > { %5599 = vmatpush.bf16.msk.msra.mxu2 %vm8369_vm8, %v12557_v54  ;;  %5615 = vmatpush.bf16.msk.msra.mxu3 %vm8383_vm3, %v12557_v54  ;;  %12723 = vst [vmem:[#allocation93_spill] sm:$0xff] %v12722_v47  ;;  %vm832_vm3 = vcmp.eq.s32.totalorder %v8337_v10, %v7383_v19 }
 0x1bf   : > { %2062 = vmatmul.bf16.vlgmr.msra.gmra.mxu2 %v7792_v49  ;;  %2075 = vmatmul.bf16.vlgmr.msra.gmra.mxu3 %v7796_v56 }
 0x1c0   : > { %5649 = vmatpush.bf16.msk.msrb.mxu2 %vm8387_vm9, %v12557_v54  ;;  %5665 = vmatpush.bf16.msk.msrb.mxu3 %vm8391_vm5, %v12557_v54  ;;  %vm828_vm5 = vcmp.eq.s32.totalorder %v8337_v10, %v7380_v18 }
 0x1c1   : > { %vm8461_vm12 = vmpackc.low %vm832_vm3, %vm828_vm5  ;;  %vm812_vm5 = vcmp.eq.s32.totalorder %v8337_v10, %v7452_v30 }
 0x1c2   : > { %v12725_v17 = vsel %vm8461_vm12, 4294967295, %v12724_v17  ;;  %vm8483_vm3 = vmpackc.low %vm824_vm2, %vm820_vm4  ;;  %vm804_vm4 = vcmp.eq.s32.totalorder %v8337_v10, %v7486_v36  ;;  %vm808_vm2 = vcmp.eq.s32.totalorder %v8337_v10, %v7489_v37 }
 0x1c3   : > { %12726 = vst [vmem:[#allocation94_spill] sm:$0xff] %v12725_v17  ;;  %v12731_v27 = vsel %vm8483_vm3, 4294967295, %v12730_v27 }
 0x1c4   : > { %5651 = vmatpush.bf16.msk.msrb.mxu2 %vm8415_vm7, %v12557_v54  ;;  %5667 = vmatpush.bf16.msk.msrb.mxu3 %vm8419_vm13, %v12557_v54  ;;  %vm896_vm13 = vcmp.eq.s32.totalorder %v8337_v10, %v7393_v21  ;;  %12732 = vst [vmem:[#allocation96_spill] sm:$0xff] %v12731_v27 }
 0x1c5   : > { %vm8465_vm15 = vmpackc.low %vm896_vm13, %vm892_vm14  ;;  %vm816_vm13 = vcmp.eq.s32.totalorder %v8337_v10, %v7455_v31 }
 0x1c6   : > { %v12728_v40 = vsel %vm8465_vm15, 4294967295, %v12727_v40 }
 0x1c7   : > { %12729 = vst [vmem:[#allocation95_spill] sm:$0xff] %v12728_v40  ;;  %v12742_v40 = vld [vmem:[#allocation39_spill] sm:$0xff] }
 0x1c8   : > { %5653 = vmatpush.bf16.msk.msrb.mxu2 %vm8439_vm1, %v12557_v54  ;;  %5669 = vmatpush.bf16.msk.msrb.mxu3 %vm8443_vm6, %v12557_v54  ;;  %vm884_vm1 = vcmp.eq.s32.totalorder %v8337_v10, %v7424_v26  ;;  %vm888_vm6 = vcmp.eq.s32.totalorder %v8337_v10, %v12680_v51  ;;  %v8518_v47 = vperm.slane %v12742_v40, 1 }
 0x1c9   : > { %vm8487_vm14 = vmpackc.low %vm888_vm6, %vm884_vm1 }
 0x1ca   : > { %v12734_v11 = vsel %vm8487_vm14, 4294967295, %v12733_v11  ;;  %vm8505_vm1 = vmpackc.low %vm816_vm13, %vm812_vm5  ;;  %vm872_vm5 = vcmp.eq.s32.totalorder %v8337_v10, %v7499_v39  ;;  %vm800_vm13 = vcmp.eq.s32.totalorder %v8337_v10, %v7512_v41  ;;  %vm518_vm8 = vcmp.eq.s32.totalorder %v8518_v47, %v7310_v5 }
 0x1cb   : > { %12735 = vst [vmem:[#allocation97_spill] sm:$0xff] %v12734_v11  ;;  %v12737_v16 = vsel %vm8505_vm1, 4294967295, %v12736_v16  ;;  %v12743_v11 = vmov 0 }
 0x1cc   : > { %5655 = vmatpush.bf16.msk.msrb.mxu2 %vm8461_vm12, %v12557_v54  ;;  %5671 = vmatpush.bf16.msk.msrb.mxu3 %vm8465_vm15, %v12557_v54  ;;  %vm876_vm12 = vcmp.eq.s32.totalorder %v8337_v10, %v7462_v32  ;;  %vm880_vm15 = vcmp.eq.s32.totalorder %v8337_v10, %v12687_v60  ;;  %12738 = vst [vmem:[#allocation98_spill] sm:$0xff] %v12737_v16  ;;  %v12755_v16 = vmov 0 }
 0x1cd   : > { %vm8509_vm6 = vmpackc.low %vm880_vm15, %vm876_vm12  ;;  %vm796_vm15 = vcmp.eq.s32.totalorder %v8337_v10, %v7293_v63 }
 0x1ce   : > { %v12740_v34 = vsel %vm8509_vm6, 4294967295, %v12739_v34  ;;  %vm8530_vm12 = vmpackc.low %vm808_vm2, %vm804_vm4  ;;  %vm526_vm4 = vcmp.eq.s32.totalorder %v8518_v47, %v7298_v1  ;;  %vm530_vm2 = vcmp.eq.s32.totalorder %v8518_v47, %v7301_v2 }
 0x1cf   : > { %12741 = vst [vmem:[#allocation99_spill] sm:$0xff] %v12740_v34  ;;  %v12744_v11 = vsel %vm8530_vm12, 4294967295, %v12743_v11  ;;  %vm8550_vm7 = vmpackc.low %vm800_vm13, %vm796_vm15  ;;  %v12749_v34 = vmov 0 }
 0x1d0   : > { %5657 = vmatpush.bf16.msk.msrb.mxu2 %vm8483_vm3, %v12557_v54  ;;  %5673 = vmatpush.bf16.msk.msrb.mxu3 %vm8487_vm14, %v12557_v54  ;;  %vm868_vm14 = vcmp.eq.s32.totalorder %v8337_v10, %v7496_v38  ;;  %12745 = vst [vmem:[#allocation39_spill] sm:$0xff] %v12744_v11  ;;  %v12750_v34 = vsel %vm8550_vm7, 4294967295, %v12749_v34  ;;  %vm8568_vm15 = vmpackc.low %vm530_vm2, %vm526_vm4 }
 0x1d1   : > { %vm8538_vm3 = vmpackc.low %vm872_vm5, %vm868_vm14  ;;  %12751 = vst [vmem:[#allocation101_spill] sm:$0xff] %v12750_v34  ;;  %vm590_vm14 = vcmp.eq.s32.totalorder %v8518_v47, %v7304_v3  ;;  %vm594_vm5 = vcmp.eq.s32.totalorder %v8518_v47, %v7307_v4  ;;  %v12756_v16 = vsel %vm8568_vm15, 4294967295, %v12755_v16  ;;  %v12764_v34 = vmov 0 }
 0x1d2   : > { %v12747_v53 = vsel %vm8538_vm3, 4294967295, %v12746_v53  ;;  %12757 = vst [vmem:[#allocation103_spill] sm:$0xff] %v12756_v16  ;;  %vm8572_vm13 = vmpackc.low %vm594_vm5, %vm590_vm14  ;;  %vm510_vm14 = vcmp.eq.s32.totalorder %v8518_v47, %v7349_v12  ;;  %vm514_vm5 = vcmp.eq.s32.totalorder %v8518_v47, %v7352_v13  ;;  %v12776_v16 = vmov 0 }
 0x1d3   : > { %12748 = vst [vmem:[#allocation100_spill] sm:$0xff] %v12747_v53  ;;  %v12759_v42 = vsel %vm8572_vm13, 4294967295, %v12758_v42  ;;  %v2037_v53 = vpop.f32.mrf.mxu0  ;;  %v2050_v11 = vpop.f32.mrf.mxu1 }
 0x1d4   : > { %5659 = vmatpush.bf16.msk.msrb.mxu2 %vm8505_vm1, %v12557_v54  ;;  %5675 = vmatpush.bf16.msk.msrb.mxu3 %vm8509_vm6, %v12557_v54  ;;  %vm860_vm1 = vcmp.eq.s32.totalorder %v8337_v10, %v7523_v43  ;;  %vm864_vm6 = vcmp.eq.s32.totalorder %v8337_v10, %v7526_v44  ;;  %v12752_v10 = vmov 0  ;;  %12760 = vst [vmem:[#allocation104_spill] sm:$0xff] %v12759_v42 }
 0x1d5   : > { %vm8564_vm9 = vmpackc.low %vm864_vm6, %vm860_vm1  ;;  %vm582_vm1 = vcmp.eq.s32.totalorder %v8518_v47, %v7316_v7  ;;  %vm586_vm6 = vcmp.eq.s32.totalorder %v8518_v47, %v7319_v8  ;;  %v8590_v27 = vadd.f32 %v2050_v11, %v2037_v53  ;;  %v12767_v11 = vmov 0 }
 0x1d6   : > { %v12753_v10 = vsel %vm8564_vm9, 4294967295, %v12752_v10  ;;  %vm8602_vm2 = vmpackc.low %vm586_vm6, %vm582_vm1  ;;  %v12770_v53 = vmov 0 }
 0x1d7   : > { %12754 = vst [vmem:[#allocation102_spill] sm:$0xff] %v12753_v10  ;;  %v12765_v34 = vsel %vm8602_vm2, 4294967295, %v12764_v34  ;;  %vm8622_vm1 = vmpackc.low %vm514_vm5, %vm510_vm14  ;;  %v12788_v10 = vmov 0 }
 0x1d8   : > { %5661 = vmatpush.bf16.msk.msrb.mxu2 %vm8530_vm12, %v12557_v54  ;;  %5677 = vmatpush.bf16.msk.msrb.mxu3 %vm8538_vm3, %v12557_v54  ;;  %vm522_vm12 = vcmp.eq.s32.totalorder %v8518_v47, %v7313_v6  ;;  %12766 = vst [vmem:[#allocation106_spill] sm:$0xff] %v12765_v34  ;;  %v12768_v11 = vsel %vm8622_vm1, 4294967295, %v12767_v11 }
 0x1d9   : > { %vm8598_vm4 = vmpackc.low %vm522_vm12, %vm518_vm8  ;;  %vm574_vm8 = vcmp.eq.s32.totalorder %v8518_v47, %v7355_v14  ;;  %vm578_vm12 = vcmp.eq.s32.totalorder %v8518_v47, %v7358_v15  ;;  %12769 = vst [vmem:[#allocation107_spill] sm:$0xff] %v12768_v11  ;;  %v12785_v11 = vmov 0 }
 0x1da   : > { %v12762_v28 = vsel %vm8598_vm4, 4294967295, %v12761_v28  ;;  %vm8626_vm6 = vmpackc.low %vm578_vm12, %vm574_vm8  ;;  %vm494_vm8 = vcmp.eq.s32.totalorder %v8518_v47, %v7414_v24  ;;  %vm498_vm12 = vcmp.eq.s32.totalorder %v8518_v47, %v7417_v25 }
 0x1db   : > { %12763 = vst [vmem:[#allocation105_spill] sm:$0xff] %v12762_v28  ;;  %v12771_v53 = vsel %vm8626_vm6, 4294967295, %v12770_v53  ;;  %v2039_v34 = vpop.f32.mrf.mxu0  ;;  %v2052_v42 = vpop.f32.mrf.mxu1  ;;  %v12773_v28 = vmov 0 }
 0x1dc   : > { %5663 = vmatpush.bf16.msk.msrb.mxu2 %vm8550_vm7, %v12557_v54  ;;  %5679 = vmatpush.bf16.msk.msrb.mxu3 %vm8564_vm9, %v12557_v54  ;;  %12772 = vst [vmem:[#allocation108_spill] sm:$0xff] %v12771_v53  ;;  %v12779_v34 = vmov 0  ;;  %v12782_v42 = vmov 0 }
 0x1df   : > { %2114 = vmatmul.bf16.vlgmr.msrb.gmra.mxu2 %v7792_v49  ;;  %2127 = vmatmul.bf16.vlgmr.msrb.gmra.mxu3 %v7796_v56 }
 0x1e0   : > { %5713 = vmatpush.bf16.msk.msra.mxu2 %vm8568_vm15, %v12557_v54  ;;  %5729 = vmatpush.bf16.msk.msra.mxu3 %vm8572_vm13, %v12557_v54  ;;  %vm502_vm13 = vcmp.eq.s32.totalorder %v8518_v47, %v7380_v18  ;;  %vm506_vm15 = vcmp.eq.s32.totalorder %v8518_v47, %v7383_v19 }
 0x1e1   : > { %vm8644_vm14 = vmpackc.low %vm506_vm15, %vm502_vm13 }
 0x1e2   : > { %v12774_v28 = vsel %vm8644_vm14, 4294967295, %v12773_v28  ;;  %vm8666_vm15 = vmpackc.low %vm498_vm12, %vm494_vm8  ;;  %vm478_vm8 = vcmp.eq.s32.totalorder %v8518_v47, %v7486_v36  ;;  %vm482_vm12 = vcmp.eq.s32.totalorder %v8518_v47, %v7489_v37 }
 0x1e3   : > { %12775 = vst [vmem:[#allocation109_spill] sm:$0xff] %v12774_v28  ;;  %v12780_v34 = vsel %vm8666_vm15, 4294967295, %v12779_v34  ;;  %v2102_v53 = vpop.f32.mrf.mxu1 }
 0x1e4   : > { %5715 = vmatpush.bf16.msk.msra.mxu2 %vm8598_vm4, %v12557_v54  ;;  %5731 = vmatpush.bf16.msk.msra.mxu3 %vm8602_vm2, %v12557_v54  ;;  %vm566_vm4 = vcmp.eq.s32.totalorder %v8518_v47, %v7390_v20  ;;  %vm570_vm2 = vcmp.eq.s32.totalorder %v8518_v47, %v7393_v21  ;;  %12781 = vst [vmem:[#allocation111_spill] sm:$0xff] %v12780_v34 }
 0x1e5   : > { %vm8648_vm5 = vmpackc.low %vm570_vm2, %vm566_vm4  ;;  %vm486_vm4 = vcmp.eq.s32.totalorder %v8518_v47, %v7452_v30  ;;  %vm490_vm2 = vcmp.eq.s32.totalorder %v8518_v47, %v7455_v31 }
 0x1e6   : > { %v12777_v16 = vsel %vm8648_vm5, 4294967295, %v12776_v16 }
 0x1e7   : > { %12778 = vst [vmem:[#allocation110_spill] sm:$0xff] %v12777_v16  ;;  %v2089_v16 = vpop.f32.mrf.mxu0 }
 0x1e8   : > { %5717 = vmatpush.bf16.msk.msra.mxu2 %vm8622_vm1, %v12557_v54  ;;  %5733 = vmatpush.bf16.msk.msra.mxu3 %vm8626_vm6, %v12557_v54  ;;  %vm558_vm1 = vcmp.eq.s32.totalorder %v8518_v47, %v7424_v26  ;;  %vm562_vm6 = vcmp.eq.s32.totalorder %v8518_v47, %v12680_v51  ;;  %v8682_v28 = vadd.f32 %v2102_v53, %v2089_v16  ;;  %v8703_v16 = vperm.slane %v12742_v40, 3 }
 0x1e9   : > { %vm8670_vm13 = vmpackc.low %vm562_vm6, %vm558_vm1  ;;  %v12791_v53 = vmov 0  ;;  %v12794_v40 = vmov 0 }
 0x1ea   : > { %v12783_v42 = vsel %vm8670_vm13, 4294967295, %v12782_v42  ;;  %vm8690_vm1 = vmpackc.low %vm490_vm2, %vm486_vm4  ;;  %vm546_vm4 = vcmp.eq.s32.totalorder %v8518_v47, %v7499_v39  ;;  %vm474_vm2 = vcmp.eq.s32.totalorder %v8518_v47, %v7512_v41  ;;  %vm520_vm7 = vcmp.eq.s32.totalorder %v8703_v16, %v7310_v5 }
 0x1eb   : > { %12784 = vst [vmem:[#allocation112_spill] sm:$0xff] %v12783_v42  ;;  %v12786_v11 = vsel %vm8690_vm1, 4294967295, %v12785_v11  ;;  %v2104_v42 = vpop.f32.mrf.mxu1  ;;  %v12812_v5 = vmov 0 }
 0x1ec   : > { %5719 = vmatpush.bf16.msk.msra.mxu2 %vm8644_vm14, %v12557_v54  ;;  %5735 = vmatpush.bf16.msk.msra.mxu3 %vm8648_vm5, %v12557_v54  ;;  %vm550_vm14 = vcmp.eq.s32.totalorder %v8518_v47, %v7462_v32  ;;  %vm554_vm5 = vcmp.eq.s32.totalorder %v8518_v47, %v12687_v60  ;;  %12787 = vst [vmem:[#allocation113_spill] sm:$0xff] %v12786_v11  ;;  %v12797_v11 = vmov 0 }
 0x1ed   : > { %vm8694_vm6 = vmpackc.low %vm554_vm5, %vm550_vm14  ;;  %vm470_vm5 = vcmp.eq.s32.totalorder %v8518_v47, %v7293_v63 }
 0x1ee   : > { %v12789_v10 = vsel %vm8694_vm6, 4294967295, %v12788_v10  ;;  %vm8715_vm14 = vmpackc.low %vm482_vm12, %vm478_vm8  ;;  %vm528_vm8 = vcmp.eq.s32.totalorder %v8703_v16, %v7298_v1  ;;  %vm532_vm12 = vcmp.eq.s32.totalorder %v8703_v16, %v7301_v2  ;;  %v12800_v1 = vmov 0 }
 0x1ef   : > { %12790 = vst [vmem:[#allocation114_spill] sm:$0xff] %v12789_v10  ;;  %v12792_v53 = vsel %vm8715_vm14, 4294967295, %v12791_v53  ;;  %v2091_v10 = vpop.f32.mrf.mxu0  ;;  %vm8735_vm9 = vmpackc.low %vm474_vm2, %vm470_vm5  ;;  %v12803_v2 = vmov 0 }
 0x1f0   : > { %5721 = vmatpush.bf16.msk.msra.mxu2 %vm8666_vm15, %v12557_v54  ;;  %5737 = vmatpush.bf16.msk.msra.mxu3 %vm8670_vm13, %v12557_v54  ;;  %vm542_vm13 = vcmp.eq.s32.totalorder %v8518_v47, %v7496_v38  ;;  %12793 = vst [vmem:[#allocation115_spill] sm:$0xff] %v12792_v53  ;;  %v12798_v11 = vsel %vm8735_vm9, 4294967295, %v12797_v11  ;;  %vm8753_vm5 = vmpackc.low %vm532_vm12, %vm528_vm8 }
 0x1f1   : > { %vm8723_vm15 = vmpackc.low %vm546_vm4, %vm542_vm13  ;;  %12799 = vst [vmem:[#allocation117_spill] sm:$0xff] %v12798_v11  ;;  %vm592_vm13 = vcmp.eq.s32.totalorder %v8703_v16, %v7304_v3  ;;  %vm596_vm4 = vcmp.eq.s32.totalorder %v8703_v16, %v7307_v4  ;;  %v12804_v2 = vsel %vm8753_vm5, 4294967295, %v12803_v2  ;;  %v12806_v3 = vmov 0 }
 0x1f2   : > { %v12795_v40 = vsel %vm8723_vm15, 4294967295, %v12794_v40  ;;  %12805 = vst [vmem:[#allocation119_spill] sm:$0xff] %v12804_v2  ;;  %vm8757_vm2 = vmpackc.low %vm596_vm4, %vm592_vm13  ;;  %v12809_v4 = vmov 0  ;;  %vm512_vm13 = vcmp.eq.s32.totalorder %v8703_v16, %v7349_v12  ;;  %vm516_vm4 = vcmp.eq.s32.totalorder %v8703_v16, %v7352_v13 }
 0x1f3   : > { %12796 = vst [vmem:[#allocation116_spill] sm:$0xff] %v12795_v40  ;;  %v12807_v3 = vsel %vm8757_vm2, 4294967295, %v12806_v3  ;;  %v12818_v12 = vmov 0  ;;  %v12821_v13 = vmov 0  ;;  %v381_v40 = vld [vmem:[%s9020_s14 + $0x80] sm:$0xff]  ;;  %v12897_v2 = vmov 0 }
 0x1f4   : > { %5723 = vmatpush.bf16.msk.msra.mxu2 %vm8690_vm1, %v12557_v54  ;;  %5739 = vmatpush.bf16.msk.msra.mxu3 %vm8694_vm6, %v12557_v54  ;;  %vm534_vm1 = vcmp.eq.s32.totalorder %v8518_v47, %v7523_v43  ;;  %vm538_vm6 = vcmp.eq.s32.totalorder %v8518_v47, %v7526_v44  ;;  %12808 = vst [vmem:[#allocation120_spill] sm:$0xff] %v12807_v3  ;;  %v12884_v3 = vmov 0 }
 0x1f5   : > { %vm8749_vm3 = vmpackc.low %vm538_vm6, %vm534_vm1  ;;  %vm584_vm1 = vcmp.eq.s32.totalorder %v8703_v16, %v7316_v7  ;;  %vm588_vm6 = vcmp.eq.s32.totalorder %v8703_v16, %v7319_v8  ;;  %v8797_v7 = vpop.f32.mrf.mxu1  ;;  %v12815_v8 = vmov 0 }
 0x1f6   : > { %v12801_v1 = vsel %vm8749_vm3, 4294967295, %v12800_v1  ;;  %vm8785_vm12 = vmpackc.low %vm588_vm6, %vm584_vm1 }
 0x1f7   : > { %12802 = vst [vmem:[#allocation118_spill] sm:$0xff] %v12801_v1  ;;  %v12813_v5 = vsel %vm8785_vm12, 4294967295, %v12812_v5  ;;  %vm8809_vm1 = vmpackc.low %vm516_vm4, %vm512_vm13 }
 0x1f8   : > { %5725 = vmatpush.bf16.msk.msra.mxu2 %vm8715_vm14, %v12557_v54  ;;  %5741 = vmatpush.bf16.msk.msra.mxu3 %vm8723_vm15, %v12557_v54  ;;  %vm524_vm14 = vcmp.eq.s32.totalorder %v8703_v16, %v7313_v6  ;;  %12814 = vst [vmem:[#allocation122_spill] sm:$0xff] %v12813_v5  ;;  %v8795_v6 = vpop.f32.mrf.mxu0  ;;  %v12816_v8 = vsel %vm8809_vm1, 4294967295, %v12815_v8  ;;  %vm568_vm15 = vcmp.eq.s32.totalorder %v8703_v16, %v7390_v20  ;;  %v12830_v20 = vmov 0 }
 0x1f9   : > { %vm8781_vm8 = vmpackc.low %vm524_vm14, %vm520_vm7  ;;  %vm576_vm7 = vcmp.eq.s32.totalorder %v8703_v16, %v7355_v14  ;;  %vm580_vm14 = vcmp.eq.s32.totalorder %v8703_v16, %v7358_v15  ;;  %12817 = vst [vmem:[#allocation123_spill] sm:$0xff] %v12816_v8  ;;  %v12824_v14 = vmov 0  ;;  %v416_v8 = vld [vmem:[%s9020_s14 + $0x198] sm:$0xff] }
 0x1fa   : > { %v12810_v4 = vsel %vm8781_vm8, 4294967295, %v12809_v4  ;;  %vm8813_vm6 = vmpackc.low %vm580_vm14, %vm576_vm7  ;;  %vm496_vm7 = vcmp.eq.s32.totalorder %v8703_v16, %v7414_v24  ;;  %vm500_vm14 = vcmp.eq.s32.totalorder %v8703_v16, %v7417_v25  ;;  %v12836_v24 = vmov 0 }
 0x1fb   : > { %12811 = vst [vmem:[#allocation121_spill] sm:$0xff] %v12810_v4  ;;  %v12819_v12 = vsel %vm8813_vm6, 4294967295, %v12818_v12  ;;  %v12839_v25 = vmov 0 }
 0x1fc   : > { %5727 = vmatpush.bf16.msk.msra.mxu2 %vm8735_vm9, %v12557_v54  ;;  %5743 = vmatpush.bf16.msk.msra.mxu3 %vm8749_vm3, %v12557_v54  ;;  %12820 = vst [vmem:[#allocation124_spill] sm:$0xff] %v12819_v12  ;;  %vm508_vm3 = vcmp.eq.s32.totalorder %v8703_v16, %v7383_v19  ;;  %v12827_v19 = vmov 0  ;;  %v12877_v12 = vmov 0 }
 0x1ff   : > { %2166 = vmatmul.bf16.vlgmr.msra.gmra.mxu2 %v7792_v49  ;;  %2179 = vmatmul.bf16.vlgmr.msra.gmra.mxu3 %v7796_v56 }
 0x200   : > { %5777 = vmatpush.bf16.msk.msrb.mxu2 %vm8753_vm5, %v12557_v54  ;;  %5793 = vmatpush.bf16.msk.msrb.mxu3 %vm8757_vm2, %v12557_v54  ;;  %vm504_vm2 = vcmp.eq.s32.totalorder %v8703_v16, %v7380_v18  ;;  %v2143_v15 = vpop.f32.mrf.mxu0  ;;  %v2156_v18 = vpop.f32.mrf.mxu1 }
 0x201   : > { %vm8831_vm13 = vmpackc.low %vm508_vm3, %vm504_vm2  ;;  %vm564_vm3 = vcmp.eq.s32.totalorder %v8703_v16, %v12680_v51  ;;  %v12857_v15 = vmov 0 }
 0x202   : > { %v12822_v13 = vsel %vm8831_vm13, 4294967295, %v12821_v13 }
 0x203   : > { %12823 = vst [vmem:[#allocation125_spill] sm:$0xff] %v12822_v13 }
 0x204   : > { %5779 = vmatpush.bf16.msk.msrb.mxu2 %vm8781_vm8, %v12557_v54  ;;  %5795 = vmatpush.bf16.msk.msrb.mxu3 %vm8785_vm12, %v12557_v54  ;;  %vm572_vm12 = vcmp.eq.s32.totalorder %v8703_v16, %v7393_v21  ;;  %v12833_v21 = vmov 0 }
 0x205   : > { %vm8835_vm4 = vmpackc.low %vm572_vm12, %vm568_vm15  ;;  %vm488_vm12 = vcmp.eq.s32.totalorder %v8703_v16, %v7452_v30  ;;  %v12845_v30 = vmov 0 }
 0x206   : > { %v12825_v14 = vsel %vm8835_vm4, 4294967295, %v12824_v14  ;;  %vm8853_vm15 = vmpackc.low %vm500_vm14, %vm496_vm7  ;;  %vm480_vm14 = vcmp.eq.s32.totalorder %v8703_v16, %v7486_v36 }
 0x207   : > { %12826 = vst [vmem:[#allocation126_spill] sm:$0xff] %v12825_v14  ;;  %v12828_v19 = vsel %vm8853_vm15, 4294967295, %v12827_v19  ;;  %v409_v14 = vld [vmem:[%s9020_s14 + $0x160] sm:$0xff] }
 0x208   : > { %5781 = vmatpush.bf16.msk.msrb.mxu2 %vm8809_vm1, %v12557_v54  ;;  %5797 = vmatpush.bf16.msk.msrb.mxu3 %vm8813_vm6, %v12557_v54  ;;  %vm560_vm1 = vcmp.eq.s32.totalorder %v8703_v16, %v7424_v26  ;;  %12829 = vst [vmem:[#allocation127_spill] sm:$0xff] %v12828_v19  ;;  %vm492_vm6 = vcmp.eq.s32.totalorder %v8703_v16, %v7455_v31  ;;  %v12842_v26 = vmov 0 }
 0x209   : > { %vm8857_vm2 = vmpackc.low %vm564_vm3, %vm560_vm1  ;;  %vm484_vm3 = vcmp.eq.s32.totalorder %v8703_v16, %v7489_v37 }
 0x20a   : > { %v12831_v20 = vsel %vm8857_vm2, 4294967295, %v12830_v20  ;;  %vm8875_vm1 = vmpackc.low %vm492_vm6, %vm488_vm12  ;;  %vm476_vm12 = vcmp.eq.s32.totalorder %v8703_v16, %v7512_v41 }
 0x20b   : > { %12832 = vst [vmem:[#allocation128_spill] sm:$0xff] %v12831_v20  ;;  %v12834_v21 = vsel %vm8875_vm1, 4294967295, %v12833_v21  ;;  %vm8897_vm6 = vmpackc.low %vm484_vm3, %vm480_vm14  ;;  %vm12218_vm14 = vcmask 1044480  }
 0x20c   : > { %5783 = vmatpush.bf16.msk.msrb.mxu2 %vm8831_vm13, %v12557_v54  ;;  %5799 = vmatpush.bf16.msk.msrb.mxu3 %vm8835_vm4, %v12557_v54  ;;  %vm552_vm13 = vcmp.eq.s32.totalorder %v8703_v16, %v7462_v32  ;;  %vm556_vm4 = vcmp.eq.s32.totalorder %v8703_v16, %v12687_v60  ;;  %12835 = vst [vmem:[#allocation129_spill] sm:$0xff] %v12834_v21  ;;  %v12840_v25 = vsel %vm8897_vm6, 4294967295, %v12839_v25 }
 0x20d   : > { %vm8879_vm7 = vmpackc.low %vm556_vm4, %vm552_vm13  ;;  %12841 = vst [vmem:[#allocation131_spill] sm:$0xff] %v12840_v25  ;;  %vm472_vm4 = vcmp.eq.s32.totalorder %v8703_v16, %v7293_v63  ;;  %v12848_v63 = vmov 0  ;;  %v368_v25 = vld [vmem:[%s9020_s14 + $0x18] sm:$0xff] }
 0x20e   : > { %v12837_v24 = vsel %vm8879_vm7, 4294967295, %v12836_v24 }
 0x20f   : > { %12838 = vst [vmem:[#allocation130_spill] sm:$0xff] %v12837_v24  ;;  %v410_v24 = vld [vmem:[%s9020_s14 + $0x168] sm:$0xff] }
 0x210   : > { %5785 = vmatpush.bf16.msk.msrb.mxu2 %vm8853_vm15, %v12557_v54  ;;  %5801 = vmatpush.bf16.msk.msrb.mxu3 %vm8857_vm2, %v12557_v54  ;;  %vm544_vm15 = vcmp.eq.s32.totalorder %v8703_v16, %v7496_v38  ;;  %vm548_vm2 = vcmp.eq.s32.totalorder %v8703_v16, %v7499_v39 }
 0x211   : > { %vm8901_vm13 = vmpackc.low %vm548_vm2, %vm544_vm15 }
 0x212   : > { %v12843_v26 = vsel %vm8901_vm13, 4294967295, %v12842_v26  ;;  %vm8919_vm15 = vmpackc.low %vm476_vm12, %vm472_vm4 }
 0x213   : > { %12844 = vst [vmem:[#allocation132_spill] sm:$0xff] %v12843_v26  ;;  %v12846_v30 = vsel %vm8919_vm15, 4294967295, %v12845_v30  ;;  %v2193_v31 = vpop.f32.mrf.mxu0  ;;  %v2206_v32 = vpop.f32.mrf.mxu1  ;;  %vm8949_vm12 = vmpackc.low %vm12218_vm14, %vm12218_vm14 }
 0x214   : > { %5787 = vmatpush.bf16.msk.msrb.mxu2 %vm8875_vm1, %v12557_v54  ;;  %5803 = vmatpush.bf16.msk.msrb.mxu3 %vm8879_vm7, %v12557_v54  ;;  %vm536_vm1 = vcmp.eq.s32.totalorder %v8703_v16, %v7523_v43  ;;  %vm540_vm7 = vcmp.eq.s32.totalorder %v8703_v16, %v7526_v44  ;;  %12847 = vst [vmem:[#allocation133_spill] sm:$0xff] %v12846_v30  ;;  %v12858_v15 = vsel %vm8949_vm12, 4294967295, %v12857_v15  ;;  %v371_v30 = vld [vmem:[%s9020_s14 + $0x30] sm:$0xff] }
 0x215   : > { %vm8923_vm2 = vmpackc.low %vm540_vm7, %vm536_vm1  ;;  %vm12853_vm1 = vcmask 1043456   ;;  %12859 = vst [vmem:[#allocation137_spill] sm:$0xff] %v12858_v15  ;;  %v407_v15 = vld [vmem:[%s9020_s14 + $0x150] sm:$0xff] }
 0x216   : > { %v12849_v63 = vsel %vm8923_vm2, 4294967295, %v12848_v63  ;;  %vm12854_vm7 = vmmov %vm12853_vm1 }
 0x217   : > { %12850 = vst [vmem:[#allocation134_spill] sm:$0xff] %v12849_v63  ;;  %vm12855_vm3 = vmmov %vm12853_vm1 }
 0x218   : > { %5789 = vmatpush.bf16.msk.msrb.mxu2 %vm8897_vm6, %v12557_v54  ;;  %5805 = vmatpush.bf16.msk.msrb.mxu3 %vm8901_vm13, %v12557_v54  ;;  %v1975_v36 = vpop.f32.mrf.mxu2  ;;  %v1988_v37 = vpop.f32.mrf.mxu3  ;;  %vm12856_vm4 = vmmov %vm12853_vm1 }
 0x219   : > { %v8935_v38 = vmax.f32 %v1975_v36, 0.0  ;;  %v8937_v39 = vmax.f32 %v1988_v37, 0.0  ;;  %v7123_v36 = vmov 0   ;;  %vm12864_vm14 = vmmov %vm12855_vm3 }
 0x21a   : > { %6978 = vset.pattern.permute.xlu0 %v7123_v36  ;;  %6979 = vset.pattern.permute.xlu1 %v7123_v36 }
 0x21b   : > { %12851 = vst [vmem:[#allocation135_spill] sm:$0xff] %v8935_v38  ;;  %v2022_v41 = vsel %vm12853_vm1, %v8935_v38, 0.0  ;;  %v2023_v43 = vsel %vm12854_vm7, %v8937_v39, 0.0  ;;  %v2195_v44 = vpop.f32.mrf.mxu0  ;;  %v2208_v47 = vpop.f32.mrf.mxu1  ;;  %vm12237_vm1 = vcmask 195584   ;;  %6980 = vset.pattern.permute.xlu2 %v7123_v36  ;;  %vm12862_vm7 = vmmov %vm12855_vm3 }
 0x21c   : > { %5791 = vmatpush.bf16.msk.msrb.mxu2 %vm8919_vm15, %v12557_v54  ;;  %5807 = vmatpush.bf16.msk.msrb.mxu3 %vm8923_vm2, %v12557_v54  ;;  %12852 = vst [vmem:[#allocation136_spill] sm:$0xff] %v8937_v39  ;;  %v2254_v51 = vpack.c.bf16 %v2022_v41, %v2022_v41  ;;  %v2255_v60 = vpack.c.bf16 %v2023_v43, %v2023_v43  ;;  %vm12876_vm2 = vcmask 326656  }
 0x21e   : > { %v2315_v10 = vsel %vm12856_vm4, %v2255_v60, 0  ;;  %vm12863_vm4 = vmmov %vm12855_vm3 }
 0x21f   : > { %2218 = vmatmul.bf16.vlgmr.msrb.gmra.mxu2 %v7792_v49  ;;  %2231 = vmatmul.bf16.vlgmr.msrb.gmra.mxu3 %v7796_v56  ;;  %v2155_v49 = vadd.f32 %v8797_v7, %v8795_v6  ;;  %v2312_v56 = vsel %vm12855_vm3, %v2254_v51, 0  ;;  %v8957_v6 = vld [vmem:[%s11785_s5 + $0x40] sm:$0xff] }
 0x220   : > { %2329 = vmatpush.bf16.msra.mxu0 %v2312_v56  ;;  %2352 = vmatpush.bf16.msra.mxu1 %v2315_v10  ;;  %v1977_v42 = vpop.f32.mrf.mxu2  ;;  %v1990_v16 = vpop.f32.mrf.mxu3  ;;  %v2262_v7 = vld [vmem:[%s11786_s6 + $0x20] sm:$0xff]  ;;  %v2207_v56 = vadd.f32 %v2206_v32, %v2193_v31  ;;  %v2260_v10 = vld [vmem:[%s11786_s6 + $0x10] sm:$0xff] }
 0x221   : > { %v5817_v18 = vpack.c.bf16 %v2155_v49, %v8590_v27  ;;  %v2261_v27 = vld [vmem:[%s11786_s6 + $0x18] sm:$0xff]  ;;  %2285 = vperm.xlu0 %6978, %v2262_v7   ;;  %v2258_v31 = vld [vmem:[%s11786_s6] sm:$0xff] }
 0x222   : > { %2280 = vperm.xlu1 %6979, %v2261_v27  }
 0x224   : > { %5818 = vmatpush.bf16.msk.msra.mxu0 %vm8949_vm12, %v5817_v18 }
 0x227   : > { %5819 = vmatmul.msk.bf16.vlgmr.msra.gmra.mxu0 %vm12237_vm1, %v8957_v6 }
 0x228   : > { %v2001_v37 = vpop.f32.mrf.mxu2  ;;  %v2014_v41 = vpop.f32.mrf.mxu3 }
 0x229   : > { %v8971_v43 = vmax.f32 %v2001_v37, 0.0  ;;  %v8973_v44 = vmax.f32 %v2014_v41, 0.0  ;;  %2275 = vperm.xlu0 %6978, %v2260_v10   ;;  %v5829_v41 = vpack.c.bf16 %v2207_v56, %v8682_v28  ;;  %v2249_v28 = vld [vmem:[%s11785_s5 + $0x50] sm:$0xf]  ;;  %v2259_v56 = vld [vmem:[%s11786_s6 + $0x8] sm:$0xff] }
 0x22a   : > { %2265 = vperm.xlu1 %6979, %v2258_v31   ;;  %v2297_v32 = vunpack.c.l.b16 %v2249_v28  ;;  %2270 = vperm.xlu2 %6980, %v2259_v56  }
 0x22b   : > { %12860 = vst [vmem:[#allocation138_spill] sm:$0xff] %v8971_v43  ;;  %v2024_v47 = vsel %vm12862_vm7, %v8971_v43, 0.0  ;;  %v2025_v51 = vsel %vm12855_vm3, %v8973_v44, 0.0  ;;  %vm12866_vm7 = vcmask 326656   ;;  %v382_v43 = vld [vmem:[%s9020_s14 + $0x88] sm:$0xff] }
 0x22c   : > { %12861 = vst [vmem:[#allocation139_spill] sm:$0xff] %v8973_v44  ;;  %v2256_v60 = vpack.c.bf16 %v2024_v47, %v2024_v47  ;;  %v2257_v49 = vpack.c.bf16 %v2025_v51, %v2025_v51  ;;  %v8989_v47 = vld [vmem:[%s11785_s5 + $0x48] sm:$0xff] }
 0x22e   : > { %v2318_v42 = vsel %vm12863_vm4, %v2256_v60, 0  ;;  %v2321_v16 = vsel %vm12864_vm14, %v2257_v49, 0  ;;  %v9003_v49 = vpack.c.b16 %v2297_v32, %v2297_v32  ;;  %vm12865_vm14 = vmmov %vm12855_vm3 }
 0x22f   : > { %2375 = vmatpush.bf16.msra.mxu2 %v2318_v42  ;;  %2398 = vmatpush.bf16.msra.mxu3 %v2321_v16  ;;  %vm12867_vm4 = vmmov %vm12866_vm7 }
 0x230   : > { %v2003_v18 = vpop.f32.mrf.mxu2  ;;  %v2016_v37 = vpop.f32.mrf.mxu3 }
 0x233   : > { %5830 = vmatpush.bf16.msk.msra.mxu2 %vm8949_vm12, %v5829_v41  ;;  %v7124_v41 = vmov 1  }
 0x234   : > { %6983 = vset.pattern.permute.xlu1 %v7124_v41  ;;  %6981 = vset.pattern.permute.xlu2 %v7124_v41 }
 0x235   : > { %2465 = vperm.xlu1 %6983, %v2261_v27   ;;  %2469 = vperm.xlu2 %6981, %v2262_v7   ;;  %v395_v27 = vld [vmem:[%s9020_s14 + $0xf0] sm:$0xff] }
 0x236   : > { %5831 = vmatmul.msk.bf16.vlgmr.msra.gmra.mxu2 %vm12237_vm1, %v8957_v6  ;;  %6982 = vset.pattern.permute.xlu0 %v7124_v41  ;;  %v391_v41 = vld [vmem:[%s9020_s14 + $0xd0] sm:$0xff] }
 0x237   : > { %5820 = vmatmul.msk.bf16.gmra.mxu0 %vm12237_vm1, %v8989_v47  ;;  %2461 = vperm.xlu0 %6982, %v2260_v10  }
 0x23d   : > { %2457 = vperm.xlu1 %6983, %v2259_v56   ;;  %2453 = vperm.xlu2 %6981, %v2258_v31   ;;  %v379_v56 = vld [vmem:[%s9020_s14 + $0x70] sm:$0xff] }
 0x242   : > { %v2063_v51 = vpop.f32.mrf.mxu2  ;;  %v2076_v60 = vpop.f32.mrf.mxu3 }
 0x243   : > { %v2077_v63 = vadd.f32 %v2076_v60, %v2063_v51  ;;  %v377_v51 = vld [vmem:[%s9020_s14 + $0x60] sm:$0xff]  ;;  %v394_v60 = vld [vmem:[%s9020_s14 + $0xe8] sm:$0xff] }
 0x245   : > { %6985 = vset.pattern.permute.xlu1 %v7123_v36  ;;  %6984 = vset.pattern.permute.xlu2 %v7123_v36 }
 0x246   : > { %5832 = vmatmul.msk.bf16.gmra.mxu2 %vm12237_vm1, %v8989_v47  ;;  %1204 = vperm.xlu1 %6985, %v395_v27  }
 0x247   : > { %5821 = vmatmul.msk.bf16.gmra.mxu0 %vm12237_vm1, %v9003_v49  ;;  %1156 = vperm.xlu2 %6984, %v379_v56   ;;  %v375_v56 = vld [vmem:[%s9020_s14 + $0x50] sm:$0xff] }
 0x24a   : > { %v2065_v42 = vpop.f32.mrf.mxu2  ;;  %v2078_v16 = vpop.f32.mrf.mxu3 }
 0x24e   : > { %1150 = vperm.xlu1 %6985, %v377_v51   ;;  %v396_v51 = vld [vmem:[%s9020_s14 + $0xf8] sm:$0xff] }
 0x24f   : > { %1207 = vperm.xlu2 %6984, %v396_v51   ;;  %v427_v51 = vld [vmem:[%s9020_s14 + $0x1f0] sm:$0xff] }
 0x256   : > { %5833 = vmatmul.msk.bf16.gmra.mxu2 %vm12237_vm1, %v9003_v49  ;;  %1201 = vperm.xlu1 %6985, %v394_v60   ;;  %v378_v60 = vld [vmem:[%s9020_s14 + $0x68] sm:$0xff] }
 0x257   : > { %1153 = vperm.xlu2 %6984, %v378_v60  }
 0x25e   : > { %1192 = vperm.xlu1 %6985, %v391_v41   ;;  %v390_v41 = vld [vmem:[%s9020_s14 + $0xc8] sm:$0xff] }
 0x25f   : > { %1144 = vperm.xlu2 %6984, %v375_v56  }
 0x262   : > { %v2115_v18 = vpop.f32.mrf.mxu2  ;;  %v2128_v37 = vpop.f32.mrf.mxu3 }
 0x26a   : > { %v2117_v28 = vpop.f32.mrf.mxu2  ;;  %v2130_v32 = vpop.f32.mrf.mxu3 }
 0x282   : > { %v2167_v42 = vpop.f32.mrf.mxu2  ;;  %v2180_v16 = vpop.f32.mrf.mxu3 }
 0x283   : > { %v2181_v26 = vadd.f32 %v2180_v16, %v2167_v42  ;;  %v380_v42 = vld [vmem:[%s9020_s14 + $0x78] sm:$0xff]  ;;  %v2129_v16 = vadd.f32 %v2128_v37, %v2115_v18  ;;  %v393_v37 = vld [vmem:[%s9020_s14 + $0xe0] sm:$0xff] }
 0x284   : > { %v412_v18 = vld [vmem:[%s9020_s14 + $0x178] sm:$0xff] }
 0x285   : > { %v5823_v7 = vpack.c.bf16 %v2181_v26, %v2077_v63  ;;  %v2631_v26 = vld [vmem:[%s11786_s6] sm:$0xf]  ;;  %v7125_v63 = vmov 2   ;;  %1255 = vperm.xlu1 %6985, %v412_v18   ;;  %v372_v18 = vld [vmem:[%s9020_s14 + $0x38] sm:$0xff] }
 0x286   : > { %6986 = vset.pattern.permute.xlu0 %v7125_v63 }
 0x287   : > { %5824 = vmatpush.bf16.msk.msra.mxu1 %vm8949_vm12, %v5823_v7  ;;  %2634 = vperm.xlu0 %6986, %v2631_v26   ;;  %v373_v26 = vld [vmem:[%s9020_s14 + $0x40] sm:$0xff] }
 0x28a   : > { %v2169_v10 = vpop.f32.mrf.mxu2  ;;  %v2182_v31 = vpop.f32.mrf.mxu3  ;;  %5825 = vmatmul.msk.bf16.vlgmr.msra.gmra.mxu1 %vm12237_vm1, %v8957_v6 }
 0x28d   : > { %1138 = vperm.xlu1 %6985, %v373_v26  }
 0x28f   : > { %6987 = vset.pattern.permute.xlu0 %v7123_v36 }
 0x290   : > { %1159 = vperm.xlu0 %6987, %v380_v42  }
 0x293   : > { %v9055_v42 = vpop.permute.xlu0 %2285 }
 0x295   : > { %1189 = vperm.xlu1 %6985, %v390_v41  }
 0x298   : > { %1198 = vperm.xlu0 %6987, %v393_v37   ;;  %v389_v37 = vld [vmem:[%s9020_s14 + $0xc0] sm:$0xff] }
 0x29a   : > { %5826 = vmatmul.msk.bf16.gmra.mxu1 %vm12237_vm1, %v8989_v47 }
 0x29b   : > { %v9067_v60 = vpop.permute.xlu0 %2275 }
 0x2a2   : > { %v2219_v28 = vpop.f32.mrf.mxu2  ;;  %v2232_v32 = vpop.f32.mrf.mxu3 }
 0x2a3   : > { %v2233_v7 = vadd.f32 %v2232_v32, %v2219_v28  ;;  %v411_v28 = vld [vmem:[%s9020_s14 + $0x170] sm:$0xff] }
 0x2a4   : > { %v2332_v36 = vpop.f32.mrf.mxu0 }
 0x2a5   : > { %v5835_v27 = vpack.c.bf16 %v2233_v7, %v2129_v16  ;;  %v392_v16 = vld [vmem:[%s9020_s14 + $0xd8] sm:$0xff]  ;;  %v425_v7 = vld [vmem:[%s9020_s14 + $0x1e0] sm:$0xff] }
 0x2a6   : > { %1195 = vperm.xlu2 %6984, %v392_v16   ;;  %1294 = vperm.xlu1 %6985, %v425_v7  }
 0x2a7   : > { %5836 = vmatpush.bf16.msk.msra.mxu3 %vm8949_vm12, %v5835_v27  ;;  %v428_v27 = vld [vmem:[%s9020_s14 + $0x1f8] sm:$0xff] }
 0x2aa   : > { %v2221_v10 = vpop.f32.mrf.mxu2  ;;  %v2234_v31 = vpop.f32.mrf.mxu3  ;;  %5837 = vmatmul.msk.bf16.vlgmr.msra.gmra.mxu3 %vm12237_vm1, %v8957_v6  ;;  %5827 = vmatmul.msk.bf16.gmra.mxu1 %vm12237_vm1, %v9003_v49  ;;  %v376_v6 = vld [vmem:[%s9020_s14 + $0x58] sm:$0xff] }
 0x2ab   : > { %1147 = vperm.xlu0 %6987, %v376_v6   ;;  %v9060_v31 = vpop.permute.xlu1 %2280 }
 0x2ac   : > { %v2334_v63 = vpop.f32.mrf.mxu0 }
 0x2ae   : > { %1300 = vperm.xlu2 %6984, %v427_v51   ;;  %1135 = vperm.xlu1 %6985, %v372_v18  }
 0x2b3   : > { %1252 = vperm.xlu0 %6987, %v411_v28   ;;  %v9074_v16 = vpop.permute.xlu1 %2265 }
 0x2b4   : > { %v2337_v32 = vpop.f32.mrf.mxu0  ;;  %v2333_v18 = vadd.f32 %v2332_v36, %v9074_v16  ;;  %v424_v36 = vld [vmem:[%s9020_s14 + $0x1d8] sm:$0xff] }
 0x2b5   : > { %v2338_v41 = vadd.f32 %v2337_v32, %v9067_v60 }
 0x2b6   : > { %1240 = vperm.xlu1 %6985, %v407_v15   ;;  %v2415_v44 = vmax.f32 %v2333_v18, 0.0  ;;  %v426_v15 = vld [vmem:[%s9020_s14 + $0x1e8] sm:$0xff] }
 0x2b9   : > { %v2378_v10 = vpop.f32.mrf.mxu2 }
 0x2ba   : > { %5838 = vmatmul.msk.bf16.gmra.mxu3 %vm12237_vm1, %v8989_v47 }
 0x2bb   : > { %1303 = vperm.xlu0 %6987, %v428_v27   ;;  %v374_v27 = vld [vmem:[%s9020_s14 + $0x48] sm:$0xff] }
 0x2bc   : > { %v2339_v47 = vpop.f32.mrf.mxu0  ;;  %1141 = vperm.xlu2 %6984, %v374_v27  }
 0x2bd   : > { %v2340_v56 = vadd.f32 %v2339_v47, %v9060_v31  ;;  %v2423_v47 = vmax.f32 %v2338_v41, 0.0  ;;  %v385_v41 = vld [vmem:[%s9020_s14 + $0xa0] sm:$0xff] }
 0x2be   : > { %1291 = vperm.xlu1 %6985, %v424_v36  }
 0x2c1   : > { %v2380_v26 = vpop.f32.mrf.mxu2 }
 0x2c3   : > { %1186 = vperm.xlu0 %6987, %v389_v37   ;;  %v2427_v37 = vmax.f32 %v2340_v56, 0.0 }
 0x2c4   : > { %v2342_v6 = vpop.f32.mrf.mxu0  ;;  %1246 = vperm.xlu2 %6984, %v409_v14  }
 0x2c5   : > { %v2343_v28 = vadd.f32 %v2342_v6, %v9055_v42 }
 0x2c6   : > { %1174 = vperm.xlu1 %6985, %v385_v41  }
 0x2c7   : > { %v2431_v7 = vmax.f32 %v2343_v28, 0.0  ;;  %v2444_v28 = vpack.c.bf16 %v2427_v37, %v2423_v47  ;;  %v2379_v47 = vadd.f32 %v2378_v10, %v9074_v16  ;;  %v9111_v10 = vld [vmem:[%s11785_s5 + $0x60] sm:$0xff] }
 0x2c9   : > { %v2448_v32 = vpack.c.bf16 %v2431_v7, %v2431_v7  ;;  %v2383_v6 = vpop.f32.mrf.mxu2  ;;  %v388_v7 = vld [vmem:[%s9020_s14 + $0xb8] sm:$0xff] }
 0x2ca   : > { %5839 = vmatmul.msk.bf16.gmra.mxu3 %vm12237_vm1, %v9003_v49  ;;  %v9072_v49 = vpop.permute.xlu2 %2270  ;;  %v2384_v14 = vadd.f32 %v2383_v6, %v9067_v60 }
 0x2cb   : > { %v2335_v51 = vadd.f32 %v2334_v63, %v9072_v49  ;;  %1249 = vperm.xlu0 %6987, %v410_v24   ;;  %v2495_v20 = vsel %vm12865_vm14, %v2448_v32, 0  ;;  %v2381_v18 = vadd.f32 %v2380_v26, %v9072_v49  ;;  %vm12868_vm14 = vmmov %vm12867_vm4 }
 0x2cc   : > { %2511 = vmatpush.bf16.msrb.mxu0 %v2495_v20  ;;  %v2344_v63 = vpop.f32.mrf.mxu0  ;;  %v9088_v20 = vld [vmem:[%s11785_s5 + $0x58] sm:$0xff]  ;;  %1297 = vperm.xlu2 %6984, %v426_v15   ;;  %v2417_v15 = vmax.f32 %v2379_v47, 0.0 }
 0x2cd   : > { %v2419_v39 = vmax.f32 %v2335_v51, 0.0  ;;  %v2425_v51 = vmax.f32 %v2384_v14, 0.0  ;;  %v406_v63 = vld [vmem:[%s9020_s14 + $0x148] sm:$0xff]  ;;  %v2421_v41 = vmax.f32 %v2381_v18, 0.0 }
 0x2ce   : > { %1237 = vperm.xlu1 %6985, %v406_v63   ;;  %v2439_v18 = vld [vmem:[%s11785_s5 + $0x68] sm:$0xf] }
 0x2cf   : > { %v2440_v56 = vpack.c.bf16 %v2419_v39, %v2415_v44  ;;  %v2442_v14 = vpack.c.bf16 %v2421_v41, %v2417_v15  ;;  %v2481_v47 = vunpack.c.l.b16 %v2439_v18  ;;  %v9147_v18 = vpop.permute.xlu0 %2461 }
 0x2d0   : > { %2512 = vmatpush.bf16.msrb.mxu0 %v2444_v28  ;;  %v387_v28 = vld [vmem:[%s9020_s14 + $0xb0] sm:$0xff] }
 0x2d1   : > { %v2385_v24 = vpop.f32.mrf.mxu2 }
 0x2d2   : > { %v9103_v36 = vpop.permute.xlu2 %2469 }
 0x2d3   : > { %1132 = vperm.xlu0 %6987, %v371_v30   ;;  %v2386_v30 = vadd.f32 %v2385_v24, %v9060_v31  ;;  %v423_v24 = vld [vmem:[%s9020_s14 + $0x1d0] sm:$0xff] }
 0x2d4   : > { %2513 = vmatpush.bf16.msrb.mxu0 %v2440_v56  ;;  %1180 = vperm.xlu2 %6984, %v387_v28   ;;  %v9105_v56 = vpop.permute.xlu1 %2465 }
 0x2d5   : > { %v2429_v37 = vmax.f32 %v2386_v30, 0.0  ;;  %v408_v30 = vld [vmem:[%s9020_s14 + $0x158] sm:$0xff] }
 0x2d7   : > { %5848 = vmatmul.msk.bf16.vlgmr.msrb.gmra.mxu0 %vm12866_vm7, %v9088_v20  ;;  %v2446_v26 = vpack.c.bf16 %v2429_v37, %v2425_v51  ;;  %v370_v51 = vld [vmem:[%s9020_s14 + $0x28] sm:$0xff]  ;;  %v369_v37 = vld [vmem:[%s9020_s14 + $0x20] sm:$0xff]  ;;  %vm12870_vm7 = vmmov %vm12867_vm4 }
 0x2d9   : > { %v2388_v39 = vpop.f32.mrf.mxu2 }
 0x2da   : > { %v2389_v44 = vadd.f32 %v2388_v39, %v9055_v42  ;;  %v367_v39 = vld [vmem:[%s9020_s14 + $0x10] sm:$0xff] }
 0x2db   : > { %1183 = vperm.xlu0 %6987, %v388_v7   ;;  %1120 = vperm.xlu1 %6985, %v367_v39  }
 0x2dc   : > { %v2433_v27 = vmax.f32 %v2389_v44, 0.0  ;;  %1243 = vperm.xlu2 %6984, %v408_v30   ;;  %v9117_v44 = vpop.permute.xlu2 %2453 }
 0x2de   : > { %v2450_v32 = vpack.c.bf16 %v2433_v27, %v2433_v27  ;;  %v9119_v27 = vpop.permute.xlu1 %2457 }
 0x2e0   : > { %v2501_v6 = vsel %vm12855_vm3, %v2450_v32, 0  ;;  %v384_v32 = vld [vmem:[%s9020_s14 + $0x98] sm:$0xff] }
 0x2e1   : > { %2557 = vmatpush.bf16.msrb.mxu2 %v2501_v6  ;;  %v2390_v7 = vpop.f32.mrf.mxu2  ;;  %v405_v6 = vld [vmem:[%s9020_s14 + $0x140] sm:$0xff] }
 0x2e2   : > { %v386_v7 = vld [vmem:[%s9020_s14 + $0xa8] sm:$0xff] }
 0x2e3   : > { %1288 = vperm.xlu0 %6987, %v423_v24   ;;  %1171 = vperm.xlu1 %6985, %v384_v32   ;;  %v9130_v24 = vpack.c.b16 %v2481_v47, %v2481_v47  ;;  %v12871_v47 = vmov 0 }
 0x2e4   : > { %1126 = vperm.xlu2 %6984, %v369_v37   ;;  %v1157_v63 = vpop.permute.xlu2 %1156 }
 0x2e5   : > { %2558 = vmatpush.bf16.msrb.mxu2 %v2446_v26  ;;  %v12869_v26 = vlaneseq }
 0x2e6   : > { %v1205_v28 = vpop.permute.xlu1 %1204 }
 0x2e7   : > { %5849 = vmatmul.msk.bf16.gmra.mxu0 %vm12867_vm4, %v9111_v10  ;;  %v9133_v15 = vand.u32 127, %v12869_v26 }
 0x2e9   : > { %2559 = vmatpush.bf16.msrb.mxu2 %v2442_v14  ;;  %v9136_v41 = vadd.s32 128, %v9133_v15  ;;  %v419_v14 = vld [vmem:[%s9020_s14 + $0x1b0] sm:$0xff]  ;;  %vm1365_vm3 = vcmp.eq.s32.totalorder %v1205_v28, %v9133_v15 }
 0x2eb   : > { %1129 = vperm.xlu0 %6987, %v370_v51   ;;  %1276 = vperm.xlu1 %6985, %v419_v14   ;;  %vm1366_vm4 = vcmp.eq.s32.totalorder %v1205_v28, %v9136_v41  ;;  %v422_v51 = vld [vmem:[%s9020_s14 + $0x1c8] sm:$0xff]  ;;  %v421_v28 = vld [vmem:[%s9020_s14 + $0x1c0] sm:$0xff] }
 0x2ec   : > { %5854 = vmatmul.msk.bf16.vlgmr.msrb.gmra.mxu2 %vm12868_vm14, %v9088_v20  ;;  %1177 = vperm.xlu2 %6984, %v386_v7   ;;  %v1208_v30 = vpop.permute.xlu2 %1207  ;;  %v383_v7 = vld [vmem:[%s9020_s14 + $0x90] sm:$0xff] }
 0x2ed   : > { %vm1367_vm14 = vcmp.eq.s32.totalorder %v1208_v30, %v9133_v15  ;;  %vm1368_vm1 = vcmp.eq.s32.totalorder %v1208_v30, %v9136_v41 }
 0x2ee   : > { %v1151_v39 = vpop.permute.xlu1 %1150  ;;  %vm9153_vm12 = vmpackc.low %vm1368_vm1, %vm1366_vm4  ;;  %vm1333_vm4 = vcmp.eq.s32.totalorder %v1157_v63, %v9133_v15 }
 0x2ef   : > { %vm1330_vm1 = vcmp.eq.s32.totalorder %v1151_v39, %v9136_v41 }
 0x2f3   : > { %1234 = vperm.xlu0 %6987, %v405_v6   ;;  %v366_v6 = vld [vmem:[%s9020_s14 + $0x8] sm:$0xff] }
 0x2f4   : > { %1282 = vperm.xlu2 %6984, %v421_v28   ;;  %1117 = vperm.xlu1 %6985, %v366_v6   ;;  %v1154_v14 = vpop.permute.xlu2 %1153  ;;  %v401_v28 = vld [vmem:[%s9020_s14 + $0x120] sm:$0xff]  ;;  %v404_v6 = vld [vmem:[%s9020_s14 + $0x138] sm:$0xff] }
 0x2f5   : > { %vm1331_vm13 = vcmp.eq.s32.totalorder %v1154_v14, %v9133_v15 }
 0x2f6   : > { %v9164_v30 = vpop.permute.xlu1 %1201 }
 0x2f7   : > { %5850 = vmatmul.msk.bf16.gmra.mxu0 %vm12870_vm7, %v9130_v24  ;;  %vm9149_vm7 = vmpackc.low %vm1367_vm14, %vm1365_vm3  ;;  %vm1332_vm3 = vcmp.eq.s32.totalorder %v1154_v14, %v9136_v41  ;;  %vm1334_vm14 = vcmp.eq.s32.totalorder %v1157_v63, %v9136_v41  ;;  %v417_v63 = vld [vmem:[%s9020_s14 + $0x1a0] sm:$0xff] }
 0x2f8   : > { %v12872_v47 = vsel %vm9149_vm7, 4294967295, %v12871_v47 }
 0x2f9   : > { %12873 = vst [vmem:[#allocation140_spill] sm:$0xff] %v12872_v47 }
 0x2fb   : > { %1285 = vperm.xlu0 %6987, %v422_v51   ;;  %v9168_v51 = vpop.permute.xlu0 %2634 }
 0x2fc   : > { %5855 = vmatmul.msk.bf16.gmra.mxu2 %vm12876_vm2, %v9111_v10  ;;  %vm9172_vm2 = vmpackc.low %vm1332_vm3, %vm1330_vm1  ;;  %1123 = vperm.xlu2 %6984, %v368_v25   ;;  %v1145_v5 = vpop.permute.xlu2 %1144  ;;  %vm12880_vm1 = vcmask 326656   ;;  %vm1329_vm3 = vcmp.eq.s32.totalorder %v1151_v39, %v9133_v15  ;;  %v12887_v39 = vmov 0 }
 0x2fd   : > { %v12878_v12 = vsel %vm9172_vm2, 4294967295, %v12877_v12  ;;  %1222 = vperm.xlu1 %6985, %v401_v28   ;;  %v12881_v28 = vmov 0 }
 0x2fe   : > { %12879 = vst [vmem:[#allocation141_spill] sm:$0xff] %v12878_v12 }
 0x303   : > { %1168 = vperm.xlu0 %6987, %v383_v7   ;;  %v1193_v7 = vpop.permute.xlu1 %1192  ;;  %v1160_v21 = vpop.permute.xlu0 %1159 }
 0x304   : > { %vm1335_vm15 = vcmp.eq.s32.totalorder %v1160_v21, %v9133_v15  ;;  %vm1336_vm6 = vcmp.eq.s32.totalorder %v1160_v21, %v9136_v41  ;;  %v365_v21 = vld [vmem:[%s9020_s14] sm:$0xff]  ;;  %v1196_v19 = vpop.permute.xlu2 %1195 }
 0x305   : > { %vm9187_vm8 = vmpackc.low %vm1335_vm15, %vm1333_vm4  ;;  %1270 = vperm.xlu1 %6985, %v417_v63   ;;  %vm1357_vm15 = vcmp.eq.s32.totalorder %v1193_v7, %v9133_v15  ;;  %vm1360_vm4 = vcmp.eq.s32.totalorder %v1196_v19, %v9136_v41  ;;  %v12890_v63 = vmov 0 }
 0x306   : > { %v12882_v28 = vsel %vm9187_vm8, 4294967295, %v12881_v28  ;;  %vm9193_vm5 = vmpackc.low %vm1336_vm6, %vm1334_vm14  ;;  %5865 = vmatpush.bf16.msk.msra.mxu2 %vm9187_vm8, %v12557_v54  ;;  %vm1358_vm6 = vcmp.eq.s32.totalorder %v1193_v7, %v9136_v41  ;;  %vm1364_vm14 = vcmp.eq.s32.totalorder %v9164_v30, %v9136_v41  ;;  %v420_v7 = vld [vmem:[%s9020_s14 + $0x1b8] sm:$0xff] }
 0x307   : > { %v9159_v32 = vpop.f32.mrf.mxu1  ;;  %12883 = vst [vmem:[#allocation142_spill] sm:$0xff] %v12882_v28  ;;  %v12885_v3 = vsel %vm9193_vm5, 4294967295, %v12884_v3  ;;  %v12893_v28 = vmov 0 }
 0x308   : > { %12886 = vst [vmem:[#allocation143_spill] sm:$0xff] %v12885_v3  ;;  %v2356_v17 = vadd.f32 %v9159_v32, %v9074_v16  ;;  %v402_v32 = vld [vmem:[%s9020_s14 + $0x128] sm:$0xff]  ;;  %v13004_v3 = vmov 0 }
 0x30b   : > { %1231 = vperm.xlu0 %6987, %v404_v6   ;;  %v403_v6 = vld [vmem:[%s9020_s14 + $0x130] sm:$0xff]  ;;  %v9206_v14 = vpop.permute.xlu1 %1255 }
 0x30c   : > { %5856 = vmatmul.msk.bf16.gmra.mxu2 %vm12880_vm1, %v9130_v24  ;;  %vm9200_vm1 = vmpackc.low %vm1331_vm13, %vm1329_vm3  ;;  %1228 = vperm.xlu2 %6984, %v403_v6   ;;  %vm1359_vm13 = vcmp.eq.s32.totalorder %v1196_v19, %v9133_v15  ;;  %v9214_v6 = vpop.permute.xlu0 %1198  ;;  %v12895_v19 = vmov 0  ;;  %v9235_v1 = vpop.permute.xlu2 %1300  ;;  %vm1400_vm0 = vcmp.eq.s32.totalorder %v9206_v14, %v9136_v41 }
 0x30d   : > { %v12888_v39 = vsel %vm9200_vm1, 4294967295, %v12887_v39  ;;  %5867 = vmatpush.bf16.msk.msra.mxu2 %vm9200_vm1, %v12557_v54  ;;  %vm9218_vm3 = vmpackc.low %vm1359_vm13, %vm1357_vm15  ;;  %vm1362_vm8 = vcmp.eq.s32.totalorder %v9214_v6, %v9136_v41  ;;  %vm1325_vm15 = vcmp.eq.s32.totalorder %v1145_v5, %v9133_v15  ;;  %vm1326_vm13 = vcmp.eq.s32.totalorder %v1145_v5, %v9136_v41 }
 0x30e   : > { %12889 = vst [vmem:[#allocation144_spill] sm:$0xff] %v12888_v39  ;;  %v12891_v63 = vsel %vm9218_vm3, 4294967295, %v12890_v63  ;;  %vm9226_vm1 = vmpackc.low %vm1360_vm4, %vm1358_vm6  ;;  %v12900_v5 = vmov 0 }
 0x30f   : > { %v9170_v26 = vpop.f32.mrf.mxu1  ;;  %12892 = vst [vmem:[#allocation145_spill] sm:$0xff] %v12891_v63  ;;  %v12894_v28 = vsel %vm9226_vm1, 4294967295, %v12893_v28  ;;  %vm9230_vm9 = vmpackc.low %vm1364_vm14, %vm1362_vm8 }
 0x310   : > { %v12896_v19 = vsel %vm9230_vm9, 4294967295, %v12895_v19 }
 0x313   : > { %1114 = vperm.xlu0 %6987, %v365_v21   ;;  %v399_v21 = vld [vmem:[%s9020_s14 + $0x110] sm:$0xff]  ;;  %v1139_v38 = vpop.permute.xlu1 %1138 }
 0x314   : > { %1279 = vperm.xlu2 %6984, %v420_v7   ;;  %1216 = vperm.xlu1 %6985, %v399_v21  }
 0x316   : > { %v1142_v53 = vpop.permute.xlu2 %1141 }
 0x317   : > { %v2360_v25 = vpop.f32.mrf.mxu1  ;;  %vm1324_vm11 = vcmp.eq.s32.totalorder %v1142_v53, %v9136_v41 }
 0x318   : > { %v2361_v4 = vadd.f32 %v2360_v25, %v9067_v60 }
 0x31b   : > { %1165 = vperm.xlu0 %6987, %v382_v43   ;;  %v9259_v34 = vpop.permute.xlu1 %1189 }
 0x31c   : > { %1162 = vperm.xlu2 %6984, %v381_v40   ;;  %1267 = vperm.xlu1 %6985, %v416_v8  }
 0x31d   : > { %v1148_v13 = vpop.permute.xlu0 %1147 }
 0x31e   : > { %vm1327_vm6 = vcmp.eq.s32.totalorder %v1148_v13, %v9133_v15  ;;  %vm1328_vm4 = vcmp.eq.s32.totalorder %v1148_v13, %v9136_v41 }
 0x31f   : > { %v2362_v39 = vpop.f32.mrf.mxu1  ;;  %vm9245_vm8 = vmpackc.low %vm1327_vm6, %vm1325_vm15  ;;  %vm1321_vm15 = vcmp.eq.s32.totalorder %v1139_v38, %v9133_v15 }
 0x320   : > { %v2363_v7 = vadd.f32 %v2362_v39, %v9060_v31  ;;  %v12898_v2 = vsel %vm9245_vm8, 4294967295, %v12897_v2  ;;  %vm9250_vm14 = vmpackc.low %vm1328_vm4, %vm1326_vm13  ;;  %5869 = vmatpush.bf16.msk.msra.mxu2 %vm9245_vm8, %v12557_v54  ;;  %v2424_v39 = vmax.f32 %v2361_v4, 0.0  ;;  %vm12902_vm13 = vcmask 1043456  }
 0x321   : > { %12899 = vst [vmem:[#allocation146_spill] sm:$0xff] %v12898_v2  ;;  %v12901_v5 = vsel %vm9250_vm14, 4294967295, %v12900_v5  ;;  %v2358_v2 = vadd.f32 %v9170_v26, %v9072_v49  ;;  %vm1323_vm8 = vcmp.eq.s32.totalorder %v1142_v53, %v9133_v15  ;;  %v12903_v26 = vmov 0 }
 0x322   : > { %v2428_v11 = vmax.f32 %v2363_v7, 0.0  ;;  %vm9276_vm10 = vmpackc.low %vm1323_vm8, %vm1321_vm15  ;;  %vm12906_vm4 = vcmp.eq.s32.totalorder %v1139_v38, %v9136_v41  ;;  %vm12909_vm8 = vcmp.eq.s32.totalorder %v9206_v14, %v9133_v15 }
 0x323   : > { %v12904_v26 = vsel %vm9276_vm10, 4294967295, %v12903_v26  ;;  %vm9284_vm1 = vmpackc.low %vm1324_vm11, %vm12906_vm4  ;;  %v1295_v38 = vpop.permute.xlu1 %1294  ;;  %vm1429_vm4 = vcmp.eq.s32.totalorder %v9235_v1, %v9133_v15 }
 0x324   : > { %v2445_v4 = vpack.c.bf16 %v2428_v11, %v2424_v39  ;;  %12905 = vst [vmem:[#allocation147_spill] sm:$0xff] %v12904_v26  ;;  %v2416_v11 = vmax.f32 %v2356_v17, 0.0  ;;  %v12907_v39 = vmov 0  ;;  %1225 = vperm.xlu2 %6984, %v402_v32   ;;  %5871 = vmatpush.bf16.msk.msra.mxu2 %vm9276_vm10, %v12557_v54  ;;  %v12912_v17 = vmov 0 }
 0x325   : > { %v1253_v40 = vpop.permute.xlu0 %1252  ;;  %v12908_v39 = vsel %vm9284_vm1, 4294967295, %v12907_v39  ;;  %v12917_v32 = vmov 0  ;;  %vm12920_vm10 = vcmask 326656   ;;  %vm1426_vm1 = vcmp.eq.s32.totalorder %v1295_v38, %v9136_v41 }
 0x326   : > { %vm1398_vm6 = vcmp.eq.s32.totalorder %v1253_v40, %v9136_v41 }
 0x327   : > { %v2365_v21 = vpop.f32.mrf.mxu1  ;;  %vm9300_vm11 = vmpackc.low %vm1400_vm0, %vm1398_vm6 }
 0x328   : > { %v2366_v43 = vadd.f32 %v2365_v21, %v9055_v42  ;;  %v12913_v17 = vsel %vm9300_vm11, 4294967295, %v12912_v17  ;;  %vm1425_vm11 = vcmp.eq.s32.totalorder %v1295_v38, %v9133_v15  ;;  %v414_v38 = vld [vmem:[%s9020_s14 + $0x188] sm:$0xff] }
 0x329   : > { %12914 = vst [vmem:[#allocation148_spill] sm:$0xff] %v12913_v17 }
 0x32a   : > { %v2432_v13 = vmax.f32 %v2366_v43, 0.0  ;;  %v398_v43 = vld [vmem:[%s9020_s14 + $0x108] sm:$0xff] }
 0x32b   : > { %1213 = vperm.xlu1 %6985, %v398_v43  }
 0x32c   : > { %v2449_v21 = vpack.c.bf16 %v2432_v13, %v2432_v13  ;;  %v2420_v13 = vmax.f32 %v2358_v2, 0.0  ;;  %v1247_v2 = vpop.permute.xlu2 %1246 }
 0x32d   : > { %v9257_v25 = vpop.f32.mrf.mxu3  ;;  %v1304_v14 = vpop.permute.xlu0 %1303 }
 0x32e   : > { %v2498_v8 = vsel %vm12902_vm13, %v2449_v21, 0  ;;  %vm1397_vm13 = vcmp.eq.s32.totalorder %v1253_v40, %v9133_v15  ;;  %v12910_v21 = vmov 0  ;;  %v2441_v40 = vpack.c.bf16 %v2420_v13, %v2416_v11  ;;  %v1136_v11 = vpop.permute.xlu1 %1135 }
 0x32f   : > { %2534 = vmatpush.bf16.msrb.mxu1 %v2498_v8  ;;  %v2367_v7 = vpop.f32.mrf.mxu1  ;;  %vm9293_vm15 = vmpackc.low %vm12909_vm8, %vm1397_vm13  ;;  %vm1430_vm13 = vcmp.eq.s32.totalorder %v9235_v1, %v9136_v41  ;;  %vm1431_vm8 = vcmp.eq.s32.totalorder %v1304_v14, %v9133_v15  ;;  %v415_v8 = vld [vmem:[%s9020_s14 + $0x190] sm:$0xff]  ;;  %v12921_v13 = vmov 0 }
 0x330   : > { %v12911_v21 = vsel %vm9293_vm15, 4294967295, %v12910_v21  ;;  %vm1432_vm15 = vcmp.eq.s32.totalorder %v1304_v14, %v9136_v41  ;;  %vm9312_vm0 = vmpackc.low %vm1431_vm8, %vm1429_vm4  ;;  %v12915_v7 = vmov 0  ;;  %1264 = vperm.xlu0 %6987, %v415_v8   ;;  %v12923_v14 = vmov 0  ;;  %v400_v8 = vld [vmem:[%s9020_s14 + $0x118] sm:$0xff] }
 0x331   : > { %v12916_v7 = vsel %vm9312_vm0, 4294967295, %v12915_v7  ;;  %vm9316_vm6 = vmpackc.low %vm1432_vm15, %vm1430_vm13  ;;  %vm1356_vm15 = vcmp.eq.s32.totalorder %v9259_v34, %v9136_v41 }
 0x332   : > { %v12918_v32 = vsel %vm9316_vm6, 4294967295, %v12917_v32 }
 0x333   : > { %2535 = vmatpush.bf16.msrb.mxu1 %v2445_v4  ;;  %v418_v4 = vld [vmem:[%s9020_s14 + $0x1a8] sm:$0xff]  ;;  %12919 = vst [vmem:[#allocation149_spill] sm:$0xff] %v12918_v32 }
 0x334   : > { %1273 = vperm.xlu2 %6984, %v418_v4   ;;  %v1298_v43 = vpop.permute.xlu2 %1297  ;;  %v12926_v4 = vmov 0 }
 0x335   : > { %v9288_v53 = vpop.f32.mrf.mxu3  ;;  %vm1427_vm4 = vcmp.eq.s32.totalorder %v1298_v43, %v9133_v15  ;;  %vm1428_vm8 = vcmp.eq.s32.totalorder %v1298_v43, %v9136_v41 }
 0x336   : > { %vm9328_vm13 = vmpackc.low %vm1427_vm4, %vm1425_vm11  ;;  %v1241_v59 = vpop.permute.xlu1 %1240  ;;  %vm1394_vm11 = vcmp.eq.s32.totalorder %v1247_v2, %v9136_v41 }
 0x337   : > { %2536 = vmatpush.bf16.msrb.mxu1 %v2441_v40  ;;  %v12922_v13 = vsel %vm9328_vm13, 4294967295, %v12921_v13  ;;  %v9332_v40 = vpop.permute.xlu0 %1186  ;;  %vm1389_vm13 = vcmp.eq.s32.totalorder %v1241_v59, %v9133_v15 }
 0x338   : > { %vm1354_vm6 = vcmp.eq.s32.totalorder %v9332_v40, %v9136_v41  ;;  %1261 = vperm.xlu0 %6987, %v414_v38   ;;  %v12930_v38 = vmov 0 }
 0x339   : > { %vm9342_vm0 = vmpackc.low %vm1356_vm15, %vm1354_vm6  ;;  %vm12933_vm15 = vcmask 326656  }
 0x33a   : > { %5851 = vmatmul.msk.bf16.vlgmr.msrb.gmra.mxu1 %vm12920_vm10, %v9088_v20  ;;  %vm9334_vm10 = vmpackc.low %vm1428_vm8, %vm1426_vm1  ;;  %v12927_v4 = vsel %vm9342_vm0, 4294967295, %v12926_v4  ;;  %vm1393_vm1 = vcmp.eq.s32.totalorder %v1247_v2, %v9133_v15  ;;  %vm1390_vm0 = vcmp.eq.s32.totalorder %v1241_v59, %v9136_v41 }
 0x33b   : > { %v12924_v14 = vsel %vm9334_vm10, 4294967295, %v12923_v14 }
 0x33c   : > { %12925 = vst [vmem:[#allocation150_spill] sm:$0xff] %v12924_v14  ;;  %1219 = vperm.xlu2 %6984, %v400_v8   ;;  %v9346_v26 = vpop.permute.xlu2 %1180 }
 0x33d   : > { %v2406_v1 = vpop.f32.mrf.mxu3 }
 0x33e   : > { %v1292_v62 = vpop.permute.xlu1 %1291  ;;  %v2407_v59 = vadd.f32 %v2406_v1, %v9067_v60  ;;  %v2402_v1 = vadd.f32 %v9257_v25, %v9074_v16  ;;  %v12945_v16 = vmov 0 }
 0x33f   : > { %v1250_v55 = vpop.permute.xlu0 %1249 }
 0x340   : > { %vm1395_vm4 = vcmp.eq.s32.totalorder %v1250_v55, %v9133_v15  ;;  %vm1396_vm8 = vcmp.eq.s32.totalorder %v1250_v55, %v9136_v41 }
 0x341   : > { %vm9352_vm10 = vmpackc.low %vm1395_vm4, %vm1393_vm1  ;;  %vm1319_vm1 = vcmp.eq.s32.totalorder %v1136_v11, %v9133_v15 }
 0x342   : > { %v12929_v9 = vsel %vm9352_vm10, 4294967295, %v12928_v9  ;;  %vm9357_vm6 = vmpackc.low %vm1396_vm8, %vm1394_vm11  ;;  %vm1320_vm8 = vcmp.eq.s32.totalorder %v1136_v11, %v9136_v41  ;;  %v2404_v11 = vadd.f32 %v9288_v53, %v9072_v49 }
 0x343   : > { %v12931_v38 = vsel %vm9357_vm6, 4294967295, %v12930_v38 }
 0x344   : > { %12932 = vst [vmem:[#allocation151_spill] sm:$0xff] %v12931_v38  ;;  %1210 = vperm.xlu2 %6984, %v397_v48   ;;  %v1244_v55 = vpop.permute.xlu2 %1243 }
 0x345   : > { %v2408_v43 = vpop.f32.mrf.mxu3  ;;  %vm1391_vm11 = vcmp.eq.s32.totalorder %v1244_v55, %v9133_v15  ;;  %vm1392_vm4 = vcmp.eq.s32.totalorder %v1244_v55, %v9136_v41  ;;  %v12942_v55 = vmov 0 }
 0x346   : > { %v2409_v58 = vadd.f32 %v2408_v43, %v9060_v31  ;;  %vm9376_vm6 = vmpackc.low %vm1392_vm4, %vm1390_vm0  ;;  %v12939_v43 = vmov 0  ;;  %vm12944_vm0 = vcmask 1043456   ;;  %v1175_v0 = vpop.permute.xlu1 %1174  ;;  %vm1361_vm4 = vcmp.eq.s32.totalorder %v9214_v6, %v9133_v15 }
 0x347   : > { %v12951_v6 = vmov 0 }
 0x34a   : > { %5852 = vmatmul.msk.bf16.gmra.mxu1 %vm12933_vm15, %v9111_v10  ;;  %vm9371_vm15 = vmpackc.low %vm1391_vm11, %vm1389_vm13  ;;  %vm1363_vm11 = vcmp.eq.s32.totalorder %v9164_v30, %v9133_v15 }
 0x34b   : > { %v12935_v29 = vsel %vm9371_vm15, 4294967295, %v12934_v29 }
 0x34c   : > { %v9398_v49 = vpop.permute.xlu2 %1126 }
 0x34d   : > { %v2411_v8 = vpop.f32.mrf.mxu3 }
 0x34e   : > { %v2412_v2 = vadd.f32 %v2411_v8, %v9055_v42  ;;  %v1133_v42 = vpop.permute.xlu0 %1132  ;;  %v12936_v8 = vmov 0  ;;  %v1238_v25 = vpop.permute.xlu1 %1237 }
 0x34f   : > { %v12937_v8 = vsel %vm9376_vm6, 4294967295, %v12936_v8  ;;  %vm1317_vm10 = vcmp.eq.s32.totalorder %v1133_v42, %v9133_v15  ;;  %vm1318_vm9 = vcmp.eq.s32.totalorder %v1133_v42, %v9136_v41  ;;  %vm1424_vm6 = vcmp.eq.s32.totalorder %v1292_v62, %v9136_v41 }
 0x350   : > { %v2434_v48 = vmax.f32 %v2412_v2, 0.0  ;;  %12938 = vst [vmem:[#allocation152_spill] sm:$0xff] %v12937_v8  ;;  %vm9382_vm14 = vmpackc.low %vm1319_vm1, %vm1317_vm10  ;;  %v2430_v2 = vmax.f32 %v2409_v58, 0.0  ;;  %v2422_v58 = vmax.f32 %v2404_v11, 0.0  ;;  %v12953_v11 = vmov 0 }
 0x351   : > { %v12940_v43 = vsel %vm9382_vm14, 4294967295, %v12939_v43  ;;  %vm9388_vm13 = vmpackc.low %vm1320_vm8, %vm1318_vm9  ;;  %5873 = vmatpush.bf16.msk.msra.mxu2 %vm9382_vm14, %v12557_v54  ;;  %vm1350_vm9 = vcmp.eq.s32.totalorder %v9346_v26, %v9136_v41  ;;  %vm12947_vm8 = vcmask 326656  }
 0x352   : > { %v2451_v31 = vpack.c.bf16 %v2434_v48, %v2434_v48  ;;  %12941 = vst [vmem:[#allocation153_spill] sm:$0xff] %v12940_v43  ;;  %v12943_v55 = vsel %vm9388_vm13, 4294967295, %v12942_v55  ;;  %v2426_v48 = vmax.f32 %v2407_v59, 0.0  ;;  %v2418_v43 = vmax.f32 %v2402_v1, 0.0 }
 0x354   : > { %v2504_v60 = vsel %vm12944_vm0, %v2451_v31, 0  ;;  %v2447_v53 = vpack.c.bf16 %v2430_v2, %v2426_v48  ;;  %v413_v31 = vld [vmem:[%s9020_s14 + $0x180] sm:$0xff]  ;;  %v2443_v52 = vpack.c.bf16 %v2422_v58, %v2418_v43  ;;  %vm1346_vm0 = vcmp.eq.s32.totalorder %v1175_v0, %v9136_v41  ;;  %v1178_v59 = vpop.permute.xlu2 %1177  ;;  %v9422_v30 = vpop.f32.mrf.mxu0  ;;  %s332_s14 = scalar_lea.vmem [#allocation2], %s11735_s22 }
 0x355   : > { %v2413_v42 = vpop.f32.mrf.mxu3  ;;  %2580 = vmatpush.bf16.msrb.mxu3 %v2504_v60  ;;  %1258 = vperm.xlu2 %6984, %v413_v31   ;;  %v12948_v43 = vmov 0  ;;  %vm1348_vm14 = vcmp.eq.s32.totalorder %v1178_v59, %v9136_v41  ;;  %v12958_v60 = vmov 0  ;;  %v12964_v48 = vmov 0  ;;  %s5395_s28 = sshll.u32 %s332_s14, 4  ;;  %s5396_s28 = int_to_ptr.vmem [resolvable:$true] %s5395_s28 }
 0x356   : > { %v1184_v45 = vpop.permute.xlu0 %1183  ;;  %vm9429_vm15 = vmpackc.low %vm1348_vm14, %vm1346_vm0  ;;  %vm1355_vm14 = vcmp.eq.s32.totalorder %v9259_v34, %v9133_v15  ;;  %vm1353_vm0 = vcmp.eq.s32.totalorder %v9332_v40, %v9133_v15  ;;  %v9450_v2 = vpop.permute.xlu1 %1120  ;;  %v12961_v40 = vmov 0  ;;  %v12967_v58 = vmov 0 }
 0x357   : > { %vm1352_vm10 = vcmp.eq.s32.totalorder %v1184_v45, %v9136_v41  ;;  %v12952_v6 = vsel %vm9429_vm15, 4294967295, %v12951_v6  ;;  %v12974_v31 = vmov 0 }
 0x358   : > { %vm9404_vm1 = vmpackc.low %vm1352_vm10, %vm1350_vm9  ;;  %vm1423_vm10 = vcmp.eq.s32.totalorder %v1292_v62, %v9133_v15 }
 0x359   : > { %2581 = vmatpush.bf16.msrb.mxu3 %v2447_v53  ;;  %v12946_v16 = vsel %vm9404_vm1, 4294967295, %v12945_v16  ;;  %vm9418_vm9 = vmpackc.low %vm1363_vm11, %vm1361_vm4 }
 0x35a   : > { %5853 = vmatmul.msk.bf16.gmra.mxu1 %vm12947_vm8, %v9130_v24  ;;  %v12949_v43 = vsel %vm9418_vm9, 4294967295, %v12948_v43 }
 0x35b   : > { %12950 = vst [vmem:[#allocation154_spill] sm:$0xff] %v12949_v43 }
 0x35c   : > { %v1283_v62 = vpop.permute.xlu2 %1282  ;;  %v2517_v1 = vpop.f32.mrf.mxu0 }
 0x35d   : > { %2582 = vmatpush.bf16.msrb.mxu3 %v2443_v52 }
 0x35e   : > { %v1289_v52 = vpop.permute.xlu0 %1288 }
 0x35f   : > { %vm1421_vm11 = vcmp.eq.s32.totalorder %v1289_v52, %v9133_v15  ;;  %vm1422_vm4 = vcmp.eq.s32.totalorder %v1289_v52, %v9136_v41 }
 0x360   : > { %5857 = vmatmul.msk.bf16.vlgmr.msrb.gmra.mxu3 %vm12947_vm8, %v9088_v20  ;;  %vm9442_vm8 = vmpackc.low %vm1424_vm6, %vm1422_vm4  ;;  %v12955_v20 = vmov 0  ;;  %vm1313_vm6 = vcmp.eq.s32.totalorder %v9398_v49, %v9133_v15  ;;  %vm1351_vm4 = vcmp.eq.s32.totalorder %v1184_v45, %v9133_v15 }
 0x361   : > { %5881 = vmatpush.bf16.msk.msra.mxu3 %vm9149_vm7, %v12557_v54  ;;  %vm9435_vm7 = vmpackc.low %vm1423_vm10, %vm1421_vm11  ;;  %v12956_v20 = vsel %vm9442_vm8, 4294967295, %v12955_v20  ;;  %vm1349_vm11 = vcmp.eq.s32.totalorder %v9346_v26, %v9133_v15  ;;  %v9488_v26 = vpop.permute.xlu1 %1171 }
 0x362   : > { %v12954_v11 = vsel %vm9435_vm7, 4294967295, %v12953_v11  ;;  %12957 = vst [vmem:[#allocation155_spill] sm:$0xff] %v12956_v20  ;;  %vm9455_vm10 = vmpackc.low %vm1355_vm14, %vm1353_vm0  ;;  %vm1345_vm0 = vcmp.eq.s32.totalorder %v1175_v0, %v9133_v15  ;;  %v12971_v0 = vmov 0 }
 0x363   : > { %v12959_v60 = vsel %vm9455_vm10, 4294967295, %v12958_v60  ;;  %vm9475_vm14 = vmpackc.low %vm1351_vm4, %vm1349_vm11 }
 0x364   : > { %12960 = vst [vmem:[#allocation156_spill] sm:$0xff] %v12959_v60  ;;  %v12965_v48 = vsel %vm9475_vm14, 4294967295, %v12964_v48  ;;  %v9486_v45 = vpop.permute.xlu2 %1123  ;;  %v2520_v42 = vpop.f32.mrf.mxu0 }
 0x365   : > { %5883 = vmatpush.bf16.msk.msra.mxu3 %vm9418_vm9, %v12557_v54  ;;  %12966 = vst [vmem:[#allocation158_spill] sm:$0xff] %v12965_v48  ;;  %vm1311_vm4 = vcmp.eq.s32.totalorder %v9486_v45, %v9133_v15  ;;  %v2521_v60 = vadd.f32 %v2520_v42, %v9147_v18 }
 0x366   : > { %v9464_v34 = vpop.permute.xlu0 %1129 }
 0x367   : > { %vm1315_vm9 = vcmp.eq.s32.totalorder %v9464_v34, %v9133_v15 }
 0x368   : > { %vm9468_vm8 = vmpackc.low %vm1315_vm9, %vm1313_vm6  ;;  %vm1309_vm9 = vcmp.eq.s32.totalorder %v9450_v2, %v9133_v15  ;;  %vm1387_vm6 = vcmp.eq.s32.totalorder %v1238_v25, %v9133_v15 }
 0x369   : > { %5885 = vmatpush.bf16.msk.msra.mxu3 %vm9218_vm3, %v12557_v54  ;;  %v12962_v40 = vsel %vm9468_vm8, 4294967295, %v12961_v40  ;;  %5875 = vmatpush.bf16.msk.msra.mxu2 %vm9468_vm8, %v12557_v54  ;;  %vm1347_vm3 = vcmp.eq.s32.totalorder %v1178_v59, %v9133_v15  ;;  %vm12970_vm8 = vcmask 326656   ;;  %vm9503_vm7 = vmpackc.low %vm1311_vm4, %vm1309_vm9  ;;  %v1277_v59 = vpop.permute.xlu1 %1276  ;;  %vm1417_vm9 = vcmp.eq.s32.totalorder %v1283_v62, %v9133_v15 }
 0x36a   : > { %12963 = vst [vmem:[#allocation157_spill] sm:$0xff] %v12962_v40  ;;  %vm9494_vm11 = vmpackc.low %vm1347_vm3, %vm1345_vm0  ;;  %v12972_v0 = vsel %vm9503_vm7, 4294967295, %v12971_v0  ;;  %vm1418_vm4 = vcmp.eq.s32.totalorder %v1283_v62, %v9136_v41 }
 0x36b   : > { %v12968_v58 = vsel %vm9494_vm11, 4294967295, %v12967_v58  ;;  %12973 = vst [vmem:[#allocation160_spill] sm:$0xff] %v12972_v0  ;;  %v12981_v0 = vmov 0 }
 0x36c   : > { %12969 = vst [vmem:[#allocation159_spill] sm:$0xff] %v12968_v58  ;;  %v2522_v52 = vpop.f32.mrf.mxu0  ;;  %v12979_v58 = vmov 0 }
 0x36d   : > { %5887 = vmatpush.bf16.msk.msra.mxu3 %vm9455_vm10, %v12557_v54  ;;  %vm1388_vm10 = vcmp.eq.s32.totalorder %v1238_v25, %v9136_v41  ;;  %5877 = vmatpush.bf16.msk.msra.mxu2 %vm9503_vm7, %v12557_v54  ;;  %v9523_v25 = vpop.permute.xlu2 %1228  ;;  %v2523_v62 = vadd.f32 %v2522_v52, %v9105_v56  ;;  %v12985_v52 = vmov 0 }
 0x36e   : > { %v1235_v53 = vpop.permute.xlu0 %1234 }
 0x36f   : > { %vm1386_vm3 = vcmp.eq.s32.totalorder %v1235_v53, %v9136_v41  ;;  %v9537_v48 = vpop.f32.mrf.mxu2  ;;  %v2610_v33 = vmax.f32 %v2523_v62, 0.0 }
 0x370   : > { %5858 = vmatmul.msk.bf16.gmra.mxu3 %vm12970_vm8, %v9111_v10  ;;  %vm9519_vm8 = vmpackc.low %vm1388_vm10, %vm1386_vm3  ;;  %v12976_v10 = vmov 0  ;;  %vm1413_vm3 = vcmp.eq.s32.totalorder %v1277_v59, %v9133_v15 }
 0x371   : > { %5889 = vmatpush.bf16.msk.msra.mxu3 %vm9475_vm14, %v12557_v54  ;;  %vm1385_vm14 = vcmp.eq.s32.totalorder %v1235_v53, %v9133_v15  ;;  %v12977_v10 = vsel %vm9519_vm8, 4294967295, %v12976_v10  ;;  %v9546_v43 = vpop.permute.xlu1 %1117 }
 0x372   : > { %vm9512_vm0 = vmpackc.low %vm1387_vm6, %vm1385_vm14  ;;  %12978 = vst [vmem:[#allocation161_spill] sm:$0xff] %v12977_v10 }
 0x373   : > { %v12975_v31 = vsel %vm9512_vm0, 4294967295, %v12974_v31 }
 0x374   : > { %v2525_v63 = vpop.f32.mrf.mxu0 }
 0x375   : > { %5891 = vmatpush.bf16.msk.msra.mxu3 %vm9494_vm11, %v12557_v54  ;;  %v1280_v40 = vpop.permute.xlu2 %1279 }
 0x376   : > { %v1286_v53 = vpop.permute.xlu0 %1285  ;;  %vm1416_vm11 = vcmp.eq.s32.totalorder %v1280_v40, %v9136_v41 }
 0x377   : > { %vm1419_vm14 = vcmp.eq.s32.totalorder %v1286_v53, %v9133_v15  ;;  %vm1420_vm6 = vcmp.eq.s32.totalorder %v1286_v53, %v9136_v41  ;;  %v2526_v53 = vadd.f32 %v2525_v63, %v9103_v36  ;;  %v2518_v63 = vadd.f32 %v2517_v1, %v9119_v27 }
 0x378   : > { %vm9529_vm7 = vmpackc.low %vm1419_vm14, %vm1417_vm9  ;;  %vm12984_vm9 = vcmask 326656   ;;  %vm1343_vm14 = vcmp.eq.s32.totalorder %v9488_v26, %v9133_v15 }
 0x379   : > { %v12980_v58 = vsel %vm9529_vm7, 4294967295, %v12979_v58  ;;  %vm9533_vm10 = vmpackc.low %vm1420_vm6, %vm1418_vm4  ;;  %vm1414_vm4 = vcmp.eq.s32.totalorder %v1277_v59, %v9136_v41  ;;  %vm1415_vm6 = vcmp.eq.s32.totalorder %v1280_v40, %v9133_v15  ;;  %v2614_v42 = vmax.f32 %v2526_v53, 0.0  ;;  %v2563_v53 = vpop.f32.mrf.mxu2  ;;  %v9583_v22 = vpop.permute.xlu1 %1222 }
 0x37a   : > { %v12982_v0 = vsel %vm9533_vm10, 4294967295, %v12981_v0  ;;  %vm9554_vm10 = vmpackc.low %vm1415_vm6, %vm1413_vm3  ;;  %v2606_v59 = vmax.f32 %v2521_v60, 0.0  ;;  %vm12993_vm6 = vcmask 1043456   ;;  %v2602_v1 = vmax.f32 %v2518_v63, 0.0 }
 0x37b   : > { %12983 = vst [vmem:[#allocation162_spill] sm:$0xff] %v12982_v0  ;;  %v12986_v52 = vsel %vm9554_vm10, 4294967295, %v12985_v52  ;;  %vm9563_vm7 = vmpackc.low %vm1416_vm11, %vm1414_vm4  ;;  %v2627_v40 = vpack.c.bf16 %v2614_v42, %v2614_v42  ;;  %vm1382_vm11 = vcmp.eq.s32.totalorder %v9523_v25, %v9136_v41 }
 0x37c   : > { %v12988_v46 = vsel %vm9563_vm7, 4294967295, %v12987_v46  ;;  %v2623_v62 = vpack.c.bf16 %v2610_v33, %v2606_v59  ;;  %v2527_v35 = vpop.f32.mrf.mxu0  ;;  %v9594_v33 = vld [vmem:[%s11785_s5 + $0x70] sm:$0x3]  ;;  %v12998_v59 = vmov 0 }
 0x37d   : > { %12989 = vst [vmem:[#allocation163_spill] sm:$0xff] %v12988_v46  ;;  %v9575_v23 = vpop.permute.xlu2 %1162 }
 0x37e   : > { %v9548_v47 = vpop.permute.xlu0 %1168 }
 0x380   : > { %5859 = vmatmul.msk.bf16.gmra.mxu3 %vm12984_vm9, %v9130_v24  ;;  %vm1341_vm9 = vcmp.eq.s32.totalorder %v9548_v47, %v9133_v15  ;;  %v2516_v24 = vadd.f32 %v9422_v30, %v9117_v44  ;;  %v2641_v30 = vsel %vm12993_vm6, %v2627_v40, 0  ;;  %v12994_v40 = vmov 0 }
 0x381   : > { %vm9567_vm3 = vmpackc.low %vm1343_vm14, %vm1341_vm9  ;;  %2657 = vmatpush.bf16.msra.mxu0 %v2641_v30  ;;  %vm1307_vm9 = vcmp.eq.s32.totalorder %v9546_v43, %v9133_v15  ;;  %v1271_v30 = vpop.permute.xlu1 %1270 }
 0x382   : > { %v12991_v57 = vsel %vm9567_vm3, 4294967295, %v12990_v57  ;;  %5893 = vmatpush.bf16.msk.msra.mxu3 %vm9567_vm3, %v12557_v54  ;;  %v2598_v60 = vmax.f32 %v2516_v24, 0.0  ;;  %v2566_v24 = vpop.f32.mrf.mxu2  ;;  %vm1409_vm3 = vcmp.eq.s32.totalorder %v1271_v30, %v9133_v15  ;;  %vm1410_vm7 = vcmp.eq.s32.totalorder %v1271_v30, %v9136_v41 }
 0x383   : > { %12992 = vst [vmem:[#allocation164_spill] sm:$0xff] %v12991_v57  ;;  %v13007_v30 = vmov 0 }
 0x384   : > { %v2619_v57 = vpack.c.bf16 %v2602_v1, %v2598_v60  ;;  %v13001_v1 = vmov 0 }
 0x385   : > { %2658 = vmatpush.bf16.msra.mxu0 %v2623_v62  ;;  %v9589_v63 = vpop.permute.xlu2 %1225 }
 0x386   : > { %v9579_v42 = vpop.permute.xlu0 %1231 }
 0x387   : > { %vm1384_vm4 = vcmp.eq.s32.totalorder %v9579_v42, %v9136_v41 }
 0x388   : > { %vm9585_vm14 = vmpackc.low %vm1384_vm4, %vm1382_vm11  ;;  %vm12997_vm11 = vcmask 326656  }
 0x389   : > { %v12995_v40 = vsel %vm9585_vm14, 4294967295, %v12994_v40  ;;  %2659 = vmatpush.bf16.msra.mxu0 %v2619_v57 }
 0x38a   : > { %12996 = vst [vmem:[#allocation165_spill] sm:$0xff] %v12995_v40  ;;  %v2568_v57 = vpop.f32.mrf.mxu2 }
 0x38c   : > { %5860 = vmatmul.msk.bf16.vlgmr.msra.gmra.mxu0 %vm12997_vm11, %v9594_v33 }
 0x38e   : > { %v1115_v35 = vpop.permute.xlu0 %1114  ;;  %v1274_v60 = vpop.permute.xlu2 %1273 }
 0x38f   : > { %vm1305_vm6 = vcmp.eq.s32.totalorder %v1115_v35, %v9133_v15  ;;  %vm1412_vm11 = vcmp.eq.s32.totalorder %v1274_v60, %v9136_v41 }
 0x390   : > { %vm9601_vm4 = vmpackc.low %vm1307_vm9, %vm1305_vm6  ;;  %vm1337_vm9 = vcmp.eq.s32.totalorder %v9575_v23, %v9133_v15  ;;  %vm1411_vm6 = vcmp.eq.s32.totalorder %v1274_v60, %v9133_v15  ;;  %v2567_v60 = vadd.f32 %v2566_v24, %v9147_v18 }
 0x391   : > { %v12999_v59 = vsel %vm9601_vm4, 4294967295, %v12998_v59  ;;  %5879 = vmatpush.bf16.msk.msra.mxu2 %vm9601_vm4, %v12557_v54  ;;  %vm9617_vm10 = vmpackc.low %vm1411_vm6, %vm1409_vm3  ;;  %vm13011_vm3 = vnez %v12896_v19  ;;  %vm1316_vm6 = vcmp.eq.s32.totalorder %v9464_v34, %v9136_v41 }
 0x392   : > { %13000 = vst [vmem:[#allocation166_spill] sm:$0xff] %v12999_v59  ;;  %v13002_v1 = vsel %vm9617_vm10, 4294967295, %v13001_v1  ;;  %v2569_v59 = vadd.f32 %v2568_v57, %v9105_v56  ;;  %v2571_v12 = vpop.f32.mrf.mxu2  ;;  %v2608_v24 = vmax.f32 %v2567_v60, 0.0  ;;  %v13037_v60 = vmov 0 }
 0x393   : > { %13003 = vst [vmem:[#allocation167_spill] sm:$0xff] %v13002_v1  ;;  %v2572_v50 = vadd.f32 %v2571_v12, %v9103_v36 }
 0x394   : > { %v2612_v46 = vmax.f32 %v2569_v59, 0.0 }
 0x395   : > { %5929 = vmatpush.bf16.msk.msrb.mxu2 %vm9193_vm5, %v12557_v54  ;;  %vm9624_vm5 = vmpackc.low %vm1412_vm11, %vm1410_vm7  ;;  %vm13010_vm7 = vnez %v12901_v5  ;;  %v2616_v61 = vmax.f32 %v2572_v50, 0.0  ;;  %vm13013_vm11 = vcmask 1043456  }
 0x396   : > { %v1166_v62 = vpop.permute.xlu0 %1165  ;;  %v13005_v3 = vsel %vm9624_vm5, 4294967295, %v13004_v3  ;;  %v1220_v34 = vpop.permute.xlu2 %1219 }
 0x397   : > { %13006 = vst [vmem:[#allocation168_spill] sm:$0xff] %v13005_v3  ;;  %vm1339_vm4 = vcmp.eq.s32.totalorder %v1166_v62, %v9133_v15  ;;  %v2564_v3 = vadd.f32 %v2563_v53, %v9119_v27  ;;  %v2629_v57 = vpack.c.bf16 %v2616_v61, %v2616_v61  ;;  %v2625_v53 = vpack.c.bf16 %v2612_v46, %v2608_v24 }
 0x398   : > { %vm9629_vm14 = vmpackc.low %vm1339_vm4, %vm1337_vm9  ;;  %vm13012_vm4 = vnez %v12908_v39  ;;  %vm1314_vm9 = vcmp.eq.s32.totalorder %v9398_v49, %v9136_v41  ;;  %v13015_v61 = vmov 0  ;;  %v9686_v49 = vpop.permute.xlu1 %1216 }
 0x399   : > { %5931 = vmatpush.bf16.msk.msrb.mxu2 %vm9172_vm2, %v12557_v54  ;;  %v13008_v30 = vsel %vm9629_vm14, 4294967295, %v13007_v30  ;;  %5895 = vmatpush.bf16.msk.msra.mxu3 %vm9629_vm14, %v12557_v54  ;;  %v2647_v50 = vsel %vm13013_vm11, %v2629_v57, 0  ;;  %vm1310_vm11 = vcmp.eq.s32.totalorder %v9450_v2, %v9136_v41  ;;  %v13024_v2 = vmov 0 }
 0x39a   : > { %13009 = vst [vmem:[#allocation169_spill] sm:$0xff] %v13008_v30  ;;  %v2562_v30 = vadd.f32 %v9537_v48, %v9117_v44  ;;  %v2604_v48 = vmax.f32 %v2564_v3, 0.0  ;;  %2683 = vmatpush.bf16.msrb.mxu0 %v2647_v50  ;;  %v2573_v59 = vpop.f32.mrf.mxu2  ;;  %v13018_v3 = vmov 0 }
 0x39b   : > { %v13044_v59 = vmov 0 }
 0x39c   : > { %v2600_v12 = vmax.f32 %v2562_v30, 0.0 }
 0x39d   : > { %5945 = vmatpush.bf16.msk.msrb.mxu3 %vm9153_vm12, %v12557_v54  ;;  %5933 = vmatpush.bf16.msk.msrb.mxu2 %vm13010_vm7, %v12557_v54  ;;  %vm1312_vm7 = vcmp.eq.s32.totalorder %v9486_v45, %v9136_v41 }
 0x39e   : > { %2684 = vmatpush.bf16.msrb.mxu0 %v2625_v53  ;;  %v2621_v46 = vpack.c.bf16 %v2604_v48, %v2600_v12 }
 0x3a0   : > { %v9733_v45 = vpop.permute.xlu1 %1267 }
 0x3a1   : > { %5947 = vmatpush.bf16.msk.msrb.mxu3 %vm13011_vm3, %v12557_v54  ;;  %5935 = vmatpush.bf16.msk.msrb.mxu2 %vm13012_vm4, %v12557_v54  ;;  %vm13014_vm3 = vnez %v12894_v28  ;;  %vm9665_vm4 = vmpackc.low %vm1316_vm6, %vm1314_vm9  ;;  %vm1308_vm6 = vcmp.eq.s32.totalorder %v9546_v43, %v9136_v41  ;;  %v13021_v43 = vmov 0 }
 0x3a2   : > { %v13016_v61 = vsel %vm9665_vm4, 4294967295, %v13015_v61  ;;  %vm9679_vm9 = vmpackc.low %vm1312_vm7, %vm1310_vm11  ;;  %2685 = vmatpush.bf16.msrb.mxu0 %v2621_v46  ;;  %vm1344_vm7 = vcmp.eq.s32.totalorder %v9488_v26, %v9136_v41  ;;  %vm1342_vm11 = vcmp.eq.s32.totalorder %v9548_v47, %v9136_v41  ;;  %v13028_v47 = vmov 0 }
 0x3a3   : > { %v13019_v3 = vsel %vm9679_vm9, 4294967295, %v13018_v3 }
 0x3a5   : > { %5949 = vmatpush.bf16.msk.msrb.mxu3 %vm13014_vm3, %v12557_v54  ;;  %5937 = vmatpush.bf16.msk.msrb.mxu2 %vm9388_vm13, %v12557_v54  ;;  %vm13017_vm3 = vnez %v12927_v4  ;;  %vm1306_vm13 = vcmp.eq.s32.totalorder %v1115_v35, %v9136_v41 }
 0x3a8   : > { %v1214_v35 = vpop.permute.xlu1 %1213 }
 0x3a9   : > { %5951 = vmatpush.bf16.msk.msrb.mxu3 %vm13017_vm3, %v12557_v54  ;;  %5939 = vmatpush.bf16.msk.msrb.mxu2 %vm9665_vm4, %v12557_v54  ;;  %vm13020_vm3 = vnez %v12911_v21  ;;  %vm9701_vm4 = vmpackc.low %vm1308_vm6, %vm1306_vm13  ;;  %vm1338_vm13 = vcmp.eq.s32.totalorder %v9575_v23, %v9136_v41  ;;  %vm13027_vm6 = vnez %v12935_v29  ;;  %v13030_v23 = vmov 0 }
 0x3aa   : > { %5897 = vmatpush.bf16.msk.msra.mxu0 %vm13020_vm3, %v12557_v54  ;;  %v13022_v43 = vsel %vm9701_vm4, 4294967295, %v13021_v43  ;;  %vm9710_vm3 = vmpackc.low %vm1344_vm7, %vm1342_vm11  ;;  %vm1381_vm11 = vcmp.eq.s32.totalorder %v9523_v25, %v9133_v15  ;;  %v13032_v25 = vmov 0 }
 0x3ab   : > { %v13025_v2 = vsel %vm9710_vm3, 4294967295, %v13024_v2 }
 0x3ad   : > { %5953 = vmatpush.bf16.msk.msrb.mxu3 %vm9404_vm1, %v12557_v54  ;;  %5941 = vmatpush.bf16.msk.msrb.mxu2 %vm9679_vm9, %v12557_v54  ;;  %vm13023_vm1 = vcmask 326656   ;;  %vm13026_vm9 = vnez %v12929_v9  ;;  %v13464_v9 = vld [vmem:[#allocation167_spill] sm:$0xff] }
 0x3ae   : > { %5862 = vmatmul.msk.bf16.vlgmr.msrb.gmra.mxu0 %vm13023_vm1, %v9594_v33  ;;  %vm1340_vm1 = vcmp.eq.s32.totalorder %v1166_v62, %v9136_v41  ;;  %v13034_v62 = vmov 0 }
 0x3af   : > { %5899 = vmatpush.bf16.msk.msra.mxu0 %vm13026_vm9, %v12557_v54  ;;  %vm9729_vm7 = vmpackc.low %vm1340_vm1, %vm1338_vm13  ;;  %vm1377_vm1 = vcmp.eq.s32.totalorder %v9583_v22, %v9133_v15 }
 0x3b0   : > { %v13029_v47 = vsel %vm9729_vm7, 4294967295, %v13028_v47 }
 0x3b1   : > { %5955 = vmatpush.bf16.msk.msrb.mxu3 %vm9429_vm15, %v12557_v54  ;;  %5943 = vmatpush.bf16.msk.msrb.mxu2 %vm9701_vm4, %v12557_v54  ;;  %vm1383_vm4 = vcmp.eq.s32.totalorder %v9579_v42, %v9133_v15  ;;  %v1211_v42 = vpop.permute.xlu2 %1210 }
 0x3b2   : > { %vm9745_vm13 = vmpackc.low %vm1383_vm4, %vm1381_vm11  ;;  %vm1373_vm4 = vcmp.eq.s32.totalorder %v9686_v49, %v9133_v15  ;;  %vm1375_vm11 = vcmp.eq.s32.totalorder %v1220_v34, %v9133_v15 }
 0x3b3   : > { %5901 = vmatpush.bf16.msk.msra.mxu0 %vm13027_vm6, %v12557_v54  ;;  %v13031_v23 = vsel %vm9745_vm13, 4294967295, %v13030_v23  ;;  %vm9766_vm15 = vmpackc.low %vm1375_vm11, %vm1373_vm4  ;;  %vm13040_vm4 = vnez %v12913_v17  ;;  %vm13041_vm11 = vnez %v12931_v38 }
 0x3b4   : > { %v13035_v62 = vsel %vm9766_vm15, 4294967295, %v13034_v62 }
 0x3b5   : > { %5957 = vmatpush.bf16.msk.msrb.mxu3 %vm9710_vm3, %v12557_v54  ;;  %vm1379_vm3 = vcmp.eq.s32.totalorder %v9589_v63, %v9133_v15  ;;  %13036 = vst [vmem:[#allocation170_spill] sm:$0xff] %v13035_v62 }
 0x3b7   : > { %5903 = vmatpush.bf16.msk.msra.mxu0 %vm9512_vm0, %v12557_v54  ;;  %v2538_v26 = vpop.f32.mrf.mxu1 }
 0x3b9   : > { %5959 = vmatpush.bf16.msk.msrb.mxu3 %vm9729_vm7, %v12557_v54  ;;  %vm9756_vm7 = vmpackc.low %vm1379_vm3, %vm1377_vm1  ;;  %vm1369_vm3 = vcmp.eq.s32.totalorder %v1211_v42, %v9133_v15  ;;  %vm1371_vm1 = vcmp.eq.s32.totalorder %v1214_v35, %v9133_v15 }
 0x3ba   : > { %v13033_v25 = vsel %vm9756_vm7, 4294967295, %v13032_v25 }
 0x3bb   : > { %5905 = vmatpush.bf16.msk.msra.mxu0 %vm9745_vm13, %v12557_v54  ;;  %vm9775_vm13 = vmpackc.low %vm1371_vm1, %vm1369_vm3  ;;  %vm13042_vm3 = vnez %v12937_v8  ;;  %vm1378_vm1 = vcmp.eq.s32.totalorder %v9583_v22, %v9136_v41 }
 0x3bc   : > { %v13038_v60 = vsel %vm9775_vm13, 4294967295, %v13037_v60  ;;  %v13462_v29 = vld [vmem:[#allocation170_spill] sm:$0xff] }
 0x3bd   : > { %13039 = vst [vmem:[#allocation171_spill] sm:$0xff] %v13038_v60 }
 0x3bf   : > { %5907 = vmatpush.bf16.msk.msra.mxu0 %vm9756_vm7, %v12557_v54  ;;  %v2540_v30 = vpop.f32.mrf.mxu1 }
 0x3c3   : > { %5909 = vmatpush.bf16.msk.msra.mxu0 %vm9766_vm15, %v12557_v54  ;;  %vm1372_vm15 = vcmp.eq.s32.totalorder %v1214_v35, %v9136_v41 }
 0x3c7   : > { %5911 = vmatpush.bf16.msk.msra.mxu0 %vm9775_vm13, %v12557_v54  ;;  %v2543_v24 = vpop.f32.mrf.mxu1  ;;  %vm1380_vm13 = vcmp.eq.s32.totalorder %v9589_v63, %v9136_v41  ;;  %v2539_v63 = vadd.f32 %v2538_v26, %v9117_v44 }
 0x3c8   : > { %v2544_v48 = vadd.f32 %v2543_v24, %v9147_v18  ;;  %v2541_v24 = vadd.f32 %v2540_v30, %v9119_v27 }
 0x3c9   : > { %v2599_v26 = vmax.f32 %v2539_v63, 0.0 }
 0x3ca   : > { %v2603_v30 = vmax.f32 %v2541_v24, 0.0 }
 0x3cb   : > { %5961 = vmatpush.bf16.msk.msrb.mxu0 %vm13040_vm4, %v12557_v54  ;;  %vm13043_vm4 = vnez %v12995_v40  ;;  %v13047_v40 = vmov 0 }
 0x3cf   : > { %5963 = vmatpush.bf16.msk.msrb.mxu0 %vm13041_vm11, %v12557_v54  ;;  %v2545_v57 = vpop.f32.mrf.mxu1  ;;  %vm1376_vm11 = vcmp.eq.s32.totalorder %v1220_v34, %v9136_v41 }
 0x3d0   : > { %v2546_v53 = vadd.f32 %v2545_v57, %v9105_v56  ;;  %v2607_v57 = vmax.f32 %v2544_v48, 0.0 }
 0x3d3   : > { %5965 = vmatpush.bf16.msk.msrb.mxu0 %vm13042_vm3, %v12557_v54  ;;  %vm9804_vm3 = vmpackc.low %vm1380_vm13, %vm1378_vm1  ;;  %vm13050_vm1 = vcmask 1043456  }
 0x3d4   : > { %v13045_v59 = vsel %vm9804_vm3, 4294967295, %v13044_v59 }
 0x3d5   : > { %13046 = vst [vmem:[#allocation172_spill] sm:$0xff] %v13045_v59 }
 0x3d7   : > { %5967 = vmatpush.bf16.msk.msrb.mxu0 %vm9519_vm8, %v12557_v54  ;;  %v2548_v50 = vpop.f32.mrf.mxu1  ;;  %vm1374_vm8 = vcmp.eq.s32.totalorder %v9686_v49, %v9136_v41 }
 0x3d8   : > { %v2549_v12 = vadd.f32 %v2548_v50, %v9103_v36  ;;  %v2611_v50 = vmax.f32 %v2546_v53, 0.0  ;;  %vm9816_vm13 = vmpackc.low %vm1376_vm11, %vm1374_vm8  ;;  %v13051_v53 = vmov 0  ;;  %vm13054_vm11 = vcmask 326656  }
 0x3d9   : > { %v13048_v40 = vsel %vm9816_vm13, 4294967295, %v13047_v40 }
 0x3da   : > { %v2615_v46 = vmax.f32 %v2549_v12, 0.0  ;;  %13049 = vst [vmem:[#allocation173_spill] sm:$0xff] %v13048_v40  ;;  %v2624_v48 = vpack.c.bf16 %v2611_v50, %v2607_v57 }
 0x3db   : > { %5969 = vmatpush.bf16.msk.msrb.mxu0 %vm13043_vm4, %v12557_v54  ;;  %vm1370_vm4 = vcmp.eq.s32.totalorder %v1211_v42, %v9136_v41  ;;  %v2620_v42 = vpack.c.bf16 %v2603_v30, %v2599_v26 }
 0x3dc   : > { %v2628_v22 = vpack.c.bf16 %v2615_v46, %v2615_v46  ;;  %vm9826_vm8 = vmpackc.low %vm1372_vm15, %vm1370_vm4  ;;  %vm13056_vm4 = vnez %v12916_v7  ;;  %v13472_v7 = vld [vmem:[#allocation151_spill] sm:$0xff] }
 0x3dd   : > { %v13052_v53 = vsel %vm9826_vm8, 4294967295, %v13051_v53  ;;  %vm13055_vm15 = vmmov %vm13050_vm1 }
 0x3de   : > { %v2644_v12 = vsel %vm13050_vm1, %v2628_v22, 0  ;;  %13053 = vst [vmem:[#allocation174_spill] sm:$0xff] %v13052_v53  ;;  %vm13057_vm1 = vmmov %vm13054_vm11 }
 0x3df   : > { %5971 = vmatpush.bf16.msk.msrb.mxu0 %vm9804_vm3, %v12557_v54  ;;  %2670 = vmatpush.bf16.msra.mxu1 %v2644_v12  ;;  %v2550_v49 = vpop.f32.mrf.mxu1 }
 0x3e3   : > { %5973 = vmatpush.bf16.msk.msrb.mxu0 %vm9816_vm13, %v12557_v54  ;;  %v2584_v34 = vpop.f32.mrf.mxu3  ;;  %2671 = vmatpush.bf16.msra.mxu1 %v2624_v48  ;;  %vm13061_vm13 = vnez %v12986_v52 }
 0x3e4   : > { %v2585_v30 = vadd.f32 %v2584_v34, %v9117_v44 }
 0x3e6   : > { %v2601_v8 = vmax.f32 %v2585_v30, 0.0 }
 0x3e7   : > { %5975 = vmatpush.bf16.msk.msrb.mxu0 %vm9826_vm8, %v12557_v54  ;;  %2672 = vmatpush.bf16.msra.mxu1 %v2620_v42  ;;  %vm13060_vm8 = vnez %v12980_v58 }
 0x3ea   : > { %5861 = vmatmul.msk.bf16.vlgmr.msra.gmra.mxu1 %vm13054_vm11, %v9594_v33  ;;  %vm13058_vm11 = vnez %v12922_v13 }
 0x3eb   : > { %v2586_v35 = vpop.f32.mrf.mxu3 }
 0x3ec   : > { %v2587_v48 = vadd.f32 %v2586_v35, %v9119_v27 }
 0x3ee   : > { %v2605_v59 = vmax.f32 %v2587_v48, 0.0 }
 0x3f3   : > { %v2589_v46 = vpop.f32.mrf.mxu3 }
 0x3f4   : > { %v2590_v12 = vadd.f32 %v2589_v46, %v9147_v18  ;;  %v2622_v18 = vpack.c.bf16 %v2605_v59, %v2601_v8  ;;  %v1265_v8 = vpop.permute.xlu0 %1264  ;;  %v13072_v46 = vld [vmem:[#allocation163_spill] sm:$0xff] }
 0x3f5   : > { %vm1405_vm3 = vcmp.eq.s32.totalorder %v1265_v8, %v9133_v15 }
 0x3f6   : > { %v2609_v42 = vmax.f32 %v2590_v12, 0.0 }
 0x3fb   : > { %v2591_v22 = vpop.f32.mrf.mxu3 }
 0x3fc   : > { %v2592_v57 = vadd.f32 %v2591_v22, %v9105_v56 }
 0x3fe   : > { %v2613_v53 = vmax.f32 %v2592_v57, 0.0 }
 0x400   : > { %v2626_v10 = vpack.c.bf16 %v2613_v53, %v2609_v42  ;;  %v13065_v53 = vmov 0 }
 0x403   : > { %v2594_v63 = vpop.f32.mrf.mxu3 }
 0x404   : > { %v2595_v24 = vadd.f32 %v2594_v63, %v9103_v36  ;;  %v13075_v63 = vmov 0 }
 0x406   : > { %v2617_v50 = vmax.f32 %v2595_v24, 0.0 }
 0x408   : > { %v2630_v49 = vpack.c.bf16 %v2617_v50, %v2617_v50 }
 0x409   : > { %v2661_v36 = vpop.f32.mrf.mxu0 }
 0x40a   : > { %v2650_v26 = vsel %vm13055_vm15, %v2630_v49, 0  ;;  %v9842_v56 = vadd.f32 %v2661_v36, %v9168_v51  ;;  %vm13059_vm15 = vnez %v12954_v11 }
 0x40b   : > { %v2596_v40 = vpop.f32.mrf.mxu3  ;;  %2696 = vmatpush.bf16.msrb.mxu1 %v2650_v26 }
 0x40c   : > { %v2704_v27 = vpack.c.bf16 %v9842_v56, %v9842_v56  ;;  %v1262_v40 = vpop.permute.xlu0 %1261 }
 0x40e   : > { %2716 = vmatmul.bf16.vlgmr.msra.gmra.mxu2 %v2704_v27 }
 0x40f   : > { %2697 = vmatpush.bf16.msrb.mxu1 %v2626_v10  ;;  %v1259_v10 = vpop.permute.xlu2 %1258 }
 0x411   : > { %v2663_v44 = vpop.f32.mrf.mxu0 }
 0x413   : > { %2698 = vmatpush.bf16.msrb.mxu1 %v2622_v18 }
 0x416   : > { %5863 = vmatmul.msk.bf16.vlgmr.msrb.gmra.mxu1 %vm13057_vm1, %v9594_v33  ;;  %vm1407_vm1 = vcmp.eq.s32.totalorder %v9733_v45, %v9133_v15  ;;  %v13062_v33 = vmov 0 }
 0x417   : > { %5913 = vmatpush.bf16.msk.msra.mxu1 %vm13056_vm4, %v12557_v54  ;;  %vm9869_vm7 = vmpackc.low %vm1407_vm1, %vm1405_vm3  ;;  %vm13068_vm3 = vnez %v12918_v32  ;;  %vm13069_vm1 = vnez %v12924_v14 }
 0x418   : > { %v13063_v33 = vsel %vm9869_vm7, 4294967295, %v13062_v33 }
 0x419   : > { %13064 = vst [vmem:[#allocation175_spill] sm:$0xff] %v13063_v33 }
 0x41b   : > { %5915 = vmatpush.bf16.msk.msra.mxu1 %vm13058_vm11, %v12557_v54 }
 0x41e   : > { %2768 = vmatmul.bf16.vlgmr.msrb.gmra.mxu2 %v2704_v27 }
 0x41f   : > { %5917 = vmatpush.bf16.msk.msra.mxu1 %vm13059_vm15, %v12557_v54 }
 0x423   : > { %5919 = vmatpush.bf16.msk.msra.mxu1 %vm13060_vm8, %v12557_v54  ;;  %vm1401_vm8 = vcmp.eq.s32.totalorder %v1259_v10, %v9133_v15 }
 0x427   : > { %5921 = vmatpush.bf16.msk.msra.mxu1 %vm13061_vm13, %v12557_v54  ;;  %vm1403_vm13 = vcmp.eq.s32.totalorder %v1262_v40, %v9133_v15 }
 0x428   : > { %vm9881_vm15 = vmpackc.low %vm1403_vm13, %vm1401_vm8  ;;  %vm13070_vm13 = vnez %v12956_v20  ;;  %vm13071_vm8 = vnez %v12982_v0 }
 0x429   : > { %v13066_v53 = vsel %vm9881_vm15, 4294967295, %v13065_v53 }
 0x42a   : > { %13067 = vst [vmem:[#allocation176_spill] sm:$0xff] %v13066_v53 }
 0x42b   : > { %5923 = vmatpush.bf16.msk.msra.mxu1 %vm9617_vm10, %v12557_v54  ;;  %v2687_v59 = vpop.f32.mrf.mxu0 }
 0x42c   : > { %v9879_v34 = vadd.f32 %v2687_v59, %v9168_v51 }
 0x42e   : > { %v2706_v35 = vpack.c.bf16 %v9879_v34, %v9879_v34 }
 0x42f   : > { %5925 = vmatpush.bf16.msk.msra.mxu1 %vm9869_vm7, %v12557_v54  ;;  %vm1406_vm7 = vcmp.eq.s32.totalorder %v1265_v8, %v9136_v41 }
 0x430   : > { %2742 = vmatmul.bf16.vlgmr.msra.gmra.mxu0 %v2706_v35 }
 0x431   : > { %v13474_v13 = vld [vmem:[#allocation176_spill] sm:$0xff] }
 0x433   : > { %5927 = vmatpush.bf16.msk.msra.mxu1 %vm9881_vm15, %v12557_v54  ;;  %v2689_v15 = vpop.f32.mrf.mxu0  ;;  %vm13073_vm15 = vnez %v13072_v46 }
 0x437   : > { %5977 = vmatpush.bf16.msk.msrb.mxu1 %vm13068_vm3, %v12557_v54  ;;  %vm1408_vm3 = vcmp.eq.s32.totalorder %v9733_v45, %v9136_v41  ;;  %v13078_v45 = vmov 0 }
 0x43b   : > { %5979 = vmatpush.bf16.msk.msrb.mxu1 %vm13069_vm1, %v12557_v54  ;;  %vm9911_vm1 = vmpackc.low %vm1408_vm3, %vm1406_vm7  ;;  %vm13081_vm7 = vcmask 1044480   ;;  %vm13082_vm3 = vcmask 1043456  }
 0x43c   : > { %v13076_v63 = vsel %vm9911_vm1, 4294967295, %v13075_v63 }
 0x43d   : > { %13077 = vst [vmem:[#allocation177_spill] sm:$0xff] %v13076_v63 }
 0x43f   : > { %5981 = vmatpush.bf16.msk.msrb.mxu1 %vm13070_vm13, %v12557_v54  ;;  %vm1404_vm13 = vcmp.eq.s32.totalorder %v1262_v40, %v9136_v41 }
 0x440   : > { %2794 = vmatmul.bf16.vlgmr.msrb.gmra.mxu0 %v2706_v35 }
 0x443   : > { %5983 = vmatpush.bf16.msk.msrb.mxu1 %vm13071_vm8, %v12557_v54  ;;  %vm1402_vm8 = vcmp.eq.s32.totalorder %v1259_v10, %v9136_v41 }
 0x447   : > { %5985 = vmatpush.bf16.msk.msrb.mxu1 %vm13073_vm15, %v12557_v54  ;;  %vm9920_vm15 = vmpackc.low %vm1404_vm13, %vm1402_vm8  ;;  %vm12429_vm8 = vcmask 130048  }
 0x448   : > { %v13079_v45 = vsel %vm9920_vm15, 4294967295, %v13078_v45  ;;  %vm9957_vm13 = vmpackc.low %vm13082_vm3, %vm13081_vm7 }
 0x449   : > { %13080 = vst [vmem:[#allocation178_spill] sm:$0xff] %v13079_v45  ;;  %v6901_v45 = vld [vmem:[%s11785_s5 + $0x80] sm:$0xff]  ;;  %vm13088_vm7 = vmmov %vm13082_vm3 }
 0x44b   : > { %5987 = vmatpush.bf16.msk.msrb.mxu1 %vm9624_vm5, %v12557_v54 }
 0x44f   : > { %5989 = vmatpush.bf16.msk.msrb.mxu1 %vm9911_vm1, %v12557_v54 }
 0x453   : > { %5991 = vmatpush.bf16.msk.msrb.mxu1 %vm9920_vm15, %v12557_v54 }
 0x467   : > { %v2674_v24 = vpop.f32.mrf.mxu1 }
 0x468   : > { %v9928_v57 = vadd.f32 %v2674_v24, %v9168_v51  ;;  %v9940_v24 = vld [vmem:[%s11786_s6 + $0x20] sm:$0xff] }
 0x46a   : > { %v2705_v50 = vpack.c.bf16 %v9928_v57, %v9928_v57 }
 0x46c   : > { %2729 = vmatmul.bf16.vlgmr.msra.gmra.mxu3 %v2705_v50 }
 0x46f   : > { %v2676_v41 = vpop.f32.mrf.mxu1 }
 0x470   : > { %v9946_v41 = vld [vmem:[%s11786_s6 + $0x10] sm:$0xff] }
 0x47c   : > { %2781 = vmatmul.bf16.vlgmr.msrb.gmra.mxu3 %v2705_v50 }
 0x491   : > { %v2717_v26 = vpop.f32.mrf.mxu2 }
 0x493   : > { %v2700_v12 = vpop.f32.mrf.mxu1 }
 0x494   : > { %v9933_v49 = vadd.f32 %v2700_v12, %v9168_v51  ;;  %v7126_v51 = vmov 3   ;;  %v9952_v12 = vld [vmem:[%s11786_s6 + $0x18] sm:$0xff] }
 0x495   : > { %6988 = vset.pattern.permute.xlu1 %v7126_v51  ;;  %6989 = vset.pattern.permute.xlu2 %v7126_v51 }
 0x496   : > { %v2707_v48 = vpack.c.bf16 %v9933_v49, %v9933_v49  ;;  %2840 = vperm.xlu1 %6988, %v9940_v24   ;;  %6990 = vset.pattern.permute.xlu0 %v7126_v51 }
 0x497   : > { %2832 = vperm.xlu2 %6989, %v9946_v41   ;;  %2836 = vperm.xlu0 %6990, %v9952_v12  }
 0x498   : > { %2755 = vmatmul.bf16.vlgmr.msra.gmra.mxu1 %v2707_v48 }
 0x499   : > { %v2719_v42 = vpop.f32.mrf.mxu2 }
 0x49b   : > { %v2702_v30 = vpop.f32.mrf.mxu1 }
 0x4a1   : > { %v2769_v36 = vpop.f32.mrf.mxu2 }
 0x4a8   : > { %2807 = vmatmul.bf16.vlgmr.msrb.gmra.mxu1 %v2707_v48 }
 0x4a9   : > { %v2771_v27 = vpop.f32.mrf.mxu2 }
 0x4aa   : > { %v9964_v27 = vld [vmem:[%s11786_s6] sm:$0xff] }
 0x4ab   : > { %2824 = vperm.xlu1 %6988, %v9964_v27  }
 0x4ad   : > { %v2743_v18 = vpop.f32.mrf.mxu0 }
 0x4b5   : > { %v2745_v44 = vpop.f32.mrf.mxu0 }
 0x4b6   : > { %v13086_v44 = vld [vmem:[#allocation40_spill] sm:$0xff] }
 0x4bd   : > { %v2795_v8 = vpop.f32.mrf.mxu0 }
 0x4c5   : > { %v2797_v10 = vpop.f32.mrf.mxu0 }
 0x4ef   : > { %v2730_v40 = vpop.f32.mrf.mxu3 }
 0x4f0   : > { %v2731_v50 = vadd.f32 %v2730_v40, %v2717_v26  ;;  %v13083_v26 = vmov 0  ;;  %v6900_v40 = vld [vmem:[%s11785_s5 + $0x78] sm:$0xff] }
 0x4f1   : > { %v13084_v26 = vsel %vm9957_vm13, 4294967295, %v13083_v26 }
 0x4f2   : > { %v2744_v48 = vadd.f32 %v2743_v18, %v2731_v50  ;;  %13085 = vst [vmem:[#allocation179_spill] sm:$0xff] %v13084_v26  ;;  %v9971_v18 = vld [vmem:[%s11786_s6 + $0x8] sm:$0xff] }
 0x4f3   : > { %2828 = vperm.xlu2 %6989, %v9971_v18  }
 0x4f7   : > { %v2732_v59 = vpop.f32.mrf.mxu3 }
 0x4ff   : > { %v2782_v35 = vpop.f32.mrf.mxu3 }
 0x507   : > { %v2784_v15 = vpop.f32.mrf.mxu3 }
 0x508   : > { %v2783_v15 = vadd.f32 %v2782_v35, %v2769_v36  ;;  %v2820_v36 = vld [vmem:[%s11785_s5 + $0x88] sm:$0xf] }
 0x50a   : > { %v2796_v51 = vadd.f32 %v2795_v8, %v2783_v15  ;;  %v2852_v8 = vunpack.c.l.b16 %v2820_v36 }
 0x50c   : > { %v2855_v35 = vpack.c.b16 %v2852_v8, %v2852_v8 }
 0x515   : > { %v2756_v30 = vpop.f32.mrf.mxu1 }
 0x516   : > { %v2757_v42 = vadd.f32 %v2756_v30, %v2744_v48  ;;  %v13087_v30 = vld [vmem:[#allocation41_spill] sm:$0xff] }
 0x518   : > { %v6001_v10 = vpack.c.bf16 %v2757_v42, %v13086_v44 }
 0x51a   : > { %6002 = vmatpush.bf16.msk.msra.mxu2 %vm9957_vm13, %v6001_v10 }
 0x51d   : > { %v2758_v59 = vpop.f32.mrf.mxu1  ;;  %6003 = vmatmul.msk.bf16.vlgmr.msra.gmra.mxu2 %vm12429_vm8, %v6900_v40 }
 0x525   : > { %v2808_v50 = vpop.f32.mrf.mxu1 }
 0x526   : > { %v2809_v48 = vadd.f32 %v2808_v50, %v2796_v51 }
 0x528   : > { %v6007_v42 = vpack.c.bf16 %v2809_v48, %v13087_v30  ;;  %v2833_v48 = vpop.permute.xlu2 %2832 }
 0x52a   : > { %6008 = vmatpush.bf16.msk.msra.mxu3 %vm9957_vm13, %v6007_v42  ;;  %v2837_v42 = vpop.permute.xlu0 %2836  ;;  %vm13094_vm13 = vcmask 1043456  }
 0x52d   : > { %v2810_v63 = vpop.f32.mrf.mxu1  ;;  %6004 = vmatmul.msk.bf16.gmra.mxu2 %vm12429_vm8, %v6901_v45  ;;  %6009 = vmatmul.msk.bf16.vlgmr.msra.gmra.mxu3 %vm12429_vm8, %v6900_v40  ;;  %v2841_v40 = vpop.permute.xlu1 %2840 }
 0x535   : > { %v2825_v20 = vpop.permute.xlu1 %2824 }
 0x53d   : > { %6005 = vmatmul.msk.bf16.gmra.mxu2 %vm12429_vm8, %v2855_v35  ;;  %6010 = vmatmul.msk.bf16.gmra.mxu3 %vm12429_vm8, %v6901_v45  ;;  %v7127_v45 = vmov 4  }
 0x53e   : > { %6991 = vset.pattern.permute.xlu1 %v7127_v45  ;;  %6992 = vset.pattern.permute.xlu2 %v7127_v45 }
 0x53f   : > { %2950 = vperm.xlu1 %6991, %v9940_v24   ;;  %6993 = vset.pattern.permute.xlu0 %v7127_v45 }
 0x540   : > { %2942 = vperm.xlu2 %6992, %v9946_v41   ;;  %2946 = vperm.xlu0 %6993, %v9952_v12  }
 0x547   : > { %2934 = vperm.xlu1 %6991, %v9964_v27  }
 0x548   : > { %2938 = vperm.xlu2 %6992, %v9971_v18  }
 0x54d   : > { %6011 = vmatmul.msk.bf16.gmra.mxu3 %vm12429_vm8, %v2855_v35  ;;  %v2829_v0 = vpop.permute.xlu2 %2828 }
 0x5a0   : > { %v2875_v10 = vpop.f32.mrf.mxu2 }
 0x5a1   : > { %v2876_v53 = vadd.f32 %v2875_v10, %v2825_v20  ;;  %v6902_v10 = vld [vmem:[%s11785_s5 + $0x90] sm:$0xff] }
 0x5a3   : > { %v2912_v17 = vmax.f32 %v2876_v53, 0.0 }
 0x5a8   : > { %v2877_v59 = vpop.f32.mrf.mxu2 }
 0x5a9   : > { %v2878_v32 = vadd.f32 %v2877_v59, %v2829_v0 }
 0x5b0   : > { %v2880_v15 = vpop.f32.mrf.mxu2  ;;  %v2898_v63 = vpop.f32.mrf.mxu3 }
 0x5b1   : > { %v2881_v36 = vadd.f32 %v2880_v15, %v2833_v48 }
 0x5b3   : > { %v2916_v38 = vmax.f32 %v2881_v36, 0.0 }
 0x5b8   : > { %v2882_v51 = vpop.f32.mrf.mxu2  ;;  %v2900_v50 = vpop.f32.mrf.mxu3 }
 0x5b9   : > { %v2883_v8 = vadd.f32 %v2882_v51, %v2837_v42  ;;  %v2914_v51 = vmax.f32 %v2878_v32, 0.0 }
 0x5bb   : > { %v2918_v33 = vmax.f32 %v2883_v8, 0.0  ;;  %v13089_v8 = vld [vmem:[#allocation5_spill] sm:$0xff] }
 0x5bc   : > { %vm13090_vm3 = vnez %v13089_v8 }
 0x5bd   : > { %v2929_v60 = vpack.c.bf16 %v2918_v33, %v2916_v38  ;;  %v2901_v33 = vadd.f32 %v2900_v50, %v2829_v0  ;;  %v13101_v50 = vld [vmem:[#allocation6_spill] sm:$0xff] }
 0x5c0   : > { %v2885_v26 = vpop.f32.mrf.mxu2  ;;  %v2903_v22 = vpop.f32.mrf.mxu3 }
 0x5c1   : > { %v2886_v46 = vadd.f32 %v2885_v26, %v2841_v40  ;;  %v2904_v38 = vadd.f32 %v2903_v22, %v2833_v48  ;;  %v13097_v48 = vld [vmem:[#allocation12_spill] sm:$0xff] }
 0x5c3   : > { %v2920_v14 = vmax.f32 %v2886_v46, 0.0 }
 0x5c5   : > { %v2931_v35 = vpack.c.bf16 %v2920_v14, %v2920_v14  ;;  %v2927_v14 = vpack.c.bf16 %v2914_v51, %v2912_v17  ;;  %v13092_v17 = vld [vmem:[#allocation7_spill] sm:$0xff]  ;;  %v13095_v51 = vld [vmem:[#allocation9_spill] sm:$0xff] }
 0x5c6   : > { %vm13093_vm8 = vnez %v13092_v17 }
 0x5c7   : > { %v2976_v26 = vsel %vm13088_vm7, %v2931_v35, 0  ;;  %vm13091_vm7 = vcmask 326656  }
 0x5c8   : > { %v2905_v15 = vpop.f32.mrf.mxu3  ;;  %2986 = vmatpush.bf16.msra.mxu0 %v2976_v26  ;;  %v2887_v46 = vpop.f32.mrf.mxu2  ;;  %v2899_v26 = vadd.f32 %v2898_v63, %v2825_v20  ;;  %v6903_v20 = vld [vmem:[%s11785_s5 + $0x98] sm:$0xff]  ;;  %v13099_v63 = vld [vmem:[#allocation15_spill] sm:$0xff] }
 0x5c9   : > { %v2906_v32 = vadd.f32 %v2905_v15, %v2837_v42  ;;  %v2915_v42 = vmax.f32 %v2901_v33, 0.0  ;;  %v13117_v33 = vld [vmem:[#allocation23_spill] sm:$0xff] }
 0x5ca   : > { %v2913_v22 = vmax.f32 %v2899_v26, 0.0  ;;  %v13121_v26 = vld [vmem:[#allocation25_spill] sm:$0xff] }
 0x5cb   : > { %v2919_v45 = vmax.f32 %v2906_v32, 0.0  ;;  %v13109_v32 = vld [vmem:[#allocation19_spill] sm:$0xff] }
 0x5cc   : > { %2987 = vmatpush.bf16.msra.mxu0 %v2929_v60  ;;  %v2928_v0 = vpack.c.bf16 %v2915_v42, %v2913_v22  ;;  %v13129_v42 = vld [vmem:[#allocation20_spill] sm:$0xff]  ;;  %v13133_v22 = vld [vmem:[#allocation22_spill] sm:$0xff] }
 0x5cd   : > { %vm13130_vm5 = vnez %v13129_v42 }
 0x5d0   : > { %v2908_v59 = vpop.f32.mrf.mxu3  ;;  %2988 = vmatpush.bf16.msra.mxu0 %v2927_v14  ;;  %v13105_v14 = vld [vmem:[#allocation17_spill] sm:$0xff] }
 0x5d1   : > { %v2909_v36 = vadd.f32 %v2908_v59, %v2841_v40  ;;  %v2917_v40 = vmax.f32 %v2904_v38, 0.0  ;;  %v13107_v59 = vld [vmem:[#allocation8_spill] sm:$0xff]  ;;  %v13113_v38 = vld [vmem:[#allocation21_spill] sm:$0xff] }
 0x5d2   : > { %vm13108_vm1 = vnez %v13107_v59 }
 0x5d3   : > { %v2921_v53 = vmax.f32 %v2909_v36, 0.0  ;;  %6020 = vmatmul.msk.bf16.vlgmr.msra.gmra.mxu0 %vm13091_vm7, %v6902_v10  ;;  %v2930_v15 = vpack.c.bf16 %v2919_v45, %v2917_v40  ;;  %vm13098_vm7 = vnez %v13097_v48  ;;  %v2926_v36 = vld [vmem:[%s11785_s5 + $0xa0] sm:$0xf]  ;;  %v13125_v40 = vld [vmem:[#allocation18_spill] sm:$0xff] }
 0x5d4   : > { %6029 = vmatpush.bf16.msk.msrb.mxu0 %vm13090_vm3, %v12557_v54  ;;  %vm13096_vm3 = vnez %v13095_v51 }
 0x5d5   : > { %v2932_v60 = vpack.c.bf16 %v2921_v53, %v2921_v53  ;;  %v13111_v53 = vld [vmem:[#allocation10_spill] sm:$0xff] }
 0x5d7   : > { %v2979_v35 = vsel %vm13094_vm13, %v2932_v60, 0  ;;  %vm13100_vm13 = vnez %v13099_v63  ;;  %v13115_v60 = vld [vmem:[#allocation13_spill] sm:$0xff] }
 0x5d8   : > { %6031 = vmatpush.bf16.msk.msrb.mxu0 %vm13093_vm8, %v12557_v54  ;;  %v2910_v46 = vpop.f32.mrf.mxu3  ;;  %3009 = vmatpush.bf16.msra.mxu1 %v2979_v35  ;;  %vm13103_vm8 = vcmask 326656   ;;  %v13119_v35 = vld [vmem:[#allocation16_spill] sm:$0xff] }
 0x5d9   : > { %vm13104_vm15 = vmmov %vm13103_vm8  ;;  %v13127_v46 = vld [vmem:[#allocation27_spill] sm:$0xff] }
 0x5dc   : > { %6033 = vmatpush.bf16.msk.msrb.mxu0 %vm13096_vm3, %v12557_v54  ;;  %3010 = vmatpush.bf16.msra.mxu1 %v2930_v15  ;;  %vm13102_vm3 = vnez %v13101_v50  ;;  %v13131_v15 = vld [vmem:[#allocation29_spill] sm:$0xff] }
 0x5e0   : > { %6035 = vmatpush.bf16.msk.msrb.mxu0 %vm13098_vm7, %v12557_v54  ;;  %3011 = vmatpush.bf16.msra.mxu1 %v2928_v0  ;;  %vm13106_vm7 = vnez %v13105_v14  ;;  %v13135_v0 = vld [vmem:[#allocation31_spill] sm:$0xff] }
 0x5e1   : > { %v3044_v14 = vld [vmem:[%s11786_s6] sm:$0x1f] }
 0x5e3   : > { %6021 = vmatmul.msk.bf16.gmra.mxu0 %vm13103_vm8, %v6903_v20  ;;  %6023 = vmatmul.msk.bf16.vlgmr.msra.gmra.mxu1 %vm13104_vm15, %v6902_v10  ;;  %vm13112_vm8 = vnez %v13111_v53  ;;  %v2962_v10 = vunpack.c.l.b16 %v2926_v36  ;;  %vm13114_vm15 = vnez %v13113_v38  ;;  %v13139_v36 = vld [vmem:[#allocation33_spill] sm:$0xff]  ;;  %v7128_v38 = vmov 5  }
 0x5e4   : > { %6037 = vmatpush.bf16.msk.msrb.mxu0 %vm13100_vm13, %v12557_v54  ;;  %6045 = vmatpush.bf16.msk.msrb.mxu1 %vm13102_vm3, %v12557_v54  ;;  %vm13110_vm13 = vnez %v13109_v32  ;;  %vm13123_vm3 = vcmask 326656  }
 0x5e5   : > { %v2965_v45 = vpack.c.b16 %v2962_v10, %v2962_v10  ;;  %v13141_v10 = vld [vmem:[#allocation26_spill] sm:$0xff]  ;;  %6994 = vset.pattern.permute.xlu1 %v7128_v38 }
 0x5e6   : > { %3047 = vperm.xlu1 %6994, %v3044_v14   ;;  %v3037_v14 = vld [vmem:[%s11785_s5 + $0xa8] sm:$0x7] }
 0x5e8   : > { %6039 = vmatpush.bf16.msk.msrb.mxu0 %vm13106_vm7, %v12557_v54  ;;  %6047 = vmatpush.bf16.msk.msrb.mxu1 %vm13108_vm1, %v12557_v54  ;;  %vm13116_vm1 = vnez %v13115_v60  ;;  %vm13118_vm7 = vnez %v13117_v33 }
 0x5ec   : > { %6041 = vmatpush.bf16.msk.msrb.mxu0 %vm13110_vm13, %v12557_v54  ;;  %6049 = vmatpush.bf16.msk.msrb.mxu1 %vm13112_vm8, %v12557_v54  ;;  %vm13120_vm13 = vnez %v13119_v35  ;;  %vm13122_vm8 = vnez %v13121_v26  ;;  %v2951_v26 = vpop.permute.xlu1 %2950  ;;  %v2947_v35 = vpop.permute.xlu0 %2946 }
 0x5f0   : > { %6043 = vmatpush.bf16.msk.msrb.mxu0 %vm13114_vm15, %v12557_v54  ;;  %6051 = vmatpush.bf16.msk.msrb.mxu1 %vm13116_vm1, %v12557_v54  ;;  %vm13124_vm15 = vmmov %vm13123_vm3  ;;  %vm13126_vm1 = vnez %v13125_v40 }
 0x5f3   : > { %6022 = vmatmul.msk.bf16.gmra.mxu0 %vm13123_vm3, %v2965_v45  ;;  %6024 = vmatmul.msk.bf16.gmra.mxu1 %vm13124_vm15, %v6903_v20  ;;  %vm13134_vm3 = vnez %v13133_v22  ;;  %vm13136_vm15 = vnez %v13135_v0  ;;  %v13137_v20 = vld [vmem:[#allocation24_spill] sm:$0xff]  ;;  %v13144_v22 = vld [vmem:[#allocation35_spill] sm:$0xff] }
 0x5f4   : > { %6093 = vmatpush.bf16.msk.msra.mxu0 %vm13118_vm7, %v12557_v54  ;;  %6053 = vmatpush.bf16.msk.msrb.mxu1 %vm13120_vm13, %v12557_v54  ;;  %vm13128_vm7 = vnez %v13127_v46  ;;  %vm13132_vm13 = vnez %v13131_v15  ;;  %v13146_v0 = vld [vmem:[#allocation28_spill] sm:$0xff]  ;;  %v2935_v59 = vpop.permute.xlu1 %2934 }
 0x5f8   : > { %6095 = vmatpush.bf16.msk.msra.mxu0 %vm13122_vm8, %v12557_v54  ;;  %6055 = vmatpush.bf16.msk.msrb.mxu1 %vm13126_vm1, %v12557_v54  ;;  %vm13138_vm1 = vnez %v13137_v20  ;;  %v13148_v20 = vld [vmem:[#allocation37_spill] sm:$0xff] }
 0x5fc   : > { %6097 = vmatpush.bf16.msk.msra.mxu0 %vm13128_vm7, %v12557_v54  ;;  %6057 = vmatpush.bf16.msk.msrb.mxu1 %vm13130_vm5, %v12557_v54  ;;  %vm13140_vm7 = vnez %v13139_v36  ;;  %vm13142_vm5 = vnez %v13141_v10  ;;  %v13150_v36 = vld [vmem:[#allocation30_spill] sm:$0xff]  ;;  %v13152_v10 = vld [vmem:[#allocation32_spill] sm:$0xff] }
 0x600   : > { %6099 = vmatpush.bf16.msk.msra.mxu0 %vm13132_vm13, %v12557_v54  ;;  %6059 = vmatpush.bf16.msk.msrb.mxu1 %vm13134_vm3, %v12557_v54  ;;  %vm13143_vm13 = vcmask 326656   ;;  %vm13145_vm3 = vnez %v13144_v22  ;;  %v13156_v22 = vld [vmem:[#allocation36_spill] sm:$0xff] }
 0x603   : > { %6025 = vmatmul.msk.bf16.gmra.mxu1 %vm13143_vm13, %v2965_v45  ;;  %v13154_v45 = vld [vmem:[#allocation34_spill] sm:$0xff] }
 0x604   : > { %6101 = vmatpush.bf16.msk.msra.mxu0 %vm13136_vm15, %v12557_v54  ;;  %6109 = vmatpush.bf16.msk.msra.mxu1 %vm13138_vm1, %v12557_v54  ;;  %vm13147_vm15 = vnez %v13146_v0  ;;  %vm13149_vm1 = vnez %v13148_v20  ;;  %vm13155_vm13 = vnez %v13154_v45  ;;  %v13158_v0 = vld [vmem:[#allocation38_spill] sm:$0xff] }
 0x608   : > { %6103 = vmatpush.bf16.msk.msra.mxu0 %vm13140_vm7, %v12557_v54  ;;  %6111 = vmatpush.bf16.msk.msra.mxu1 %vm13142_vm5, %v12557_v54  ;;  %vm13151_vm7 = vnez %v13150_v36  ;;  %vm13153_vm5 = vnez %v13152_v10  ;;  %v2943_v10 = vpop.permute.xlu2 %2942 }
 0x60c   : > { %6105 = vmatpush.bf16.msk.msra.mxu0 %vm13145_vm3, %v12557_v54  ;;  %6113 = vmatpush.bf16.msk.msra.mxu1 %vm13147_vm15, %v12557_v54  ;;  %vm13157_vm3 = vnez %v13156_v22  ;;  %vm13159_vm15 = vnez %v13158_v0 }
 0x610   : > { %6107 = vmatpush.bf16.msk.msra.mxu0 %vm13149_vm1, %v12557_v54  ;;  %6115 = vmatpush.bf16.msk.msra.mxu1 %vm13151_vm7, %v12557_v54  ;;  %v2939_v32 = vpop.permute.xlu2 %2938  ;;  %vm13175_vm7 = vcmask 326656  }
 0x614   : > { %6117 = vmatpush.bf16.msk.msra.mxu1 %vm13153_vm5, %v12557_v54  ;;  %vm13166_vm5 = vcmask 1043456  }
 0x618   : > { %6119 = vmatpush.bf16.msk.msra.mxu1 %vm13155_vm13, %v12557_v54 }
 0x61c   : > { %6121 = vmatpush.bf16.msk.msra.mxu1 %vm13157_vm3, %v12557_v54 }
 0x620   : > { %6123 = vmatpush.bf16.msk.msra.mxu1 %vm13159_vm15, %v12557_v54  ;;  %vm13160_vm15 = vcmask 1043456  }
 0x650   : > { %v2990_v20 = vpop.f32.mrf.mxu0 }
 0x651   : > { %v2991_v48 = vadd.f32 %v2990_v20, %v2935_v59  ;;  %v13167_v20 = vld [vmem:[#allocation78_spill] sm:$0xff] }
 0x658   : > { %v2992_v15 = vpop.f32.mrf.mxu0 }
 0x659   : > { %v2993_v63 = vadd.f32 %v2992_v15, %v2939_v32 }
 0x660   : > { %v2995_v36 = vpop.f32.mrf.mxu0  ;;  %v3013_v42 = vpop.f32.mrf.mxu1 }
 0x661   : > { %v2996_v22 = vadd.f32 %v2995_v36, %v2943_v10  ;;  %v3029_v36 = vmax.f32 %v2993_v63, 0.0 }
 0x663   : > { %v3031_v51 = vmax.f32 %v2996_v22, 0.0  ;;  %v13161_v22 = vld [vmem:[#allocation74_spill] sm:$0xff] }
 0x664   : > { %vm13162_vm3 = vnez %v13161_v22 }
 0x668   : > { %v2997_v46 = vpop.f32.mrf.mxu0  ;;  %v3015_v40 = vpop.f32.mrf.mxu1 }
 0x669   : > { %v2998_v53 = vadd.f32 %v2997_v46, %v2947_v35  ;;  %v3027_v46 = vmax.f32 %v2991_v48, 0.0 }
 0x66b   : > { %v3033_v17 = vmax.f32 %v2998_v53, 0.0 }
 0x66d   : > { %v3040_v1 = vpack.c.bf16 %v3033_v17, %v3031_v51  ;;  %v3016_v17 = vadd.f32 %v3015_v40, %v2939_v32  ;;  %v13171_v40 = vld [vmem:[#allocation11_spill] sm:$0xff] }
 0x670   : > { %v3000_v33 = vpop.f32.mrf.mxu0  ;;  %v3018_v45 = vpop.f32.mrf.mxu1 }
 0x671   : > { %v3001_v60 = vadd.f32 %v3000_v33, %v2951_v26 }
 0x673   : > { %v3035_v0 = vmax.f32 %v3001_v60, 0.0  ;;  %v3038_v60 = vpack.c.bf16 %v3029_v36, %v3027_v46  ;;  %v13180_v36 = vld [vmem:[#allocation84_spill] sm:$0xff]  ;;  %v13182_v46 = vld [vmem:[#allocation79_spill] sm:$0xff] }
 0x675   : > { %v3042_v50 = vpack.c.bf16 %v3035_v0, %v3035_v0  ;;  %v3014_v0 = vadd.f32 %v3013_v42, %v2935_v59  ;;  %v13173_v59 = vld [vmem:[#allocation75_spill] sm:$0xff]  ;;  %v13176_v42 = vld [vmem:[#allocation14_spill] sm:$0xff] }
 0x677   : > { %v3054_v8 = vsel %vm13160_vm15, %v3042_v50, 0  ;;  %vm13163_vm15 = vcmask 326656  }
 0x678   : > { %v3020_v33 = vpop.f32.mrf.mxu1  ;;  %3064 = vmatpush.bf16.msrb.mxu2 %v3054_v8  ;;  %v3002_v38 = vpop.f32.mrf.mxu0  ;;  %v3019_v8 = vadd.f32 %v3018_v45, %v2943_v10  ;;  %v3028_v10 = vmax.f32 %v3014_v0, 0.0  ;;  %v13169_v45 = vld [vmem:[#allocation80_spill] sm:$0xff] }
 0x679   : > { %v3021_v50 = vadd.f32 %v3020_v33, %v2947_v35  ;;  %v3030_v35 = vmax.f32 %v3016_v17, 0.0  ;;  %v13178_v38 = vld [vmem:[#allocation77_spill] sm:$0xff]  ;;  %v13204_v0 = vld [vmem:[#allocation96_spill] sm:$0xff] }
 0x67a   : > { %vm13179_vm1 = vnez %v13178_v38  ;;  %v13198_v17 = vld [vmem:[#allocation85_spill] sm:$0xff] }
 0x67b   : > { %v3034_v51 = vmax.f32 %v3021_v50, 0.0  ;;  %v3039_v32 = vpack.c.bf16 %v3030_v35, %v3028_v10  ;;  %v13190_v50 = vld [vmem:[#allocation82_spill] sm:$0xff]  ;;  %v13210_v35 = vld [vmem:[#allocation91_spill] sm:$0xff]  ;;  %v13214_v10 = vld [vmem:[#allocation93_spill] sm:$0xff] }
 0x67c   : > { %3065 = vmatpush.bf16.msrb.mxu2 %v3040_v1  ;;  %v13164_v1 = vld [vmem:[#allocation76_spill] sm:$0xff] }
 0x67d   : > { %vm13165_vm13 = vnez %v13164_v1 }
 0x680   : > { %v3023_v62 = vpop.f32.mrf.mxu1  ;;  %3066 = vmatpush.bf16.msrb.mxu2 %v3038_v60  ;;  %v13184_v60 = vld [vmem:[#allocation86_spill] sm:$0xff] }
 0x681   : > { %v3024_v15 = vadd.f32 %v3023_v62, %v2951_v26  ;;  %v3032_v62 = vmax.f32 %v3019_v8, 0.0  ;;  %v13194_v8 = vld [vmem:[#allocation83_spill] sm:$0xff] }
 0x683   : > { %v3036_v53 = vmax.f32 %v3024_v15, 0.0  ;;  %6026 = vmatmul.msk.bf16.vlgmr.msrb.gmra.mxu2 %vm13163_vm15, %v3037_v14  ;;  %v3041_v33 = vpack.c.bf16 %v3034_v51, %v3032_v62  ;;  %vm13170_vm15 = vnez %v13169_v45  ;;  %v13188_v15 = vld [vmem:[#allocation88_spill] sm:$0xff]  ;;  %v13200_v51 = vld [vmem:[#allocation94_spill] sm:$0xff]  ;;  %v13206_v62 = vld [vmem:[#allocation89_spill] sm:$0xff] }
 0x684   : > { %6061 = vmatpush.bf16.msk.msra.mxu2 %vm13162_vm3, %v12557_v54  ;;  %vm13168_vm3 = vnez %v13167_v20 }
 0x685   : > { %v3043_v48 = vpack.c.bf16 %v3036_v53, %v3036_v53  ;;  %v13192_v53 = vld [vmem:[#allocation90_spill] sm:$0xff] }
 0x687   : > { %v3057_v63 = vsel %vm13166_vm5, %v3043_v48, 0  ;;  %vm13172_vm5 = vnez %v13171_v40  ;;  %v13196_v48 = vld [vmem:[#allocation92_spill] sm:$0xff]  ;;  %v6904_v40 = vld [vmem:[%s11785_s5 + $0xb0] sm:$0xff] }
 0x688   : > { %6063 = vmatpush.bf16.msk.msra.mxu2 %vm13165_vm13, %v12557_v54  ;;  %v3025_v26 = vpop.f32.mrf.mxu1  ;;  %3077 = vmatpush.bf16.msrb.mxu3 %v3057_v63  ;;  %vm13174_vm13 = vnez %v13173_v59  ;;  %v13202_v63 = vld [vmem:[#allocation87_spill] sm:$0xff] }
 0x689   : > { %v13208_v26 = vld [vmem:[#allocation98_spill] sm:$0xff] }
 0x68c   : > { %6065 = vmatpush.bf16.msk.msra.mxu2 %vm13168_vm3, %v12557_v54  ;;  %3078 = vmatpush.bf16.msrb.mxu3 %v3041_v33  ;;  %vm13177_vm3 = vnez %v13176_v42  ;;  %v13212_v33 = vld [vmem:[#allocation39_spill] sm:$0xff] }
 0x690   : > { %6067 = vmatpush.bf16.msk.msra.mxu2 %vm13170_vm15, %v12557_v54  ;;  %3079 = vmatpush.bf16.msrb.mxu3 %v3039_v32  ;;  %vm13181_vm15 = vnez %v13180_v36  ;;  %v13216_v32 = vld [vmem:[#allocation101_spill] sm:$0xff] }
 0x693   : > { %6027 = vmatmul.msk.bf16.vlgmr.msrb.gmra.mxu3 %vm13175_vm7, %v3037_v14  ;;  %v13186_v14 = vld [vmem:[#allocation81_spill] sm:$0xff] }
 0x694   : > { %6069 = vmatpush.bf16.msk.msra.mxu2 %vm13172_vm5, %v12557_v54  ;;  %6077 = vmatpush.bf16.msk.msra.mxu3 %vm13174_vm13, %v12557_v54  ;;  %vm13183_vm5 = vnez %v13182_v46  ;;  %vm13185_vm13 = vnez %v13184_v60  ;;  %vm13187_vm7 = vnez %v13186_v14 }
 0x698   : > { %6071 = vmatpush.bf16.msk.msra.mxu2 %vm13177_vm3, %v12557_v54  ;;  %6079 = vmatpush.bf16.msk.msra.mxu3 %vm13179_vm1, %v12557_v54  ;;  %vm13189_vm3 = vnez %v13188_v15  ;;  %vm13191_vm1 = vnez %v13190_v50 }
 0x69c   : > { %6073 = vmatpush.bf16.msk.msra.mxu2 %vm13181_vm15, %v12557_v54  ;;  %6081 = vmatpush.bf16.msk.msra.mxu3 %vm13183_vm5, %v12557_v54  ;;  %vm13193_vm15 = vnez %v13192_v53  ;;  %vm13195_vm5 = vnez %v13194_v8 }
 0x6a0   : > { %6075 = vmatpush.bf16.msk.msra.mxu2 %vm13185_vm13, %v12557_v54  ;;  %6083 = vmatpush.bf16.msk.msra.mxu3 %vm13187_vm7, %v12557_v54  ;;  %vm13197_vm13 = vnez %v13196_v48  ;;  %vm13199_vm7 = vnez %v13198_v17 }
 0x6a4   : > { %6125 = vmatpush.bf16.msk.msrb.mxu2 %vm13189_vm3, %v12557_v54  ;;  %6085 = vmatpush.bf16.msk.msra.mxu3 %vm13191_vm1, %v12557_v54  ;;  %vm13201_vm3 = vnez %v13200_v51  ;;  %vm13203_vm1 = vnez %v13202_v63  ;;  %v3085_v63 = vmul.f32 0.5, %v13086_v44  ;;  %v13233_v44 = vld [vmem:[#allocation44_spill] sm:$0xff] }
 0x6a8   : > { %6127 = vmatpush.bf16.msk.msrb.mxu2 %vm13193_vm15, %v12557_v54  ;;  %6087 = vmatpush.bf16.msk.msra.mxu3 %vm13195_vm5, %v12557_v54  ;;  %vm13205_vm15 = vnez %v13204_v0  ;;  %vm13207_vm5 = vnez %v13206_v62  ;;  %v13218_v62 = vld [vmem:[#allocation95_spill] sm:$0xff] }
 0x6ac   : > { %6129 = vmatpush.bf16.msk.msrb.mxu2 %vm13197_vm13, %v12557_v54  ;;  %6089 = vmatpush.bf16.msk.msra.mxu3 %vm13199_vm7, %v12557_v54  ;;  %vm13209_vm13 = vnez %v13208_v26  ;;  %vm13211_vm7 = vnez %v13210_v35  ;;  %v13220_v26 = vld [vmem:[#allocation97_spill] sm:$0xff]  ;;  %v13222_v35 = vld [vmem:[#allocation99_spill] sm:$0xff] }
 0x6b0   : > { %6131 = vmatpush.bf16.msk.msrb.mxu2 %vm13201_vm3, %v12557_v54  ;;  %6091 = vmatpush.bf16.msk.msra.mxu3 %vm13203_vm1, %v12557_v54  ;;  %vm13213_vm3 = vnez %v13212_v33  ;;  %vm13215_vm1 = vnez %v13214_v10  ;;  %v13224_v33 = vld [vmem:[#allocation100_spill] sm:$0xff]  ;;  %v13226_v10 = vld [vmem:[#allocation102_spill] sm:$0xff] }
 0x6b4   : > { %6133 = vmatpush.bf16.msk.msrb.mxu2 %vm13205_vm15, %v12557_v54  ;;  %6141 = vmatpush.bf16.msk.msrb.mxu3 %vm13207_vm5, %v12557_v54  ;;  %vm13217_vm15 = vnez %v13216_v32  ;;  %vm13219_vm5 = vnez %v13218_v62  ;;  %v3048_v32 = vpop.permute.xlu1 %3047 }
 0x6b8   : > { %6135 = vmatpush.bf16.msk.msrb.mxu2 %vm13209_vm13, %v12557_v54  ;;  %6143 = vmatpush.bf16.msk.msrb.mxu3 %vm13211_vm7, %v12557_v54  ;;  %vm13221_vm13 = vnez %v13220_v26  ;;  %vm13223_vm7 = vnez %v13222_v35 }
 0x6bc   : > { %6137 = vmatpush.bf16.msk.msrb.mxu2 %vm13213_vm3, %v12557_v54  ;;  %6145 = vmatpush.bf16.msk.msrb.mxu3 %vm13215_vm1, %v12557_v54  ;;  %vm13225_vm3 = vnez %v13224_v33  ;;  %vm13227_vm1 = vnez %v13226_v10  ;;  %v13229_v10 = vld [vmem:[#allocation42_spill] sm:$0xff] }
 0x6c0   : > { %6139 = vmatpush.bf16.msk.msrb.mxu2 %vm13217_vm15, %v12557_v54  ;;  %6147 = vmatpush.bf16.msk.msrb.mxu3 %vm13219_vm5, %v12557_v54 }
 0x6c4   : > { %6149 = vmatpush.bf16.msk.msrb.mxu3 %vm13221_vm13, %v12557_v54 }
 0x6c8   : > { %6151 = vmatpush.bf16.msk.msrb.mxu3 %vm13223_vm7, %v12557_v54  ;;  %vm13234_vm7 = vnez %v13233_v44  ;;  %v13242_v44 = vld [vmem:[#allocation48_spill] sm:$0xff] }
 0x6cc   : > { %6153 = vmatpush.bf16.msk.msrb.mxu3 %vm13225_vm3, %v12557_v54 }
 0x6d0   : > { %6155 = vmatpush.bf16.msk.msrb.mxu3 %vm13227_vm1, %v12557_v54  ;;  %vm13230_vm1 = vnez %v13229_v10  ;;  %v13239_v10 = vld [vmem:[#allocation107_spill] sm:$0xff] }
 0x706   : > { %v3068_v0 = vpop.f32.mrf.mxu2 }
 0x707   : > { %v3069_v62 = vadd.f32 %v3068_v0, %v3048_v32  ;;  %v13231_v0 = vld [vmem:[#allocation103_spill] sm:$0xff] }
 0x708   : > { %vm13232_vm3 = vnez %v13231_v0  ;;  %v3086_v0 = vmul.f32 0.5, %v13087_v30  ;;  %v13246_v30 = vld [vmem:[#allocation50_spill] sm:$0xff] }
 0x709   : > { %v3087_v51 = vmul.f32 0.5, %v3069_v62  ;;  %v13237_v62 = vld [vmem:[#allocation46_spill] sm:$0xff] }
 0x70a   : > { %vm13238_vm5 = vnez %v13237_v62 }
 0x70b   : > { %v10219_v26 = vadd.f32 %v3087_v51, %v3085_v63  ;;  %v13235_v51 = vld [vmem:[#allocation105_spill] sm:$0xff] }
 0x70c   : > { %vm13236_vm13 = vnez %v13235_v51  ;;  %v13244_v51 = vld [vmem:[#allocation109_spill] sm:$0xff] }
 0x70d   : > { %13228 = vst [vmem:[#allocation40_spill] sm:$0xff] %v10219_v26  ;;  %v10223_v35 = vpack.c.bf16 %v10219_v26, %v10219_v26 }
 0x70e   : > { %v3070_v17 = vpop.f32.mrf.mxu2 }
 0x70f   : > { %3117 = vmatmul.bf16.vlgmr.msrb.gmra.mxu0 %v10223_v35  ;;  %3143 = vmatmul.bf16.vlgmr.msra.gmra.mxu2 %v10223_v35 }
 0x710   : > { %6157 = vmatpush.bf16.msk.msrb.mxu0 %vm13230_vm1, %v12557_v54  ;;  %6189 = vmatpush.bf16.msk.msra.mxu2 %vm13232_vm3, %v12557_v54  ;;  %vm13240_vm1 = vnez %v13239_v10 }
 0x714   : > { %6159 = vmatpush.bf16.msk.msrb.mxu0 %vm13234_vm7, %v12557_v54  ;;  %6191 = vmatpush.bf16.msk.msra.mxu2 %vm13236_vm13, %v12557_v54  ;;  %vm13243_vm7 = vnez %v13242_v44  ;;  %vm13245_vm13 = vnez %v13244_v51  ;;  %v13256_v51 = vld [vmem:[#allocation45_spill] sm:$0xff] }
 0x715   : > { %vm13257_vm15 = vnez %v13256_v51  ;;  %v13268_v51 = vld [vmem:[#allocation108_spill] sm:$0xff]  ;;  %v13306_v44 = vld [vmem:[#allocation57_spill] sm:$0xff] }
 0x716   : > { %v3081_v17 = vpop.f32.mrf.mxu3 }
 0x717   : > { %v3082_v63 = vadd.f32 %v3081_v17, %v3048_v32 }
 0x718   : > { %6161 = vmatpush.bf16.msk.msrb.mxu0 %vm13238_vm5, %v12557_v54  ;;  %6193 = vmatpush.bf16.msk.msra.mxu2 %vm13240_vm1, %v12557_v54 }
 0x719   : > { %v3088_v33 = vmul.f32 0.5, %v3082_v63  ;;  %v13252_v63 = vld [vmem:[#allocation104_spill] sm:$0xff] }
 0x71a   : > { %vm13253_vm5 = vnez %v13252_v63  ;;  %v13264_v63 = vld [vmem:[#allocation47_spill] sm:$0xff] }
 0x71b   : > { %v10246_v48 = vadd.f32 %v3088_v33, %v3086_v0  ;;  %v13248_v33 = vld [vmem:[#allocation43_spill] sm:$0xff] }
 0x71c   : > { %6163 = vmatpush.bf16.msk.msrb.mxu0 %vm13243_vm7, %v12557_v54  ;;  %6195 = vmatpush.bf16.msk.msra.mxu2 %vm13245_vm13, %v12557_v54  ;;  %vm13247_vm7 = vnez %v13246_v30  ;;  %vm13249_vm13 = vnez %v13248_v33  ;;  %v13250_v0 = vld [vmem:[#allocation111_spill] sm:$0xff]  ;;  %v13258_v30 = vld [vmem:[#allocation113_spill] sm:$0xff]  ;;  %v13260_v33 = vld [vmem:[#allocation106_spill] sm:$0xff] }
 0x71d   : > { %13241 = vst [vmem:[#allocation41_spill] sm:$0xff] %v10246_v48  ;;  %v10256_v32 = vpack.c.bf16 %v10246_v48, %v10246_v48  ;;  %vm13251_vm1 = vnez %v13250_v0  ;;  %v13262_v0 = vld [vmem:[#allocation54_spill] sm:$0xff] }
 0x71e   : > { %v3083_v17 = vpop.f32.mrf.mxu3 }
 0x71f   : > { %3130 = vmatmul.bf16.vlgmr.msrb.gmra.mxu1 %v10256_v32  ;;  %3156 = vmatmul.bf16.vlgmr.msra.gmra.mxu3 %v10256_v32  ;;  %v13254_v17 = vld [vmem:[#allocation52_spill] sm:$0xff] }
 0x720   : > { %3169 = vmatmul.bf16.vlgmr.msra.gmra.mxu0 %v10223_v35  ;;  %3195 = vmatmul.bf16.vlgmr.msrb.gmra.mxu2 %v10223_v35  ;;  %vm13255_vm3 = vnez %v13254_v17  ;;  %v13266_v17 = vld [vmem:[#allocation115_spill] sm:$0xff] }
 0x721   : > { %6165 = vmatpush.bf16.msk.msrb.mxu0 %vm13247_vm7, %v12557_v54  ;;  %6173 = vmatpush.bf16.msk.msrb.mxu1 %vm13249_vm13, %v12557_v54  ;;  %vm13259_vm7 = vnez %v13258_v30  ;;  %vm13261_vm13 = vnez %v13260_v33  ;;  %v13270_v30 = vld [vmem:[#allocation56_spill] sm:$0xff]  ;;  %v13272_v33 = vld [vmem:[#allocation49_spill] sm:$0xff] }
 0x722   : > { %6197 = vmatpush.bf16.msk.msra.mxu2 %vm13251_vm1, %v12557_v54  ;;  %6205 = vmatpush.bf16.msk.msra.mxu3 %vm13253_vm5, %v12557_v54  ;;  %vm13263_vm1 = vnez %v13262_v0  ;;  %vm13265_vm5 = vnez %v13264_v63  ;;  %v13274_v0 = vld [vmem:[#allocation117_spill] sm:$0xff]  ;;  %v13276_v63 = vld [vmem:[#allocation110_spill] sm:$0xff] }
 0x725   : > { %6167 = vmatpush.bf16.msk.msrb.mxu0 %vm13255_vm3, %v12557_v54  ;;  %6175 = vmatpush.bf16.msk.msrb.mxu1 %vm13257_vm15, %v12557_v54  ;;  %vm13267_vm3 = vnez %v13266_v17  ;;  %vm13269_vm15 = vnez %v13268_v51  ;;  %v13278_v17 = vld [vmem:[#allocation58_spill] sm:$0xff]  ;;  %v13280_v51 = vld [vmem:[#allocation119_spill] sm:$0xff] }
 0x726   : > { %6199 = vmatpush.bf16.msk.msra.mxu2 %vm13259_vm7, %v12557_v54  ;;  %6207 = vmatpush.bf16.msk.msra.mxu3 %vm13261_vm13, %v12557_v54  ;;  %vm13271_vm7 = vnez %v13270_v30  ;;  %vm13273_vm13 = vnez %v13272_v33  ;;  %v13290_v33 = vld [vmem:[#allocation53_spill] sm:$0xff]  ;;  %v13294_v30 = vld [vmem:[#allocation62_spill] sm:$0xff] }
 0x729   : > { %6169 = vmatpush.bf16.msk.msrb.mxu0 %vm13263_vm1, %v12557_v54  ;;  %6177 = vmatpush.bf16.msk.msrb.mxu1 %vm13265_vm5, %v12557_v54  ;;  %vm13275_vm1 = vnez %v13274_v0  ;;  %vm13277_vm5 = vnez %v13276_v63  ;;  %v13282_v0 = vld [vmem:[#allocation51_spill] sm:$0xff]  ;;  %v13284_v63 = vld [vmem:[#allocation112_spill] sm:$0xff] }
 0x72a   : > { %6201 = vmatpush.bf16.msk.msra.mxu2 %vm13267_vm3, %v12557_v54  ;;  %6209 = vmatpush.bf16.msk.msra.mxu3 %vm13269_vm15, %v12557_v54  ;;  %vm13279_vm3 = vnez %v13278_v17  ;;  %vm13281_vm15 = vnez %v13280_v51  ;;  %v13286_v17 = vld [vmem:[#allocation60_spill] sm:$0xff]  ;;  %v13288_v51 = vld [vmem:[#allocation121_spill] sm:$0xff] }
 0x72d   : > { %6171 = vmatpush.bf16.msk.msrb.mxu0 %vm13271_vm7, %v12557_v54  ;;  %6179 = vmatpush.bf16.msk.msrb.mxu1 %vm13273_vm13, %v12557_v54  ;;  %vm13291_vm13 = vnez %v13290_v33  ;;  %vm13295_vm7 = vnez %v13294_v30  ;;  %v13302_v33 = vld [vmem:[#allocation64_spill] sm:$0xff]  ;;  %v3095_v30 = vmul.f32 0.5, %v9842_v56  ;;  %v13314_v56 = vld [vmem:[#allocation66_spill] sm:$0xff] }
 0x72e   : > { %6203 = vmatpush.bf16.msk.msra.mxu2 %vm13275_vm1, %v12557_v54  ;;  %6211 = vmatpush.bf16.msk.msra.mxu3 %vm13277_vm5, %v12557_v54  ;;  %vm13283_vm1 = vnez %v13282_v0  ;;  %vm13285_vm5 = vnez %v13284_v63  ;;  %v13292_v0 = vld [vmem:[#allocation114_spill] sm:$0xff]  ;;  %v13296_v63 = vld [vmem:[#allocation123_spill] sm:$0xff] }
 0x72f   : > { %3182 = vmatmul.bf16.vlgmr.msra.gmra.mxu1 %v10256_v32  ;;  %3208 = vmatmul.bf16.vlgmr.msrb.gmra.mxu3 %v10256_v32 }
 0x730   : > { %3221 = vmatmul.bf16.vlgmr.msrb.gmra.mxu0 %v10223_v35 }
 0x731   : > { %6221 = vmatpush.bf16.msk.msra.mxu0 %vm13279_vm3, %v12557_v54  ;;  %6181 = vmatpush.bf16.msk.msrb.mxu1 %vm13283_vm1, %v12557_v54  ;;  %vm13287_vm3 = vnez %v13286_v17  ;;  %vm13293_vm1 = vnez %v13292_v0  ;;  %v13298_v17 = vld [vmem:[#allocation55_spill] sm:$0xff]  ;;  %v13304_v0 = vld [vmem:[#allocation125_spill] sm:$0xff] }
 0x732   : > { %6253 = vmatpush.bf16.msk.msrb.mxu2 %vm13281_vm15, %v12557_v54  ;;  %6213 = vmatpush.bf16.msk.msra.mxu3 %vm13285_vm5, %v12557_v54  ;;  %vm13289_vm15 = vnez %v13288_v51  ;;  %vm13297_vm5 = vnez %v13296_v63  ;;  %v13300_v51 = vld [vmem:[#allocation116_spill] sm:$0xff]  ;;  %v3097_v63 = vmul.f32 0.5, %v9879_v34  ;;  %v13316_v34 = vld [vmem:[#allocation127_spill] sm:$0xff] }
 0x733   : > { %3247 = vmatmul.bf16.vlgmr.msra.gmra.mxu2 %v10223_v35 }
 0x735   : > { %6223 = vmatpush.bf16.msk.msra.mxu0 %vm13287_vm3, %v12557_v54  ;;  %6183 = vmatpush.bf16.msk.msrb.mxu1 %vm13291_vm13, %v12557_v54  ;;  %vm13299_vm3 = vnez %v13298_v17  ;;  %vm13303_vm13 = vnez %v13302_v33  ;;  %v13308_v17 = vld [vmem:[#allocation135_spill] sm:$0xff] }
 0x736   : > { %6255 = vmatpush.bf16.msk.msrb.mxu2 %vm13289_vm15, %v12557_v54  ;;  %6215 = vmatpush.bf16.msk.msra.mxu3 %vm13293_vm1, %v12557_v54  ;;  %vm13301_vm15 = vnez %v13300_v51  ;;  %vm13305_vm1 = vnez %v13304_v0  ;;  %v3091_v10 = vmul.f32 0.5, %v13308_v17  ;;  %v13309_v51 = vld [vmem:[#allocation118_spill] sm:$0xff]  ;;  %v13311_v33 = vld [vmem:[#allocation59_spill] sm:$0xff]  ;;  %v13318_v17 = vld [vmem:[#allocation120_spill] sm:$0xff] }
 0x737   : > { %v13313_v0 = vld [vmem:[#allocation138_spill] sm:$0xff] }
 0x738   : > { %v3093_v62 = vmul.f32 0.5, %v13313_v0  ;;  %v13320_v0 = vld [vmem:[#allocation61_spill] sm:$0xff] }
 0x739   : > { %6225 = vmatpush.bf16.msk.msra.mxu0 %vm13295_vm7, %v12557_v54  ;;  %6185 = vmatpush.bf16.msk.msrb.mxu1 %vm13299_vm3, %v12557_v54  ;;  %vm13317_vm3 = vnez %v13316_v34 }
 0x73a   : > { %6257 = vmatpush.bf16.msk.msrb.mxu2 %vm13297_vm5, %v12557_v54  ;;  %6217 = vmatpush.bf16.msk.msra.mxu3 %vm13301_vm15, %v12557_v54  ;;  %vm13307_vm5 = vnez %v13306_v44  ;;  %vm13310_vm15 = vnez %v13309_v51  ;;  %v10375_v44 = vadd.f32 %v3095_v30, %v3091_v10  ;;  %v13324_v10 = vld [vmem:[#allocation129_spill] sm:$0xff]  ;;  %v13326_v30 = vld [vmem:[#allocation122_spill] sm:$0xff] }
 0x73b   : > { %v13338_v51 = vld [vmem:[#allocation65_spill] sm:$0xff] }
 0x73d   : > { %6227 = vmatpush.bf16.msk.msra.mxu0 %vm13303_vm13, %v12557_v54  ;;  %6187 = vmatpush.bf16.msk.msrb.mxu1 %vm13307_vm5, %v12557_v54  ;;  %vm13312_vm13 = vnez %v13311_v33  ;;  %vm13319_vm5 = vnez %v13318_v17  ;;  %v10381_v33 = vadd.f32 %v3097_v63, %v3093_v62  ;;  %v13336_v17 = vld [vmem:[#allocation124_spill] sm:$0xff] }
 0x73e   : > { %6259 = vmatpush.bf16.msk.msrb.mxu2 %vm13305_vm1, %v12557_v54  ;;  %6219 = vmatpush.bf16.msk.msra.mxu3 %vm13310_vm15, %v12557_v54  ;;  %vm13315_vm1 = vnez %v13314_v56  ;;  %v13322_v56 = vld [vmem:[#allocation68_spill] sm:$0xff]  ;;  %vm13328_vm15 = vcmask 1043456  }
 0x73f   : > { %v3103_v62 = vsel %vm13328_vm15, %v10375_v44, 0.0  ;;  %vm13329_vm7 = vmmov %vm13328_vm15  ;;  %vm13339_vm15 = vnez %v13338_v51  ;;  %v3098_v51 = vmul.f32 0.5, %v9933_v49 }
 0x740   : > { %3234 = vmatmul.bf16.vlgmr.msrb.gmra.mxu1 %v10256_v32  ;;  %v3105_v63 = vsel %vm13329_vm7, %v10381_v33, 0.0 }
 0x741   : > { %6237 = vmatpush.bf16.msk.msra.mxu1 %vm13312_vm13, %v12557_v54  ;;  %6229 = vmatpush.bf16.msk.msra.mxu0 %vm13315_vm1, %v12557_v54  ;;  %vm13321_vm13 = vnez %v13320_v0  ;;  %vm13323_vm1 = vnez %v13322_v56  ;;  %v13330_v0 = vld [vmem:[#allocation63_spill] sm:$0xff]  ;;  %v13332_v56 = vld [vmem:[#allocation70_spill] sm:$0xff]  ;;  %v3336_v34 = vpack.c.bf16 %v3105_v63, %v3105_v63 }
 0x742   : > { %6261 = vmatpush.bf16.msk.msrb.mxu2 %vm13317_vm3, %v12557_v54  ;;  %6269 = vmatpush.bf16.msk.msrb.mxu3 %vm13319_vm5, %v12557_v54  ;;  %vm13325_vm3 = vnez %v13324_v10  ;;  %vm13327_vm5 = vnez %v13326_v30  ;;  %v13334_v10 = vld [vmem:[#allocation131_spill] sm:$0xff]  ;;  %v3334_v30 = vpack.c.bf16 %v3103_v62, %v3103_v62  ;;  %v3096_v62 = vmul.f32 0.5, %v9928_v57 }
 0x743   : > { %3260 = vmatmul.bf16.vlgmr.msra.gmra.mxu3 %v10256_v32  ;;  %v13350_v57 = vld [vmem:[#allocation67_spill] sm:$0xff] }
 0x745   : > { %6239 = vmatpush.bf16.msk.msra.mxu1 %vm13321_vm13, %v12557_v54  ;;  %6231 = vmatpush.bf16.msk.msra.mxu0 %vm13323_vm1, %v12557_v54  ;;  %vm13331_vm13 = vnez %v13330_v0  ;;  %vm13333_vm1 = vnez %v13332_v56  ;;  %v13340_v0 = vld [vmem:[#allocation72_spill] sm:$0xff]  ;;  %v13342_v56 = vld [vmem:[#allocation133_spill] sm:$0xff] }
 0x746   : > { %6263 = vmatpush.bf16.msk.msrb.mxu2 %vm13325_vm3, %v12557_v54  ;;  %6271 = vmatpush.bf16.msk.msrb.mxu3 %vm13327_vm5, %v12557_v54  ;;  %vm13335_vm3 = vnez %v13334_v10  ;;  %vm13337_vm5 = vnez %v13336_v17  ;;  %vm13341_vm7 = vnez %v13340_v0  ;;  %v13345_v17 = vld [vmem:[#allocation126_spill] sm:$0xff]  ;;  %v13348_v0 = vld [vmem:[#allocation136_spill] sm:$0xff] }
 0x747   : > { %v3092_v8 = vmul.f32 0.5, %v13348_v0  ;;  %v13365_v0 = vld [vmem:[#allocation73_spill] sm:$0xff] }
 0x749   : > { %6241 = vmatpush.bf16.msk.msra.mxu1 %vm13331_vm13, %v12557_v54  ;;  %6233 = vmatpush.bf16.msk.msra.mxu0 %vm13333_vm1, %v12557_v54  ;;  %vm13343_vm1 = vnez %v13342_v56  ;;  %vm13344_vm13 = vcmask 1043456   ;;  %v13349_v56 = vld [vmem:[#allocation139_spill] sm:$0xff] }
 0x74a   : > { %6265 = vmatpush.bf16.msk.msrb.mxu2 %vm13335_vm3, %v12557_v54  ;;  %6273 = vmatpush.bf16.msk.msrb.mxu3 %vm13337_vm5, %v12557_v54  ;;  %v3381_v10 = vsel %vm13344_vm13, %v3334_v30, 0  ;;  %vm13346_vm5 = vnez %v13345_v17  ;;  %vm13347_vm3 = vmmov %vm13344_vm13  ;;  %v3094_v30 = vmul.f32 0.5, %v13349_v56  ;;  %vm13351_vm13 = vnez %v13350_v57 }
 0x74b   : > { %v3387_v63 = vsel %vm13347_vm3, %v3336_v34, 0  ;;  %v10435_v17 = vadd.f32 %v3096_v62, %v3092_v8  ;;  %v13355_v34 = vld [vmem:[#allocation69_spill] sm:$0xff]  ;;  %v13361_v62 = vld [vmem:[#allocation71_spill] sm:$0xff] }
 0x74c   : > { %v10440_v49 = vadd.f32 %v3098_v51, %v3094_v30  ;;  %v13363_v30 = vld [vmem:[#allocation132_spill] sm:$0xff] }
 0x74d   : > { %6243 = vmatpush.bf16.msk.msra.mxu1 %vm13339_vm15, %v12557_v54  ;;  %6235 = vmatpush.bf16.msk.msra.mxu0 %vm13341_vm7, %v12557_v54  ;;  %vm13359_vm7 = vcmask 1043456   ;;  %vm13362_vm15 = vnez %v13361_v62 }
 0x74e   : > { %6267 = vmatpush.bf16.msk.msrb.mxu2 %vm13343_vm1, %v12557_v54  ;;  %6275 = vmatpush.bf16.msk.msrb.mxu3 %vm13346_vm5, %v12557_v54  ;;  %13354 = vst [vmem:[#allocation180_spill] sm:$0xff] %v10440_v49  ;;  %vm13356_vm5 = vnez %v13355_v34  ;;  %v13368_v34 = vld [vmem:[#allocation134_spill] sm:$0xff] }
 0x750   : > { %3273 = vmatmul.bf16.vlgmr.msra.gmra.mxu0 %v10223_v35 }
 0x751   : > { %3398 = vmatpush.bf16.msrb.mxu0 %v3381_v10  ;;  %3299 = vmatmul.bf16.vlgmr.msrb.gmra.mxu2 %v10223_v35  ;;  %v13352_v10 = vld [vmem:[#allocation128_spill] sm:$0xff]  ;;  %v13357_v35 = vld [vmem:[#allocation130_spill] sm:$0xff] }
 0x752   : > { %3444 = vmatpush.bf16.msra.mxu2 %v3387_v63  ;;  %6245 = vmatpush.bf16.msk.msra.mxu1 %vm13351_vm13, %v12557_v54  ;;  %vm13353_vm3 = vnez %v13352_v10  ;;  %vm13358_vm1 = vnez %v13357_v35  ;;  %v3104_v63 = vsel %vm13359_vm7, %v10435_v17, 0.0  ;;  %vm13360_vm13 = vmmov %vm13359_vm7 }
 0x753   : > { %6277 = vmatpush.bf16.msk.msrb.mxu3 %vm13353_vm3, %v12557_v54  ;;  %v3106_v8 = vsel %vm13360_vm13, %v10440_v49, 0.0  ;;  %v3335_v51 = vpack.c.bf16 %v3104_v63, %v3104_v63  ;;  %vm13364_vm3 = vnez %v13363_v30 }
 0x754   : > { %v3337_v56 = vpack.c.bf16 %v3106_v8, %v3106_v8 }
 0x756   : > { %6247 = vmatpush.bf16.msk.msra.mxu1 %vm13356_vm5, %v12557_v54  ;;  %vm13366_vm5 = vnez %v13365_v0 }
 0x757   : > { %6279 = vmatpush.bf16.msk.msrb.mxu3 %vm13358_vm1, %v12557_v54  ;;  %vm13367_vm1 = vmmov %vm13359_vm7  ;;  %vm13369_vm7 = vnez %v13368_v34 }
 0x758   : > { %v3384_v35 = vsel %vm13367_vm1, %v3335_v51, 0  ;;  %vm13370_vm13 = vmmov %vm13367_vm1 }
 0x759   : > { %v3390_v62 = vsel %vm13370_vm13, %v3337_v56, 0  ;;  %vm13373_vm13 = vcmask 195584  }
 0x75a   : > { %6249 = vmatpush.bf16.msk.msra.mxu1 %vm13362_vm15, %v12557_v54 }
 0x75b   : > { %6281 = vmatpush.bf16.msk.msrb.mxu3 %vm13364_vm3, %v12557_v54 }
 0x75e   : > { %6251 = vmatpush.bf16.msk.msra.mxu1 %vm13366_vm5, %v12557_v54 }
 0x75f   : > { %6283 = vmatpush.bf16.msk.msrb.mxu3 %vm13369_vm7, %v12557_v54  ;;  %vm13374_vm7 = vmmov %vm13373_vm13 }
 0x760   : > { %vm13377_vm5 = vmmov %vm13374_vm7 }
 0x761   : > { %3286 = vmatmul.bf16.vlgmr.msra.gmra.mxu1 %v10256_v32  ;;  %vm13379_vm3 = vmmov %vm13377_vm5 }
 0x762   : > { %3421 = vmatpush.bf16.msrb.mxu1 %v3384_v35  ;;  %3312 = vmatmul.bf16.vlgmr.msrb.gmra.mxu3 %v10256_v32  ;;  %vm13380_vm15 = vmmov %vm13379_vm3 }
 0x763   : > { %3467 = vmatpush.bf16.msra.mxu3 %v3390_v62  ;;  %vm13381_vm8 = vmmov %vm13379_vm3 }
 0x764   : > { %vm13382_vm10 = vmmov %vm13379_vm3 }
 0x765   : > { %vm13383_vm0 = vmmov %vm13379_vm3 }
 0x78c   : > { %v3118_v63 = vpop.f32.mrf.mxu0 }
 0x792   : > { %v3144_v8 = vpop.f32.mrf.mxu2 }
 0x794   : > { %v3120_v30 = vpop.f32.mrf.mxu0 }
 0x79a   : > { %v3146_v10 = vpop.f32.mrf.mxu2 }
 0x79c   : > { %v3131_v0 = vpop.f32.mrf.mxu1 }
 0x79d   : > { %v3170_v57 = vpop.f32.mrf.mxu0  ;;  %v3132_v59 = vadd.f32 %v3131_v0, %v3118_v63  ;;  %v3329_v0 = vld [vmem:[%s11785_s5 + $0xc0] sm:$0xf] }
 0x7a2   : > { %v3157_v53 = vpop.f32.mrf.mxu3 }
 0x7a3   : > { %v3196_v51 = vpop.f32.mrf.mxu2 }
 0x7a4   : > { %v3133_v50 = vpop.f32.mrf.mxu1 }
 0x7a5   : > { %v3172_v15 = vpop.f32.mrf.mxu0  ;;  %v13371_v50 = vld [vmem:[#allocation137_spill] sm:$0xff] }
 0x7a6   : > { %vm13372_vm1 = vnez %v13371_v50  ;;  %v3158_v15 = vadd.f32 %v3157_v53, %v3144_v8 }
 0x7aa   : > { %v3159_v34 = vpop.f32.mrf.mxu3 }
 0x7ab   : > { %v3198_v14 = vpop.f32.mrf.mxu2 }
 0x7ac   : > { %v3183_v35 = vpop.f32.mrf.mxu1 }
 0x7ad   : > { %v3222_v60 = vpop.f32.mrf.mxu0  ;;  %v3184_v8 = vadd.f32 %v3183_v35, %v3170_v57 }
 0x7b2   : > { %v3209_v56 = vpop.f32.mrf.mxu3 }
 0x7b4   : > { %v3185_v46 = vpop.f32.mrf.mxu1 }
 0x7b5   : > { %v3224_v36 = vpop.f32.mrf.mxu0  ;;  %v6905_v46 = vld [vmem:[%s11785_s5 + $0xb8] sm:$0xff] }
 0x7b6   : > { %v3248_v62 = vpop.f32.mrf.mxu2 }
 0x7ba   : > { %v3211_v38 = vpop.f32.mrf.mxu3 }
 0x7bd   : > { %v3235_v42 = vpop.f32.mrf.mxu1 }
 0x7be   : > { %v3250_v32 = vpop.f32.mrf.mxu2  ;;  %v3236_v30 = vadd.f32 %v3235_v42, %v3222_v60 }
 0x7bf   : > { %v3367_v32 = vunpack.c.l.b16 %v3329_v0 }
 0x7c0   : > { %v6293_v10 = vpack.c.bf16 %v3236_v30, %v3132_v59  ;;  %v7129_v59 = vmov 6  }
 0x7c1   : > { %6997 = vset.pattern.permute.xlu1 %v7129_v59  ;;  %6996 = vset.pattern.permute.xlu0 %v7129_v59 }
 0x7c2   : > { %6294 = vmatpush.bf16.msk.msrb.mxu0 %vm13372_vm1, %v6293_v10  ;;  %3351 = vperm.xlu1 %6997, %v9952_v12   ;;  %v3370_v10 = vpack.c.b16 %v3367_v32, %v3367_v32 }
 0x7c3   : > { %3347 = vperm.xlu0 %6996, %v9946_v41   ;;  %6995 = vset.pattern.permute.xlu2 %v7129_v59 }
 0x7c4   : > { %3355 = vperm.xlu2 %6995, %v9940_v24  }
 0x7c5   : > { %v3237_v45 = vpop.f32.mrf.mxu1  ;;  %6295 = vmatmul.msk.bf16.vlgmr.msrb.gmra.mxu0 %vm13373_vm13, %v6904_v40  ;;  %vm13375_vm13 = vmmov %vm13374_vm7 }
 0x7c6   : > { %v3261_v14 = vpop.f32.mrf.mxu3 }
 0x7c7   : > { %v3262_v34 = vadd.f32 %v3261_v14, %v3248_v62 }
 0x7c9   : > { %v6299_v36 = vpack.c.bf16 %v3262_v34, %v3158_v15  ;;  %v3210_v15 = vadd.f32 %v3209_v56, %v3196_v51 }
 0x7ca   : > { %3343 = vperm.xlu1 %6997, %v9971_v18  }
 0x7cb   : > { %6300 = vmatpush.bf16.msk.msrb.mxu1 %vm13372_vm1, %v6299_v36 }
 0x7cc   : > { %3339 = vperm.xlu2 %6995, %v9964_v27  }
 0x7cd   : > { %v3274_v38 = vpop.f32.mrf.mxu0 }
 0x7ce   : > { %v3263_v42 = vpop.f32.mrf.mxu3  ;;  %6301 = vmatmul.msk.bf16.vlgmr.msrb.gmra.mxu1 %vm13374_vm7, %v6904_v40 }
 0x7d4   : > { %v3300_v45 = vpop.f32.mrf.mxu2 }
 0x7d5   : > { %v3276_v60 = vpop.f32.mrf.mxu0  ;;  %6296 = vmatmul.msk.bf16.gmra.mxu0 %vm13375_vm13, %v6905_v46  ;;  %vm13376_vm13 = vmmov %vm13374_vm7 }
 0x7dc   : > { %v3302_v53 = vpop.f32.mrf.mxu2 }
 0x7de   : > { %v3287_v63 = vpop.f32.mrf.mxu1  ;;  %6302 = vmatmul.msk.bf16.gmra.mxu1 %vm13374_vm7, %v6905_v46  ;;  %vm13378_vm7 = vmmov %vm13377_vm5 }
 0x7df   : > { %v3288_v62 = vadd.f32 %v3287_v63, %v3274_v38 }
 0x7e1   : > { %v6305_v30 = vpack.c.bf16 %v3288_v62, %v3184_v8 }
 0x7e3   : > { %6306 = vmatpush.bf16.msk.msra.mxu2 %vm13372_vm1, %v6305_v30 }
 0x7e5   : > { %v3313_v14 = vpop.f32.mrf.mxu3  ;;  %6297 = vmatmul.msk.bf16.gmra.mxu0 %vm13377_vm5, %v3370_v10 }
 0x7e6   : > { %v3314_v34 = vadd.f32 %v3313_v14, %v3300_v45  ;;  %v3289_v36 = vpop.f32.mrf.mxu1  ;;  %6307 = vmatmul.msk.bf16.vlgmr.msra.gmra.mxu2 %vm13376_vm13, %v6904_v40 }
 0x7e8   : > { %v6311_v42 = vpack.c.bf16 %v3314_v34, %v3210_v15 }
 0x7ea   : > { %6312 = vmatpush.bf16.msk.msra.mxu3 %vm13372_vm1, %v6311_v42 }
 0x7ed   : > { %v3315_v57 = vpop.f32.mrf.mxu3  ;;  %6313 = vmatmul.msk.bf16.vlgmr.msra.gmra.mxu3 %vm13378_vm7, %v6904_v40 }
 0x7ee   : > { %6303 = vmatmul.msk.bf16.gmra.mxu1 %vm13379_vm3, %v3370_v10 }
 0x7f6   : > { %6308 = vmatmul.msk.bf16.gmra.mxu2 %vm13380_vm15, %v6905_v46 }
 0x7fd   : > { %6314 = vmatmul.msk.bf16.gmra.mxu3 %vm13381_vm8, %v6905_v46  ;;  %vm13386_vm8 = vcmask 326656  }
 0x7fe   : > { %vm13387_vm5 = vmmov %vm13386_vm8 }
 0x7ff   : > { %vm13388_vm15 = vmmov %vm13387_vm5 }
 0x800   : > { %vm13389_vm3 = vmmov %vm13387_vm5 }
 0x806   : > { %6309 = vmatmul.msk.bf16.gmra.mxu2 %vm13382_vm10, %v3370_v10 }
 0x80d   : > { %6315 = vmatmul.msk.bf16.gmra.mxu3 %vm13383_vm0, %v3370_v10  ;;  %vm13384_vm0 = vcmask 1043456  }
 0x80e   : > { %vm13385_vm10 = vmmov %vm13384_vm0 }
 0x80f   : > { %vm13390_vm13 = vmmov %vm13384_vm0 }
 0x810   : > { %vm13391_vm7 = vmmov %vm13384_vm0 }
 0x81e   : > { %v10504_v40 = vpop.permute.xlu2 %3355 }
 0x826   : > { %v10513_v14 = vpop.permute.xlu2 %3339 }
 0x834   : > { %v10502_v60 = vpop.permute.xlu1 %3351 }
 0x835   : > { %v10506_v0 = vpop.permute.xlu0 %3347 }
 0x83c   : > { %v10511_v30 = vpop.permute.xlu1 %3343 }
 0x842   : > { %v3401_v51 = vpop.f32.mrf.mxu0 }
 0x843   : > { %v3402_v34 = vadd.f32 %v3401_v51, %v10513_v14 }
 0x845   : > { %v3484_v22 = vmax.f32 %v3402_v34, 0.0 }
 0x84a   : > { %v3403_v56 = vpop.f32.mrf.mxu0 }
 0x84b   : > { %v3424_v35 = vpop.f32.mrf.mxu1  ;;  %v3404_v36 = vadd.f32 %v3403_v56, %v10511_v30 }
 0x84c   : > { %v3425_v56 = vadd.f32 %v3424_v35, %v10513_v14 }
 0x84d   : > { %v3488_v48 = vmax.f32 %v3404_v36, 0.0 }
 0x84e   : > { %v3485_v35 = vmax.f32 %v3425_v56, 0.0 }
 0x852   : > { %v3406_v59 = vpop.f32.mrf.mxu0 }
 0x853   : > { %v3426_v38 = vpop.f32.mrf.mxu1  ;;  %v3407_v62 = vadd.f32 %v3406_v59, %v10506_v0 }
 0x855   : > { %v3492_v42 = vmax.f32 %v3407_v62, 0.0 }
 0x85a   : > { %v3408_v53 = vpop.f32.mrf.mxu0 }
 0x85b   : > { %v3429_v45 = vpop.f32.mrf.mxu1  ;;  %v3409_v46 = vadd.f32 %v3408_v53, %v10502_v60 }
 0x85c   : > { %v3430_v59 = vadd.f32 %v3429_v45, %v10506_v0 }
 0x85d   : > { %v3496_v57 = vmax.f32 %v3409_v46, 0.0  ;;  %v3427_v46 = vadd.f32 %v3426_v38, %v10511_v30 }
 0x85f   : > { %v3513_v1 = vpack.c.bf16 %v3496_v57, %v3492_v42  ;;  %v3489_v34 = vmax.f32 %v3427_v46, 0.0 }
 0x862   : > { %v3411_v8 = vpop.f32.mrf.mxu0 }
 0x863   : > { %v3431_v63 = vpop.f32.mrf.mxu1  ;;  %v3412_v32 = vadd.f32 %v3411_v8, %v10504_v40 }
 0x864   : > { %v3432_v53 = vadd.f32 %v3431_v63, %v10502_v60  ;;  %v3493_v63 = vmax.f32 %v3430_v59, 0.0  ;;  %v7130_v59 = vmov 7  }
 0x865   : > { %v3500_v10 = vmax.f32 %v3412_v32, 0.0  ;;  %7000 = vset.pattern.permute.xlu1 %v7130_v59  ;;  %6999 = vset.pattern.permute.xlu0 %v7130_v59 }
 0x866   : > { %3534 = vperm.xlu1 %7000, %v9952_v12   ;;  %3530 = vperm.xlu0 %6999, %v9946_v41   ;;  %v3508_v12 = vld [vmem:[%s11785_s5 + $0xd8] sm:$0xf] }
 0x867   : > { %v3517_v50 = vpack.c.bf16 %v3500_v10, %v3500_v10  ;;  %v3497_v10 = vmax.f32 %v3432_v53, 0.0  ;;  %v6907_v53 = vld [vmem:[%s11785_s5 + $0xd0] sm:$0xff]  ;;  %6998 = vset.pattern.permute.xlu2 %v7130_v59 }
 0x868   : > { %3538 = vperm.xlu2 %6998, %v9940_v24  }
 0x869   : > { %v10515_v15 = vpop.f32.mrf.mxu2  ;;  %v3564_v8 = vsel %vm13384_vm0, %v3517_v50, 0  ;;  %v3509_v50 = vpack.c.bf16 %v3488_v48, %v3484_v22  ;;  %v3514_v42 = vpack.c.bf16 %v3497_v10, %v3493_v63  ;;  %vm13392_vm0 = vmmov %vm13389_vm3 }
 0x86a   : > { %3580 = vmatpush.bf16.msra.mxu0 %v3564_v8  ;;  %v3413_v26 = vpop.f32.mrf.mxu0 }
 0x86b   : > { %v3434_v20 = vpop.f32.mrf.mxu1  ;;  %v10531_v26 = vld [vmem:[%s11785_s5 + $0xc8] sm:$0xff] }
 0x86c   : > { %v3435_v32 = vadd.f32 %v3434_v20, %v10504_v40 }
 0x86e   : > { %v3501_v51 = vmax.f32 %v3435_v32, 0.0  ;;  %3581 = vmatpush.bf16.msra.mxu0 %v3513_v1  ;;  %v3510_v1 = vpack.c.bf16 %v3489_v34, %v3485_v35  ;;  %3526 = vperm.xlu1 %7000, %v9971_v18  }
 0x870   : > { %v10524_v62 = vpop.f32.mrf.mxu3  ;;  %v3518_v45 = vpack.c.bf16 %v3501_v51, %v3501_v51  ;;  %3522 = vperm.xlu2 %6998, %v9964_v27  }
 0x871   : > { %v3449_v49 = vpop.f32.mrf.mxu2 }
 0x872   : > { %v3567_v20 = vsel %vm13385_vm10, %v3518_v45, 0  ;;  %3582 = vmatpush.bf16.msra.mxu0 %v3509_v50  ;;  %v3450_v24 = vadd.f32 %v3449_v49, %v10511_v30  ;;  %vm13393_vm10 = vmmov %vm13392_vm0 }
 0x873   : > { %3603 = vmatpush.bf16.msra.mxu1 %v3567_v20  ;;  %v3436_v36 = vpop.f32.mrf.mxu1  ;;  %v3550_v20 = vunpack.c.l.b16 %v3508_v12 }
 0x874   : > { %v3490_v49 = vmax.f32 %v3450_v24, 0.0 }
 0x875   : > { %6324 = vmatmul.msk.bf16.vlgmr.msra.gmra.mxu0 %vm13386_vm8, %v10531_v26  ;;  %v3553_v27 = vpack.c.b16 %v3550_v20, %v3550_v20  ;;  %vm13394_vm8 = vmmov %vm13392_vm0 }
 0x877   : > { %3604 = vmatpush.bf16.msra.mxu1 %v3514_v42  ;;  %v3448_v42 = vadd.f32 %v10515_v15, %v10513_v14 }
 0x878   : > { %v3472_v38 = vpop.f32.mrf.mxu3 }
 0x879   : > { %v3452_v22 = vpop.f32.mrf.mxu2 }
 0x87a   : > { %v3453_v63 = vadd.f32 %v3452_v22, %v10506_v0 }
 0x87b   : > { %3605 = vmatpush.bf16.msra.mxu1 %v3510_v1 }
 0x87c   : > { %v3494_v35 = vmax.f32 %v3453_v63, 0.0 }
 0x87e   : > { %6327 = vmatmul.msk.bf16.vlgmr.msra.gmra.mxu1 %vm13387_vm5, %v10531_v26  ;;  %vm13395_vm5 = vmmov %vm13392_vm0 }
 0x880   : > { %v3475_v48 = vpop.f32.mrf.mxu3 }
 0x881   : > { %v3454_v57 = vpop.f32.mrf.mxu2 }
 0x882   : > { %v3455_v56 = vadd.f32 %v3454_v57, %v10502_v60  ;;  %v3476_v57 = vadd.f32 %v3475_v48, %v10506_v0 }
 0x884   : > { %v3498_v10 = vmax.f32 %v3455_v56, 0.0  ;;  %v3495_v63 = vmax.f32 %v3476_v57, 0.0 }
 0x885   : > { %6325 = vmatmul.msk.bf16.gmra.mxu0 %vm13388_vm15, %v6907_v53  ;;  %vm13396_vm15 = vmmov %vm13392_vm0 }
 0x886   : > { %v3515_v22 = vpack.c.bf16 %v3498_v10, %v3494_v35 }
 0x888   : > { %v3477_v8 = vpop.f32.mrf.mxu3 }
 0x889   : > { %v3457_v32 = vpop.f32.mrf.mxu2  ;;  %v3478_v18 = vadd.f32 %v3477_v8, %v10502_v60 }
 0x88a   : > { %v3458_v51 = vadd.f32 %v3457_v32, %v10504_v40  ;;  %v3486_v32 = vmax.f32 %v3448_v42, 0.0 }
 0x88b   : > { %v3499_v56 = vmax.f32 %v3478_v18, 0.0 }
 0x88c   : > { %v3502_v46 = vmax.f32 %v3458_v51, 0.0  ;;  %v3473_v51 = vadd.f32 %v3472_v38, %v10511_v30 }
 0x88d   : > { %v3516_v48 = vpack.c.bf16 %v3499_v56, %v3495_v63 }
 0x88e   : > { %v3519_v41 = vpack.c.bf16 %v3502_v46, %v3502_v46  ;;  %6328 = vmatmul.msk.bf16.gmra.mxu1 %vm13389_vm3, %v6907_v53  ;;  %v3511_v46 = vpack.c.bf16 %v3490_v49, %v3486_v32  ;;  %v3491_v0 = vmax.f32 %v3473_v51, 0.0  ;;  %vm13397_vm3 = vmmov %vm13392_vm0 }
 0x890   : > { %v3480_v45 = vpop.f32.mrf.mxu3  ;;  %v3570_v50 = vsel %vm13390_vm13, %v3519_v41, 0  ;;  %vm13398_vm13 = vmmov %vm13392_vm0 }
 0x891   : > { %v3481_v34 = vadd.f32 %v3480_v45, %v10504_v40  ;;  %v3459_v36 = vpop.f32.mrf.mxu2  ;;  %3626 = vmatpush.bf16.msrb.mxu2 %v3570_v50  ;;  %v3471_v40 = vadd.f32 %v10524_v62, %v10513_v14 }
 0x893   : > { %v3503_v1 = vmax.f32 %v3481_v34, 0.0  ;;  %v3487_v8 = vmax.f32 %v3471_v40, 0.0 }
 0x895   : > { %v3520_v59 = vpack.c.bf16 %v3503_v1, %v3503_v1  ;;  %3627 = vmatpush.bf16.msrb.mxu2 %v3515_v22  ;;  %6326 = vmatmul.msk.bf16.gmra.mxu0 %vm13392_vm0, %v3553_v27  ;;  %v3512_v30 = vpack.c.bf16 %v3491_v0, %v3487_v8 }
 0x897   : > { %v3573_v15 = vsel %vm13391_vm7, %v3520_v59, 0  ;;  %vm13399_vm7 = vmmov %vm13392_vm0  ;;  %vm13400_vm0 = vcmask 1043456  }
 0x898   : > { %v3482_v60 = vpop.f32.mrf.mxu3  ;;  %3649 = vmatpush.bf16.msrb.mxu3 %v3573_v15 }
 0x899   : > { %3628 = vmatpush.bf16.msrb.mxu2 %v3511_v46 }
 0x89c   : > { %3650 = vmatpush.bf16.msrb.mxu3 %v3516_v48  ;;  %6330 = vmatmul.msk.bf16.vlgmr.msrb.gmra.mxu2 %vm13393_vm10, %v10531_v26  ;;  %vm13401_vm10 = vmmov %vm13400_vm0 }
 0x89e   : > { %6329 = vmatmul.msk.bf16.gmra.mxu1 %vm13394_vm8, %v3553_v27 }
 0x8a0   : > { %3651 = vmatpush.bf16.msrb.mxu3 %v3512_v30 }
 0x8a3   : > { %6333 = vmatmul.msk.bf16.vlgmr.msrb.gmra.mxu3 %vm13395_vm5, %v10531_v26  ;;  %vm13404_vm5 = vmmov %vm13397_vm3 }
 0x8ac   : > { %6331 = vmatmul.msk.bf16.gmra.mxu2 %vm13396_vm15, %v6907_v53 }
 0x8b3   : > { %6334 = vmatmul.msk.bf16.gmra.mxu3 %vm13397_vm3, %v6907_v53 }
 0x8bc   : > { %6332 = vmatmul.msk.bf16.gmra.mxu2 %vm13398_vm13, %v3553_v27 }
 0x8c2   : > { %v10574_v24 = vpop.permute.xlu2 %3538 }
 0x8c3   : > { %6335 = vmatmul.msk.bf16.gmra.mxu3 %vm13399_vm7, %v3553_v27  ;;  %vm13411_vm7 = vmmov %vm13404_vm5 }
 0x8ca   : > { %v10583_v36 = vpop.permute.xlu2 %3522 }
 0x8d8   : > { %v10576_v45 = vpop.permute.xlu1 %3534  ;;  %v10578_v26 = vpop.permute.xlu0 %3530 }
 0x8e0   : > { %v10585_v18 = vpop.permute.xlu1 %3526 }
 0x8f2   : > { %v3584_v14 = vpop.f32.mrf.mxu0 }
 0x8f3   : > { %v3585_v1 = vadd.f32 %v3584_v14, %v10583_v36 }
 0x8f5   : > { %v3667_v63 = vmax.f32 %v3585_v1, 0.0 }
 0x8fa   : > { %v3586_v38 = vpop.f32.mrf.mxu0 }
 0x8fb   : > { %v3607_v62 = vpop.f32.mrf.mxu1  ;;  %v3587_v22 = vadd.f32 %v3586_v38, %v10585_v18 }
 0x8fc   : > { %v3608_v30 = vadd.f32 %v3607_v62, %v10583_v36 }
 0x8fd   : > { %v3671_v60 = vmax.f32 %v3587_v22, 0.0 }
 0x902   : > { %v3589_v41 = vpop.f32.mrf.mxu0 }
 0x903   : > { %v3609_v12 = vpop.f32.mrf.mxu1  ;;  %v3590_v35 = vadd.f32 %v3589_v41, %v10578_v26 }
 0x904   : > { %v3610_v14 = vadd.f32 %v3609_v12, %v10585_v18  ;;  %v13402_v12 = vld [vmem:[#allocation142_spill] sm:$0xff] }
 0x905   : > { %v3675_v57 = vmax.f32 %v3590_v35, 0.0  ;;  %vm13403_vm8 = vnez %v13402_v12 }
 0x906   : > { %v3672_v35 = vmax.f32 %v3610_v14, 0.0  ;;  %v13422_v14 = vld [vmem:[#allocation157_spill] sm:$0xff] }
 0x90a   : > { %v3591_v50 = vpop.f32.mrf.mxu0 }
 0x90b   : > { %v3612_v10 = vpop.f32.mrf.mxu1  ;;  %v3592_v53 = vadd.f32 %v3591_v50, %v10576_v45 }
 0x90c   : > { %v3613_v51 = vadd.f32 %v3612_v10, %v10578_v26  ;;  %v3688_v10 = vpack.c.bf16 %v3671_v60, %v3667_v63  ;;  %v13416_v63 = vld [vmem:[#allocation145_spill] sm:$0xff] }
 0x90d   : > { %v3679_v27 = vmax.f32 %v3592_v53, 0.0  ;;  %v3668_v53 = vmax.f32 %v3608_v30, 0.0  ;;  %v13420_v30 = vld [vmem:[#allocation156_spill] sm:$0xff] }
 0x90e   : > { %v3676_v38 = vmax.f32 %v3613_v51, 0.0 }
 0x90f   : > { %v3692_v40 = vpack.c.bf16 %v3679_v27, %v3675_v57  ;;  %v3689_v22 = vpack.c.bf16 %v3672_v35, %v3668_v53  ;;  %v13405_v57 = vld [vmem:[#allocation144_spill] sm:$0xff]  ;;  %v7131_v27 = vmov 8   ;;  %v13428_v53 = vld [vmem:[#allocation159_spill] sm:$0xff] }
 0x910   : > { %vm13406_vm15 = vnez %v13405_v57  ;;  %7001 = vset.pattern.permute.xlu2 %v7131_v27 }
 0x912   : > { %v3594_v42 = vpop.f32.mrf.mxu0 }
 0x913   : > { %v3614_v20 = vpop.f32.mrf.mxu1  ;;  %v3595_v34 = vadd.f32 %v3594_v42, %v10574_v24 }
 0x914   : > { %v3615_v32 = vadd.f32 %v3614_v20, %v10576_v45 }
 0x915   : > { %v3683_v49 = vmax.f32 %v3595_v34, 0.0 }
 0x916   : > { %v3680_v41 = vmax.f32 %v3615_v32, 0.0  ;;  %v7045_v32 = vld [vmem:[%s11786_s6] sm:$0xf] }
 0x917   : > { %v3696_v59 = vpack.c.bf16 %v3683_v49, %v3683_v49  ;;  %v10599_v49 = vld [vmem:[%s11785_s5 + $0xe0] sm:$0x3]  ;;  %3701 = vperm.xlu2 %7001, %v7045_v32   ;;  %v13434_v32 = vld [vmem:[#allocation164_spill] sm:$0xff] }
 0x918   : > { %v3693_v42 = vpack.c.bf16 %v3680_v41, %v3676_v38  ;;  %v13424_v38 = vld [vmem:[#allocation158_spill] sm:$0xff] }
 0x919   : > { %v3708_v15 = vsel %vm13400_vm0, %v3696_v59, 0  ;;  %v13407_v59 = vld [vmem:[#allocation140_spill] sm:$0xff] }
 0x91a   : > { %3724 = vmatpush.bf16.msrb.mxu0 %v3708_v15  ;;  %v3596_v0 = vpop.f32.mrf.mxu0  ;;  %vm13408_vm3 = vnez %v13407_v59 }
 0x91b   : > { %v3617_v56 = vpop.f32.mrf.mxu1  ;;  %v13418_v0 = vld [vmem:[#allocation153_spill] sm:$0xff] }
 0x91c   : > { %v3618_v46 = vadd.f32 %v3617_v56, %v10574_v24  ;;  %v13409_v56 = vld [vmem:[#allocation146_spill] sm:$0xff] }
 0x91d   : > { %vm13410_vm13 = vnez %v13409_v56 }
 0x91e   : > { %v3684_v48 = vmax.f32 %v3618_v46, 0.0  ;;  %3725 = vmatpush.bf16.msrb.mxu0 %v3692_v40  ;;  %v13412_v46 = vld [vmem:[#allocation154_spill] sm:$0xff]  ;;  %v13414_v40 = vld [vmem:[#allocation147_spill] sm:$0xff] }
 0x91f   : > { %v3630_v8 = vpop.f32.mrf.mxu2  ;;  %vm13413_vm0 = vnez %v13412_v46 }
 0x920   : > { %v3697_v50 = vpack.c.bf16 %v3684_v48, %v3684_v48 }
 0x922   : > { %v3711_v20 = vsel %vm13401_vm10, %v3697_v50, 0  ;;  %3726 = vmatpush.bf16.msrb.mxu0 %v3688_v10  ;;  %vm13415_vm10 = vnez %v13414_v40  ;;  %v13426_v50 = vld [vmem:[#allocation160_spill] sm:$0xff]  ;;  %v3631_v40 = vadd.f32 %v3630_v8, %v10583_v36 }
 0x923   : > { %3737 = vmatpush.bf16.msrb.mxu1 %v3711_v20  ;;  %v3619_v34 = vpop.f32.mrf.mxu1 }
 0x924   : > { %v13430_v34 = vld [vmem:[#allocation166_spill] sm:$0xff] }
 0x925   : > { %6336 = vmatmul.msk.bf16.vlgmr.msrb.gmra.mxu0 %vm13404_vm5, %v10599_v49  ;;  %vm13419_vm5 = vnez %v13418_v0 }
 0x926   : > { %v10601_v62 = vpop.f32.mrf.mxu3  ;;  %6341 = vmatpush.bf16.msk.msra.mxu0 %vm13403_vm8, %v12557_v54  ;;  %vm13417_vm8 = vnez %v13416_v63 }
 0x927   : > { %v3632_v1 = vpop.f32.mrf.mxu2  ;;  %3738 = vmatpush.bf16.msrb.mxu1 %v3693_v42 }
 0x928   : > { %v3633_v27 = vadd.f32 %v3632_v1, %v10585_v18 }
 0x92a   : > { %6343 = vmatpush.bf16.msk.msra.mxu0 %vm13406_vm15, %v12557_v54  ;;  %vm13421_vm15 = vnez %v13420_v30  ;;  %v3673_v30 = vmax.f32 %v3633_v27, 0.0 }
 0x92b   : > { %3739 = vmatpush.bf16.msrb.mxu1 %v3689_v22  ;;  %v13432_v22 = vld [vmem:[#allocation143_spill] sm:$0xff] }
 0x92e   : > { %v3655_v51 = vpop.f32.mrf.mxu3  ;;  %6345 = vmatpush.bf16.msk.msra.mxu0 %vm13410_vm13, %v12557_v54  ;;  %6337 = vmatmul.msk.bf16.vlgmr.msrb.gmra.mxu1 %vm13411_vm7, %v10599_v49  ;;  %vm13425_vm13 = vnez %v13424_v38  ;;  %vm13427_vm7 = vnez %v13426_v50 }
 0x92f   : > { %6357 = vmatpush.bf16.msk.msra.mxu1 %vm13408_vm3, %v12557_v54  ;;  %v3635_v15 = vpop.f32.mrf.mxu2  ;;  %vm13423_vm3 = vnez %v13422_v14 }
 0x930   : > { %v3636_v12 = vadd.f32 %v3635_v15, %v10578_v26 }
 0x932   : > { %6347 = vmatpush.bf16.msk.msra.mxu0 %vm13415_vm10, %v12557_v54  ;;  %vm13431_vm10 = vnez %v13430_v34  ;;  %v3677_v63 = vmax.f32 %v3636_v12, 0.0 }
 0x933   : > { %6359 = vmatpush.bf16.msk.msra.mxu1 %vm13413_vm0, %v12557_v54  ;;  %vm13429_vm0 = vnez %v13428_v53 }
 0x936   : > { %v3658_v60 = vpop.f32.mrf.mxu3  ;;  %6349 = vmatpush.bf16.msk.msra.mxu0 %vm13419_vm5, %v12557_v54  ;;  %vm13435_vm5 = vnez %v13434_v32 }
 0x937   : > { %6361 = vmatpush.bf16.msk.msra.mxu1 %vm13417_vm8, %v12557_v54  ;;  %v3637_v48 = vpop.f32.mrf.mxu2  ;;  %vm13433_vm8 = vnez %v13432_v22  ;;  %v3659_v8 = vadd.f32 %v3658_v60, %v10578_v26  ;;  %v3654_v26 = vadd.f32 %v10601_v62, %v10583_v36 }
 0x938   : > { %v3638_v42 = vadd.f32 %v3637_v48, %v10576_v45 }
 0x939   : > { %v3678_v60 = vmax.f32 %v3659_v8, 0.0  ;;  %v13504_v8 = vld [vmem:[#allocation180_spill] sm:$0xff] }
 0x93a   : > { %6351 = vmatpush.bf16.msk.msra.mxu0 %vm13423_vm3, %v12557_v54  ;;  %v3681_v59 = vmax.f32 %v3638_v42, 0.0 }
 0x93b   : > { %6363 = vmatpush.bf16.msk.msra.mxu1 %vm13421_vm15, %v12557_v54  ;;  %vm13436_vm15 = vcmask 1043456  }
 0x93c   : > { %v3694_v50 = vpack.c.bf16 %v3681_v59, %v3677_v63  ;;  %vm13440_vm3 = vmmov %vm13436_vm15  ;;  %v4156_v59 = vmul.f32 0.5, %v10435_v17 }
 0x93e   : > { %v3660_v41 = vpop.f32.mrf.mxu3  ;;  %6353 = vmatpush.bf16.msk.msra.mxu0 %vm13427_vm7, %v12557_v54  ;;  %vm13444_vm7 = vcmask 326656  }
 0x93f   : > { %6365 = vmatpush.bf16.msk.msra.mxu1 %vm13425_vm13, %v12557_v54  ;;  %v3640_v10 = vpop.f32.mrf.mxu2  ;;  %v3661_v1 = vadd.f32 %v3660_v41, %v10576_v45  ;;  %v3669_v45 = vmax.f32 %v3631_v40, 0.0  ;;  %v3656_v41 = vadd.f32 %v3655_v51, %v10585_v18  ;;  %vm13443_vm13 = vnez %v12911_v21  ;;  %v13470_v21 = vld [vmem:[#allocation175_spill] sm:$0xff] }
 0x940   : > { %v3641_v20 = vadd.f32 %v3640_v10, %v10574_v24  ;;  %v3670_v18 = vmax.f32 %v3654_v26, 0.0  ;;  %v4155_v51 = vmul.f32 0.5, %v10375_v44 }
 0x941   : > { %v3682_v10 = vmax.f32 %v3661_v1, 0.0  ;;  %v3690_v42 = vpack.c.bf16 %v3673_v30, %v3669_v45  ;;  %v3674_v37 = vmax.f32 %v3656_v41, 0.0 }
 0x942   : > { %v3685_v35 = vmax.f32 %v3641_v20, 0.0  ;;  %6355 = vmatpush.bf16.msk.msra.mxu0 %vm13431_vm10, %v12557_v54  ;;  %vm13446_vm10 = vnez %v12943_v55  ;;  %v13478_v55 = vld [vmem:[#allocation152_spill] sm:$0xff] }
 0x943   : > { %6367 = vmatpush.bf16.msk.msra.mxu1 %vm13429_vm0, %v12557_v54  ;;  %vm13445_vm0 = vnez %v12894_v28  ;;  %v13466_v28 = vld [vmem:[#allocation171_spill] sm:$0xff] }
 0x944   : > { %v3698_v57 = vpack.c.bf16 %v3685_v35, %v3685_v35 }
 0x946   : > { %6405 = vmatpush.bf16.msk.msrb.mxu0 %vm13433_vm8, %v12557_v54  ;;  %v3663_v56 = vpop.f32.mrf.mxu3  ;;  %v3714_v46 = vsel %vm13436_vm15, %v3698_v57, 0  ;;  %vm13447_vm8 = vnez %v12927_v4  ;;  %vm13451_vm15 = vnez %v12975_v31  ;;  %v13476_v4 = vld [vmem:[#allocation149_spill] sm:$0xff]  ;;  %v13488_v31 = vld [vmem:[#allocation162_spill] sm:$0xff] }
 0x947   : > { %6369 = vmatpush.bf16.msk.msra.mxu1 %vm13435_vm5, %v12557_v54  ;;  %v3664_v15 = vadd.f32 %v3663_v56, %v10574_v24  ;;  %v3642_v0 = vpop.f32.mrf.mxu2  ;;  %3750 = vmatpush.bf16.msra.mxu2 %v3714_v46  ;;  %vm13448_vm5 = vnez %v13016_v61  ;;  %v13492_v61 = vld [vmem:[#allocation163_spill] sm:$0xff] }
 0x948   : > { %v4157_v0 = vmul.f32 0.5, %v10381_v33 }
 0x949   : > { %v3686_v14 = vmax.f32 %v3664_v15, 0.0 }
 0x94a   : > { %6407 = vmatpush.bf16.msk.msrb.mxu0 %vm9172_vm2, %v12557_v54  ;;  %vm13439_vm2 = vnez %v12901_v5  ;;  %v3695_v5 = vpack.c.bf16 %v3682_v10, %v3678_v60 }
 0x94b   : > { %6371 = vmatpush.bf16.msk.msra.mxu1 %vm9629_vm14, %v12557_v54  ;;  %v3699_v24 = vpack.c.bf16 %v3686_v14, %v3686_v14  ;;  %3751 = vmatpush.bf16.msra.mxu2 %v3694_v50  ;;  %vm13442_vm14 = vnez %v12908_v39  ;;  %v13468_v39 = vld [vmem:[#allocation148_spill] sm:$0xff] }
 0x94d   : > { %v3717_v20 = vsel %vm13440_vm3, %v3699_v24, 0  ;;  %vm13454_vm3 = vnez %v12952_v6  ;;  %v13482_v6 = vld [vmem:[#allocation161_spill] sm:$0xff]  ;;  %v4158_v24 = vmul.f32 0.5, %v13504_v8 }
 0x94e   : > { %6409 = vmatpush.bf16.msk.msrb.mxu0 %vm13439_vm2, %v12557_v54  ;;  %v3665_v53 = vpop.f32.mrf.mxu3  ;;  %3763 = vmatpush.bf16.msra.mxu3 %v3717_v20  ;;  %vm13453_vm2 = vnez %v12954_v11  ;;  %v13484_v11 = vld [vmem:[#allocation155_spill] sm:$0xff] }
 0x94f   : > { %6421 = vmatpush.bf16.msk.msrb.mxu1 %vm9153_vm12, %v12557_v54  ;;  %vm13441_vm12 = vnez %v12896_v19  ;;  %3752 = vmatpush.bf16.msra.mxu2 %v3690_v42  ;;  %v3691_v19 = vpack.c.bf16 %v3674_v37, %v3670_v18 }
 0x952   : > { %6411 = vmatpush.bf16.msk.msrb.mxu0 %vm13442_vm14, %v12557_v54  ;;  %3764 = vmatpush.bf16.msra.mxu3 %v3695_v5  ;;  %vm13457_vm14 = vnez %v12980_v58  ;;  %v13486_v58 = vld [vmem:[#allocation165_spill] sm:$0xff] }
 0x953   : > { %6423 = vmatpush.bf16.msk.msrb.mxu1 %vm13441_vm12, %v12557_v54  ;;  %6373 = vmatpush.bf16.msk.msrb.mxu2 %vm13443_vm13, %v12557_v54  ;;  %vm13456_vm12 = vnez %v13022_v43  ;;  %vm13458_vm13 = vnez %v13025_v2  ;;  %v13496_v43 = vld [vmem:[#allocation168_spill] sm:$0xff]  ;;  %v13498_v2 = vld [vmem:[#allocation174_spill] sm:$0xff] }
 0x954   : > { %6338 = vmatmul.msk.bf16.vlgmr.msra.gmra.mxu2 %vm13444_vm7, %v10599_v49 }
 0x956   : > { %6413 = vmatpush.bf16.msk.msrb.mxu0 %vm13446_vm10, %v12557_v54  ;;  %3765 = vmatpush.bf16.msra.mxu3 %v3691_v19  ;;  %vm13461_vm10 = vnez %v13029_v47  ;;  %v13500_v47 = vld [vmem:[#allocation177_spill] sm:$0xff] }
 0x957   : > { %6425 = vmatpush.bf16.msk.msrb.mxu1 %vm13445_vm0, %v12557_v54  ;;  %6375 = vmatpush.bf16.msk.msrb.mxu2 %vm13026_vm9, %v12557_v54  ;;  %vm13449_vm9 = vmmov %vm13444_vm7  ;;  %vm13459_vm7 = vnez %v13033_v25  ;;  %vm13460_vm0 = vnez %v12986_v52  ;;  %v13490_v52 = vld [vmem:[#allocation172_spill] sm:$0xff] }
 0x959   : > { %6339 = vmatmul.msk.bf16.vlgmr.msra.gmra.mxu3 %vm13449_vm9, %v10599_v49  ;;  %vm13467_vm9 = vnez %v13466_v28 }
 0x95a   : > { %6389 = vmatpush.bf16.msk.msrb.mxu3 %vm13056_vm4, %v12557_v54  ;;  %6415 = vmatpush.bf16.msk.msrb.mxu0 %vm13448_vm5, %v12557_v54  ;;  %vm13450_vm4 = vnez %v12946_v16  ;;  %vm13465_vm5 = vnez %v13464_v9  ;;  %v13480_v16 = vld [vmem:[#allocation150_spill] sm:$0xff]  ;;  %v10834_v9 = vld [vmem:[%s11786_s6 + $0x10] sm:$0xff] }
 0x95b   : > { %6427 = vmatpush.bf16.msk.msrb.mxu1 %vm13447_vm8, %v12557_v54  ;;  %6377 = vmatpush.bf16.msk.msrb.mxu2 %vm13027_vm6, %v12557_v54  ;;  %vm13452_vm6 = vnez %v13019_v3  ;;  %vm13463_vm8 = vnez %v13462_v29  ;;  %v13494_v3 = vld [vmem:[#allocation173_spill] sm:$0xff]  ;;  %v7132_v29 = vmov 9  }
 0x95c   : > { %7003 = vset.pattern.permute.xlu1 %v7132_v29  ;;  %7004 = vset.pattern.permute.xlu2 %v7132_v29 }
 0x95d   : > { %3899 = vperm.xlu1 %7003, %v10834_v9   ;;  %7002 = vset.pattern.permute.xlu0 %v7132_v29 }
 0x95e   : > { %6391 = vmatpush.bf16.msk.msrb.mxu3 %vm13058_vm11, %v12557_v54  ;;  %6417 = vmatpush.bf16.msk.msrb.mxu0 %vm13452_vm6, %v12557_v54  ;;  %vm13455_vm11 = vnez %v13031_v23  ;;  %vm13473_vm6 = vnez %v13472_v7  ;;  %v13502_v23 = vld [vmem:[#allocation178_spill] sm:$0xff] }
 0x95f   : > { %6429 = vmatpush.bf16.msk.msrb.mxu1 %vm13450_vm4, %v12557_v54  ;;  %6379 = vmatpush.bf16.msk.msrb.mxu2 %vm13451_vm15, %v12557_v54  ;;  %vm13469_vm4 = vnez %v13468_v39  ;;  %vm13471_vm15 = vnez %v13470_v21  ;;  %v10840_v39 = vld [vmem:[%s11786_s6 + $0x18] sm:$0xff]  ;;  %v10846_v21 = vld [vmem:[%s11786_s6 + $0x20] sm:$0xff] }
 0x960   : > { %3903 = vperm.xlu2 %7004, %v10840_v39   ;;  %3907 = vperm.xlu0 %7002, %v10846_v21  }
 0x962   : > { %6393 = vmatpush.bf16.msk.msrb.mxu3 %vm13453_vm2, %v12557_v54  ;;  %6419 = vmatpush.bf16.msk.msrb.mxu0 %vm13456_vm12, %v12557_v54  ;;  %vm13475_vm2 = vnez %v13474_v13  ;;  %vm13481_vm12 = vnez %v13480_v16  ;;  %v10852_v16 = vld [vmem:[%s11786_s6] sm:$0xff] }
 0x963   : > { %6431 = vmatpush.bf16.msk.msrb.mxu1 %vm13454_vm3, %v12557_v54  ;;  %6381 = vmatpush.bf16.msk.msrb.mxu2 %vm13455_vm11, %v12557_v54  ;;  %vm13477_vm3 = vnez %v13476_v4  ;;  %vm13479_vm11 = vnez %v13478_v55 }
 0x965   : > { %3891 = vperm.xlu1 %7003, %v10852_v16  }
 0x966   : > { %6395 = vmatpush.bf16.msk.msrb.mxu3 %vm13457_vm14, %v12557_v54  ;;  %vm13483_vm14 = vnez %v13482_v6  ;;  %v13505_v6 = vld [vmem:[#allocation40_spill] sm:$0xff] }
 0x967   : > { %6433 = vmatpush.bf16.msk.msrb.mxu1 %vm13458_vm13, %v12557_v54  ;;  %6383 = vmatpush.bf16.msk.msrb.mxu2 %vm13459_vm7, %v12557_v54  ;;  %vm13485_vm13 = vnez %v13484_v11  ;;  %vm13487_vm7 = vnez %v13486_v58  ;;  %v10859_v58 = vld [vmem:[%s11786_s6 + $0x8] sm:$0xff] }
 0x968   : > { %3895 = vperm.xlu2 %7004, %v10859_v58  }
 0x96a   : > { %6397 = vmatpush.bf16.msk.msrb.mxu3 %vm13460_vm0, %v12557_v54  ;;  %vm13489_vm0 = vnez %v13488_v31  ;;  %v6908_v31 = vld [vmem:[%s11785_s5 + $0xe8] sm:$0xff] }
 0x96b   : > { %6435 = vmatpush.bf16.msk.msrb.mxu1 %vm13461_vm10, %v12557_v54  ;;  %6385 = vmatpush.bf16.msk.msrb.mxu2 %vm13463_vm8, %v12557_v54  ;;  %vm13491_vm10 = vnez %v13490_v52  ;;  %vm13493_vm8 = vnez %v13492_v61  ;;  %v13506_v52 = vld [vmem:[#allocation179_spill] sm:$0xff] }
 0x96e   : > { %6399 = vmatpush.bf16.msk.msrb.mxu3 %vm13465_vm5, %v12557_v54  ;;  %vm13495_vm5 = vnez %v13494_v3 }
 0x96f   : > { %6387 = vmatpush.bf16.msk.msrb.mxu2 %vm13467_vm9, %v12557_v54  ;;  %vm13497_vm9 = vnez %v13496_v43 }
 0x971   : > { %v3702_v25 = vpop.permute.xlu2 %3701 }
 0x972   : > { %6401 = vmatpush.bf16.msk.msrb.mxu3 %vm13471_vm15, %v12557_v54  ;;  %vm13501_vm15 = vnez %v13500_v47 }
 0x973   : > { %6437 = vmatpush.bf16.msk.msra.mxu2 %vm13469_vm4, %v12557_v54  ;;  %vm13499_vm4 = vnez %v13498_v2 }
 0x976   : > { %6403 = vmatpush.bf16.msk.msrb.mxu3 %vm13475_vm2, %v12557_v54  ;;  %vm13507_vm2 = vnez %v13506_v52 }
 0x977   : > { %6439 = vmatpush.bf16.msk.msra.mxu2 %vm13473_vm6, %v12557_v54  ;;  %vm13503_vm6 = vnez %v13502_v23 }
 0x97a   : > { %6453 = vmatpush.bf16.msk.msra.mxu3 %vm13477_vm3, %v12557_v54  ;;  %vm13508_vm3 = vcmask 130048  }
 0x97b   : > { %6441 = vmatpush.bf16.msk.msra.mxu2 %vm13479_vm11, %v12557_v54  ;;  %vm13510_vm11 = vmmov %vm13508_vm3 }
 0x97e   : > { %6455 = vmatpush.bf16.msk.msra.mxu3 %vm13481_vm12, %v12557_v54  ;;  %vm13511_vm12 = vmmov %vm13508_vm3 }
 0x97f   : > { %6443 = vmatpush.bf16.msk.msra.mxu2 %vm13483_vm14, %v12557_v54  ;;  %vm13512_vm14 = vmmov %vm13508_vm3 }
 0x982   : > { %6457 = vmatpush.bf16.msk.msra.mxu3 %vm13485_vm13, %v12557_v54  ;;  %vm13513_vm13 = vmmov %vm13508_vm3 }
 0x983   : > { %6445 = vmatpush.bf16.msk.msra.mxu2 %vm13487_vm7, %v12557_v54  ;;  %vm13514_vm7 = vmmov %vm13508_vm3 }
 0x986   : > { %6459 = vmatpush.bf16.msk.msra.mxu3 %vm13489_vm0, %v12557_v54  ;;  %vm13515_vm0 = vcmask 1043456  }
 0x987   : > { %6447 = vmatpush.bf16.msk.msra.mxu2 %vm13491_vm10, %v12557_v54 }
 0x98a   : > { %6461 = vmatpush.bf16.msk.msra.mxu3 %vm13493_vm8, %v12557_v54  ;;  %vm13518_vm8 = vcmask 326656  }
 0x98b   : > { %6449 = vmatpush.bf16.msk.msra.mxu2 %vm13495_vm5, %v12557_v54 }
 0x98e   : > { %6463 = vmatpush.bf16.msk.msra.mxu3 %vm13497_vm9, %v12557_v54  ;;  %vm13521_vm9 = vmmov %vm13515_vm0 }
 0x98f   : > { %6451 = vmatpush.bf16.msk.msra.mxu2 %vm13499_vm4, %v12557_v54 }
 0x992   : > { %6465 = vmatpush.bf16.msk.msra.mxu3 %vm13501_vm15, %v12557_v54 }
 0x996   : > { %6467 = vmatpush.bf16.msk.msra.mxu3 %vm13503_vm6, %v12557_v54 }
 0x9a2   : > { %v3728_v36 = vpop.f32.mrf.mxu0 }
 0x9a3   : > { %v3729_v49 = vadd.f32 %v3728_v36, %v3702_v25  ;;  %v13509_v36 = vld [vmem:[#allocation41_spill] sm:$0xff] }
 0x9a5   : > { %v3771_v62 = vpack.c.bf16 %v3729_v49, %v3729_v49  ;;  %v4159_v35 = vmul.f32 0.5, %v3729_v49 }
 0x9a7   : > { %v10820_v34 = vadd.f32 %v4159_v35, %v4155_v51  ;;  %3783 = vmatmul.bf16.vlgmr.msra.gmra.mxu0 %v3771_v62  ;;  %v3887_v35 = vld [vmem:[%s11785_s5 + $0xf8] sm:$0xf] }
 0x9aa   : > { %v3730_v57 = vpop.f32.mrf.mxu0 }
 0x9ab   : > { %v3741_v12 = vpop.f32.mrf.mxu1 }
 0x9ac   : > { %v3742_v22 = vadd.f32 %v3741_v12, %v3702_v25  ;;  %v3919_v12 = vunpack.c.l.b16 %v3887_v35  ;;  %v13522_v35 = vld [vmem:[#allocation9_spill] sm:$0xff] }
 0x9ad   : > { %vm13523_vm4 = vnez %v13522_v35  ;;  %v7051_v35 = vld [vmem:[%s11786_s6] sm:$0x1f] }
 0x9ae   : > { %v3772_v27 = vpack.c.bf16 %v3742_v22, %v3742_v22  ;;  %v4160_v32 = vmul.f32 0.5, %v3742_v22  ;;  %v3922_v22 = vpack.c.b16 %v3919_v12, %v3919_v12 }
 0x9b0   : > { %v10823_v56 = vadd.f32 %v4160_v32, %v4156_v59  ;;  %3796 = vmatmul.bf16.vlgmr.msra.gmra.mxu1 %v3772_v27 }
 0x9b3   : > { %v3743_v46 = vpop.f32.mrf.mxu1 }
 0x9b7   : > { %3835 = vmatmul.bf16.vlgmr.msrb.gmra.mxu0 %v3771_v62  ;;  %v6909_v62 = vld [vmem:[%s11785_s5 + $0xf0] sm:$0xff] }
 0x9c0   : > { %3848 = vmatmul.bf16.vlgmr.msrb.gmra.mxu1 %v3772_v27 }
 0x9d7   : > { %v3754_v40 = vpop.f32.mrf.mxu2 }
 0x9d8   : > { %v3755_v63 = vadd.f32 %v3754_v40, %v3702_v25 }
 0x9da   : > { %v3773_v15 = vpack.c.bf16 %v3755_v63, %v3755_v63  ;;  %v4161_v48 = vmul.f32 0.5, %v3755_v63  ;;  %v3904_v63 = vpop.permute.xlu2 %3903 }
 0x9dc   : > { %v10826_v1 = vadd.f32 %v4161_v48, %v4157_v0  ;;  %3809 = vmatmul.bf16.vlgmr.msrb.gmra.mxu2 %v3773_v15  ;;  %v3767_v30 = vpop.f32.mrf.mxu3  ;;  %v3908_v0 = vpop.permute.xlu0 %3907 }
 0x9dd   : > { %v3768_v14 = vadd.f32 %v3767_v30, %v3702_v25 }
 0x9df   : > { %v3756_v38 = vpop.f32.mrf.mxu2  ;;  %v3774_v50 = vpack.c.bf16 %v3768_v14, %v3768_v14  ;;  %v4162_v45 = vmul.f32 0.5, %v3768_v14 }
 0x9e1   : > { %v10829_v41 = vadd.f32 %v4162_v45, %v4158_v24  ;;  %3822 = vmatmul.bf16.vlgmr.msrb.gmra.mxu3 %v3774_v50 }
 0x9e2   : > { %v3896_v24 = vpop.permute.xlu2 %3895 }
 0x9e4   : > { %v3769_v10 = vpop.f32.mrf.mxu3 }
 0x9ec   : > { %3861 = vmatmul.bf16.vlgmr.msra.gmra.mxu2 %v3773_v15  ;;  %v3900_v15 = vpop.permute.xlu1 %3899 }
 0x9f1   : > { %3874 = vmatmul.bf16.vlgmr.msra.gmra.mxu3 %v3774_v50 }
 0x9f4   : > { %v3892_v45 = vpop.permute.xlu1 %3891 }
 0xa24   : > { %v3784_v20 = vpop.f32.mrf.mxu0 }
 0xa2c   : > { %v3786_v26 = vpop.f32.mrf.mxu0 }
 0xa2d   : > { %v3797_v42 = vpop.f32.mrf.mxu1 }
 0xa2e   : > { %v3798_v28 = vadd.f32 %v3797_v42, %v3784_v20  ;;  %v7133_v20 = vmov 10  }
 0xa2f   : > { %7006 = vset.pattern.permute.xlu1 %v7133_v20  ;;  %7007 = vset.pattern.permute.xlu2 %v7133_v20 }
 0xa30   : > { %4008 = vperm.xlu1 %7006, %v10834_v9   ;;  %7005 = vset.pattern.permute.xlu0 %v7133_v20  ;;  %v13548_v20 = vld [vmem:[#allocation25_spill] sm:$0xff] }
 0xa31   : > { %4012 = vperm.xlu2 %7007, %v10840_v39   ;;  %4016 = vperm.xlu0 %7005, %v10846_v21  }
 0xa34   : > { %v3836_v53 = vpop.f32.mrf.mxu0 }
 0xa35   : > { %v3799_v60 = vpop.f32.mrf.mxu1 }
 0xa38   : > { %4000 = vperm.xlu1 %7006, %v10852_v16  }
 0xa39   : > { %4004 = vperm.xlu2 %7007, %v10859_v58  }
 0xa3c   : > { %v3838_v5 = vpop.f32.mrf.mxu0 }
 0xa3d   : > { %v3849_v37 = vpop.f32.mrf.mxu1 }
 0xa3e   : > { %v3850_v43 = vadd.f32 %v3849_v37, %v3836_v53 }
 0xa45   : > { %v3851_v18 = vpop.f32.mrf.mxu1 }
 0xa5f   : > { %v3810_v19 = vpop.f32.mrf.mxu2 }
 0xa60   : > { %v3811_v7 = vadd.f32 %v3810_v19, %v3798_v28 }
 0xa64   : > { %v3823_v13 = vpop.f32.mrf.mxu3 }
 0xa65   : > { %v3824_v4 = vadd.f32 %v3823_v13, %v3811_v7 }
 0xa67   : > { %v3812_v55 = vpop.f32.mrf.mxu2  ;;  %v6477_v11 = vpack.c.bf16 %v3824_v4, %v13505_v6  ;;  %v6910_v4 = vld [vmem:[%s11785_s5 + $0x100] sm:$0xff] }
 0xa69   : > { %6478 = vmatpush.bf16.msk.msra.mxu0 %vm13507_vm2, %v6477_v11 }
 0xa6c   : > { %v3825_v61 = vpop.f32.mrf.mxu3  ;;  %6479 = vmatmul.msk.bf16.vlgmr.msra.gmra.mxu0 %vm13508_vm3, %v6908_v31  ;;  %vm13530_vm3 = vmmov %vm13518_vm8 }
 0xa6f   : > { %v3862_v3 = vpop.f32.mrf.mxu2 }
 0xa70   : > { %v3863_v2 = vadd.f32 %v3862_v3, %v3850_v43 }
 0xa74   : > { %v3875_v47 = vpop.f32.mrf.mxu3 }
 0xa75   : > { %v3876_v23 = vadd.f32 %v3875_v47, %v3863_v2  ;;  %v13519_v2 = vld [vmem:[#allocation7_spill] sm:$0xff] }
 0xa76   : > { %vm13520_vm5 = vnez %v13519_v2 }
 0xa77   : > { %v3864_v25 = vpop.f32.mrf.mxu2  ;;  %v6483_v49 = vpack.c.bf16 %v3876_v23, %v13509_v36 }
 0xa79   : > { %6484 = vmatpush.bf16.msk.msra.mxu1 %vm13507_vm2, %v6483_v49 }
 0xa7c   : > { %v3877_v51 = vpop.f32.mrf.mxu3  ;;  %6480 = vmatmul.msk.bf16.gmra.mxu0 %vm13510_vm11, %v6909_v62  ;;  %6485 = vmatmul.msk.bf16.vlgmr.msra.gmra.mxu1 %vm13511_vm12, %v6908_v31  ;;  %v13516_v31 = vld [vmem:[#allocation5_spill] sm:$0xff]  ;;  %vm13531_vm11 = vmmov %vm13530_vm3 }
 0xa7d   : > { %vm13517_vm10 = vnez %v13516_v31  ;;  %v13583_v31 = vld [vmem:[#allocation36_spill] sm:$0xff] }
 0xa8c   : > { %6481 = vmatmul.msk.bf16.gmra.mxu0 %vm13512_vm14, %v3922_v22  ;;  %6486 = vmatmul.msk.bf16.gmra.mxu1 %vm13513_vm13, %v6909_v62 }
 0xa9c   : > { %6487 = vmatmul.msk.bf16.gmra.mxu1 %vm13514_vm7, %v3922_v22 }
 0xae9   : > { %v3941_v57 = vpop.f32.mrf.mxu0 }
 0xaea   : > { %v3942_v60 = vadd.f32 %v3941_v57, %v3892_v45 }
 0xaec   : > { %v3978_v28 = vmax.f32 %v3942_v60, 0.0  ;;  %v13556_v60 = vld [vmem:[#allocation20_spill] sm:$0xff] }
 0xaf1   : > { %v3943_v27 = vpop.f32.mrf.mxu0 }
 0xaf2   : > { %v3944_v26 = vadd.f32 %v3943_v27, %v3896_v24  ;;  %v13524_v27 = vld [vmem:[#allocation12_spill] sm:$0xff] }
 0xaf3   : > { %vm13525_vm15 = vnez %v13524_v27 }
 0xaf4   : > { %v3980_v29 = vmax.f32 %v3944_v26, 0.0  ;;  %v13554_v26 = vld [vmem:[#allocation27_spill] sm:$0xff] }
 0xaf6   : > { %v3993_v13 = vpack.c.bf16 %v3980_v29, %v3978_v28  ;;  %v13568_v29 = vld [vmem:[#allocation26_spill] sm:$0xff]  ;;  %v13571_v28 = vld [vmem:[#allocation35_spill] sm:$0xff] }
 0xaf9   : > { %v3946_v59 = vpop.f32.mrf.mxu0  ;;  %v3964_v32 = vpop.f32.mrf.mxu1 }
 0xafa   : > { %v3947_v38 = vadd.f32 %v3946_v59, %v3900_v15  ;;  %v3965_v49 = vadd.f32 %v3964_v32, %v3892_v45  ;;  %v6911_v32 = vld [vmem:[%s11785_s5 + $0x108] sm:$0xff] }
 0xafc   : > { %v3982_v53 = vmax.f32 %v3947_v38, 0.0  ;;  %v3979_v57 = vmax.f32 %v3965_v49, 0.0  ;;  %v13540_v38 = vld [vmem:[#allocation21_spill] sm:$0xff]  ;;  %v4009_v49 = vpop.permute.xlu1 %4008 }
 0xb01   : > { %v3948_v46 = vpop.f32.mrf.mxu0  ;;  %v3966_v40 = vpop.f32.mrf.mxu1 }
 0xb02   : > { %v3949_v50 = vadd.f32 %v3948_v46, %v3904_v63  ;;  %v3967_v47 = vadd.f32 %v3966_v40, %v3896_v24  ;;  %v13526_v46 = vld [vmem:[#allocation15_spill] sm:$0xff]  ;;  %v13528_v40 = vld [vmem:[#allocation6_spill] sm:$0xff] }
 0xb03   : > { %vm13527_vm6 = vnez %v13526_v46  ;;  %vm13529_vm2 = vnez %v13528_v40  ;;  %v13544_v24 = vld [vmem:[#allocation23_spill] sm:$0xff] }
 0xb04   : > { %v3984_v37 = vmax.f32 %v3949_v50, 0.0  ;;  %v3981_v12 = vmax.f32 %v3967_v47, 0.0  ;;  %v13542_v50 = vld [vmem:[#allocation13_spill] sm:$0xff]  ;;  %v4001_v46 = vpop.permute.xlu1 %4000 }
 0xb06   : > { %v3995_v7 = vpack.c.bf16 %v3984_v37, %v3982_v53  ;;  %v3994_v59 = vpack.c.bf16 %v3981_v12, %v3979_v57  ;;  %v13558_v53 = vld [vmem:[#allocation29_spill] sm:$0xff]  ;;  %v13560_v37 = vld [vmem:[#allocation22_spill] sm:$0xff] }
 0xb09   : > { %v3951_v48 = vpop.f32.mrf.mxu0  ;;  %v3969_v30 = vpop.f32.mrf.mxu1 }
 0xb0a   : > { %v3952_v14 = vadd.f32 %v3951_v48, %v3908_v0  ;;  %v3970_v3 = vadd.f32 %v3969_v30, %v3900_v15  ;;  %v13534_v15 = vld [vmem:[#allocation8_spill] sm:$0xff]  ;;  %v13536_v48 = vld [vmem:[#allocation19_spill] sm:$0xff]  ;;  %v13538_v30 = vld [vmem:[#allocation10_spill] sm:$0xff] }
 0xb0b   : > { %vm13535_vm14 = vnez %v13534_v15  ;;  %vm13537_vm13 = vnez %v13536_v48  ;;  %vm13539_vm7 = vnez %v13538_v30 }
 0xb0c   : > { %v3986_v10 = vmax.f32 %v3952_v14, 0.0  ;;  %v3983_v62 = vmax.f32 %v3970_v3, 0.0 }
 0xb0e   : > { %v3997_v42 = vpack.c.bf16 %v3986_v10, %v3986_v10  ;;  %v13546_v10 = vld [vmem:[#allocation16_spill] sm:$0xff] }
 0xb10   : > { %v4042_v5 = vsel %vm13515_vm0, %v3997_v42, 0  ;;  %vm13541_vm0 = vnez %v13540_v38  ;;  %v13552_v42 = vld [vmem:[#allocation18_spill] sm:$0xff] }
 0xb11   : > { %v3971_v18 = vpop.f32.mrf.mxu1  ;;  %4052 = vmatpush.bf16.msrb.mxu2 %v4042_v5  ;;  %v3953_v19 = vpop.f32.mrf.mxu0  ;;  %v13562_v5 = vld [vmem:[#allocation31_spill] sm:$0xff] }
 0xb12   : > { %v3972_v52 = vadd.f32 %v3971_v18, %v3904_v63  ;;  %v13532_v63 = vld [vmem:[#allocation17_spill] sm:$0xff]  ;;  %v13564_v18 = vld [vmem:[#allocation24_spill] sm:$0xff] }
 0xb13   : > { %vm13533_vm12 = vnez %v13532_v63  ;;  %v13566_v19 = vld [vmem:[#allocation33_spill] sm:$0xff] }
 0xb14   : > { %v3985_v23 = vmax.f32 %v3972_v52, 0.0  ;;  %v13585_v52 = vld [vmem:[#allocation38_spill] sm:$0xff] }
 0xb15   : > { %4053 = vmatpush.bf16.msrb.mxu2 %v3995_v7  ;;  %v13573_v7 = vld [vmem:[#allocation28_spill] sm:$0xff] }
 0xb16   : > { %v3996_v22 = vpack.c.bf16 %v3985_v23, %v3983_v62  ;;  %v7134_v62 = vmov 11  }
 0xb17   : > { %7008 = vset.pattern.permute.xlu0 %v7134_v62  ;;  %v13607_v62 = vld [vmem:[#allocation84_spill] sm:$0xff] }
 0xb18   : > { %4111 = vperm.xlu0 %7008, %v7051_v35   ;;  %v13611_v35 = vld [vmem:[#allocation86_spill] sm:$0xff] }
 0xb19   : > { %v3974_v55 = vpop.f32.mrf.mxu1  ;;  %4054 = vmatpush.bf16.msrb.mxu2 %v3993_v13  ;;  %v13575_v13 = vld [vmem:[#allocation37_spill] sm:$0xff] }
 0xb1a   : > { %v3975_v11 = vadd.f32 %v3974_v55, %v3908_v0  ;;  %v3992_v0 = vld [vmem:[%s11785_s5 + $0x110] sm:$0xf]  ;;  %v13579_v55 = vld [vmem:[#allocation32_spill] sm:$0xff] }
 0xb1b   : > { %v4028_v14 = vunpack.c.l.b16 %v3992_v0 }
 0xb1c   : > { %v3987_v61 = vmax.f32 %v3975_v11, 0.0  ;;  %6496 = vmatmul.msk.bf16.vlgmr.msrb.gmra.mxu2 %vm13518_vm8, %v6910_v4  ;;  %vm13545_vm8 = vnez %v13544_v24  ;;  %v13581_v11 = vld [vmem:[#allocation34_spill] sm:$0xff] }
 0xb1d   : > { %6505 = vmatpush.bf16.msk.msra.mxu2 %vm13517_vm10, %v12557_v54  ;;  %vm13543_vm10 = vnez %v13542_v50  ;;  %v4031_v45 = vpack.c.b16 %v4028_v14, %v4028_v14 }
 0xb1e   : > { %v3998_v43 = vpack.c.bf16 %v3987_v61, %v3987_v61 }
 0xb20   : > { %v4045_v25 = vsel %vm13521_vm9, %v3998_v43, 0  ;;  %vm13549_vm9 = vnez %v13548_v20 }
 0xb21   : > { %6507 = vmatpush.bf16.msk.msra.mxu2 %vm13520_vm5, %v12557_v54  ;;  %v3976_v51 = vpop.f32.mrf.mxu1  ;;  %4075 = vmatpush.bf16.msrb.mxu3 %v4045_v25  ;;  %vm13547_vm5 = vnez %v13546_v10  ;;  %v4013_v25 = vpop.permute.xlu2 %4012 }
 0xb22   : > { %v4017_v51 = vpop.permute.xlu0 %4016 }
 0xb25   : > { %6509 = vmatpush.bf16.msk.msra.mxu2 %vm13523_vm4, %v12557_v54  ;;  %4076 = vmatpush.bf16.msrb.mxu3 %v3996_v22  ;;  %vm13550_vm4 = vmmov %vm13530_vm3 }
 0xb29   : > { %6511 = vmatpush.bf16.msk.msra.mxu2 %vm13525_vm15, %v12557_v54  ;;  %4077 = vmatpush.bf16.msrb.mxu3 %v3994_v59  ;;  %vm13551_vm15 = vmmov %vm13530_vm3 }
 0xb2c   : > { %6497 = vmatmul.msk.bf16.gmra.mxu2 %vm13530_vm3, %v6911_v32  ;;  %6499 = vmatmul.msk.bf16.vlgmr.msrb.gmra.mxu3 %vm13531_vm11, %v6910_v4  ;;  %vm13557_vm3 = vnez %v13556_v60  ;;  %vm13559_vm11 = vnez %v13558_v53  ;;  %v13577_v4 = vld [vmem:[#allocation30_spill] sm:$0xff] }
 0xb2d   : > { %6513 = vmatpush.bf16.msk.msra.mxu2 %vm13527_vm6, %v12557_v54  ;;  %6521 = vmatpush.bf16.msk.msra.mxu3 %vm13529_vm2, %v12557_v54  ;;  %vm13553_vm6 = vnez %v13552_v42  ;;  %vm13555_vm2 = vnez %v13554_v26  ;;  %v4103_v26 = vld [vmem:[%s11785_s5 + $0x118] sm:$0x7] }
 0xb2e   : > { %v13588_v53 = vld [vmem:[#allocation74_spill] sm:$0xff] }
 0xb31   : > { %6515 = vmatpush.bf16.msk.msra.mxu2 %vm13533_vm12, %v12557_v54  ;;  %6523 = vmatpush.bf16.msk.msra.mxu3 %vm13535_vm14, %v12557_v54  ;;  %vm13561_vm12 = vnez %v13560_v37  ;;  %vm13563_vm14 = vnez %v13562_v5 }
 0xb35   : > { %6517 = vmatpush.bf16.msk.msra.mxu2 %vm13537_vm13, %v12557_v54  ;;  %6525 = vmatpush.bf16.msk.msra.mxu3 %vm13539_vm7, %v12557_v54  ;;  %vm13565_vm13 = vnez %v13564_v18  ;;  %vm13567_vm7 = vnez %v13566_v19 }
 0xb39   : > { %6519 = vmatpush.bf16.msk.msra.mxu2 %vm13541_vm0, %v12557_v54  ;;  %6527 = vmatpush.bf16.msk.msra.mxu3 %vm13543_vm10, %v12557_v54  ;;  %vm13569_vm0 = vnez %v13568_v29  ;;  %vm13570_vm10 = vmmov %vm13550_vm4  ;;  %v13591_v29 = vld [vmem:[#allocation76_spill] sm:$0xff] }
 0xb3c   : > { %6498 = vmatmul.msk.bf16.gmra.mxu2 %vm13550_vm4, %v4031_v45  ;;  %6500 = vmatmul.msk.bf16.gmra.mxu3 %vm13551_vm15, %v6911_v32  ;;  %vm13578_vm4 = vnez %v13577_v4  ;;  %vm13580_vm15 = vnez %v13579_v55  ;;  %v4005_v32 = vpop.permute.xlu2 %4004 }
 0xb3d   : > { %6569 = vmatpush.bf16.msk.msrb.mxu2 %vm13545_vm8, %v12557_v54  ;;  %6529 = vmatpush.bf16.msk.msra.mxu3 %vm13547_vm5, %v12557_v54  ;;  %vm13572_vm8 = vnez %v13571_v28  ;;  %vm13574_vm5 = vnez %v13573_v7 }
 0xb41   : > { %6571 = vmatpush.bf16.msk.msrb.mxu2 %vm13549_vm9, %v12557_v54  ;;  %6531 = vmatpush.bf16.msk.msra.mxu3 %vm13553_vm6, %v12557_v54  ;;  %vm13576_vm9 = vnez %v13575_v13  ;;  %vm13582_vm6 = vnez %v13581_v11 }
 0xb45   : > { %6573 = vmatpush.bf16.msk.msrb.mxu2 %vm13555_vm2, %v12557_v54  ;;  %6533 = vmatpush.bf16.msk.msra.mxu3 %vm13557_vm3, %v12557_v54  ;;  %vm13584_vm2 = vnez %v13583_v31  ;;  %vm13586_vm3 = vnez %v13585_v52  ;;  %v13594_v31 = vld [vmem:[#allocation78_spill] sm:$0xff] }
 0xb49   : > { %6575 = vmatpush.bf16.msk.msrb.mxu2 %vm13559_vm11, %v12557_v54  ;;  %6535 = vmatpush.bf16.msk.msra.mxu3 %vm13561_vm12, %v12557_v54  ;;  %vm13587_vm11 = vcmask 1043456   ;;  %vm13589_vm12 = vnez %v13588_v53 }
 0xb4c   : > { %6501 = vmatmul.msk.bf16.gmra.mxu3 %vm13570_vm10, %v4031_v45 }
 0xb4d   : > { %6577 = vmatpush.bf16.msk.msrb.mxu2 %vm13563_vm14, %v12557_v54  ;;  %6585 = vmatpush.bf16.msk.msrb.mxu3 %vm13565_vm13, %v12557_v54  ;;  %vm13590_vm14 = vmmov %vm13570_vm10  ;;  %vm13592_vm13 = vnez %v13591_v29 }
 0xb51   : > { %6579 = vmatpush.bf16.msk.msrb.mxu2 %vm13567_vm7, %v12557_v54  ;;  %6587 = vmatpush.bf16.msk.msrb.mxu3 %vm13569_vm0, %v12557_v54  ;;  %vm13593_vm7 = vmmov %vm13587_vm11  ;;  %vm13595_vm0 = vnez %v13594_v31  ;;  %v13665_v31 = vld [vmem:[#allocation107_spill] sm:$0xff] }
 0xb55   : > { %6581 = vmatpush.bf16.msk.msrb.mxu2 %vm13572_vm8, %v12557_v54  ;;  %6589 = vmatpush.bf16.msk.msrb.mxu3 %vm13574_vm5, %v12557_v54 }
 0xb59   : > { %6583 = vmatpush.bf16.msk.msrb.mxu2 %vm13576_vm9, %v12557_v54  ;;  %6591 = vmatpush.bf16.msk.msrb.mxu3 %vm13578_vm4, %v12557_v54  ;;  %vm13602_vm9 = vmmov %vm13590_vm14 }
 0xb5d   : > { %6593 = vmatpush.bf16.msk.msrb.mxu3 %vm13580_vm15, %v12557_v54 }
 0xb61   : > { %6595 = vmatpush.bf16.msk.msrb.mxu3 %vm13582_vm6, %v12557_v54  ;;  %vm13608_vm6 = vnez %v13607_v62  ;;  %v13677_v62 = vld [vmem:[#allocation104_spill] sm:$0xff] }
 0xb65   : > { %6597 = vmatpush.bf16.msk.msrb.mxu3 %vm13584_vm2, %v12557_v54 }
 0xb69   : > { %6599 = vmatpush.bf16.msk.msrb.mxu3 %vm13586_vm3, %v12557_v54  ;;  %vm13612_vm3 = vnez %v13611_v35  ;;  %v13681_v35 = vld [vmem:[#allocation45_spill] sm:$0xff] }
 0xb9f   : > { %v4056_v61 = vpop.f32.mrf.mxu2 }
 0xba0   : > { %v4057_v0 = vadd.f32 %v4056_v61, %v4001_v46 }
 0xba2   : > { %v4093_v45 = vmax.f32 %v4057_v0, 0.0  ;;  %v13633_v0 = vld [vmem:[#allocation89_spill] sm:$0xff] }
 0xba7   : > { %v4058_v3 = vpop.f32.mrf.mxu2 }
 0xba8   : > { %v4059_v15 = vadd.f32 %v4058_v3, %v4005_v32 }
 0xbaa   : > { %v4095_v24 = vmax.f32 %v4059_v15, 0.0  ;;  %v13631_v15 = vld [vmem:[#allocation96_spill] sm:$0xff] }
 0xbac   : > { %v4104_v20 = vpack.c.bf16 %v4095_v24, %v4093_v45  ;;  %v13645_v24 = vld [vmem:[#allocation95_spill] sm:$0xff]  ;;  %v13647_v45 = vld [vmem:[#allocation97_spill] sm:$0xff] }
 0xbaf   : > { %v4061_v43 = vpop.f32.mrf.mxu2  ;;  %v4079_v2 = vpop.f32.mrf.mxu3 }
 0xbb0   : > { %v4062_v27 = vadd.f32 %v4061_v43, %v4009_v49  ;;  %v4080_v4 = vadd.f32 %v4079_v2, %v4001_v46  ;;  %v13596_v43 = vld [vmem:[#allocation80_spill] sm:$0xff]  ;;  %v13600_v2 = vld [vmem:[#allocation75_spill] sm:$0xff]  ;;  %v13625_v46 = vld [vmem:[#allocation85_spill] sm:$0xff] }
 0xbb1   : > { %vm13597_vm10 = vnez %v13596_v43  ;;  %vm13601_vm5 = vnez %v13600_v2  ;;  %v13667_v43 = vld [vmem:[#allocation48_spill] sm:$0xff] }
 0xbb2   : > { %v4097_v48 = vmax.f32 %v4062_v27, 0.0  ;;  %v4094_v3 = vmax.f32 %v4080_v4, 0.0  ;;  %v13619_v27 = vld [vmem:[#allocation90_spill] sm:$0xff] }
 0xbb7   : > { %v4063_v47 = vpop.f32.mrf.mxu2  ;;  %v4081_v23 = vpop.f32.mrf.mxu3 }
 0xbb8   : > { %v4064_v59 = vadd.f32 %v4063_v47, %v4013_v25  ;;  %v4082_v28 = vadd.f32 %v4081_v23, %v4005_v32  ;;  %v13598_v23 = vld [vmem:[#allocation11_spill] sm:$0xff]  ;;  %v13623_v32 = vld [vmem:[#allocation92_spill] sm:$0xff] }
 0xbb9   : > { %vm13599_vm8 = vnez %v13598_v23 }
 0xbba   : > { %v4099_v30 = vmax.f32 %v4064_v59, 0.0  ;;  %v4096_v52 = vmax.f32 %v4082_v28, 0.0  ;;  %v13621_v59 = vld [vmem:[#allocation83_spill] sm:$0xff]  ;;  %v13655_v28 = vld [vmem:[#allocation42_spill] sm:$0xff] }
 0xbbc   : > { %v4106_v10 = vpack.c.bf16 %v4099_v30, %v4097_v48  ;;  %v4105_v47 = vpack.c.bf16 %v4096_v52, %v4094_v3  ;;  %v13635_v48 = vld [vmem:[#allocation98_spill] sm:$0xff]  ;;  %v13637_v30 = vld [vmem:[#allocation91_spill] sm:$0xff]  ;;  %v4150_v52 = vmul.f32 0.5, %v13509_v36 }
 0xbbd   : > { %v13671_v36 = vld [vmem:[#allocation50_spill] sm:$0xff] }
 0xbbf   : > { %v4066_v12 = vpop.f32.mrf.mxu2  ;;  %v4084_v22 = vpop.f32.mrf.mxu3 }
 0xbc0   : > { %v4067_v57 = vadd.f32 %v4066_v12, %v4017_v51  ;;  %v4085_v18 = vadd.f32 %v4084_v22, %v4009_v49  ;;  %v13605_v49 = vld [vmem:[#allocation77_spill] sm:$0xff]  ;;  %v13615_v22 = vld [vmem:[#allocation88_spill] sm:$0xff] }
 0xbc1   : > { %vm13606_vm15 = vnez %v13605_v49  ;;  %v13613_v12 = vld [vmem:[#allocation81_spill] sm:$0xff]  ;;  %v13675_v49 = vld [vmem:[#allocation111_spill] sm:$0xff] }
 0xbc2   : > { %v4101_v40 = vmax.f32 %v4067_v57, 0.0  ;;  %v4098_v55 = vmax.f32 %v4085_v18, 0.0  ;;  %v13617_v57 = vld [vmem:[#allocation82_spill] sm:$0xff] }
 0xbc4   : > { %v4108_v63 = vpack.c.bf16 %v4101_v40, %v4101_v40  ;;  %v13627_v40 = vld [vmem:[#allocation94_spill] sm:$0xff] }
 0xbc6   : > { %v4118_v14 = vsel %vm13587_vm11, %v4108_v63, 0  ;;  %vm13614_vm11 = vnez %v13613_v12  ;;  %v13629_v63 = vld [vmem:[#allocation87_spill] sm:$0xff]  ;;  %v13683_v12 = vld [vmem:[#allocation113_spill] sm:$0xff] }
 0xbc7   : > { %v4086_v38 = vpop.f32.mrf.mxu3  ;;  %4128 = vmatpush.bf16.msrb.mxu0 %v4118_v14  ;;  %v4068_v50 = vpop.f32.mrf.mxu2  ;;  %v13639_v14 = vld [vmem:[#allocation39_spill] sm:$0xff] }
 0xbc8   : > { %v4087_v37 = vadd.f32 %v4086_v38, %v4013_v25  ;;  %v13603_v25 = vld [vmem:[#allocation14_spill] sm:$0xff]  ;;  %v13641_v38 = vld [vmem:[#allocation93_spill] sm:$0xff] }
 0xbc9   : > { %vm13604_vm4 = vnez %v13603_v25  ;;  %v13643_v50 = vld [vmem:[#allocation101_spill] sm:$0xff]  ;;  %v13673_v25 = vld [vmem:[#allocation43_spill] sm:$0xff] }
 0xbca   : > { %v4100_v7 = vmax.f32 %v4087_v37, 0.0  ;;  %v4149_v37 = vmul.f32 0.5, %v13505_v6  ;;  %v13661_v6 = vld [vmem:[#allocation105_spill] sm:$0xff] }
 0xbcb   : > { %4129 = vmatpush.bf16.msrb.mxu0 %v4106_v10  ;;  %v13649_v10 = vld [vmem:[#allocation99_spill] sm:$0xff] }
 0xbcc   : > { %v4107_v61 = vpack.c.bf16 %v4100_v7, %v4098_v55  ;;  %v13657_v7 = vld [vmem:[#allocation103_spill] sm:$0xff] }
 0xbcf   : > { %v4089_v42 = vpop.f32.mrf.mxu3  ;;  %4130 = vmatpush.bf16.msrb.mxu0 %v4104_v20  ;;  %v13651_v20 = vld [vmem:[#allocation100_spill] sm:$0xff] }
 0xbd0   : > { %v4090_v60 = vadd.f32 %v4089_v42, %v4017_v51  ;;  %v13609_v51 = vld [vmem:[#allocation79_spill] sm:$0xff]  ;;  %v13653_v42 = vld [vmem:[#allocation102_spill] sm:$0xff] }
 0xbd1   : > { %vm13610_vm2 = vnez %v13609_v51  ;;  %v13679_v51 = vld [vmem:[#allocation52_spill] sm:$0xff] }
 0xbd2   : > { %v4102_v5 = vmax.f32 %v4090_v60, 0.0  ;;  %6502 = vmatmul.msk.bf16.vlgmr.msrb.gmra.mxu0 %vm13590_vm14, %v4103_v26  ;;  %vm13618_vm14 = vnez %v13617_v57  ;;  %v13687_v57 = vld [vmem:[#allocation54_spill] sm:$0xff] }
 0xbd3   : > { %6537 = vmatpush.bf16.msk.msra.mxu0 %vm13589_vm12, %v12557_v54  ;;  %vm13616_vm12 = vnez %v13615_v22  ;;  %v13685_v22 = vld [vmem:[#allocation106_spill] sm:$0xff] }
 0xbd4   : > { %v4109_v19 = vpack.c.bf16 %v4102_v5, %v4102_v5 }
 0xbd6   : > { %v4121_v13 = vsel %vm13593_vm7, %v4109_v19, 0  ;;  %vm13622_vm7 = vnez %v13621_v59  ;;  %v13691_v59 = vld [vmem:[#allocation115_spill] sm:$0xff] }
 0xbd7   : > { %6539 = vmatpush.bf16.msk.msra.mxu0 %vm13592_vm13, %v12557_v54  ;;  %v4091_v11 = vpop.f32.mrf.mxu3  ;;  %4141 = vmatpush.bf16.msrb.mxu1 %v4121_v13  ;;  %vm13620_vm13 = vnez %v13619_v27  ;;  %v13659_v13 = vld [vmem:[#allocation44_spill] sm:$0xff]  ;;  %v13689_v27 = vld [vmem:[#allocation47_spill] sm:$0xff] }
 0xbd8   : > { %v13663_v11 = vld [vmem:[#allocation46_spill] sm:$0xff] }
 0xbdb   : > { %6541 = vmatpush.bf16.msk.msra.mxu0 %vm13595_vm0, %v12557_v54  ;;  %4142 = vmatpush.bf16.msrb.mxu1 %v4107_v61  ;;  %vm13624_vm0 = vnez %v13623_v32  ;;  %v13693_v32 = vld [vmem:[#allocation108_spill] sm:$0xff] }
 0xbdf   : > { %6543 = vmatpush.bf16.msk.msra.mxu0 %vm13597_vm10, %v12557_v54  ;;  %4143 = vmatpush.bf16.msrb.mxu1 %v4105_v47  ;;  %vm13626_vm10 = vnez %v13625_v46  ;;  %v13669_v47 = vld [vmem:[#allocation109_spill] sm:$0xff]  ;;  %v13695_v46 = vld [vmem:[#allocation56_spill] sm:$0xff] }
 0xbe2   : > { %6503 = vmatmul.msk.bf16.vlgmr.msrb.gmra.mxu1 %vm13602_vm9, %v4103_v26  ;;  %vm13632_vm9 = vnez %v13631_v15  ;;  %v4112_v26 = vpop.permute.xlu0 %4111  ;;  %v13701_v15 = vld [vmem:[#allocation110_spill] sm:$0xff] }
 0xbe3   : > { %6545 = vmatpush.bf16.msk.msra.mxu0 %vm13599_vm8, %v12557_v54  ;;  %6553 = vmatpush.bf16.msk.msra.mxu1 %vm13601_vm5, %v12557_v54  ;;  %vm13628_vm8 = vnez %v13627_v40  ;;  %vm13630_vm5 = vnez %v13629_v63  ;;  %v13697_v40 = vld [vmem:[#allocation49_spill] sm:$0xff] }
 0xbe4   : > { %v13699_v63 = vld [vmem:[#allocation117_spill] sm:$0xff] }
 0xbe7   : > { %6547 = vmatpush.bf16.msk.msra.mxu0 %vm13604_vm4, %v12557_v54  ;;  %6555 = vmatpush.bf16.msk.msra.mxu1 %vm13606_vm15, %v12557_v54  ;;  %vm13634_vm4 = vnez %v13633_v0  ;;  %vm13636_vm15 = vnez %v13635_v48  ;;  %v13703_v0 = vld [vmem:[#allocation58_spill] sm:$0xff]  ;;  %v13705_v48 = vld [vmem:[#allocation119_spill] sm:$0xff] }
 0xbeb   : > { %6549 = vmatpush.bf16.msk.msra.mxu0 %vm13608_vm6, %v12557_v54  ;;  %6557 = vmatpush.bf16.msk.msra.mxu1 %vm13610_vm2, %v12557_v54  ;;  %vm13638_vm6 = vnez %v13637_v30  ;;  %vm13640_vm2 = vnez %v13639_v14  ;;  %v13707_v30 = vld [vmem:[#allocation51_spill] sm:$0xff]  ;;  %v13709_v14 = vld [vmem:[#allocation112_spill] sm:$0xff] }
 0xbef   : > { %6551 = vmatpush.bf16.msk.msra.mxu0 %vm13612_vm3, %v12557_v54  ;;  %6559 = vmatpush.bf16.msk.msra.mxu1 %vm13614_vm11, %v12557_v54  ;;  %vm13642_vm3 = vnez %v13641_v38  ;;  %vm13644_vm11 = vnez %v13643_v50  ;;  %v13711_v38 = vld [vmem:[#allocation60_spill] sm:$0xff]  ;;  %v13713_v50 = vld [vmem:[#allocation121_spill] sm:$0xff] }
 0xbf3   : > { %6601 = vmatpush.bf16.msk.msrb.mxu0 %vm13616_vm12, %v12557_v54  ;;  %6561 = vmatpush.bf16.msk.msra.mxu1 %vm13618_vm14, %v12557_v54  ;;  %vm13646_vm12 = vnez %v13645_v24  ;;  %vm13648_vm14 = vnez %v13647_v45  ;;  %v13715_v24 = vld [vmem:[#allocation53_spill] sm:$0xff]  ;;  %v13717_v45 = vld [vmem:[#allocation114_spill] sm:$0xff] }
 0xbf7   : > { %6603 = vmatpush.bf16.msk.msrb.mxu0 %vm13620_vm13, %v12557_v54  ;;  %6563 = vmatpush.bf16.msk.msra.mxu1 %vm13622_vm7, %v12557_v54  ;;  %vm13650_vm13 = vnez %v13649_v10  ;;  %vm13652_vm7 = vnez %v13651_v20  ;;  %v13719_v10 = vld [vmem:[#allocation62_spill] sm:$0xff]  ;;  %v13721_v20 = vld [vmem:[#allocation123_spill] sm:$0xff] }
 0xbfb   : > { %6605 = vmatpush.bf16.msk.msrb.mxu0 %vm13624_vm0, %v12557_v54  ;;  %6565 = vmatpush.bf16.msk.msra.mxu1 %vm13626_vm10, %v12557_v54  ;;  %vm13654_vm0 = vnez %v13653_v42  ;;  %vm13656_vm10 = vnez %v13655_v28  ;;  %v13723_v42 = vld [vmem:[#allocation55_spill] sm:$0xff] }
 0xbfc   : > { %v13739_v28 = vld [vmem:[#allocation127_spill] sm:$0xff] }
 0xbff   : > { %6607 = vmatpush.bf16.msk.msrb.mxu0 %vm13628_vm8, %v12557_v54  ;;  %6567 = vmatpush.bf16.msk.msra.mxu1 %vm13630_vm5, %v12557_v54  ;;  %vm13658_vm8 = vnez %v13657_v7  ;;  %vm13660_vm5 = vnez %v13659_v13  ;;  %v13741_v7 = vld [vmem:[#allocation120_spill] sm:$0xff]  ;;  %v13743_v13 = vld [vmem:[#allocation61_spill] sm:$0xff] }
 0xc03   : > { %6609 = vmatpush.bf16.msk.msrb.mxu0 %vm13632_vm9, %v12557_v54  ;;  %6617 = vmatpush.bf16.msk.msrb.mxu1 %vm13634_vm4, %v12557_v54  ;;  %vm13662_vm9 = vnez %v13661_v6  ;;  %vm13664_vm4 = vnez %v13663_v11  ;;  %v13745_v6 = vld [vmem:[#allocation68_spill] sm:$0xff] }
 0xc07   : > { %6611 = vmatpush.bf16.msk.msrb.mxu0 %vm13636_vm15, %v12557_v54  ;;  %6619 = vmatpush.bf16.msk.msrb.mxu1 %vm13638_vm6, %v12557_v54  ;;  %vm13666_vm15 = vnez %v13665_v31  ;;  %vm13668_vm6 = vnez %v13667_v43 }
 0xc0b   : > { %6613 = vmatpush.bf16.msk.msrb.mxu0 %vm13640_vm2, %v12557_v54  ;;  %6621 = vmatpush.bf16.msk.msrb.mxu1 %vm13642_vm3, %v12557_v54  ;;  %vm13670_vm2 = vnez %v13669_v47  ;;  %vm13672_vm3 = vnez %v13671_v36  ;;  %v13759_v47 = vld [vmem:[#allocation124_spill] sm:$0xff]  ;;  %v13761_v36 = vld [vmem:[#allocation65_spill] sm:$0xff] }
 0xc0f   : > { %6615 = vmatpush.bf16.msk.msrb.mxu0 %vm13644_vm11, %v12557_v54  ;;  %6623 = vmatpush.bf16.msk.msrb.mxu1 %vm13646_vm12, %v12557_v54  ;;  %vm13674_vm11 = vnez %v13673_v25  ;;  %vm13676_vm12 = vnez %v13675_v49  ;;  %v13763_v25 = vld [vmem:[#allocation72_spill] sm:$0xff]  ;;  %v13765_v49 = vld [vmem:[#allocation133_spill] sm:$0xff] }
 0xc13   : > { %6625 = vmatpush.bf16.msk.msrb.mxu1 %vm13648_vm14, %v12557_v54  ;;  %vm13678_vm14 = vnez %v13677_v62 }
 0xc17   : > { %6627 = vmatpush.bf16.msk.msrb.mxu1 %vm13650_vm13, %v12557_v54  ;;  %vm13680_vm13 = vnez %v13679_v51  ;;  %v13768_v51 = vld [vmem:[#allocation126_spill] sm:$0xff] }
 0xc1b   : > { %6629 = vmatpush.bf16.msk.msrb.mxu1 %vm13652_vm7, %v12557_v54  ;;  %vm13682_vm7 = vnez %v13681_v35 }
 0xc1f   : > { %6631 = vmatpush.bf16.msk.msrb.mxu1 %vm13654_vm0, %v12557_v54  ;;  %vm13684_vm0 = vnez %v13683_v12  ;;  %v13771_v12 = vld [vmem:[#allocation67_spill] sm:$0xff] }
 0xc4f   : > { %v4132_v60 = vpop.f32.mrf.mxu0 }
 0xc50   : > { %v4133_v53 = vadd.f32 %v4132_v60, %v4112_v26  ;;  %v13727_v60 = vld [vmem:[#allocation64_spill] sm:$0xff] }
 0xc52   : > { %v4151_v5 = vmul.f32 0.5, %v4133_v53  ;;  %v13729_v53 = vld [vmem:[#allocation125_spill] sm:$0xff] }
 0xc54   : > { %v4153_v18 = vadd.f32 %v4151_v5, %v4149_v37  ;;  %v13731_v37 = vld [vmem:[#allocation57_spill] sm:$0xff]  ;;  %v13733_v5 = vld [vmem:[#allocation118_spill] sm:$0xff] }
 0xc56   : > { %v11107_v19 = vpack.c.bf16 %v4153_v18, %v4153_v18  ;;  %v13735_v18 = vld [vmem:[#allocation59_spill] sm:$0xff] }
 0xc57   : > { %v4134_v29 = vpop.f32.mrf.mxu0 }
 0xc58   : > { %4181 = vmatmul.bf16.vlgmr.msra.gmra.mxu2 %v11107_v19  ;;  %4207 = vmatmul.bf16.vlgmr.msra.gmra.mxu0 %v11107_v19  ;;  %v13737_v29 = vld [vmem:[#allocation66_spill] sm:$0xff] }
 0xc59   : > { %6633 = vmatpush.bf16.msk.msra.mxu2 %vm13656_vm10, %v12557_v54  ;;  %6665 = vmatpush.bf16.msk.msra.mxu0 %vm13658_vm8, %v12557_v54  ;;  %vm13686_vm10 = vnez %v13685_v22  ;;  %vm13688_vm8 = vnez %v13687_v57  ;;  %v13773_v22 = vld [vmem:[#allocation128_spill] sm:$0xff]  ;;  %v13775_v57 = vld [vmem:[#allocation69_spill] sm:$0xff] }
 0xc5d   : > { %6635 = vmatpush.bf16.msk.msra.mxu2 %vm13660_vm5, %v12557_v54  ;;  %6667 = vmatpush.bf16.msk.msra.mxu0 %vm13662_vm9, %v12557_v54  ;;  %vm13690_vm5 = vnez %v13689_v27  ;;  %vm13692_vm9 = vnez %v13691_v59  ;;  %v13777_v27 = vld [vmem:[#allocation130_spill] sm:$0xff] }
 0xc5f   : > { %v4145_v4 = vpop.f32.mrf.mxu1 }
 0xc60   : > { %v4146_v55 = vadd.f32 %v4145_v4, %v4112_v26  ;;  %v13725_v26 = vld [vmem:[#allocation116_spill] sm:$0xff]  ;;  %v13747_v4 = vld [vmem:[#allocation129_spill] sm:$0xff] }
 0xc61   : > { %6637 = vmatpush.bf16.msk.msra.mxu2 %vm13664_vm4, %v12557_v54  ;;  %6669 = vmatpush.bf16.msk.msra.mxu0 %vm13666_vm15, %v12557_v54  ;;  %vm13694_vm4 = vnez %v13693_v32  ;;  %vm13696_vm15 = vnez %v13695_v46  ;;  %v13781_v32 = vld [vmem:[#allocation71_spill] sm:$0xff] }
 0xc62   : > { %v4152_v61 = vmul.f32 0.5, %v4146_v55  ;;  %v13749_v55 = vld [vmem:[#allocation122_spill] sm:$0xff] }
 0xc64   : > { %v4154_v3 = vadd.f32 %v4152_v61, %v4150_v52  ;;  %v13753_v52 = vld [vmem:[#allocation63_spill] sm:$0xff]  ;;  %v13755_v61 = vld [vmem:[#allocation70_spill] sm:$0xff] }
 0xc65   : > { %6639 = vmatpush.bf16.msk.msra.mxu2 %vm13668_vm6, %v12557_v54  ;;  %6671 = vmatpush.bf16.msk.msra.mxu0 %vm13670_vm2, %v12557_v54  ;;  %vm13698_vm6 = vnez %v13697_v40  ;;  %vm13700_vm2 = vnez %v13699_v63  ;;  %v13783_v40 = vld [vmem:[#allocation132_spill] sm:$0xff] }
 0xc66   : > { %v11136_v23 = vpack.c.bf16 %v4154_v3, %v4154_v3  ;;  %v13757_v3 = vld [vmem:[#allocation131_spill] sm:$0xff] }
 0xc67   : > { %v4147_v2 = vpop.f32.mrf.mxu1 }
 0xc68   : > { %4194 = vmatmul.bf16.vlgmr.msra.gmra.mxu3 %v11136_v23  ;;  %4220 = vmatmul.bf16.vlgmr.msra.gmra.mxu1 %v11136_v23 }
 0xc69   : > { %4233 = vmatmul.bf16.vlgmr.msrb.gmra.mxu2 %v11107_v19  ;;  %4259 = vmatmul.bf16.vlgmr.msrb.gmra.mxu0 %v11107_v19 }
 0xc6a   : > { %6641 = vmatpush.bf16.msk.msra.mxu2 %vm13672_vm3, %v12557_v54  ;;  %6649 = vmatpush.bf16.msk.msra.mxu3 %vm13674_vm11, %v12557_v54  ;;  %vm13702_vm3 = vnez %v13701_v15  ;;  %vm13704_vm11 = vnez %v13703_v0  ;;  %v13785_v15 = vld [vmem:[#allocation73_spill] sm:$0xff] }
 0xc6b   : > { %6673 = vmatpush.bf16.msk.msra.mxu0 %vm13676_vm12, %v12557_v54  ;;  %6681 = vmatpush.bf16.msk.msra.mxu1 %vm13678_vm14, %v12557_v54  ;;  %vm13706_vm12 = vnez %v13705_v48  ;;  %vm13708_vm14 = vnez %v13707_v30  ;;  %v13788_v48 = vld [vmem:[#allocation134_spill] sm:$0xff] }
 0xc6e   : > { %6643 = vmatpush.bf16.msk.msra.mxu2 %vm13680_vm13, %v12557_v54  ;;  %6651 = vmatpush.bf16.msk.msra.mxu3 %vm13682_vm7, %v12557_v54  ;;  %vm13710_vm13 = vnez %v13709_v14  ;;  %vm13712_vm7 = vnez %v13711_v38 }
 0xc6f   : > { %6675 = vmatpush.bf16.msk.msra.mxu0 %vm13684_vm0, %v12557_v54  ;;  %6683 = vmatpush.bf16.msk.msra.mxu1 %vm13686_vm10, %v12557_v54  ;;  %vm13714_vm0 = vnez %v13713_v50  ;;  %vm13716_vm10 = vnez %v13715_v24 }
 0xc72   : > { %6645 = vmatpush.bf16.msk.msra.mxu2 %vm13688_vm8, %v12557_v54  ;;  %6653 = vmatpush.bf16.msk.msra.mxu3 %vm13690_vm5, %v12557_v54  ;;  %vm13718_vm8 = vnez %v13717_v45  ;;  %vm13720_vm5 = vnez %v13719_v10 }
 0xc73   : > { %6677 = vmatpush.bf16.msk.msra.mxu0 %vm13692_vm9, %v12557_v54  ;;  %6685 = vmatpush.bf16.msk.msra.mxu1 %vm13694_vm4, %v12557_v54  ;;  %vm13722_vm9 = vnez %v13721_v20  ;;  %vm13724_vm4 = vnez %v13723_v42 }
 0xc76   : > { %6647 = vmatpush.bf16.msk.msra.mxu2 %vm13696_vm15, %v12557_v54  ;;  %6655 = vmatpush.bf16.msk.msra.mxu3 %vm13698_vm6, %v12557_v54  ;;  %vm13726_vm15 = vnez %v13725_v26  ;;  %vm13728_vm6 = vnez %v13727_v60 }
 0xc77   : > { %6679 = vmatpush.bf16.msk.msra.mxu0 %vm13700_vm2, %v12557_v54  ;;  %6687 = vmatpush.bf16.msk.msra.mxu1 %vm13702_vm3, %v12557_v54  ;;  %vm13730_vm2 = vnez %v13729_v53  ;;  %vm13732_vm3 = vnez %v13731_v37 }
 0xc78   : > { %4246 = vmatmul.bf16.vlgmr.msrb.gmra.mxu3 %v11136_v23  ;;  %4272 = vmatmul.bf16.vlgmr.msrb.gmra.mxu1 %v11136_v23 }
 0xc79   : > { %4285 = vmatmul.bf16.vlgmr.msra.gmra.mxu2 %v11107_v19 }
 0xc7a   : > { %6697 = vmatpush.bf16.msk.msrb.mxu2 %vm13704_vm11, %v12557_v54  ;;  %6657 = vmatpush.bf16.msk.msra.mxu3 %vm13708_vm14, %v12557_v54  ;;  %vm13734_vm11 = vnez %v13733_v5  ;;  %vm13738_vm14 = vnez %v13737_v29 }
 0xc7b   : > { %6729 = vmatpush.bf16.msk.msrb.mxu0 %vm13706_vm12, %v12557_v54  ;;  %6689 = vmatpush.bf16.msk.msra.mxu1 %vm13710_vm13, %v12557_v54  ;;  %vm13736_vm12 = vnez %v13735_v18  ;;  %vm13740_vm13 = vnez %v13739_v28 }
 0xc7c   : > { %4311 = vmatmul.bf16.vlgmr.msra.gmra.mxu0 %v11107_v19 }
 0xc7e   : > { %6699 = vmatpush.bf16.msk.msrb.mxu2 %vm13712_vm7, %v12557_v54  ;;  %6659 = vmatpush.bf16.msk.msra.mxu3 %vm13716_vm10, %v12557_v54  ;;  %vm13742_vm7 = vnez %v13741_v7  ;;  %vm13746_vm10 = vnez %v13745_v6 }
 0xc7f   : > { %6731 = vmatpush.bf16.msk.msrb.mxu0 %vm13714_vm0, %v12557_v54  ;;  %6691 = vmatpush.bf16.msk.msra.mxu1 %vm13718_vm8, %v12557_v54  ;;  %vm13744_vm0 = vnez %v13743_v13  ;;  %vm13748_vm8 = vnez %v13747_v4 }
 0xc82   : > { %6701 = vmatpush.bf16.msk.msrb.mxu2 %vm13720_vm5, %v12557_v54  ;;  %6661 = vmatpush.bf16.msk.msra.mxu3 %vm13724_vm4, %v12557_v54  ;;  %vm13750_vm5 = vnez %v13749_v55 }
 0xc83   : > { %6733 = vmatpush.bf16.msk.msrb.mxu0 %vm13722_vm9, %v12557_v54  ;;  %6693 = vmatpush.bf16.msk.msra.mxu1 %vm13726_vm15, %v12557_v54  ;;  %vm13751_vm9 = vcmask 1043456   ;;  %vm13754_vm15 = vnez %v13753_v52  ;;  %v6912_v52 = vld [vmem:[%s11785_s5 + $0x120] sm:$0xff] }
 0xc84   : > { %v4167_v11 = vsel %vm13751_vm9, %v10820_v34, 0.0  ;;  %vm13752_vm4 = vmmov %vm13751_vm9  ;;  %vm13778_vm9 = vnez %v13777_v27 }
 0xc85   : > { %v4169_v31 = vsel %vm13752_vm4, %v10826_v1, 0.0  ;;  %v4398_v43 = vpack.c.bf16 %v4167_v11, %v4167_v11  ;;  %v7135_v11 = vmov 12  }
 0xc86   : > { %6703 = vmatpush.bf16.msk.msrb.mxu2 %vm13728_vm6, %v12557_v54  ;;  %6663 = vmatpush.bf16.msk.msra.mxu3 %vm13732_vm3, %v12557_v54  ;;  %vm13756_vm6 = vnez %v13755_v61  ;;  %vm13760_vm3 = vnez %v13759_v47  ;;  %v4400_v2 = vpack.c.bf16 %v4169_v31, %v4169_v31 }
 0xc87   : > { %6735 = vmatpush.bf16.msk.msrb.mxu0 %vm13730_vm2, %v12557_v54  ;;  %6695 = vmatpush.bf16.msk.msra.mxu1 %vm13734_vm11, %v12557_v54  ;;  %vm13758_vm2 = vnez %v13757_v3  ;;  %vm13762_vm11 = vnez %v13761_v36 }
 0xc88   : > { %7011 = vset.pattern.permute.xlu0 %v7135_v11  ;;  %7009 = vset.pattern.permute.xlu1 %v7135_v11 }
 0xc89   : > { %4298 = vmatmul.bf16.vlgmr.msra.gmra.mxu3 %v11136_v23  ;;  %4407 = vperm.xlu0 %7011, %v10859_v58  }
 0xc8a   : > { %6713 = vmatpush.bf16.msk.msrb.mxu3 %vm13736_vm12, %v12557_v54  ;;  %6705 = vmatpush.bf16.msk.msrb.mxu2 %vm13738_vm14, %v12557_v54  ;;  %vm13764_vm12 = vnez %v13763_v25  ;;  %vm13766_vm14 = vnez %v13765_v49 }
 0xc8b   : > { %6737 = vmatpush.bf16.msk.msrb.mxu0 %vm13740_vm13, %v12557_v54  ;;  %6745 = vmatpush.bf16.msk.msrb.mxu1 %vm13742_vm7, %v12557_v54  ;;  %vm13767_vm13 = vmmov %vm13752_vm4  ;;  %vm13769_vm7 = vnez %v13768_v51  ;;  %v6913_v51 = vld [vmem:[%s11785_s5 + $0x128] sm:$0xff] }
 0xc8c   : > { %4324 = vmatmul.bf16.vlgmr.msra.gmra.mxu1 %v11136_v23  ;;  %v4445_v62 = vsel %vm13767_vm13, %v4398_v43, 0  ;;  %4419 = vperm.xlu1 %7009, %v10846_v21   ;;  %vm13792_vm13 = vcmask 195584  }
 0xc8d   : > { %7010 = vset.pattern.permute.xlu2 %v7135_v11 }
 0xc8e   : > { %6715 = vmatpush.bf16.msk.msrb.mxu3 %vm13744_vm0, %v12557_v54  ;;  %6707 = vmatpush.bf16.msk.msrb.mxu2 %vm13746_vm10, %v12557_v54  ;;  %vm13770_vm0 = vmmov %vm13752_vm4  ;;  %vm13772_vm10 = vnez %v13771_v12 }
 0xc8f   : > { %6739 = vmatpush.bf16.msk.msrb.mxu0 %vm13748_vm8, %v12557_v54  ;;  %6747 = vmatpush.bf16.msk.msrb.mxu1 %vm13750_vm5, %v12557_v54  ;;  %v4451_v35 = vsel %vm13770_vm0, %v4400_v2, 0  ;;  %vm13774_vm8 = vnez %v13773_v22  ;;  %vm13776_vm5 = vnez %v13775_v57  ;;  %vm13779_vm4 = vmmov %vm13770_vm0  ;;  %v4393_v22 = vld [vmem:[%s11785_s5 + $0x130] sm:$0xf] }
 0xc90   : > { %v4168_v59 = vsel %vm13779_vm4, %v10823_v56, 0.0  ;;  %4411 = vperm.xlu2 %7010, %v10834_v9  }
 0xc91   : > { %v4399_v46 = vpack.c.bf16 %v4168_v59, %v4168_v59 }
 0xc92   : > { %6717 = vmatpush.bf16.msk.msrb.mxu3 %vm13754_vm15, %v12557_v54  ;;  %6709 = vmatpush.bf16.msk.msrb.mxu2 %vm13756_vm6, %v12557_v54  ;;  %vm13780_vm15 = vmmov %vm13770_vm0  ;;  %vm13782_vm6 = vnez %v13781_v32 }
 0xc93   : > { %6741 = vmatpush.bf16.msk.msrb.mxu0 %vm13758_vm2, %v12557_v54  ;;  %6749 = vmatpush.bf16.msk.msrb.mxu1 %vm13760_vm3, %v12557_v54  ;;  %vm13784_vm2 = vnez %v13783_v40  ;;  %vm13786_vm3 = vnez %v13785_v15 }
 0xc94   : > { %4415 = vperm.xlu1 %7009, %v10840_v39  }
 0xc96   : > { %6719 = vmatpush.bf16.msk.msrb.mxu3 %vm13762_vm11, %v12557_v54  ;;  %6711 = vmatpush.bf16.msk.msrb.mxu2 %vm13764_vm12, %v12557_v54  ;;  %vm13787_vm11 = vmmov %vm13770_vm0  ;;  %vm13789_vm12 = vnez %v13788_v48 }
 0xc97   : > { %6743 = vmatpush.bf16.msk.msrb.mxu0 %vm13766_vm14, %v12557_v54  ;;  %6751 = vmatpush.bf16.msk.msrb.mxu1 %vm13769_vm7, %v12557_v54  ;;  %v4448_v0 = vsel %vm13787_vm11, %v4399_v46, 0  ;;  %vm13790_vm14 = vmmov %vm13770_vm0 }
 0xc98   : > { %vm13793_vm7 = vmmov %vm13792_vm13  ;;  %4403 = vperm.xlu2 %7010, %v10852_v16  }
 0xc99   : > { %4337 = vmatmul.bf16.vlgmr.msrb.gmra.mxu2 %v11107_v19  ;;  %vm13794_vm0 = vmmov %vm13793_vm7 }
 0xc9a   : > { %4462 = vmatpush.bf16.msra.mxu2 %v4445_v62  ;;  %4363 = vmatmul.bf16.vlgmr.msrb.gmra.mxu0 %v11107_v19  ;;  %v4170_v19 = vsel %vm13780_vm15, %v10829_v41, 0.0  ;;  %vm13799_vm4 = vmmov %vm13794_vm0 }
 0xc9b   : > { %4508 = vmatpush.bf16.msra.mxu0 %v4451_v35  ;;  %6721 = vmatpush.bf16.msk.msrb.mxu3 %vm13772_vm10, %v12557_v54  ;;  %v4401_v63 = vpack.c.bf16 %v4170_v19, %v4170_v19  ;;  %vm13795_vm10 = vmmov %vm13794_vm0  ;;  %v4431_v19 = vunpack.c.l.b16 %v4393_v22 }
 0xc9c   : > { %6753 = vmatpush.bf16.msk.msrb.mxu1 %vm13774_vm8, %v12557_v54  ;;  %vm13796_vm8 = vmmov %vm13794_vm0 }
 0xc9d   : > { %v4454_v30 = vsel %vm13790_vm14, %v4401_v63, 0  ;;  %v4434_v15 = vpack.c.b16 %v4431_v19, %v4431_v19  ;;  %vm13800_vm15 = vmmov %vm13794_vm0  ;;  %v7136_v19 = vmov 13  }
 0xc9e   : > { %7014 = vset.pattern.permute.xlu0 %v7136_v19  ;;  %7012 = vset.pattern.permute.xlu1 %v7136_v19 }
 0xc9f   : > { %6723 = vmatpush.bf16.msk.msrb.mxu3 %vm13776_vm5, %v12557_v54  ;;  %vm13797_vm5 = vmmov %vm13794_vm0  ;;  %4590 = vperm.xlu0 %7014, %v10859_v58  }
 0xca0   : > { %6755 = vmatpush.bf16.msk.msrb.mxu1 %vm13778_vm9, %v12557_v54  ;;  %vm13798_vm9 = vmmov %vm13794_vm0  ;;  %7013 = vset.pattern.permute.xlu2 %v7136_v19 }
 0xca1   : > { %4602 = vperm.xlu1 %7012, %v10846_v21   ;;  %4594 = vperm.xlu2 %7013, %v10834_v9  }
 0xca3   : > { %6725 = vmatpush.bf16.msk.msrb.mxu3 %vm13782_vm6, %v12557_v54  ;;  %vm13801_vm6 = vmmov %vm13794_vm0 }
 0xca4   : > { %6757 = vmatpush.bf16.msk.msrb.mxu1 %vm13784_vm2, %v12557_v54  ;;  %vm13802_vm2 = vmmov %vm13794_vm0 }
 0xca7   : > { %6727 = vmatpush.bf16.msk.msrb.mxu3 %vm13786_vm3, %v12557_v54  ;;  %vm13803_vm3 = vmmov %vm13794_vm0 }
 0xca8   : > { %6759 = vmatpush.bf16.msk.msrb.mxu1 %vm13789_vm12, %v12557_v54  ;;  %vm13806_vm12 = vcmask 326656  }
 0xca9   : > { %4598 = vperm.xlu1 %7012, %v10840_v39   ;;  %4586 = vperm.xlu2 %7013, %v10852_v16   ;;  %vm13807_vm14 = vmmov %vm13806_vm12 }
 0xcaa   : > { %4350 = vmatmul.bf16.vlgmr.msrb.gmra.mxu3 %v11136_v23 }
 0xcab   : > { %4485 = vmatpush.bf16.msra.mxu3 %v4448_v0  ;;  %4376 = vmatmul.bf16.vlgmr.msrb.gmra.mxu1 %v11136_v23 }
 0xcac   : > { %4531 = vmatpush.bf16.msra.mxu1 %v4454_v30 }
 0xcd5   : > { %v4208_v14 = vpop.f32.mrf.mxu0 }
 0xcdb   : > { %v4182_v38 = vpop.f32.mrf.mxu2 }
 0xcdd   : > { %v4210_v50 = vpop.f32.mrf.mxu0 }
 0xce3   : > { %v4184_v24 = vpop.f32.mrf.mxu2 }
 0xce5   : > { %v4221_v45 = vpop.f32.mrf.mxu1 }
 0xce6   : > { %v4260_v10 = vpop.f32.mrf.mxu0  ;;  %v4222_v4 = vadd.f32 %v4221_v45, %v4208_v14 }
 0xceb   : > { %v4195_v20 = vpop.f32.mrf.mxu3 }
 0xcec   : > { %v4234_v42 = vpop.f32.mrf.mxu2  ;;  %v4196_v43 = vadd.f32 %v4195_v20, %v4182_v38 }
 0xced   : > { %v4223_v26 = vpop.f32.mrf.mxu1 }
 0xcee   : > { %v4262_v60 = vpop.f32.mrf.mxu0 }
 0xcef   : > { %v11370_v60 = vpop.permute.xlu2 %4411 }
 0xcf3   : > { %v4197_v53 = vpop.f32.mrf.mxu3 }
 0xcf4   : > { %v4236_v54 = vpop.f32.mrf.mxu2 }
 0xcf5   : > { %v4273_v37 = vpop.f32.mrf.mxu1 }
 0xcf6   : > { %v4274_v27 = vadd.f32 %v4273_v37, %v4260_v10 }
 0xcf9   : > { %v4312_v5 = vpop.f32.mrf.mxu0 }
 0xcfb   : > { %v4247_v18 = vpop.f32.mrf.mxu3 }
 0xcfc   : > { %v4286_v29 = vpop.f32.mrf.mxu2  ;;  %v4248_v40 = vadd.f32 %v4247_v18, %v4234_v42 }
 0xcfd   : > { %v4275_v28 = vpop.f32.mrf.mxu1 }
 0xcfe   : > { %v11366_v10 = vpop.permute.xlu1 %4419 }
 0xd01   : > { %v4314_v7 = vpop.f32.mrf.mxu0 }
 0xd02   : > { %v11380_v7 = vpop.permute.xlu0 %4407 }
 0xd03   : > { %v4249_v13 = vpop.f32.mrf.mxu3 }
 0xd04   : > { %v4288_v23 = vpop.f32.mrf.mxu2 }
 0xd05   : > { %v11382_v23 = vpop.permute.xlu2 %4403 }
 0xd06   : > { %v11374_v37 = vpop.permute.xlu1 %4415 }
 0xd09   : > { %v4325_v6 = vpop.f32.mrf.mxu1 }
 0xd0a   : > { %v4326_v55 = vadd.f32 %v4325_v6, %v4312_v5 }
 0xd0c   : > { %v6775_v31 = vpack.c.bf16 %v4326_v55, %v4222_v4  ;;  %v4299_v3 = vpop.f32.mrf.mxu3 }
 0xd0d   : > { %v4300_v47 = vadd.f32 %v4299_v3, %v4286_v29 }
 0xd0e   : > { %6776 = vmatpush.bf16.msk.msra.mxu3 %vm13372_vm1, %v6775_v31 }
 0xd0f   : > { %v6769_v2 = vpack.c.bf16 %v4300_v47, %v4196_v43 }
 0xd11   : > { %v4327_v36 = vpop.f32.mrf.mxu1  ;;  %6777 = vmatmul.msk.bf16.vlgmr.msra.gmra.mxu3 %vm13792_vm13, %v6912_v52  ;;  %6770 = vmatpush.bf16.msk.msra.mxu2 %vm13372_vm1, %v6769_v2 }
 0xd14   : > { %v4301_v49 = vpop.f32.mrf.mxu3  ;;  %6771 = vmatmul.msk.bf16.vlgmr.msra.gmra.mxu2 %vm13793_vm7, %v6912_v52  ;;  %vm13809_vm7 = vmmov %vm13806_vm12 }
 0xd17   : > { %v4364_v25 = vpop.f32.mrf.mxu0 }
 0xd1c   : > { %v4338_v62 = vpop.f32.mrf.mxu2 }
 0xd1f   : > { %v4366_v35 = vpop.f32.mrf.mxu0 }
 0xd21   : > { %6778 = vmatmul.msk.bf16.gmra.mxu3 %vm13794_vm0, %v6913_v51 }
 0xd24   : > { %v4340_v12 = vpop.f32.mrf.mxu2  ;;  %6772 = vmatmul.msk.bf16.gmra.mxu2 %vm13795_vm10, %v6913_v51  ;;  %vm13811_vm10 = vmmov %vm13809_vm7 }
 0xd28   : > { %v4377_v57 = vpop.f32.mrf.mxu1 }
 0xd29   : > { %v4378_v59 = vadd.f32 %v4377_v57, %v4364_v25 }
 0xd2b   : > { %v6787_v32 = vpack.c.bf16 %v4378_v59, %v4274_v27 }
 0xd2d   : > { %6788 = vmatpush.bf16.msk.msra.mxu1 %vm13372_vm1, %v6787_v32  ;;  %v4351_v46 = vpop.f32.mrf.mxu3 }
 0xd2e   : > { %v4352_v63 = vadd.f32 %v4351_v46, %v4338_v62 }
 0xd30   : > { %v6781_v0 = vpack.c.bf16 %v4352_v63, %v4248_v40  ;;  %v4379_v48 = vpop.f32.mrf.mxu1  ;;  %6789 = vmatmul.msk.bf16.vlgmr.msra.gmra.mxu1 %vm13796_vm8, %v6912_v52  ;;  %vm13812_vm8 = vmmov %vm13809_vm7 }
 0xd31   : > { %6779 = vmatmul.msk.bf16.gmra.mxu3 %vm13797_vm5, %v4434_v15  ;;  %vm13813_vm5 = vmmov %vm13809_vm7 }
 0xd32   : > { %6782 = vmatpush.bf16.msk.msra.mxu0 %vm13372_vm1, %v6781_v0  ;;  %vm13804_vm1 = vmmov %vm13787_vm11 }
 0xd33   : > { %vm13805_vm11 = vmmov %vm13804_vm1 }
 0xd34   : > { %6773 = vmatmul.msk.bf16.gmra.mxu2 %vm13799_vm4, %v4434_v15  ;;  %vm13808_vm13 = vmmov %vm13804_vm1 }
 0xd35   : > { %v4353_v30 = vpop.f32.mrf.mxu3  ;;  %6783 = vmatmul.msk.bf16.vlgmr.msra.gmra.mxu0 %vm13798_vm9, %v6912_v52  ;;  %vm13810_vm0 = vmmov %vm13804_vm1 }
 0xd36   : > { %v6914_v30 = vld [vmem:[%s11785_s5 + $0x138] sm:$0xff]  ;;  %vm13814_vm9 = vmmov %vm13813_vm5 }
 0xd37   : > { %vm13815_vm4 = vmmov %vm13813_vm5 }
 0xd40   : > { %6790 = vmatmul.msk.bf16.gmra.mxu1 %vm13800_vm15, %v6913_v51  ;;  %vm13816_vm15 = vmmov %vm13815_vm4 }
 0xd45   : > { %6784 = vmatmul.msk.bf16.gmra.mxu0 %vm13801_vm6, %v6913_v51  ;;  %vm13817_vm6 = vmmov %vm13815_vm4 }
 0xd50   : > { %6791 = vmatmul.msk.bf16.gmra.mxu1 %vm13802_vm2, %v4434_v15  ;;  %vm13818_vm2 = vmmov %vm13815_vm4 }
 0xd55   : > { %6785 = vmatmul.msk.bf16.gmra.mxu0 %vm13803_vm3, %v4434_v15  ;;  %vm13819_vm3 = vmmov %vm13818_vm2 }
 0xd94   : > { %v4488_v14 = vpop.f32.mrf.mxu3 }
 0xd95   : > { %v4489_v47 = vadd.f32 %v4488_v14, %v11382_v23 }
 0xd97   : > { %v4465_v38 = vpop.f32.mrf.mxu2  ;;  %v4549_v59 = vmax.f32 %v4489_v47, 0.0 }
 0xd98   : > { %v4466_v32 = vadd.f32 %v4465_v38, %v11382_v23 }
 0xd9a   : > { %v4548_v38 = vmax.f32 %v4466_v32, 0.0 }
 0xd9c   : > { %v4490_v50 = vpop.f32.mrf.mxu3 }
 0xd9d   : > { %v4491_v31 = vadd.f32 %v4490_v50, %v11380_v7 }
 0xd9f   : > { %v4467_v24 = vpop.f32.mrf.mxu2  ;;  %v4553_v51 = vmax.f32 %v4491_v31, 0.0 }
 0xda0   : > { %v4468_v22 = vadd.f32 %v4467_v24, %v11380_v7 }
 0xda1   : > { %v4574_v15 = vpack.c.bf16 %v4553_v51, %v4549_v59  ;;  %v11440_v59 = vpop.permute.xlu1 %4602 }
 0xda2   : > { %v4552_v0 = vmax.f32 %v4468_v22, 0.0 }
 0xda4   : > { %v4493_v45 = vpop.f32.mrf.mxu3  ;;  %v4573_v58 = vpack.c.bf16 %v4552_v0, %v4548_v38 }
 0xda5   : > { %v4494_v6 = vadd.f32 %v4493_v45, %v11370_v60 }
 0xda7   : > { %v4470_v20 = vpop.f32.mrf.mxu2  ;;  %v4557_v2 = vmax.f32 %v4494_v6, 0.0 }
 0xda8   : > { %v4471_v62 = vadd.f32 %v4470_v20, %v11370_v60 }
 0xda9   : > { %v11446_v0 = vpop.permute.xlu1 %4598 }
 0xdaa   : > { %v4556_v46 = vmax.f32 %v4471_v62, 0.0 }
 0xdac   : > { %v4495_v26 = vpop.f32.mrf.mxu3 }
 0xdad   : > { %v11368_v42 = vpop.f32.mrf.mxu1  ;;  %v4496_v28 = vadd.f32 %v4495_v26, %v11374_v37 }
 0xdae   : > { %v4535_v6 = vadd.f32 %v11368_v42, %v11382_v23 }
 0xdaf   : > { %v4472_v54 = vpop.f32.mrf.mxu2  ;;  %v4561_v52 = vmax.f32 %v4496_v28, 0.0 }
 0xdb0   : > { %v4473_v3 = vadd.f32 %v4472_v54, %v11374_v37 }
 0xdb1   : > { %v4578_v12 = vpack.c.bf16 %v4561_v52, %v4557_v2 }
 0xdb2   : > { %v11372_v53 = vpop.f32.mrf.mxu0  ;;  %v4560_v57 = vmax.f32 %v4473_v3, 0.0 }
 0xdb3   : > { %v4512_v42 = vadd.f32 %v11372_v53, %v11382_v23 }
 0xdb4   : > { %v4498_v18 = vpop.f32.mrf.mxu3  ;;  %v4577_v48 = vpack.c.bf16 %v4560_v57, %v4556_v46 }
 0xdb5   : > { %v11376_v5 = vpop.f32.mrf.mxu1  ;;  %v4499_v29 = vadd.f32 %v4498_v18, %v11366_v10 }
 0xdb6   : > { %v4537_v18 = vadd.f32 %v11376_v5, %v11380_v7 }
 0xdb7   : > { %v4565_v13 = vmax.f32 %v4499_v29, 0.0  ;;  %v4475_v11 = vpop.f32.mrf.mxu2 }
 0xdb8   : > { %v4476_v61 = vadd.f32 %v4475_v11, %v11366_v10  ;;  %v4555_v52 = vmax.f32 %v4537_v18, 0.0 }
 0xdb9   : > { %v4582_v4 = vpack.c.bf16 %v4565_v13, %v4565_v13  ;;  %v6915_v13 = vld [vmem:[%s11785_s5 + $0x140] sm:$0xff] }
 0xdba   : > { %v11385_v55 = vpop.f32.mrf.mxu0  ;;  %v4564_v36 = vmax.f32 %v4476_v61, 0.0 }
 0xdbb   : > { %v4631_v43 = vsel %vm13804_vm1, %v4582_v4, 0  ;;  %vm13820_vm1 = vmmov %vm13810_vm0 }
 0xdbc   : > { %v4500_v49 = vpop.f32.mrf.mxu3  ;;  %4667 = vmatpush.bf16.msrb.mxu3 %v4631_v43  ;;  %v4581_v35 = vpack.c.bf16 %v4564_v36, %v4564_v36  ;;  %v4551_v43 = vmax.f32 %v4535_v6, 0.0 }
 0xdbd   : > { %v4539_v25 = vpop.f32.mrf.mxu1 }
 0xdbe   : > { %v4628_v27 = vsel %vm13805_vm11, %v4581_v35, 0  ;;  %v4540_v20 = vadd.f32 %v4539_v25, %v11370_v60  ;;  %vm13821_vm11 = vmmov %vm13810_vm0 }
 0xdbf   : > { %v4477_v63 = vpop.f32.mrf.mxu2  ;;  %4644 = vmatpush.bf16.msrb.mxu2 %v4628_v27 }
 0xdc0   : > { %4668 = vmatpush.bf16.msrb.mxu3 %v4578_v12  ;;  %v4559_v4 = vmax.f32 %v4540_v20, 0.0  ;;  %v11444_v63 = vpop.permute.xlu2 %4594 }
 0xdc2   : > { %v4516_v40 = vpop.f32.mrf.mxu0 }
 0xdc3   : > { %4645 = vmatpush.bf16.msrb.mxu2 %v4577_v48  ;;  %v4517_v5 = vadd.f32 %v4516_v40, %v11370_v60  ;;  %v4576_v60 = vpack.c.bf16 %v4555_v52, %v4551_v43 }
 0xdc4   : > { %4669 = vmatpush.bf16.msrb.mxu3 %v4574_v15 }
 0xdc5   : > { %v4541_v14 = vpop.f32.mrf.mxu1  ;;  %v4558_v2 = vmax.f32 %v4517_v5, 0.0 }
 0xdc6   : > { %v4542_v9 = vadd.f32 %v4541_v14, %v11374_v37 }
 0xdc7   : > { %6803 = vmatmul.msk.bf16.vlgmr.msrb.gmra.mxu3 %vm13806_vm12, %v6914_v30  ;;  %4646 = vmatpush.bf16.msrb.mxu2 %v4573_v58  ;;  %vm13822_vm12 = vmmov %vm13818_vm2 }
 0xdc8   : > { %v4563_v29 = vmax.f32 %v4542_v9, 0.0  ;;  %v7137_v9 = vmov 14  }
 0xdc9   : > { %7015 = vset.pattern.permute.xlu1 %v7137_v9 }
 0xdca   : > { %v4518_v50 = vpop.f32.mrf.mxu0  ;;  %6800 = vmatmul.msk.bf16.vlgmr.msrb.gmra.mxu2 %vm13807_vm14, %v6914_v30  ;;  %v4580_v61 = vpack.c.bf16 %v4563_v29, %v4559_v4  ;;  %vm13823_vm14 = vmmov %vm13818_vm2 }
 0xdcb   : > { %v4519_v16 = vadd.f32 %v4518_v50, %v11374_v37  ;;  %v4514_v37 = vadd.f32 %v11385_v55, %v11380_v7  ;;  %v4572_v7 = vld [vmem:[%s11785_s5 + $0x148] sm:$0xf]  ;;  %v4550_v55 = vmax.f32 %v4512_v42, 0.0  ;;  %v11452_v50 = vpop.permute.xlu0 %4590 }
 0xdcc   : > { %v4614_v51 = vunpack.c.l.b16 %v4572_v7 }
 0xdcd   : > { %v4544_v24 = vpop.f32.mrf.mxu1  ;;  %v4562_v3 = vmax.f32 %v4519_v16, 0.0  ;;  %v4554_v25 = vmax.f32 %v4514_v37, 0.0 }
 0xdce   : > { %v4545_v21 = vadd.f32 %v4544_v24, %v11366_v10  ;;  %v4617_v53 = vpack.c.b16 %v4614_v51, %v4614_v51 }
 0xdcf   : > { %v4579_v49 = vpack.c.bf16 %v4562_v3, %v4558_v2  ;;  %v4575_v62 = vpack.c.bf16 %v4554_v25, %v4550_v55 }
 0xdd0   : > { %v4567_v45 = vmax.f32 %v4545_v21, 0.0 }
 0xdd2   : > { %v4584_v26 = vpack.c.bf16 %v4567_v45, %v4567_v45  ;;  %v4521_v54 = vpop.f32.mrf.mxu0  ;;  %v11455_v45 = vpop.permute.xlu2 %4586 }
 0xdd3   : > { %v4522_v39 = vadd.f32 %v4521_v54, %v11366_v10  ;;  %v7052_v54 = vld [vmem:[%s11786_s6] sm:$0xf] }
 0xdd4   : > { %v4637_v28 = vsel %vm13808_vm13, %v4584_v26, 0  ;;  %4765 = vperm.xlu1 %7015, %v7052_v54   ;;  %vm13824_vm13 = vmmov %vm13810_vm0 }
 0xdd5   : > { %v4566_v11 = vmax.f32 %v4522_v39, 0.0  ;;  %v4546_v31 = vpop.f32.mrf.mxu1  ;;  %4713 = vmatpush.bf16.msrb.mxu1 %v4637_v28 }
 0xdd7   : > { %v4583_v10 = vpack.c.bf16 %v4566_v11, %v4566_v11  ;;  %6804 = vmatmul.msk.bf16.gmra.mxu3 %vm13809_vm7, %v6915_v13  ;;  %vm13825_vm7 = vmmov %vm13810_vm0 }
 0xdd9   : > { %4714 = vmatpush.bf16.msrb.mxu1 %v4580_v61  ;;  %v4634_v47 = vsel %vm13810_vm0, %v4583_v10, 0  ;;  %vm13826_vm0 = vmmov %vm13818_vm2 }
 0xdda   : > { %v4523_v36 = vpop.f32.mrf.mxu0  ;;  %4690 = vmatpush.bf16.msrb.mxu0 %v4634_v47  ;;  %6801 = vmatmul.msk.bf16.gmra.mxu2 %vm13811_vm10, %v6915_v13  ;;  %vm13827_vm10 = vmmov %vm13826_vm0 }
 0xddd   : > { %4715 = vmatpush.bf16.msrb.mxu1 %v4576_v60 }
 0xdde   : > { %4691 = vmatpush.bf16.msrb.mxu0 %v4579_v49 }
 0xde0   : > { %6809 = vmatmul.msk.bf16.vlgmr.msrb.gmra.mxu1 %vm13812_vm8, %v6914_v30  ;;  %vm13828_vm8 = vmmov %vm13820_vm1 }
 0xde2   : > { %4692 = vmatpush.bf16.msrb.mxu0 %v4575_v62  ;;  %v4751_v62 = vld [vmem:[%s11785_s5 + $0x150] sm:$0x3] }
 0xde5   : > { %6806 = vmatmul.msk.bf16.vlgmr.msrb.gmra.mxu0 %vm13813_vm5, %v6914_v30  ;;  %vm11494_vm5 = vmpackc.low %vm13828_vm8, %vm13828_vm8 }
 0xde6   : > { %vm13847_vm8 = vmmov %vm13826_vm0 }
 0xde7   : > { %6805 = vmatmul.msk.bf16.gmra.mxu3 %vm13814_vm9, %v4617_v53  ;;  %vm4897_vm9 = vcmask 261120  }
 0xdea   : > { %6802 = vmatmul.msk.bf16.gmra.mxu2 %vm13815_vm4, %v4617_v53  ;;  %vm13835_vm4 = vmmov %vm13820_vm1 }
 0xdf0   : > { %6810 = vmatmul.msk.bf16.gmra.mxu1 %vm13816_vm15, %v6915_v13  ;;  %vm13836_vm15 = vmmov %vm13820_vm1 }
 0xdf5   : > { %6807 = vmatmul.msk.bf16.gmra.mxu0 %vm13817_vm6, %v6915_v13  ;;  %vm13837_vm6 = vmmov %vm13826_vm0 }
 0xe00   : > { %6811 = vmatmul.msk.bf16.gmra.mxu1 %vm13818_vm2, %v4617_v53  ;;  %vm13838_vm2 = vmmov %vm13826_vm0 }
 0xe05   : > { %6808 = vmatmul.msk.bf16.gmra.mxu0 %vm13819_vm3, %v4617_v53  ;;  %vm13839_vm3 = vmmov %vm13820_vm1 }
 0xe4a   : > { %v4671_v23 = vpop.f32.mrf.mxu3 }
 0xe4b   : > { %v4672_v6 = vadd.f32 %v4671_v23, %v11455_v45 }
 0xe4d   : > { %v4648_v35 = vpop.f32.mrf.mxu2  ;;  %v4732_v47 = vmax.f32 %v4672_v6, 0.0 }
 0xe4e   : > { %v4649_v2 = vadd.f32 %v4648_v35, %v11455_v45 }
 0xe50   : > { %v4731_v51 = vmax.f32 %v4649_v2, 0.0  ;;  %v11505_v2 = vld [vmem:[%s11786_s6 + $0x10] sm:$0xff] }
 0xe52   : > { %v4673_v12 = vpop.f32.mrf.mxu3 }
 0xe53   : > { %v4674_v18 = vadd.f32 %v4673_v12, %v11452_v50 }
 0xe55   : > { %v4650_v22 = vpop.f32.mrf.mxu2  ;;  %v4736_v52 = vmax.f32 %v4674_v18, 0.0 }
 0xe56   : > { %v4651_v3 = vadd.f32 %v4650_v22, %v11452_v50 }
 0xe57   : > { %v4753_v25 = vpack.c.bf16 %v4736_v52, %v4732_v47 }
 0xe58   : > { %v4735_v49 = vmax.f32 %v4651_v3, 0.0  ;;  %v4835_v3 = vmul.f32 0.5, %v10820_v34 }
 0xe5a   : > { %v4676_v57 = vpop.f32.mrf.mxu3  ;;  %v4752_v23 = vpack.c.bf16 %v4735_v49, %v4731_v51  ;;  %v11519_v49 = vld [vmem:[%s11786_s6 + $0x20] sm:$0xff] }
 0xe5b   : > { %v4677_v21 = vadd.f32 %v4676_v57, %v11444_v63 }
 0xe5d   : > { %v11438_v27 = vpop.f32.mrf.mxu1  ;;  %v4653_v19 = vpop.f32.mrf.mxu2  ;;  %v4740_v4 = vmax.f32 %v4677_v21, 0.0 }
 0xe5e   : > { %v4654_v5 = vadd.f32 %v4653_v19, %v11444_v63  ;;  %v4718_v21 = vadd.f32 %v11438_v27, %v11455_v45 }
 0xe60   : > { %v4739_v36 = vmax.f32 %v4654_v5, 0.0 }
 0xe62   : > { %v11442_v32 = vpop.f32.mrf.mxu0  ;;  %v4678_v46 = vpop.f32.mrf.mxu3 }
 0xe63   : > { %v4679_v38 = vadd.f32 %v4678_v46, %v11446_v0  ;;  %v4695_v27 = vadd.f32 %v11442_v32, %v11455_v45  ;;  %v4836_v32 = vmul.f32 0.5, %v10823_v56 }
 0xe65   : > { %v4719_v40 = vpop.f32.mrf.mxu1  ;;  %v4655_v15 = vpop.f32.mrf.mxu2  ;;  %v4744_v29 = vmax.f32 %v4679_v38, 0.0 }
 0xe66   : > { %v4656_v16 = vadd.f32 %v4655_v15, %v11446_v0  ;;  %v4720_v15 = vadd.f32 %v4719_v40, %v11452_v50 }
 0xe67   : > { %v4757_v61 = vpack.c.bf16 %v4744_v29, %v4740_v4 }
 0xe68   : > { %v4743_v43 = vmax.f32 %v4656_v16, 0.0  ;;  %v4738_v54 = vmax.f32 %v4720_v15, 0.0  ;;  %v4837_v15 = vmul.f32 0.5, %v10826_v1 }
 0xe6a   : > { %v11448_v48 = vpop.f32.mrf.mxu0  ;;  %v4681_v30 = vpop.f32.mrf.mxu3  ;;  %v4756_v7 = vpack.c.bf16 %v4743_v43, %v4739_v36 }
 0xe6b   : > { %v4682_v14 = vadd.f32 %v4681_v30, %v11440_v59 }
 0xe6d   : > { %v4722_v58 = vpop.f32.mrf.mxu1  ;;  %v4748_v24 = vmax.f32 %v4682_v14, 0.0  ;;  %v4658_v26 = vpop.f32.mrf.mxu2 }
 0xe6e   : > { %v4659_v39 = vadd.f32 %v4658_v26, %v11440_v59  ;;  %v4723_v57 = vadd.f32 %v4722_v58, %v11444_v63 }
 0xe6f   : > { %v4761_v20 = vpack.c.bf16 %v4748_v24, %v4748_v24 }
 0xe70   : > { %v4747_v11 = vmax.f32 %v4659_v39, 0.0  ;;  %v4742_v9 = vmax.f32 %v4723_v57, 0.0  ;;  %v4734_v39 = vmax.f32 %v4718_v21, 0.0  ;;  %v13833_v21 = vld [vmem:[#allocation139_spill] sm:$0xff] }
 0xe71   : > { %v4775_v13 = vsel %vm13820_vm1, %v4761_v20, 0  ;;  %vm13840_vm1 = vmmov %vm13826_vm0 }
 0xe72   : > { %v4699_v28 = vpop.f32.mrf.mxu0  ;;  %v4683_v31 = vpop.f32.mrf.mxu3  ;;  %4801 = vmatpush.bf16.msra.mxu3 %v4775_v13  ;;  %v4760_v10 = vpack.c.bf16 %v4747_v11, %v4747_v11  ;;  %v4755_v6 = vpack.c.bf16 %v4738_v54, %v4734_v39 }
 0xe73   : > { %v4700_v58 = vadd.f32 %v4699_v28, %v11444_v63  ;;  %v4733_v28 = vmax.f32 %v4695_v27, 0.0 }
 0xe74   : > { %v4772_v42 = vsel %vm13821_vm11, %v4760_v10, 0  ;;  %vm13841_vm11 = vmmov %vm13839_vm3 }
 0xe75   : > { %v4724_v37 = vpop.f32.mrf.mxu1  ;;  %v4660_v60 = vpop.f32.mrf.mxu2  ;;  %4788 = vmatpush.bf16.msra.mxu2 %v4772_v42  ;;  %v4741_v16 = vmax.f32 %v4700_v58, 0.0  ;;  %v7138_v42 = vmov 18  }
 0xe76   : > { %4802 = vmatpush.bf16.msra.mxu3 %v4757_v61  ;;  %v4725_v35 = vadd.f32 %v4724_v37, %v11446_v0  ;;  %7017 = vset.pattern.permute.xlu1 %v7138_v42  ;;  %v13831_v60 = vld [vmem:[#allocation136_spill] sm:$0xff] }
 0xe77   : > { %7018 = vset.pattern.permute.xlu0 %v7138_v42  ;;  %4873 = vperm.xlu1 %7017, %v11505_v2  }
 0xe78   : > { %v4746_v30 = vmax.f32 %v4725_v35, 0.0  ;;  %7016 = vset.pattern.permute.xlu2 %v7138_v42 }
 0xe79   : > { %4789 = vmatpush.bf16.msra.mxu2 %v4756_v7  ;;  %4881 = vperm.xlu2 %7016, %v11519_v49  }
 0xe7a   : > { %v4701_v55 = vpop.f32.mrf.mxu0  ;;  %4803 = vmatpush.bf16.msra.mxu3 %v4753_v25  ;;  %v4759_v40 = vpack.c.bf16 %v4746_v30, %v4742_v9  ;;  %v6837_v25 = vpack.c.bf16 %v10435_v17, %v13831_v60  ;;  %v13832_v17 = vld [vmem:[#allocation135_spill] sm:$0xff]  ;;  %v6855_v9 = vpack.c.bf16 %v13504_v8, %v13833_v21 }
 0xe7b   : > { %v4702_v38 = vadd.f32 %v4701_v55, %v11446_v0  ;;  %v6916_v55 = vld [vmem:[%s11785_s5 + $0x190] sm:$0xff]  ;;  %v6828_v51 = vpack.c.bf16 %v10375_v44, %v13832_v17  ;;  %v4838_v44 = vmul.f32 0.5, %v10829_v41 }
 0xe7d   : > { %v4727_v53 = vpop.f32.mrf.mxu1  ;;  %6813 = vmatmul.msk.bf16.vlgmr.msra.gmra.mxu3 %vm13822_vm12, %v4751_v62  ;;  %4790 = vmatpush.bf16.msra.mxu2 %v4752_v23  ;;  %v4745_v29 = vmax.f32 %v4702_v38, 0.0  ;;  %vm13842_vm12 = vmmov %vm13826_vm0 }
 0xe7e   : > { %v4728_v12 = vadd.f32 %v4727_v53, %v11440_v59 }
 0xe7f   : > { %v4758_v63 = vpack.c.bf16 %v4745_v29, %v4741_v16 }
 0xe80   : > { %v4750_v22 = vmax.f32 %v4728_v12, 0.0  ;;  %6812 = vmatmul.msk.bf16.vlgmr.msra.gmra.mxu2 %vm13823_vm14, %v4751_v62  ;;  %v11544_v12 = vld [vmem:[%s11786_s6 + $0x18] sm:$0xff]  ;;  %vm13843_vm14 = vmmov %vm13826_vm0 }
 0xe81   : > { %4877 = vperm.xlu2 %7016, %v11544_v12  }
 0xe82   : > { %v4763_v19 = vpack.c.bf16 %v4750_v22, %v4750_v22  ;;  %v4704_v46 = vpop.f32.mrf.mxu0 }
 0xe83   : > { %v4705_v14 = vadd.f32 %v4704_v46, %v11440_v59  ;;  %v4697_v59 = vadd.f32 %v11448_v48, %v11452_v50  ;;  %v4766_v48 = vpop.permute.xlu1 %4765 }
 0xe84   : > { %v4781_v24 = vsel %vm13824_vm13, %v4763_v19, 0  ;;  %vm13844_vm13 = vmmov %vm13826_vm0 }
 0xe85   : > { %v4749_v20 = vmax.f32 %v4705_v14, 0.0  ;;  %v4729_v26 = vpop.f32.mrf.mxu1  ;;  %4827 = vmatpush.bf16.msrb.mxu3 %v4781_v24  ;;  %v4737_v4 = vmax.f32 %v4697_v59, 0.0  ;;  %v6917_v24 = vld [vmem:[%s11785_s5 + $0x198] sm:$0xff] }
 0xe86   : > { %v13834_v26 = vld [vmem:[#allocation138_spill] sm:$0xff] }
 0xe87   : > { %v4762_v18 = vpack.c.bf16 %v4749_v20, %v4749_v20  ;;  %v4754_v11 = vpack.c.bf16 %v4737_v4, %v4733_v28  ;;  %v6846_v58 = vpack.c.bf16 %v10381_v33, %v13834_v26 }
 0xe89   : > { %4828 = vmatpush.bf16.msrb.mxu3 %v4759_v40  ;;  %v4778_v0 = vsel %vm13825_vm7, %v4762_v18, 0  ;;  %vm13845_vm7 = vmmov %vm13826_vm0 }
 0xe8a   : > { %v4706_v13 = vpop.f32.mrf.mxu0  ;;  %4814 = vmatpush.bf16.msrb.mxu2 %v4778_v0 }
 0xe8d   : > { %4829 = vmatpush.bf16.msrb.mxu3 %v4755_v6 }
 0xe8e   : > { %4815 = vmatpush.bf16.msrb.mxu2 %v4758_v63 }
 0xe90   : > { %6815 = vmatmul.msk.bf16.vlgmr.msrb.gmra.mxu3 %vm13826_vm0, %v4751_v62 }
 0xe92   : > { %4816 = vmatpush.bf16.msrb.mxu2 %v4754_v11 }
 0xe95   : > { %6814 = vmatmul.msk.bf16.vlgmr.msrb.gmra.mxu2 %vm13827_vm10, %v4751_v62  ;;  %vm13846_vm10 = vmmov %vm13826_vm0 }
 0xed3   : > { %v11580_v39 = vpop.permute.xlu2 %4881 }
 0xedb   : > { %v11586_v6 = vpop.permute.xlu2 %4877 }
 0xee9   : > { %v11584_v13 = vpop.permute.xlu1 %4873 }
 0xf00   : > { %v4805_v50 = vpop.f32.mrf.mxu3 }
 0xf01   : > { %v4806_v31 = vadd.f32 %v4805_v50, %v4766_v48 }
 0xf03   : > { %v4840_v45 = vmul.f32 0.5, %v4806_v31  ;;  %v4792_v52 = vpop.f32.mrf.mxu2 }
 0xf04   : > { %v4793_v61 = vadd.f32 %v4792_v52, %v4766_v48 }
 0xf05   : > { %v4844_v5 = vadd.f32 %v4840_v45, %v4836_v32 }
 0xf06   : > { %v4839_v43 = vmul.f32 0.5, %v4793_v61 }
 0xf07   : > { %v6834_v37 = vpack.c.bf16 %v4844_v5, %v10823_v56  ;;  %v11511_v56 = vld [vmem:[%s11786_s6] sm:$0xff] }
 0xf08   : > { %v4807_v47 = vpop.f32.mrf.mxu3  ;;  %v4843_v36 = vadd.f32 %v4839_v43, %v4835_v3  ;;  %4865 = vperm.xlu0 %7018, %v11511_v56  }
 0xf09   : > { %6835 = vmatpush.bf16.msk.msra.mxu1 %vm11494_vm5, %v6834_v37 }
 0xf0a   : > { %v6825_v7 = vpack.c.bf16 %v4843_v36, %v10820_v34  ;;  %v11536_v34 = vld [vmem:[%s11786_s6 + $0x8] sm:$0xff] }
 0xf0b   : > { %v4794_v62 = vpop.f32.mrf.mxu2  ;;  %4869 = vperm.xlu1 %7017, %v11536_v34  }
 0xf0c   : > { %6826 = vmatpush.bf16.msk.msra.mxu0 %vm11494_vm5, %v6825_v7 }
 0xf0d   : > { %6838 = vmatpush.bf16.msk.msra.mxu1 %vm11494_vm5, %v6837_v25 }
 0xf10   : > { %6839 = vmatmul.msk.bf16.vlgmr.msra.gmra.mxu1 %vm4897_vm9, %v6916_v55  ;;  %6829 = vmatpush.bf16.msk.msra.mxu0 %vm11494_vm5, %v6828_v51 }
 0xf13   : > { %v4831_v53 = vpop.f32.mrf.mxu3  ;;  %6830 = vmatmul.msk.bf16.vlgmr.msra.gmra.mxu0 %vm4897_vm9, %v6916_v55 }
 0xf14   : > { %v4832_v23 = vadd.f32 %v4831_v53, %v4766_v48 }
 0xf16   : > { %v4842_v35 = vmul.f32 0.5, %v4832_v23 }
 0xf18   : > { %v4846_v22 = vadd.f32 %v4842_v35, %v4838_v44  ;;  %v4818_v57 = vpop.f32.mrf.mxu2 }
 0xf19   : > { %v4819_v19 = vadd.f32 %v4818_v57, %v4766_v48 }
 0xf1a   : > { %v6852_v46 = vpack.c.bf16 %v4846_v22, %v10829_v41 }
 0xf1b   : > { %v4841_v30 = vmul.f32 0.5, %v4819_v19  ;;  %v4833_v14 = vpop.f32.mrf.mxu3 }
 0xf1c   : > { %6853 = vmatpush.bf16.msk.msra.mxu3 %vm11494_vm5, %v6852_v46 }
 0xf1d   : > { %v4845_v38 = vadd.f32 %v4841_v30, %v4837_v15 }
 0xf1f   : > { %v6843_v20 = vpack.c.bf16 %v4845_v38, %v10826_v1  ;;  %v4855_v1 = vld [vmem:[%s11785_s5 + $0x1a0] sm:$0xf]  ;;  %v11613_v38 = vld [vmem:[%s11785_s5 + $0x1a8] sm:$0xff] }
 0xf20   : > { %6856 = vmatpush.bf16.msk.msra.mxu3 %vm11494_vm5, %v6855_v9  ;;  %v4820_v41 = vpop.f32.mrf.mxu2  ;;  %6840 = vmatmul.msk.bf16.gmra.mxu1 %vm4897_vm9, %v6917_v24  ;;  %v4893_v8 = vunpack.c.l.b16 %v4855_v1 }
 0xf21   : > { %6844 = vmatpush.bf16.msk.msra.mxu2 %vm11494_vm5, %v6843_v20  ;;  %v7139_v41 = vmov 19  }
 0xf22   : > { %v4896_v54 = vpack.c.b16 %v4893_v8, %v4893_v8  ;;  %7020 = vset.pattern.permute.xlu1 %v7139_v41  ;;  %7021 = vset.pattern.permute.xlu0 %v7139_v41 }
 0xf23   : > { %6857 = vmatmul.msk.bf16.vlgmr.msra.gmra.mxu3 %vm4897_vm9, %v6916_v55  ;;  %6831 = vmatmul.msk.bf16.gmra.mxu0 %vm4897_vm9, %v6917_v24 }
 0xf24   : > { %5045 = vperm.xlu1 %7020, %v11505_v2   ;;  %5037 = vperm.xlu0 %7021, %v11511_v56  }
 0xf25   : > { %6847 = vmatpush.bf16.msk.msra.mxu2 %vm11494_vm5, %v6846_v58  ;;  %7019 = vset.pattern.permute.xlu2 %v7139_v41  ;;  %vm13848_vm5 = vmmov %vm13826_vm0 }
 0xf26   : > { %5053 = vperm.xlu2 %7019, %v11519_v49  }
 0xf28   : > { %6848 = vmatmul.msk.bf16.vlgmr.msra.gmra.mxu2 %vm4897_vm9, %v6916_v55 }
 0xf2c   : > { %5041 = vperm.xlu1 %7020, %v11536_v34  }
 0xf2e   : > { %5049 = vperm.xlu2 %7019, %v11544_v12  }
 0xf30   : > { %6841 = vmatmul.msk.bf16.gmra.mxu1 %vm4897_vm9, %v4896_v54 }
 0xf33   : > { %6858 = vmatmul.msk.bf16.gmra.mxu3 %vm4897_vm9, %v6917_v24  ;;  %6832 = vmatmul.msk.bf16.gmra.mxu0 %vm4897_vm9, %v4896_v54 }
 0xf38   : > { %6849 = vmatmul.msk.bf16.gmra.mxu2 %vm4897_vm9, %v6917_v24 }
 0xf43   : > { %6859 = vmatmul.msk.bf16.gmra.mxu3 %vm4897_vm9, %v4896_v54 }
 0xf48   : > { %6850 = vmatmul.msk.bf16.gmra.mxu2 %vm4897_vm9, %v4896_v54  ;;  %vm13849_vm9 = vmmov %vm13826_vm0 }
 0xf7a   : > { %v11595_v32 = vpop.permute.xlu0 %4865 }
 0xf7d   : > { %v11597_v45 = vpop.permute.xlu1 %4869 }
 0xf8d   : > { %v4939_v33 = vpop.f32.mrf.mxu1 }
 0xf8e   : > { %v4940_v52 = vadd.f32 %v4939_v33, %v11595_v32 }
 0xf90   : > { %v4916_v40 = vpop.f32.mrf.mxu0  ;;  %v5000_v17 = vmax.f32 %v4940_v52, 0.0 }
 0xf91   : > { %v4917_v22 = vadd.f32 %v4916_v40, %v11595_v32 }
 0xf93   : > { %v4999_v24 = vmax.f32 %v4917_v22, 0.0 }
 0xf95   : > { %v4941_v18 = vpop.f32.mrf.mxu1 }
 0xf96   : > { %v4942_v61 = vadd.f32 %v4941_v18, %v11597_v45 }
 0xf98   : > { %v4918_v59 = vpop.f32.mrf.mxu0  ;;  %v5004_v51 = vmax.f32 %v4942_v61, 0.0 }
 0xf99   : > { %v4919_v57 = vadd.f32 %v4918_v59, %v11597_v45 }
 0xf9a   : > { %v5025_v46 = vpack.c.bf16 %v5004_v51, %v5000_v17  ;;  %v11660_v17 = vpop.permute.xlu1 %5045 }
 0xf9b   : > { %v5003_v21 = vmax.f32 %v4919_v57, 0.0 }
 0xf9d   : > { %v4944_v29 = vpop.f32.mrf.mxu1  ;;  %v5024_v20 = vpack.c.bf16 %v5003_v21, %v4999_v24 }
 0xf9e   : > { %v4945_v28 = vadd.f32 %v4944_v29, %v11584_v13 }
 0xfa0   : > { %v4921_v0 = vpop.f32.mrf.mxu0  ;;  %v5008_v10 = vmax.f32 %v4945_v28, 0.0 }
 0xfa1   : > { %v4922_v3 = vadd.f32 %v4921_v0, %v11584_v13  ;;  %v6919_v0 = vld [vmem:[%s11785_s5 + $0x1b0] sm:$0xff] }
 0xfa3   : > { %v5007_v23 = vmax.f32 %v4922_v3, 0.0 }
 0xfa5   : > { %v4946_v16 = vpop.f32.mrf.mxu1 }
 0xfa6   : > { %v11582_v27 = vpop.f32.mrf.mxu3  ;;  %v4947_v50 = vadd.f32 %v4946_v16, %v11586_v6 }
 0xfa7   : > { %v4986_v16 = vadd.f32 %v11582_v27, %v11595_v32 }
 0xfa8   : > { %v4923_v63 = vpop.f32.mrf.mxu0  ;;  %v5012_v37 = vmax.f32 %v4947_v50, 0.0 }
 0xfa9   : > { %v4924_v42 = vadd.f32 %v4923_v63, %v11586_v6 }
 0xfaa   : > { %v5029_v62 = vpack.c.bf16 %v5012_v37, %v5008_v10 }
 0xfab   : > { %v11588_v4 = vpop.f32.mrf.mxu2  ;;  %v5011_v44 = vmax.f32 %v4924_v42, 0.0 }
 0xfac   : > { %v4963_v27 = vadd.f32 %v11588_v4, %v11595_v32 }
 0xfad   : > { %v4949_v48 = vpop.f32.mrf.mxu1  ;;  %v5028_v30 = vpack.c.bf16 %v5011_v44, %v5007_v23 }
 0xfae   : > { %v11591_v11 = vpop.f32.mrf.mxu3  ;;  %v4950_v31 = vadd.f32 %v4949_v48, %v11580_v39  ;;  %v5001_v3 = vmax.f32 %v4963_v27, 0.0  ;;  %v5215_v27 = vld [vmem:[%s11786_s6] sm:$0x1] }
 0xfaf   : > { %v4988_v2 = vadd.f32 %v11591_v11, %v11597_v45 }
 0xfb0   : > { %v5016_v5 = vmax.f32 %v4950_v31, 0.0  ;;  %v4926_v36 = vpop.f32.mrf.mxu0 }
 0xfb1   : > { %v4927_v60 = vadd.f32 %v4926_v36, %v11580_v39 }
 0xfb2   : > { %v5033_v43 = vpack.c.bf16 %v5016_v5, %v5016_v5  ;;  %v5002_v5 = vmax.f32 %v4986_v16, 0.0 }
 0xfb3   : > { %v11602_v47 = vpop.f32.mrf.mxu2  ;;  %v5015_v7 = vmax.f32 %v4927_v60, 0.0 }
 0xfb4   : > { %v5082_v25 = vsel %vm13835_vm4, %v5033_v43, 0  ;;  %v4965_v50 = vadd.f32 %v11602_v47, %v11597_v45  ;;  %v5023_v45 = vld [vmem:[%s11785_s5 + $0x1b8] sm:$0xf]  ;;  %vm13850_vm4 = vmmov %vm13839_vm3 }
 0xfb5   : > { %5118 = vmatpush.bf16.msrb.mxu1 %v5082_v25  ;;  %v4951_v53 = vpop.f32.mrf.mxu1  ;;  %v5032_v35 = vpack.c.bf16 %v5015_v7, %v5015_v7  ;;  %v5065_v4 = vunpack.c.l.b16 %v5023_v45  ;;  %v11658_v7 = vpop.permute.xlu2 %5053 }
 0xfb6   : > { %v4990_v55 = vpop.f32.mrf.mxu3  ;;  %v5005_v10 = vmax.f32 %v4965_v50, 0.0  ;;  %v5202_v50 = vld [vmem:[%s11785_s5 + $0x1c0] sm:$0x1] }
 0xfb7   : > { %v5079_v19 = vsel %vm13836_vm15, %v5032_v35, 0  ;;  %v4991_v33 = vadd.f32 %v4990_v55, %v11584_v13  ;;  %v5068_v32 = vpack.c.b16 %v5065_v4, %v5065_v4  ;;  %vm13851_vm15 = vmmov %vm13839_vm3 }
 0xfb8   : > { %5095 = vmatpush.bf16.msrb.mxu0 %v5079_v19  ;;  %v4928_v14 = vpop.f32.mrf.mxu0  ;;  %v5026_v43 = vpack.c.bf16 %v5005_v10, %v5001_v3  ;;  %v11669_v19 = vpop.permute.xlu0 %5037 }
 0xfb9   : > { %5119 = vmatpush.bf16.msrb.mxu1 %v5029_v62  ;;  %v5010_v34 = vmax.f32 %v4991_v33, 0.0 }
 0xfbb   : > { %v4967_v15 = vpop.f32.mrf.mxu2 }
 0xfbc   : > { %5096 = vmatpush.bf16.msrb.mxu0 %v5028_v30  ;;  %v4968_v11 = vadd.f32 %v4967_v15, %v11584_v13  ;;  %v11673_v30 = vpop.permute.xlu1 %5041 }
 0xfbd   : > { %5120 = vmatpush.bf16.msrb.mxu1 %v5025_v46  ;;  %v11662_v53 = vpop.permute.xlu2 %5049 }
 0xfbe   : > { %v4992_v9 = vpop.f32.mrf.mxu3  ;;  %v5009_v52 = vmax.f32 %v4968_v11, 0.0 }
 0xfbf   : > { %v4993_v8 = vadd.f32 %v4992_v9, %v11586_v6 }
 0xfc0   : > { %6871 = vmatmul.msk.bf16.vlgmr.msrb.gmra.mxu1 %vm13837_vm6, %v11613_v38  ;;  %5097 = vmatpush.bf16.msrb.mxu0 %v5024_v20  ;;  %vm13852_vm6 = vmmov %vm13826_vm0 }
 0xfc1   : > { %v5014_v56 = vmax.f32 %v4993_v8, 0.0 }
 0xfc3   : > { %v4969_v26 = vpop.f32.mrf.mxu2  ;;  %6868 = vmatmul.msk.bf16.vlgmr.msrb.gmra.mxu0 %vm13838_vm2, %v11613_v38  ;;  %v5031_v48 = vpack.c.bf16 %v5014_v56, %v5010_v34  ;;  %vm13853_vm2 = vmmov %vm13826_vm0 }
 0xfc4   : > { %v4970_v59 = vadd.f32 %v4969_v26, %v11586_v6 }
 0xfc6   : > { %v4995_v58 = vpop.f32.mrf.mxu3  ;;  %v5013_v31 = vmax.f32 %v4970_v59, 0.0 }
 0xfc7   : > { %v4996_v1 = vadd.f32 %v4995_v58, %v11580_v39 }
 0xfc8   : > { %v5030_v37 = vpack.c.bf16 %v5013_v31, %v5009_v52  ;;  %v7140_v52 = vmov 20  }
 0xfc9   : > { %v5018_v54 = vmax.f32 %v4996_v1, 0.0  ;;  %7022 = vset.pattern.permute.xlu2 %v7140_v52  ;;  %7023 = vset.pattern.permute.xlu0 %v7140_v52 }
 0xfca   : > { %5218 = vperm.xlu2 %7022, %v5215_v27  }
 0xfcb   : > { %v5035_v40 = vpack.c.bf16 %v5018_v54, %v5018_v54  ;;  %v4972_v18 = vpop.f32.mrf.mxu2 }
 0xfcc   : > { %v4973_v49 = vadd.f32 %v4972_v18, %v11580_v39  ;;  %v5006_v39 = vmax.f32 %v4988_v2, 0.0 }
 0xfcd   : > { %v5088_v29 = vsel %vm13839_vm3, %v5035_v40, 0 }
 0xfce   : > { %v5017_v63 = vmax.f32 %v4973_v49, 0.0  ;;  %v4997_v28 = vpop.f32.mrf.mxu3  ;;  %5164 = vmatpush.bf16.msrb.mxu3 %v5088_v29  ;;  %v5027_v13 = vpack.c.bf16 %v5006_v39, %v5002_v5 }
 0xfd0   : > { %v5034_v6 = vpack.c.bf16 %v5017_v63, %v5017_v63  ;;  %6872 = vmatmul.msk.bf16.gmra.mxu1 %vm13840_vm1, %v6919_v0  ;;  %vm13854_vm1 = vmmov %vm13839_vm3 }
 0xfd2   : > { %5165 = vmatpush.bf16.msrb.mxu3 %v5031_v48  ;;  %v5085_v12 = vsel %vm13841_vm11, %v5034_v6, 0  ;;  %vm13855_vm11 = vmmov %vm13826_vm0 }
 0xfd3   : > { %v4974_v61 = vpop.f32.mrf.mxu2  ;;  %5141 = vmatpush.bf16.msrb.mxu2 %v5085_v12  ;;  %6869 = vmatmul.msk.bf16.gmra.mxu0 %vm13842_vm12, %v6919_v0  ;;  %vm13856_vm12 = vmmov %vm13826_vm0 }
 0xfd6   : > { %5166 = vmatpush.bf16.msrb.mxu3 %v5027_v13 }
 0xfd7   : > { %5142 = vmatpush.bf16.msrb.mxu2 %v5030_v37 }
 0xfd9   : > { %6877 = vmatmul.msk.bf16.vlgmr.msrb.gmra.mxu3 %vm13843_vm14, %v11613_v38 }
 0xfdb   : > { %5143 = vmatpush.bf16.msrb.mxu2 %v5026_v43 }
 0xfde   : > { %6874 = vmatmul.msk.bf16.vlgmr.msrb.gmra.mxu2 %vm13844_vm13, %v11613_v38 }
 0xfe0   : > { %6873 = vmatmul.msk.bf16.gmra.mxu1 %vm13845_vm7, %v5068_v32 }
 0xfe3   : > { %6870 = vmatmul.msk.bf16.gmra.mxu0 %vm13826_vm0, %v5068_v32 }
 0xfe9   : > { %6878 = vmatmul.msk.bf16.gmra.mxu3 %vm13846_vm10, %v6919_v0 }
 0xfee   : > { %6875 = vmatmul.msk.bf16.gmra.mxu2 %vm13847_vm8, %v6919_v0 }
 0xff9   : > { %6879 = vmatmul.msk.bf16.gmra.mxu3 %vm13848_vm5, %v5068_v32 }
 0xffe   : > { %6876 = vmatmul.msk.bf16.gmra.mxu2 %vm13849_vm9, %v5068_v32 }
0x103d   : > { %v5122_v47 = vpop.f32.mrf.mxu1 }
0x103e   : > { %v5123_v14 = vadd.f32 %v5122_v47, %v11669_v19 }
0x1040   : > { %v5099_v42 = vpop.f32.mrf.mxu0  ;;  %v5183_v54 = vmax.f32 %v5123_v14, 0.0 }
0x1041   : > { %v5100_v29 = vadd.f32 %v5099_v42, %v11669_v19 }
0x1043   : > { %v5182_v48 = vmax.f32 %v5100_v29, 0.0 }
0x1045   : > { %v5124_v36 = vpop.f32.mrf.mxu1 }
0x1046   : > { %v5125_v38 = vadd.f32 %v5124_v36, %v11673_v30 }
0x1048   : > { %v5101_v60 = vpop.f32.mrf.mxu0  ;;  %v5187_v33 = vmax.f32 %v5125_v38, 0.0 }
0x1049   : > { %v5102_v0 = vadd.f32 %v5101_v60, %v11673_v30 }
0x104a   : > { %v5204_v63 = vpack.c.bf16 %v5187_v33, %v5183_v54 }
0x104b   : > { %v5186_v6 = vmax.f32 %v5102_v0, 0.0 }
0x104d   : > { %v5127_v25 = vpop.f32.mrf.mxu1  ;;  %v5203_v5 = vpack.c.bf16 %v5186_v6, %v5182_v48 }
0x104e   : > { %v5128_v44 = vadd.f32 %v5127_v25, %v11660_v17 }
0x1050   : > { %v5104_v55 = vpop.f32.mrf.mxu0  ;;  %v5191_v24 = vmax.f32 %v5128_v44, 0.0 }
0x1051   : > { %v5105_v9 = vadd.f32 %v5104_v55, %v11660_v17 }
0x1053   : > { %v5190_v56 = vmax.f32 %v5105_v9, 0.0 }
0x1055   : > { %v5129_v62 = vpop.f32.mrf.mxu1 }
0x1056   : > { %v5130_v22 = vadd.f32 %v5129_v62, %v11662_v53 }
0x1058   : > { %v5106_v51 = vpop.f32.mrf.mxu0  ;;  %v5195_v21 = vmax.f32 %v5130_v22, 0.0 }
0x1059   : > { %v5107_v41 = vadd.f32 %v5106_v51, %v11662_v53 }
0x105a   : > { %v5208_v18 = vpack.c.bf16 %v5195_v21, %v5191_v24 }
0x105b   : > { %v5194_v49 = vmax.f32 %v5107_v41, 0.0 }
0x105c   : > { %v11664_v23 = vpop.f32.mrf.mxu3 }
0x105d   : > { %v5132_v35 = vpop.f32.mrf.mxu1  ;;  %v5207_v28 = vpack.c.bf16 %v5194_v49, %v5190_v56  ;;  %v5169_v25 = vadd.f32 %v11664_v23, %v11669_v19 }
0x105e   : > { %v5133_v57 = vadd.f32 %v5132_v35, %v11658_v7 }
0x1060   : > { %v5199_v46 = vmax.f32 %v5133_v57, 0.0  ;;  %v5109_v26 = vpop.f32.mrf.mxu0 }
0x1061   : > { %v11671_v15 = vpop.f32.mrf.mxu2  ;;  %v5110_v1 = vadd.f32 %v5109_v26, %v11658_v7 }
0x1062   : > { %v5212_v20 = vpack.c.bf16 %v5199_v46, %v5199_v46  ;;  %v5146_v38 = vadd.f32 %v11671_v15, %v11669_v19  ;;  %v5219_v19 = vpop.permute.xlu2 %5218 }
0x1063   : > { %v5198_v40 = vmax.f32 %v5110_v1, 0.0 }
0x1064   : > { %v5170_v58 = vpop.f32.mrf.mxu3  ;;  %v5228_v8 = vsel %vm13850_vm4, %v5212_v20, 0 }
0x1065   : > { %5254 = vmatpush.bf16.msra.mxu1 %v5228_v8  ;;  %v5134_v2 = vpop.f32.mrf.mxu1  ;;  %v5211_v59 = vpack.c.bf16 %v5198_v40, %v5198_v40  ;;  %v5171_v32 = vadd.f32 %v5170_v58, %v11673_v30 }
0x1067   : > { %v5225_v34 = vsel %vm13851_vm15, %v5211_v59, 0  ;;  %v5189_v35 = vmax.f32 %v5171_v32, 0.0 }
0x1068   : > { %5241 = vmatpush.bf16.msra.mxu0 %v5225_v34  ;;  %v5111_v11 = vpop.f32.mrf.mxu0 }
0x1069   : > { %v5147_v16 = vpop.f32.mrf.mxu2  ;;  %5255 = vmatpush.bf16.msra.mxu1 %v5208_v18 }
0x106a   : > { %v5148_v46 = vadd.f32 %v5147_v16, %v11673_v30 }
0x106c   : > { %v5173_v39 = vpop.f32.mrf.mxu3  ;;  %5242 = vmatpush.bf16.msra.mxu0 %v5207_v28  ;;  %v5188_v9 = vmax.f32 %v5148_v46, 0.0 }
0x106d   : > { %5256 = vmatpush.bf16.msra.mxu1 %v5204_v63  ;;  %v5174_v3 = vadd.f32 %v5173_v39, %v11660_v17 }
0x106f   : > { %v5193_v55 = vmax.f32 %v5174_v3, 0.0 }
0x1070   : > { %6881 = vmatmul.msk.bf16.vlgmr.msra.gmra.mxu1 %vm13852_vm6, %v5202_v50  ;;  %5243 = vmatpush.bf16.msra.mxu0 %v5203_v5 }
0x1071   : > { %v5150_v31 = vpop.f32.mrf.mxu2 }
0x1072   : > { %v5151_v44 = vadd.f32 %v5150_v31, %v11660_v17  ;;  %v5184_v17 = vmax.f32 %v5146_v38, 0.0 }
0x1073   : > { %6880 = vmatmul.msk.bf16.vlgmr.msra.gmra.mxu0 %vm13853_vm2, %v5202_v50 }
0x1074   : > { %v5175_v12 = vpop.f32.mrf.mxu3  ;;  %v5192_v23 = vmax.f32 %v5151_v44, 0.0  ;;  %v5205_v41 = vpack.c.bf16 %v5188_v9, %v5184_v17 }
0x1075   : > { %v5176_v37 = vadd.f32 %v5175_v12, %v11662_v53 }
0x1077   : > { %v5197_v47 = vmax.f32 %v5176_v37, 0.0 }
0x1079   : > { %v5152_v61 = vpop.f32.mrf.mxu2  ;;  %v5210_v22 = vpack.c.bf16 %v5197_v47, %v5193_v55 }
0x107a   : > { %v5153_v36 = vadd.f32 %v5152_v61, %v11662_v53 }
0x107c   : > { %v5178_v13 = vpop.f32.mrf.mxu3  ;;  %v5196_v14 = vmax.f32 %v5153_v36, 0.0 }
0x107d   : > { %v5179_v10 = vadd.f32 %v5178_v13, %v11658_v7 }
0x107e   : > { %v5209_v20 = vpack.c.bf16 %v5196_v14, %v5192_v23 }
0x107f   : > { %v5201_v45 = vmax.f32 %v5179_v10, 0.0 }
0x1081   : > { %v5214_v43 = vpack.c.bf16 %v5201_v45, %v5201_v45  ;;  %v5155_v4 = vpop.f32.mrf.mxu2 }
0x1082   : > { %v5156_v42 = vadd.f32 %v5155_v4, %v11658_v7  ;;  %v5185_v7 = vmax.f32 %v5169_v25, 0.0 }
0x1083   : > { %v5234_v60 = vsel %vm13839_vm3, %v5214_v43, 0 }
0x1084   : > { %v5200_v62 = vmax.f32 %v5156_v42, 0.0  ;;  %v5180_v51 = vpop.f32.mrf.mxu3  ;;  %5280 = vmatpush.bf16.msra.mxu3 %v5234_v60  ;;  %v5206_v21 = vpack.c.bf16 %v5189_v35, %v5185_v7 }
0x1086   : > { %v5213_v57 = vpack.c.bf16 %v5200_v62, %v5200_v62 }
0x1088   : > { %5281 = vmatpush.bf16.msra.mxu3 %v5210_v22  ;;  %v5231_v53 = vsel %vm13854_vm1, %v5213_v57, 0 }
0x1089   : > { %v5157_v24 = vpop.f32.mrf.mxu2  ;;  %5267 = vmatpush.bf16.msra.mxu2 %v5231_v53 }
0x108c   : > { %5282 = vmatpush.bf16.msra.mxu3 %v5206_v21 }
0x108d   : > { %5268 = vmatpush.bf16.msra.mxu2 %v5209_v20 }
0x108f   : > { %6883 = vmatmul.msk.bf16.vlgmr.msra.gmra.mxu3 %vm13855_vm11, %v5202_v50 }
0x1091   : > { %5269 = vmatpush.bf16.msra.mxu2 %v5205_v41 }
0x1094   : > { %6882 = vmatmul.msk.bf16.vlgmr.msra.gmra.mxu2 %vm13856_vm12, %v5202_v50 }
0x10ed   : > { %v5258_v30 = vpop.f32.mrf.mxu1 }
0x10ee   : > { %v5259_v15 = vadd.f32 %v5258_v30, %v5219_v19 }
0x10f0   : > { %v5245_v26 = vpop.f32.mrf.mxu0  ;;  %v6885_v8 = vmul.f32 -1.442695, %v5259_v15 }
0x10f1   : > { %v5246_v54 = vadd.f32 %v5245_v26, %v5219_v19 }
0x10f2   : > { %7024 = vpow2.f32 %v6885_v8 }
0x10f3   : > { %v6884_v33 = vmul.f32 -1.442695, %v5246_v54 }
0x10f5   : > { %v5260_v58 = vpop.f32.mrf.mxu1  ;;  %7026 = vpow2.f32 %v6884_v33  ;;  %v13865_v33 = vlaneseq }
0x10f8   : > { %v5247_v1 = vpop.f32.mrf.mxu0  ;;  %v7025_v40 = vpop.eup %7024 }
0x10f9   : > { %v5301_v18 = vadd.f32 1.0, %v7025_v40 }
0x10fb   : > { %v7027_v2 = vpop.eup %7026  ;;  %7028 = vrcp.f32 %v5301_v18  ;;  %v5330_v10 = vand.u32 2147483648, %v5301_v18  ;;  %vm5324_vm14 = vweird.f32 %v5301_v18  ;;  %v5328_v3 = vand.u32 2147483647, %v5301_v18 }
0x10fc   : > { %v5300_v29 = vadd.f32 1.0, %v7027_v2 }
0x10fd   : > { %v5331_v42 = vor.u32 1.1754944e-38, %v5330_v10  ;;  %vm11718_vm9 = vcmp.eq.f32.partialorder %v5328_v3, 8.507059e+37 }
0x10fe   : > { %vm5309_vm0 = vweird.f32 %v5300_v29  ;;  %v5315_v25 = vand.u32 2147483648, %v5300_v29  ;;  %v5313_v62 = vand.u32 2147483647, %v5300_v29 }
0x1100   : > { %vm5314_vm2 = vcmp.eq.f32.partialorder %v5313_v62, 8.507059e+37  ;;  %v5316_v9 = vor.u32 1.1754944e-38, %v5315_v25 }
0x1101   : > { %v7029_v28 = vpop.eup %7028 }
0x1102   : > { %v5320_v39 = vmul.f32 %v7029_v28, %v5301_v18  ;;  %vm5325_vm13 = vweird.f32 %v7029_v28 }
0x1103   : > { %vm11712_vm7 = vmor %vm5324_vm14, %vm5325_vm13  ;;  %vm5371_vm14 = vcmask 1040384   ;;  %vm5373_vm13 = vcmask 1042434  }
0x1104   : > { %v5321_v5 = vsub.f32 1.0, %v5320_v39 }
0x1106   : > { %v5322_v61 = vmul.f32 %v7029_v28, %v5321_v5 }
0x1108   : > { %v5323_v4 = vadd.f32 %v7029_v28, %v5322_v61 }
0x110a   : > { %v5327_v46 = vsel %vm11712_vm7, %v7029_v28, %v5323_v4  ;;  %vm5379_vm7 = vcmp.lt.s32.totalorder %v13865_v33, 512 }
0x110b   : > { %v5332_v20 = vsel %vm11718_vm9, %v5331_v42, %v5327_v46 }
0x110c   : > { %v5368_v1 = vrot.slane %v5332_v20, 7 }
0x1112   : > { %v5284_v56 = vpop.f32.mrf.mxu3 }
0x1113   : > { %v5285_v49 = vadd.f32 %v5284_v56, %v5219_v19 }
0x1115   : > { %v6887_v59 = vmul.f32 -1.442695, %v5285_v49 }
0x1117   : > { %v5271_v0 = vpop.f32.mrf.mxu2  ;;  %7030 = vpow2.f32 %v6887_v59 }
0x1118   : > { %v5272_v16 = vadd.f32 %v5271_v0, %v5219_v19  ;;  %7032 = vrcp.f32 %v5300_v29 }
0x111a   : > { %v6886_v34 = vmul.f32 -1.442695, %v5272_v16  ;;  %v5286_v63 = vpop.f32.mrf.mxu3 }
0x111c   : > { %7034 = vpow2.f32 %v6886_v34 }
0x111d   : > { %v7031_v11 = vpop.eup %7030 }
0x111e   : > { %v5303_v48 = vadd.f32 1.0, %v7031_v11  ;;  %v11708_v6 = vpop.eup %7032 }
0x111f   : > { %v5273_v50 = vpop.f32.mrf.mxu2  ;;  %v5305_v12 = vmul.f32 %v11708_v6, %v5300_v29  ;;  %vm5310_vm10 = vweird.f32 %v11708_v6 }
0x1120   : > { %7036 = vrcp.f32 %v5303_v48  ;;  %vm5354_vm8 = vweird.f32 %v5303_v48  ;;  %v5360_v55 = vand.u32 2147483648, %v5303_v48  ;;  %vm11723_vm4 = vmor %vm5309_vm0, %vm5310_vm10  ;;  %v5358_v14 = vand.u32 2147483647, %v5303_v48 }
0x1121   : > { %v5306_v13 = vsub.f32 1.0, %v5305_v12  ;;  %vm13866_vm0 = vcmask 1041408  }
0x1122   : > { %v7035_v31 = vpop.eup %7034  ;;  %v5361_v21 = vor.u32 1.1754944e-38, %v5360_v55  ;;  %vm5359_vm1 = vcmp.eq.f32.partialorder %v5358_v14, 8.507059e+37 }
0x1123   : > { %v5302_v27 = vadd.f32 1.0, %v7035_v31  ;;  %v5307_v43 = vmul.f32 %v11708_v6, %v5306_v13 }
0x1125   : > { %7038 = vrcp.f32 %v5302_v27  ;;  %v5308_v22 = vadd.f32 %v11708_v6, %v5307_v43  ;;  %v5345_v7 = vand.u32 2147483648, %v5302_v27  ;;  %v5343_v23 = vand.u32 2147483647, %v5302_v27 }
0x1126   : > { %v7037_v52 = vpop.eup %7036  ;;  %vm5339_vm3 = vweird.f32 %v5302_v27 }
0x1127   : > { %v5350_v37 = vmul.f32 %v7037_v52, %v5303_v48  ;;  %vm5355_vm5 = vweird.f32 %v7037_v52  ;;  %v5312_v17 = vsel %vm11723_vm4, %v11708_v6, %v5308_v22  ;;  %v5346_v30 = vor.u32 1.1754944e-38, %v5345_v7 }
0x1128   : > { %vm11729_vm15 = vmor %vm5354_vm8, %vm5355_vm5  ;;  %vm5344_vm12 = vcmp.eq.f32.partialorder %v5343_v23, 8.507059e+37  ;;  %v5317_v19 = vsel %vm5314_vm2, %v5316_v9, %v5312_v17 }
0x1129   : > { %v5351_v45 = vsub.f32 1.0, %v5350_v37  ;;  %v5372_v40 = vsel %vm5371_vm14, %v5317_v19, %v5368_v1 }
0x112b   : > { %v7039_v32 = vpop.eup %7038  ;;  %v5352_v36 = vmul.f32 %v7037_v52, %v5351_v45 }
0x112c   : > { %v5335_v60 = vmul.f32 %v7039_v32, %v5302_v27  ;;  %vm5340_vm6 = vweird.f32 %v7039_v32 }
0x112d   : > { %v5353_v44 = vadd.f32 %v7037_v52, %v5352_v36  ;;  %vm5341_vm11 = vmor %vm5339_vm3, %vm5340_vm6 }
0x112e   : > { %v5336_v35 = vsub.f32 1.0, %v5335_v60 }
0x112f   : > { %v5357_v24 = vsel %vm11729_vm15, %v7037_v52, %v5353_v44 }
0x1130   : > { %v5337_v38 = vmul.f32 %v7039_v32, %v5336_v35  ;;  %v5362_v26 = vsel %vm5359_vm1, %v5361_v21, %v5357_v24 }
0x1131   : > { %v5370_v54 = vrot.slane %v5362_v26, 5 }
0x1132   : > { %v5338_v41 = vadd.f32 %v7039_v32, %v5337_v38 }
0x1134   : > { %v5342_v58 = vsel %vm5341_vm11, %v7039_v32, %v5338_v41 }
0x1135   : > { %v5347_v15 = vsel %vm5344_vm12, %v5346_v30, %v5342_v58 }
0x1136   : > { %v5369_v8 = vrot.slane %v5347_v15, 6 }
0x1138   : > { %v5374_v18 = vsel %vm5373_vm13, %v5369_v8, %v5370_v54 }
0x1139   : > { %v5375_v2 = vsel %vm13866_vm0, %v5372_v40, %v5374_v18 }
0x113a   : > { %5381 = vst.msk [vmem:[%s332_s14] sm:$0xf] %vm5379_vm7, %v5375_v2 }
0x113b   : > { %7085 = shalt.err (!%p7082_p7)
}
0x113c   : > { %6920 = dma.vmem_to_hbm [thread:$0]  (%p7219_p5), %s5396_s28, 64, %s5398_s15, %s5383_s29  }
0x113d PF: > { %p6926_p8 = scmp.ge.s32.totalorder %s7120_s27, 2  ;;  %s5409_s21 = sand.u32 1, %s7108_s24  }
0x113e   : > { %s5410_s23 = scalar_lea.sflag [#allocation3], %s5409_s21 }
0x113f   : > { %p6923_p9 = pnand %p6926_p8, %p7223_p6 }
0x1141   : > { %p6924_p10 = pneg %p6923_p9 }
0x1143   : > { %7103 = dma.done.wait (%p6924_p10), %s5410_s23, 64  }
0x1144   : > { %7105 = vsyncadd (%p6924_p10), %s5410_s23, 4294967232  ;;  %p17_p11 = scmp.ge.s32.totalorder %s7206_s30, 4   ;;  %s13867_s24 = smov %s7112_s25 }
0x1145   : > { %s13868_s25 = smov %s7116_s26  ;;  %s13869_s26 = smov %s7217_s10 }
0x1146   : > { %s13870_s27 = smov %s7206_s30  ;;  %19 = sbr.rel (!%p17_p11) target bundleno = 3 (0x3), region = 96 }
0x114b   :  { %5416 = vsyncpa [#allocation3], 1 }
0x114c   :  { %5418 = vsyncpa [#allocation3 + $0x1], 1 }

</bundles_post_ra>
